<compile_context>
chip_gen: v7x
topology: tpu7x:2x2x1
jax: 0.10.0
libtpu: 0.0.40
codegen_flags: <defaults>
</compile_context>

<pallas_src>
import jax
import jax.numpy as jnp
from jax import lax
from jax.experimental import pallas as pl
from jax.experimental.pallas import tpu as pltpu

# ---- geometry pinned by the PyTorch module ---------------------------------
C_IN, C1, K = 4, 20, 6
L_IN = 1193
L1 = L_IN - K + 1            # 1188 (conv1 'valid' length)
L2 = L1 - K + 1              # 1183 (conv2 'valid' length)
POOL = 13
LP = L2 // POOL              # 91 pooled positions
H = 100
FLAT = C1 * LP               # 1820

# ---- lane-padded (multiple-of-128) widths used inside the kernel -----------
LANE = 128
L2P = 1280                   # conv2 / pooling stage width   (>= 1183)
L1P = 1408                   # conv1 output width            (>= L2P + K - 1 = 1285)
LXP = 1536                   # padded input width            (>= L1P + K - 1 = 1413)
WMW = L2P - (POOL - 1)       # 1268: width of the 13-tap window-max slab
LPP = LANE                   # pooled positions padded 91 -> 128
HP = LANE                    # hidden units padded 100 -> 128


def _vmem():
    return pl.BlockSpec(memory_space=pltpu.MemorySpace.VMEM)


# -----------------------------------------------------------------------------
# Single fused kernel: conv1+ReLU -> conv2+ReLU -> maxpool -> dense+sigmoid -> dense2
# -----------------------------------------------------------------------------
def fused_forward_kernel(x_ref, w1s_ref, b1_ref, w2s_ref, b2_ref,
                         wd_ref, bd_ref, wo_ref, bo_ref,
                         out_ref,
                         xs_ref, h1s_ref, c2_ref):
    # x_ref  : (4, 1536) f32, zero-padded past col 1192
    # w1s_ref: (20, 24)    b1_ref: (20, 1)
    # w2s_ref: (20, 120)   b2_ref: (20, 1)
    # wd_ref : (20, 128, 128)  bd_ref: (1, 128)  wo_ref: (128, 1)  bo_ref: (1, 1)
    # out_ref: (1, 1)
    # xs_ref : (24, 1408) scratch   h1s_ref: (120, 1280) scratch   c2_ref: (20, 1280) scratch

    # ---- conv1 + ReLU as ONE stacked matmul -------------------------------
    x = x_ref[...]                                            # (4, 1536)
    for k in range(K):                                        # im2col on sublanes
        xs_ref[k * C_IN:(k + 1) * C_IN, :] = x[:, k:k + L1P]  # row k*4+c <- x[c, l+k]
    h1 = jnp.dot(w1s_ref[...], xs_ref[...],
                 preferred_element_type=jnp.float32)          # (20, 1408)
    h1 = jnp.maximum(h1 + b1_ref[...], 0.0)

    # ---- conv2 + ReLU as ONE stacked matmul -------------------------------
    for k in range(K):
        h1s_ref[k * C1:(k + 1) * C1, :] = h1[:, k:k + L2P]    # row k*20+c <- h1[c, l+k]
    c2 = jnp.dot(w2s_ref[...], h1s_ref[...],
                 preferred_element_type=jnp.float32)          # (20, 1280)
    c2_ref[...] = jnp.maximum(c2 + b2_ref[...], 0.0)

    # ---- max_pool1d(k=13, s=13) in-kernel ---------------------------------
    # window max over 13 taps (lane shifts); valid at lanes 0..1170 stepping 13,
    # all of which only touch conv2 positions <= 1182 (i.e. only valid data).
    wm = c2_ref[:, 0:WMW]                                     # (20, 1268)
    for j in range(1, POOL):
        wm = jnp.maximum(wm, c2_ref[:, j:j + WMW])
    # stride-13 compaction as a matmul with a 0/1 selection matrix (built on the VPU)
    l_idx = lax.broadcasted_iota(jnp.int32, (WMW, LPP), 0)
    p_idx = lax.broadcasted_iota(jnp.int32, (WMW, LPP), 1)
    sel = jnp.where((l_idx == p_idx * POOL) & (p_idx < LP),
                    1.0, 0.0).astype(jnp.float32)             # (1268, 128)
    pooled = jnp.dot(wm, sel,
                     preferred_element_type=jnp.float32)      # (20, 128); cols >=91 are 0

    # ---- dense(1820->100) + sigmoid + dense2(100->1) ----------------------
    # z[j] = bd[j] + sum_c sum_p pooled[c, p] * wd[j, c*91 + p]
    z = bd_ref[...]                                           # (1, 128), zero past col 99
    for c in range(C1):
        z = z + jnp.dot(pooled[c:c + 1, :], wd_ref[c],
                        preferred_element_type=jnp.float32)   # (1,128)@(128,128)
    d1 = 1.0 / (1.0 + jnp.exp(-z))                            # sigmoid (padded cols harmless)
    out_ref[...] = jnp.dot(d1, wo_ref[...],
                           preferred_element_type=jnp.float32) + bo_ref[...]


# -----------------------------------------------------------------------------
# One-time weight repack/pad (call OUTSIDE jit so no transposes run per forward)
# -----------------------------------------------------------------------------
def prepare_params(params):
    w1, b1, w2, b2, wd, bd, w2d, b2d = params
    f32 = jnp.float32
    # conv weights stacked to match the im2col row order (k-major, then channel)
    w1s = jnp.transpose(w1, (0, 2, 1)).reshape(C1, K * C_IN).astype(f32)   # (20, 24)
    w2s = jnp.transpose(w2, (0, 2, 1)).reshape(C1, K * C1).astype(f32)     # (20, 120)
    b1c = b1.reshape(C1, 1).astype(f32)
    b2c = b2.reshape(C1, 1).astype(f32)
    # dense weight per conv channel, lane-padded:  wdp[c, p, j] = wd[j, c*91 + p]
    wd3 = jnp.transpose(wd.reshape(H, C1, LP), (1, 2, 0)).astype(f32)      # (20, 91, 100)
    wdp = jnp.zeros((C1, LPP, HP), f32).at[:, :LP, :H].set(wd3)            # (20, 128, 128)
    bdp = jnp.zeros((1, HP), f32).at[:, :H].set(bd.reshape(1, H).astype(f32))
    wop = jnp.zeros((HP, 1), f32).at[:H, :].set(w2d.reshape(H, 1).astype(f32))
    bop = b2d.reshape(1, 1).astype(f32)
    return (w1s, b1c, w2s, b2c, wdp, bdp, wop, bop)


# -----------------------------------------------------------------------------
# Forward wrapper (jit this; `prep` comes from prepare_params, computed once)
# -----------------------------------------------------------------------------
def net_forward(x, prep):
    w1s, b1c, w2s, b2c, wdp, bdp, wop, bop = prep
    x2d = x.reshape(C_IN, L_IN).astype(jnp.float32)           # NCL (N=1) -> CL
    xp = jnp.pad(x2d, ((0, 0), (0, LXP - L_IN)))              # zero tail keeps padding finite

    out = pl.pallas_call(
        fused_forward_kernel,
        out_shape=jax.ShapeDtypeStruct((1, 1), jnp.float32),
        in_specs=[_vmem()] * 9,
        out_specs=_vmem(),
        scratch_shapes=[
            pltpu.VMEM((K * C_IN, L1P), jnp.float32),   # stacked (im2col) conv1 operand
            pltpu.VMEM((K * C1, L2P), jnp.float32),     # stacked (im2col) conv2 operand
            pltpu.VMEM((C1, L2P), jnp.float32),         # conv2 activation (pool source)
        ],
        compiler_params=pltpu.CompilerParams(vmem_limit_bytes=32 * 1024 * 1024),
    )(xp, w1s, b1c, w2s, b2c, wdp, bdp, wop, bop)
    return out.reshape(1)                                     # matches PyTorch output shape (1,)


# -----------------------------------------------------------------------------
# Pure-JAX reference (correctness check)
# -----------------------------------------------------------------------------
def reference_forward(x, params):
    w1, b1, w2, b2, wd, bd, w2d, b2d = params
    dn = ("NCH", "OIH", "NCH")
    hp = jax.lax.Precision.HIGHEST
    c1 = lax.conv_general_dilated(x, w1, (1,), "VALID", dimension_numbers=dn, precision=hp)
    c1 = jnp.maximum(c1 + b1[None, :, None], 0.0)
    c2 = lax.conv_general_dilated(c1, w2, (1,), "VALID", dimension_numbers=dn, precision=hp)
    c2 = jnp.maximum(c2 + b2[None, :, None], 0.0)
    m1 = jnp.max(c2[:, :, :LP * POOL].reshape(1, C1, LP, POOL), axis=-1)
    flat = m1.reshape(-1)                                     # (1820,), index = c*91 + p
    d1 = jax.nn.sigmoid(jnp.dot(flat, wd.T, precision=hp) + bd)
    d2 = jnp.dot(d1, w2d.T, precision=hp) + b2d
    return d2                                                 # (1,)


if __name__ == "__main__":
    key = jax.random.PRNGKey(0)
    ks = jax.random.split(key, 9)
    w1 = jax.random.normal(ks[0], (C1, C_IN, K), jnp.float32) * (1.0 / (C_IN * K) ** 0.5)
    b1 = jax.random.normal(ks[1], (C1,), jnp.float32) * 0.1
    w2 = jax.random.normal(ks[2], (C1, C1, K), jnp.float32) * (1.0 / (C1 * K) ** 0.5)
    b2 = jax.random.normal(ks[3], (C1,), jnp.float32) * 0.1
    wd = jax.random.normal(ks[4], (H, FLAT), jnp.float32) * (1.0 / FLAT ** 0.5)
    bd = jax.random.normal(ks[5], (H,), jnp.float32) * 0.1
    w2d = jax.random.normal(ks[6], (1, H), jnp.float32) * (1.0 / H ** 0.5)
    b2d = jax.random.normal(ks[7], (1,), jnp.float32) * 0.1
    params = (w1, b1, w2, b2, wd, bd, w2d, b2d)

    x = jax.random.normal(ks[8], (1, C_IN, L_IN), jnp.float32)

    prepared = prepare_params(params)          # one-time repack, outside jit
    fwd = jax.jit(net_forward)
    out = jax.block_until_ready(fwd(x, prepared))
    ref = jax.block_until_ready(reference_forward(x, params))

    assert out.shape == (1,), out.shape
    assert jnp.allclose(out, ref, rtol=1e-2, atol=1e-2), (out, ref)
    print("KERNEL_OK")
</pallas_src>

<mosaic_0001>
module attributes {stable_mosaic.version = 11 : i64} {
  func.func @fused_forward_kernel(%arg0: memref<4x1536xf32, #tpu.memory_space<vmem>>, %arg1: memref<20x24xf32, #tpu.memory_space<vmem>>, %arg2: memref<20x1xf32, #tpu.memory_space<vmem>>, %arg3: memref<20x120xf32, #tpu.memory_space<vmem>>, %arg4: memref<20x1xf32, #tpu.memory_space<vmem>>, %arg5: memref<20x128x128xf32, #tpu.memory_space<vmem>>, %arg6: memref<1x128xf32, #tpu.memory_space<vmem>>, %arg7: memref<128x1xf32, #tpu.memory_space<vmem>>, %arg8: memref<1x1xf32, #tpu.memory_space<vmem>>, %arg9: memref<1x1xf32, #tpu.memory_space<vmem>>, %arg10: memref<24x1408xf32, #tpu.memory_space<vmem>>, %arg11: memref<120x1280xf32, #tpu.memory_space<vmem>>, %arg12: memref<20x1280xf32, #tpu.memory_space<vmem>>) attributes {dimension_semantics = [], scalar_prefetch = 0 : i64, scratch_operands = 3 : i64, tpu.core_type = #tpu.core_type<tc>} {
    %c0 = arith.constant 0 : index
    %c0_0 = arith.constant 0 : index
    %0 = vector.load %arg0[%c0, %c0_0] : memref<4x1536xf32, #tpu.memory_space<vmem>>, vector<4x1536xf32>
    %1 = vector.extract_strided_slice %0 {offsets = [0, 0], sizes = [4, 1408], strides = [1, 1]} : vector<4x1536xf32> to vector<4x1408xf32>
    %c0_1 = arith.constant 0 : index
    %c0_2 = arith.constant 0 : index
    %2 = vector.load %arg10[%c0_1, %c0_2] : memref<24x1408xf32, #tpu.memory_space<vmem>>, vector<4x1408xf32>
    tpu.vector_store %arg10[%c0_1, %c0_2], %1 {strides = array<i32>} : memref<24x1408xf32, #tpu.memory_space<vmem>>, vector<4x1408xf32>,
    %3 = vector.extract_strided_slice %0 {offsets = [0, 1], sizes = [4, 1408], strides = [1, 1]} : vector<4x1536xf32> to vector<4x1408xf32>
    %c4 = arith.constant 4 : index
    %c0_3 = arith.constant 0 : index
    %4 = vector.load %arg10[%c4, %c0_3] : memref<24x1408xf32, #tpu.memory_space<vmem>>, vector<4x1408xf32>
    tpu.vector_store %arg10[%c4, %c0_3], %3 {strides = array<i32>} : memref<24x1408xf32, #tpu.memory_space<vmem>>, vector<4x1408xf32>,
    %5 = vector.extract_strided_slice %0 {offsets = [0, 2], sizes = [4, 1408], strides = [1, 1]} : vector<4x1536xf32> to vector<4x1408xf32>
    %c8 = arith.constant 8 : index
    %c0_4 = arith.constant 0 : index
    %6 = vector.load %arg10[%c8, %c0_4] : memref<24x1408xf32, #tpu.memory_space<vmem>>, vector<4x1408xf32>
    tpu.vector_store %arg10[%c8, %c0_4], %5 {strides = array<i32>} : memref<24x1408xf32, #tpu.memory_space<vmem>>, vector<4x1408xf32>,
    %7 = vector.extract_strided_slice %0 {offsets = [0, 3], sizes = [4, 1408], strides = [1, 1]} : vector<4x1536xf32> to vector<4x1408xf32>
    %c12 = arith.constant 12 : index
    %c0_5 = arith.constant 0 : index
    %8 = vector.load %arg10[%c12, %c0_5] : memref<24x1408xf32, #tpu.memory_space<vmem>>, vector<4x1408xf32>
    tpu.vector_store %arg10[%c12, %c0_5], %7 {strides = array<i32>} : memref<24x1408xf32, #tpu.memory_space<vmem>>, vector<4x1408xf32>,
    %9 = vector.extract_strided_slice %0 {offsets = [0, 4], sizes = [4, 1408], strides = [1, 1]} : vector<4x1536xf32> to vector<4x1408xf32>
    %c16 = arith.constant 16 : index
    %c0_6 = arith.constant 0 : index
    %10 = vector.load %arg10[%c16, %c0_6] : memref<24x1408xf32, #tpu.memory_space<vmem>>, vector<4x1408xf32>
    tpu.vector_store %arg10[%c16, %c0_6], %9 {strides = array<i32>} : memref<24x1408xf32, #tpu.memory_space<vmem>>, vector<4x1408xf32>,
    %11 = vector.extract_strided_slice %0 {offsets = [0, 5], sizes = [4, 1408], strides = [1, 1]} : vector<4x1536xf32> to vector<4x1408xf32>
    %c20 = arith.constant 20 : index
    %c0_7 = arith.constant 0 : index
    %12 = vector.load %arg10[%c20, %c0_7] : memref<24x1408xf32, #tpu.memory_space<vmem>>, vector<4x1408xf32>
    tpu.vector_store %arg10[%c20, %c0_7], %11 {strides = array<i32>} : memref<24x1408xf32, #tpu.memory_space<vmem>>, vector<4x1408xf32>,
    %c0_8 = arith.constant 0 : index
    %c0_9 = arith.constant 0 : index
    %13 = vector.load %arg1[%c0_8, %c0_9] : memref<20x24xf32, #tpu.memory_space<vmem>>, vector<20x24xf32>
    %c0_10 = arith.constant 0 : index
    %c0_11 = arith.constant 0 : index
    %14 = vector.load %arg10[%c0_10, %c0_11] : memref<24x1408xf32, #tpu.memory_space<vmem>>, vector<24x1408xf32>
    %cst = arith.constant dense<0.000000e+00> : vector<20x1408xf32>
    %15 = tpu.matmul %13, %14, %cst {dimension_numbers = #tpu.dot_dimension_numbers<[1], [0], [0], [1], [0, 0, 1, 1], [], []>} : vector<20x24xf32>, vector<24x1408xf32>, vector<20x1408xf32> -> vector<20x1408xf32>
    %c0_12 = arith.constant 0 : index
    %c0_13 = arith.constant 0 : index
    %16 = vector.load %arg2[%c0_12, %c0_13] : memref<20x1xf32, #tpu.memory_space<vmem>>, vector<20x1xf32>
    %17 = vector.broadcast %16 : vector<20x1xf32> to vector<20x1408xf32>
    %18 = arith.addf %15, %17 : vector<20x1408xf32>
    %cst_14 = arith.constant 0.000000e+00 : f32
    %19 = vector.broadcast %cst_14 : f32 to vector<20x1408xf32>
    %20 = arith.maximumf %18, %19 : vector<20x1408xf32>
    %21 = vector.extract_strided_slice %20 {offsets = [0, 0], sizes = [20, 1280], strides = [1, 1]} : vector<20x1408xf32> to vector<20x1280xf32>
    %c0_15 = arith.constant 0 : index
    %c0_16 = arith.constant 0 : index
    %22 = vector.load %arg11[%c0_15, %c0_16] : memref<120x1280xf32, #tpu.memory_space<vmem>>, vector<20x1280xf32>
    tpu.vector_store %arg11[%c0_15, %c0_16], %21 {strides = array<i32>} : memref<120x1280xf32, #tpu.memory_space<vmem>>, vector<20x1280xf32>,
    %23 = vector.extract_strided_slice %20 {offsets = [0, 1], sizes = [20, 1280], strides = [1, 1]} : vector<20x1408xf32> to vector<20x1280xf32>
    %c20_17 = arith.constant 20 : index
    %c0_18 = arith.constant 0 : index
    %24 = vector.load %arg11[%c20_17, %c0_18] : memref<120x1280xf32, #tpu.memory_space<vmem>>, vector<20x1280xf32>
    tpu.vector_store %arg11[%c20_17, %c0_18], %23 {strides = array<i32>} : memref<120x1280xf32, #tpu.memory_space<vmem>>, vector<20x1280xf32>,
    %25 = vector.extract_strided_slice %20 {offsets = [0, 2], sizes = [20, 1280], strides = [1, 1]} : vector<20x1408xf32> to vector<20x1280xf32>
    %c40 = arith.constant 40 : index
    %c0_19 = arith.constant 0 : index
    %26 = vector.load %arg11[%c40, %c0_19] : memref<120x1280xf32, #tpu.memory_space<vmem>>, vector<20x1280xf32>
    tpu.vector_store %arg11[%c40, %c0_19], %25 {strides = array<i32>} : memref<120x1280xf32, #tpu.memory_space<vmem>>, vector<20x1280xf32>,
    %27 = vector.extract_strided_slice %20 {offsets = [0, 3], sizes = [20, 1280], strides = [1, 1]} : vector<20x1408xf32> to vector<20x1280xf32>
    %c60 = arith.constant 60 : index
    %c0_20 = arith.constant 0 : index
    %28 = vector.load %arg11[%c60, %c0_20] : memref<120x1280xf32, #tpu.memory_space<vmem>>, vector<20x1280xf32>
    tpu.vector_store %arg11[%c60, %c0_20], %27 {strides = array<i32>} : memref<120x1280xf32, #tpu.memory_space<vmem>>, vector<20x1280xf32>,
    %29 = vector.extract_strided_slice %20 {offsets = [0, 4], sizes = [20, 1280], strides = [1, 1]} : vector<20x1408xf32> to vector<20x1280xf32>
    %c80 = arith.constant 80 : index
    %c0_21 = arith.constant 0 : index
    %30 = vector.load %arg11[%c80, %c0_21] : memref<120x1280xf32, #tpu.memory_space<vmem>>, vector<20x1280xf32>
    tpu.vector_store %arg11[%c80, %c0_21], %29 {strides = array<i32>} : memref<120x1280xf32, #tpu.memory_space<vmem>>, vector<20x1280xf32>,
    %31 = vector.extract_strided_slice %20 {offsets = [0, 5], sizes = [20, 1280], strides = [1, 1]} : vector<20x1408xf32> to vector<20x1280xf32>
    %c100 = arith.constant 100 : index
    %c0_22 = arith.constant 0 : index
    %32 = vector.load %arg11[%c100, %c0_22] : memref<120x1280xf32, #tpu.memory_space<vmem>>, vector<20x1280xf32>
    tpu.vector_store %arg11[%c100, %c0_22], %31 {strides = array<i32>} : memref<120x1280xf32, #tpu.memory_space<vmem>>, vector<20x1280xf32>,
    %c0_23 = arith.constant 0 : index
    %c0_24 = arith.constant 0 : index
    %33 = vector.load %arg3[%c0_23, %c0_24] : memref<20x120xf32, #tpu.memory_space<vmem>>, vector<20x120xf32>
    %c0_25 = arith.constant 0 : index
    %c0_26 = arith.constant 0 : index
    %34 = vector.load %arg11[%c0_25, %c0_26] : memref<120x1280xf32, #tpu.memory_space<vmem>>, vector<120x1280xf32>
    %cst_27 = arith.constant dense<0.000000e+00> : vector<20x1280xf32>
    %35 = tpu.matmul %33, %34, %cst_27 {dimension_numbers = #tpu.dot_dimension_numbers<[1], [0], [0], [1], [0, 0, 1, 1], [], []>} : vector<20x120xf32>, vector<120x1280xf32>, vector<20x1280xf32> -> vector<20x1280xf32>
    %c0_28 = arith.constant 0 : index
    %c0_29 = arith.constant 0 : index
    %36 = vector.load %arg4[%c0_28, %c0_29] : memref<20x1xf32, #tpu.memory_space<vmem>>, vector<20x1xf32>
    %37 = vector.broadcast %36 : vector<20x1xf32> to vector<20x1280xf32>
    %38 = arith.addf %35, %37 : vector<20x1280xf32>
    %cst_30 = arith.constant 0.000000e+00 : f32
    %39 = vector.broadcast %cst_30 : f32 to vector<20x1280xf32>
    %40 = arith.maximumf %38, %39 : vector<20x1280xf32>
    %c0_31 = arith.constant 0 : index
    %c0_32 = arith.constant 0 : index
    %41 = vector.load %arg12[%c0_31, %c0_32] : memref<20x1280xf32, #tpu.memory_space<vmem>>, vector<20x1280xf32>
    tpu.vector_store %arg12[%c0_31, %c0_32], %40 {strides = array<i32>} : memref<20x1280xf32, #tpu.memory_space<vmem>>, vector<20x1280xf32>,
    %c0_33 = arith.constant 0 : index
    %c0_34 = arith.constant 0 : index
    %42 = vector.load %arg12[%c0_33, %c0_34] : memref<20x1280xf32, #tpu.memory_space<vmem>>, vector<20x1268xf32>
    %c0_35 = arith.constant 0 : index
    %c1 = arith.constant 1 : index
    %43 = vector.load %arg12[%c0_35, %c1] : memref<20x1280xf32, #tpu.memory_space<vmem>>, vector<20x1268xf32>
    %44 = arith.maximumf %42, %43 : vector<20x1268xf32>
    %c0_36 = arith.constant 0 : index
    %c2 = arith.constant 2 : index
    %45 = vector.load %arg12[%c0_36, %c2] : memref<20x1280xf32, #tpu.memory_space<vmem>>, vector<20x1268xf32>
    %46 = arith.maximumf %44, %45 : vector<20x1268xf32>
    %c0_37 = arith.constant 0 : index
    %c3 = arith.constant 3 : index
    %47 = vector.load %arg12[%c0_37, %c3] : memref<20x1280xf32, #tpu.memory_space<vmem>>, vector<20x1268xf32>
    %48 = arith.maximumf %46, %47 : vector<20x1268xf32>
    %c0_38 = arith.constant 0 : index
    %c4_39 = arith.constant 4 : index
    %49 = vector.load %arg12[%c0_38, %c4_39] : memref<20x1280xf32, #tpu.memory_space<vmem>>, vector<20x1268xf32>
    %50 = arith.maximumf %48, %49 : vector<20x1268xf32>
    %c0_40 = arith.constant 0 : index
    %c5 = arith.constant 5 : index
    %51 = vector.load %arg12[%c0_40, %c5] : memref<20x1280xf32, #tpu.memory_space<vmem>>, vector<20x1268xf32>
    %52 = arith.maximumf %50, %51 : vector<20x1268xf32>
    %c0_41 = arith.constant 0 : index
    %c6 = arith.constant 6 : index
    %53 = vector.load %arg12[%c0_41, %c6] : memref<20x1280xf32, #tpu.memory_space<vmem>>, vector<20x1268xf32>
    %54 = arith.maximumf %52, %53 : vector<20x1268xf32>
    %c0_42 = arith.constant 0 : index
    %c7 = arith.constant 7 : index
    %55 = vector.load %arg12[%c0_42, %c7] : memref<20x1280xf32, #tpu.memory_space<vmem>>, vector<20x1268xf32>
    %56 = arith.maximumf %54, %55 : vector<20x1268xf32>
    %c0_43 = arith.constant 0 : index
    %c8_44 = arith.constant 8 : index
    %57 = vector.load %arg12[%c0_43, %c8_44] : memref<20x1280xf32, #tpu.memory_space<vmem>>, vector<20x1268xf32>
    %58 = arith.maximumf %56, %57 : vector<20x1268xf32>
    %c0_45 = arith.constant 0 : index
    %c9 = arith.constant 9 : index
    %59 = vector.load %arg12[%c0_45, %c9] : memref<20x1280xf32, #tpu.memory_space<vmem>>, vector<20x1268xf32>
    %60 = arith.maximumf %58, %59 : vector<20x1268xf32>
    %c0_46 = arith.constant 0 : index
    %c10 = arith.constant 10 : index
    %61 = vector.load %arg12[%c0_46, %c10] : memref<20x1280xf32, #tpu.memory_space<vmem>>, vector<20x1268xf32>
    %62 = arith.maximumf %60, %61 : vector<20x1268xf32>
    %c0_47 = arith.constant 0 : index
    %c11 = arith.constant 11 : index
    %63 = vector.load %arg12[%c0_47, %c11] : memref<20x1280xf32, #tpu.memory_space<vmem>>, vector<20x1268xf32>
    %64 = arith.maximumf %62, %63 : vector<20x1268xf32>
    %c0_48 = arith.constant 0 : index
    %c12_49 = arith.constant 12 : index
    %65 = vector.load %arg12[%c0_48, %c12_49] : memref<20x1280xf32, #tpu.memory_space<vmem>>, vector<20x1268xf32>
    %66 = arith.maximumf %64, %65 : vector<20x1268xf32>
    %67 = tpu.iota {dimensions = array<i32: 0>} : vector<1268x128xi32>
    %68 = tpu.iota {dimensions = array<i32: 1>} : vector<1268x128xi32>
    %c13_i32 = arith.constant 13 : i32
    %69 = vector.broadcast %c13_i32 : i32 to vector<1268x128xi32>
    %70 = arith.muli %68, %69 : vector<1268x128xi32>
    %71 = arith.cmpi eq, %67, %70 : vector<1268x128xi32>
    %c91_i32 = arith.constant 91 : i32
    %72 = vector.broadcast %c91_i32 : i32 to vector<1268x128xi32>
    %73 = arith.cmpi slt, %68, %72 : vector<1268x128xi32>
    %74 = arith.andi %71, %73 : vector<1268x128xi1>
    %cst_50 = arith.constant 1.000000e+00 : f32
    %cst_51 = arith.constant 0.000000e+00 : f32
    %75 = vector.broadcast %cst_50 : f32 to vector<1268x128xf32>
    %76 = vector.broadcast %cst_51 : f32 to vector<1268x128xf32>
    %77 = arith.select %74, %75, %76 : vector<1268x128xi1>, vector<1268x128xf32>
    %cst_52 = arith.constant dense<0.000000e+00> : vector<20x128xf32>
    %78 = tpu.matmul %66, %77, %cst_52 {dimension_numbers = #tpu.dot_dimension_numbers<[1], [0], [0], [1], [0, 0, 1, 1], [], []>} : vector<20x1268xf32>, vector<1268x128xf32>, vector<20x128xf32> -> vector<20x128xf32>
    %c0_53 = arith.constant 0 : index
    %c0_54 = arith.constant 0 : index
    %79 = vector.load %arg6[%c0_53, %c0_54] : memref<1x128xf32, #tpu.memory_space<vmem>>, vector<1x128xf32>
    %80 = vector.extract_strided_slice %78 {offsets = [0, 0], sizes = [1, 128], strides = [1, 1]} : vector<20x128xf32> to vector<1x128xf32>
    %c0_55 = arith.constant 0 : index
    %c0_56 = arith.constant 0 : index
    %c0_57 = arith.constant 0 : index
    %81 = vector.load %arg5[%c0_55, %c0_56, %c0_57] : memref<20x128x128xf32, #tpu.memory_space<vmem>>, vector<1x128x128xf32>
    %82 = vector.shape_cast %81 : vector<1x128x128xf32> to vector<128x128xf32>
    %cst_58 = arith.constant dense<0.000000e+00> : vector<1x128xf32>
    %83 = tpu.matmul %80, %82, %cst_58 {dimension_numbers = #tpu.dot_dimension_numbers<[1], [0], [0], [1], [0, 0, 1, 1], [], []>} : vector<1x128xf32>, vector<128x128xf32>, vector<1x128xf32> -> vector<1x128xf32>
    %84 = arith.addf %79, %83 : vector<1x128xf32>
    %85 = vector.extract_strided_slice %78 {offsets = [1, 0], sizes = [1, 128], strides = [1, 1]} : vector<20x128xf32> to vector<1x128xf32>
    %c1_59 = arith.constant 1 : index
    %c0_60 = arith.constant 0 : index
    %c0_61 = arith.constant 0 : index
    %86 = vector.load %arg5[%c1_59, %c0_60, %c0_61] : memref<20x128x128xf32, #tpu.memory_space<vmem>>, vector<1x128x128xf32>
    %87 = vector.shape_cast %86 : vector<1x128x128xf32> to vector<128x128xf32>
    %cst_62 = arith.constant dense<0.000000e+00> : vector<1x128xf32>
    %88 = tpu.matmul %85, %87, %cst_62 {dimension_numbers = #tpu.dot_dimension_numbers<[1], [0], [0], [1], [0, 0, 1, 1], [], []>} : vector<1x128xf32>, vector<128x128xf32>, vector<1x128xf32> -> vector<1x128xf32>
    %89 = arith.addf %84, %88 : vector<1x128xf32>
    %90 = vector.extract_strided_slice %78 {offsets = [2, 0], sizes = [1, 128], strides = [1, 1]} : vector<20x128xf32> to vector<1x128xf32>
    %c2_63 = arith.constant 2 : index
    %c0_64 = arith.constant 0 : index
    %c0_65 = arith.constant 0 : index
    %91 = vector.load %arg5[%c2_63, %c0_64, %c0_65] : memref<20x128x128xf32, #tpu.memory_space<vmem>>, vector<1x128x128xf32>
    %92 = vector.shape_cast %91 : vector<1x128x128xf32> to vector<128x128xf32>
    %cst_66 = arith.constant dense<0.000000e+00> : vector<1x128xf32>
    %93 = tpu.matmul %90, %92, %cst_66 {dimension_numbers = #tpu.dot_dimension_numbers<[1], [0], [0], [1], [0, 0, 1, 1], [], []>} : vector<1x128xf32>, vector<128x128xf32>, vector<1x128xf32> -> vector<1x128xf32>
    %94 = arith.addf %89, %93 : vector<1x128xf32>
    %95 = vector.extract_strided_slice %78 {offsets = [3, 0], sizes = [1, 128], strides = [1, 1]} : vector<20x128xf32> to vector<1x128xf32>
    %c3_67 = arith.constant 3 : index
    %c0_68 = arith.constant 0 : index
    %c0_69 = arith.constant 0 : index
    %96 = vector.load %arg5[%c3_67, %c0_68, %c0_69] : memref<20x128x128xf32, #tpu.memory_space<vmem>>, vector<1x128x128xf32>
    %97 = vector.shape_cast %96 : vector<1x128x128xf32> to vector<128x128xf32>
    %cst_70 = arith.constant dense<0.000000e+00> : vector<1x128xf32>
    %98 = tpu.matmul %95, %97, %cst_70 {dimension_numbers = #tpu.dot_dimension_numbers<[1], [0], [0], [1], [0, 0, 1, 1], [], []>} : vector<1x128xf32>, vector<128x128xf32>, vector<1x128xf32> -> vector<1x128xf32>
    %99 = arith.addf %94, %98 : vector<1x128xf32>
    %100 = vector.extract_strided_slice %78 {offsets = [4, 0], sizes = [1, 128], strides = [1, 1]} : vector<20x128xf32> to vector<1x128xf32>
    %c4_71 = arith.constant 4 : index
    %c0_72 = arith.constant 0 : index
    %c0_73 = arith.constant 0 : index
    %101 = vector.load %arg5[%c4_71, %c0_72, %c0_73] : memref<20x128x128xf32, #tpu.memory_space<vmem>>, vector<1x128x128xf32>
    %102 = vector.shape_cast %101 : vector<1x128x128xf32> to vector<128x128xf32>
    %cst_74 = arith.constant dense<0.000000e+00> : vector<1x128xf32>
    %103 = tpu.matmul %100, %102, %cst_74 {dimension_numbers = #tpu.dot_dimension_numbers<[1], [0], [0], [1], [0, 0, 1, 1], [], []>} : vector<1x128xf32>, vector<128x128xf32>, vector<1x128xf32> -> vector<1x128xf32>
    %104 = arith.addf %99, %103 : vector<1x128xf32>
    %105 = vector.extract_strided_slice %78 {offsets = [5, 0], sizes = [1, 128], strides = [1, 1]} : vector<20x128xf32> to vector<1x128xf32>
    %c5_75 = arith.constant 5 : index
    %c0_76 = arith.constant 0 : index
    %c0_77 = arith.constant 0 : index
    %106 = vector.load %arg5[%c5_75, %c0_76, %c0_77] : memref<20x128x128xf32, #tpu.memory_space<vmem>>, vector<1x128x128xf32>
    %107 = vector.shape_cast %106 : vector<1x128x128xf32> to vector<128x128xf32>
    %cst_78 = arith.constant dense<0.000000e+00> : vector<1x128xf32>
    %108 = tpu.matmul %105, %107, %cst_78 {dimension_numbers = #tpu.dot_dimension_numbers<[1], [0], [0], [1], [0, 0, 1, 1], [], []>} : vector<1x128xf32>, vector<128x128xf32>, vector<1x128xf32> -> vector<1x128xf32>
    %109 = arith.addf %104, %108 : vector<1x128xf32>
    %110 = vector.extract_strided_slice %78 {offsets = [6, 0], sizes = [1, 128], strides = [1, 1]} : vector<20x128xf32> to vector<1x128xf32>
    %c6_79 = arith.constant 6 : index
    %c0_80 = arith.constant 0 : index
    %c0_81 = arith.constant 0 : index
    %111 = vector.load %arg5[%c6_79, %c0_80, %c0_81] : memref<20x128x128xf32, #tpu.memory_space<vmem>>, vector<1x128x128xf32>
    %112 = vector.shape_cast %111 : vector<1x128x128xf32> to vector<128x128xf32>
    %cst_82 = arith.constant dense<0.000000e+00> : vector<1x128xf32>
    %113 = tpu.matmul %110, %112, %cst_82 {dimension_numbers = #tpu.dot_dimension_numbers<[1], [0], [0], [1], [0, 0, 1, 1], [], []>} : vector<1x128xf32>, vector<128x128xf32>, vector<1x128xf32> -> vector<1x128xf32>
    %114 = arith.addf %109, %113 : vector<1x128xf32>
    %115 = vector.extract_strided_slice %78 {offsets = [7, 0], sizes = [1, 128], strides = [1, 1]} : vector<20x128xf32> to vector<1x128xf32>
    %c7_83 = arith.constant 7 : index
    %c0_84 = arith.constant 0 : index
    %c0_85 = arith.constant 0 : index
    %116 = vector.load %arg5[%c7_83, %c0_84, %c0_85] : memref<20x128x128xf32, #tpu.memory_space<vmem>>, vector<1x128x128xf32>
    %117 = vector.shape_cast %116 : vector<1x128x128xf32> to vector<128x128xf32>
    %cst_86 = arith.constant dense<0.000000e+00> : vector<1x128xf32>
    %118 = tpu.matmul %115, %117, %cst_86 {dimension_numbers = #tpu.dot_dimension_numbers<[1], [0], [0], [1], [0, 0, 1, 1], [], []>} : vector<1x128xf32>, vector<128x128xf32>, vector<1x128xf32> -> vector<1x128xf32>
    %119 = arith.addf %114, %118 : vector<1x128xf32>
    %120 = vector.extract_strided_slice %78 {offsets = [8, 0], sizes = [1, 128], strides = [1, 1]} : vector<20x128xf32> to vector<1x128xf32>
    %c8_87 = arith.constant 8 : index
    %c0_88 = arith.constant 0 : index
    %c0_89 = arith.constant 0 : index
    %121 = vector.load %arg5[%c8_87, %c0_88, %c0_89] : memref<20x128x128xf32, #tpu.memory_space<vmem>>, vector<1x128x128xf32>
    %122 = vector.shape_cast %121 : vector<1x128x128xf32> to vector<128x128xf32>
    %cst_90 = arith.constant dense<0.000000e+00> : vector<1x128xf32>
    %123 = tpu.matmul %120, %122, %cst_90 {dimension_numbers = #tpu.dot_dimension_numbers<[1], [0], [0], [1], [0, 0, 1, 1], [], []>} : vector<1x128xf32>, vector<128x128xf32>, vector<1x128xf32> -> vector<1x128xf32>
    %124 = arith.addf %119, %123 : vector<1x128xf32>
    %125 = vector.extract_strided_slice %78 {offsets = [9, 0], sizes = [1, 128], strides = [1, 1]} : vector<20x128xf32> to vector<1x128xf32>
    %c9_91 = arith.constant 9 : index
    %c0_92 = arith.constant 0 : index
    %c0_93 = arith.constant 0 : index
    %126 = vector.load %arg5[%c9_91, %c0_92, %c0_93] : memref<20x128x128xf32, #tpu.memory_space<vmem>>, vector<1x128x128xf32>
    %127 = vector.shape_cast %126 : vector<1x128x128xf32> to vector<128x128xf32>
    %cst_94 = arith.constant dense<0.000000e+00> : vector<1x128xf32>
    %128 = tpu.matmul %125, %127, %cst_94 {dimension_numbers = #tpu.dot_dimension_numbers<[1], [0], [0], [1], [0, 0, 1, 1], [], []>} : vector<1x128xf32>, vector<128x128xf32>, vector<1x128xf32> -> vector<1x128xf32>
    %129 = arith.addf %124, %128 : vector<1x128xf32>
    %130 = vector.extract_strided_slice %78 {offsets = [10, 0], sizes = [1, 128], strides = [1, 1]} : vector<20x128xf32> to vector<1x128xf32>
    %c10_95 = arith.constant 10 : index
    %c0_96 = arith.constant 0 : index
    %c0_97 = arith.constant 0 : index
    %131 = vector.load %arg5[%c10_95, %c0_96, %c0_97] : memref<20x128x128xf32, #tpu.memory_space<vmem>>, vector<1x128x128xf32>
    %132 = vector.shape_cast %131 : vector<1x128x128xf32> to vector<128x128xf32>
    %cst_98 = arith.constant dense<0.000000e+00> : vector<1x128xf32>
    %133 = tpu.matmul %130, %132, %cst_98 {dimension_numbers = #tpu.dot_dimension_numbers<[1], [0], [0], [1], [0, 0, 1, 1], [], []>} : vector<1x128xf32>, vector<128x128xf32>, vector<1x128xf32> -> vector<1x128xf32>
    %134 = arith.addf %129, %133 : vector<1x128xf32>
    %135 = vector.extract_strided_slice %78 {offsets = [11, 0], sizes = [1, 128], strides = [1, 1]} : vector<20x128xf32> to vector<1x128xf32>
    %c11_99 = arith.constant 11 : index
    %c0_100 = arith.constant 0 : index
    %c0_101 = arith.constant 0 : index
    %136 = vector.load %arg5[%c11_99, %c0_100, %c0_101] : memref<20x128x128xf32, #tpu.memory_space<vmem>>, vector<1x128x128xf32>
    %137 = vector.shape_cast %136 : vector<1x128x128xf32> to vector<128x128xf32>
    %cst_102 = arith.constant dense<0.000000e+00> : vector<1x128xf32>
    %138 = tpu.matmul %135, %137, %cst_102 {dimension_numbers = #tpu.dot_dimension_numbers<[1], [0], [0], [1], [0, 0, 1, 1], [], []>} : vector<1x128xf32>, vector<128x128xf32>, vector<1x128xf32> -> vector<1x128xf32>
    %139 = arith.addf %134, %138 : vector<1x128xf32>
    %140 = vector.extract_strided_slice %78 {offsets = [12, 0], sizes = [1, 128], strides = [1, 1]} : vector<20x128xf32> to vector<1x128xf32>
    %c12_103 = arith.constant 12 : index
    %c0_104 = arith.constant 0 : index
    %c0_105 = arith.constant 0 : index
    %141 = vector.load %arg5[%c12_103, %c0_104, %c0_105] : memref<20x128x128xf32, #tpu.memory_space<vmem>>, vector<1x128x128xf32>
    %142 = vector.shape_cast %141 : vector<1x128x128xf32> to vector<128x128xf32>
    %cst_106 = arith.constant dense<0.000000e+00> : vector<1x128xf32>
    %143 = tpu.matmul %140, %142, %cst_106 {dimension_numbers = #tpu.dot_dimension_numbers<[1], [0], [0], [1], [0, 0, 1, 1], [], []>} : vector<1x128xf32>, vector<128x128xf32>, vector<1x128xf32> -> vector<1x128xf32>
    %144 = arith.addf %139, %143 : vector<1x128xf32>
    %145 = vector.extract_strided_slice %78 {offsets = [13, 0], sizes = [1, 128], strides = [1, 1]} : vector<20x128xf32> to vector<1x128xf32>
    %c13 = arith.constant 13 : index
    %c0_107 = arith.constant 0 : index
    %c0_108 = arith.constant 0 : index
    %146 = vector.load %arg5[%c13, %c0_107, %c0_108] : memref<20x128x128xf32, #tpu.memory_space<vmem>>, vector<1x128x128xf32>
    %147 = vector.shape_cast %146 : vector<1x128x128xf32> to vector<128x128xf32>
    %cst_109 = arith.constant dense<0.000000e+00> : vector<1x128xf32>
    %148 = tpu.matmul %145, %147, %cst_109 {dimension_numbers = #tpu.dot_dimension_numbers<[1], [0], [0], [1], [0, 0, 1, 1], [], []>} : vector<1x128xf32>, vector<128x128xf32>, vector<1x128xf32> -> vector<1x128xf32>
    %149 = arith.addf %144, %148 : vector<1x128xf32>
    %150 = vector.extract_strided_slice %78 {offsets = [14, 0], sizes = [1, 128], strides = [1, 1]} : vector<20x128xf32> to vector<1x128xf32>
    %c14 = arith.constant 14 : index
    %c0_110 = arith.constant 0 : index
    %c0_111 = arith.constant 0 : index
    %151 = vector.load %arg5[%c14, %c0_110, %c0_111] : memref<20x128x128xf32, #tpu.memory_space<vmem>>, vector<1x128x128xf32>
    %152 = vector.shape_cast %151 : vector<1x128x128xf32> to vector<128x128xf32>
    %cst_112 = arith.constant dense<0.000000e+00> : vector<1x128xf32>
    %153 = tpu.matmul %150, %152, %cst_112 {dimension_numbers = #tpu.dot_dimension_numbers<[1], [0], [0], [1], [0, 0, 1, 1], [], []>} : vector<1x128xf32>, vector<128x128xf32>, vector<1x128xf32> -> vector<1x128xf32>
    %154 = arith.addf %149, %153 : vector<1x128xf32>
    %155 = vector.extract_strided_slice %78 {offsets = [15, 0], sizes = [1, 128], strides = [1, 1]} : vector<20x128xf32> to vector<1x128xf32>
    %c15 = arith.constant 15 : index
    %c0_113 = arith.constant 0 : index
    %c0_114 = arith.constant 0 : index
    %156 = vector.load %arg5[%c15, %c0_113, %c0_114] : memref<20x128x128xf32, #tpu.memory_space<vmem>>, vector<1x128x128xf32>
    %157 = vector.shape_cast %156 : vector<1x128x128xf32> to vector<128x128xf32>
    %cst_115 = arith.constant dense<0.000000e+00> : vector<1x128xf32>
    %158 = tpu.matmul %155, %157, %cst_115 {dimension_numbers = #tpu.dot_dimension_numbers<[1], [0], [0], [1], [0, 0, 1, 1], [], []>} : vector<1x128xf32>, vector<128x128xf32>, vector<1x128xf32> -> vector<1x128xf32>
    %159 = arith.addf %154, %158 : vector<1x128xf32>
    %160 = vector.extract_strided_slice %78 {offsets = [16, 0], sizes = [1, 128], strides = [1, 1]} : vector<20x128xf32> to vector<1x128xf32>
    %c16_116 = arith.constant 16 : index
    %c0_117 = arith.constant 0 : index
    %c0_118 = arith.constant 0 : index
    %161 = vector.load %arg5[%c16_116, %c0_117, %c0_118] : memref<20x128x128xf32, #tpu.memory_space<vmem>>, vector<1x128x128xf32>
    %162 = vector.shape_cast %161 : vector<1x128x128xf32> to vector<128x128xf32>
    %cst_119 = arith.constant dense<0.000000e+00> : vector<1x128xf32>
    %163 = tpu.matmul %160, %162, %cst_119 {dimension_numbers = #tpu.dot_dimension_numbers<[1], [0], [0], [1], [0, 0, 1, 1], [], []>} : vector<1x128xf32>, vector<128x128xf32>, vector<1x128xf32> -> vector<1x128xf32>
    %164 = arith.addf %159, %163 : vector<1x128xf32>
    %165 = vector.extract_strided_slice %78 {offsets = [17, 0], sizes = [1, 128], strides = [1, 1]} : vector<20x128xf32> to vector<1x128xf32>
    %c17 = arith.constant 17 : index
    %c0_120 = arith.constant 0 : index
    %c0_121 = arith.constant 0 : index
    %166 = vector.load %arg5[%c17, %c0_120, %c0_121] : memref<20x128x128xf32, #tpu.memory_space<vmem>>, vector<1x128x128xf32>
    %167 = vector.shape_cast %166 : vector<1x128x128xf32> to vector<128x128xf32>
    %cst_122 = arith.constant dense<0.000000e+00> : vector<1x128xf32>
    %168 = tpu.matmul %165, %167, %cst_122 {dimension_numbers = #tpu.dot_dimension_numbers<[1], [0], [0], [1], [0, 0, 1, 1], [], []>} : vector<1x128xf32>, vector<128x128xf32>, vector<1x128xf32> -> vector<1x128xf32>
    %169 = arith.addf %164, %168 : vector<1x128xf32>
    %170 = vector.extract_strided_slice %78 {offsets = [18, 0], sizes = [1, 128], strides = [1, 1]} : vector<20x128xf32> to vector<1x128xf32>
    %c18 = arith.constant 18 : index
    %c0_123 = arith.constant 0 : index
    %c0_124 = arith.constant 0 : index
    %171 = vector.load %arg5[%c18, %c0_123, %c0_124] : memref<20x128x128xf32, #tpu.memory_space<vmem>>, vector<1x128x128xf32>
    %172 = vector.shape_cast %171 : vector<1x128x128xf32> to vector<128x128xf32>
    %cst_125 = arith.constant dense<0.000000e+00> : vector<1x128xf32>
    %173 = tpu.matmul %170, %172, %cst_125 {dimension_numbers = #tpu.dot_dimension_numbers<[1], [0], [0], [1], [0, 0, 1, 1], [], []>} : vector<1x128xf32>, vector<128x128xf32>, vector<1x128xf32> -> vector<1x128xf32>
    %174 = arith.addf %169, %173 : vector<1x128xf32>
    %175 = vector.extract_strided_slice %78 {offsets = [19, 0], sizes = [1, 128], strides = [1, 1]} : vector<20x128xf32> to vector<1x128xf32>
    %c19 = arith.constant 19 : index
    %c0_126 = arith.constant 0 : index
    %c0_127 = arith.constant 0 : index
    %176 = vector.load %arg5[%c19, %c0_126, %c0_127] : memref<20x128x128xf32, #tpu.memory_space<vmem>>, vector<1x128x128xf32>
    %177 = vector.shape_cast %176 : vector<1x128x128xf32> to vector<128x128xf32>
    %cst_128 = arith.constant dense<0.000000e+00> : vector<1x128xf32>
    %178 = tpu.matmul %175, %177, %cst_128 {dimension_numbers = #tpu.dot_dimension_numbers<[1], [0], [0], [1], [0, 0, 1, 1], [], []>} : vector<1x128xf32>, vector<128x128xf32>, vector<1x128xf32> -> vector<1x128xf32>
    %179 = arith.addf %174, %178 : vector<1x128xf32>
    %cst_129 = arith.constant 0.000000e+00 : f32
    %180 = vector.broadcast %cst_129 : f32 to vector<1x128xf32>
    %181 = arith.subf %180, %179 : vector<1x128xf32>
    %182 = math.exp %181 : vector<1x128xf32>
    %cst_130 = arith.constant 1.000000e+00 : f32
    %183 = vector.broadcast %cst_130 : f32 to vector<1x128xf32>
    %184 = arith.addf %183, %182 : vector<1x128xf32>
    %cst_131 = arith.constant 1.000000e+00 : f32
    %185 = vector.broadcast %cst_131 : f32 to vector<1x128xf32>
    %186 = arith.divf %185, %184 : vector<1x128xf32>
    %c0_132 = arith.constant 0 : index
    %c0_133 = arith.constant 0 : index
    %187 = vector.load %arg7[%c0_132, %c0_133] : memref<128x1xf32, #tpu.memory_space<vmem>>, vector<128x1xf32>
    %cst_134 = arith.constant dense<0.000000e+00> : vector<1x1xf32>
    %188 = tpu.matmul %186, %187, %cst_134 {dimension_numbers = #tpu.dot_dimension_numbers<[1], [0], [0], [1], [0, 0, 1, 1], [], []>} : vector<1x128xf32>, vector<128x1xf32>, vector<1x1xf32> -> vector<1x1xf32>
    %c0_135 = arith.constant 0 : index
    %c0_136 = arith.constant 0 : index
    %189 = vector.load %arg8[%c0_135, %c0_136] : memref<1x1xf32, #tpu.memory_space<vmem>>, vector<1x1xf32>
    %190 = arith.addf %188, %189 : vector<1x1xf32>
    %c0_137 = arith.constant 0 : index
    %c0_138 = arith.constant 0 : index
    %191 = vector.load %arg9[%c0_137, %c0_138] : memref<1x1xf32, #tpu.memory_space<vmem>>, vector<1x1xf32>
    tpu.vector_store %arg9[%c0_137, %c0_138], %190 {strides = array<i32>} : memref<1x1xf32, #tpu.memory_space<vmem>>, vector<1x1xf32>,
    return
  }
}

</mosaic_0001>

<bundles_post_ra>
// kernel: net_forward.1
= control target key start
LH: loop header
LB: loop body
LE: loop exit
PB: predicated region body
PF: predicated region fallthrough
CT: control target
= control target key end

     0   :  { %s17342_s0 = inlined_call_operand.vmem [shape: f32[4,1536], index: 0, kind: input, shape index: {}]   ;;  %s17343_s1 = inlined_call_operand.hbm [shape: f32[20,24], index: 1, kind: input, shape index: {}]   ;;  %s17344_s2 = inlined_call_operand.vmem [shape: f32[20,1], index: 2, kind: input, shape index: {}]   ;;  %s17345_s3 = inlined_call_operand.hbm [shape: f32[20,120], index: 3, kind: input, shape index: {}]   ;;  %s17346_s4 = inlined_call_operand.vmem [shape: f32[20,1], index: 4, kind: input, shape index: {}]   ;;  %s17347_s5 = inlined_call_operand.hbm [shape: f32[20,128,128], index: 5, kind: input, shape index: {}]   ;;  %s17348_s6 = inlined_call_operand.hbm [shape: f32[1,128], index: 6, kind: input, shape index: {}]   ;;  %s17349_s7 = inlined_call_operand.vmem [shape: f32[128,1], index: 7, kind: input, shape index: {}]   ;;  %s17350_s8 = inlined_call_operand.<no memory space> [shape: f32[1,1], index: 8, kind: input, shape index: {}]   ;;  %s17351_s9 = inlined_call_operand.hbm [shape: f32[1,1], index: 9, kind: output, shape index: {}]  }
   0x1   :  { %v14_v0 = vstv %s17350_s8 }
   0x2   :  { %15 = vst [vmem:[#allocation5] sm:$0x1] %v14_v0 }
   0x3   :  { %16 = vsyncpa [#allocation7], 0 }
   0x4   :  { %17 = vsyncpa [#allocation10], 0 }
   0x5   :  { %18 = vsyncpa [#allocation13], 0 }
   0x6   :  { %19 = vsyncpa [#allocation8], 0  ;;  %s10682_s11 = smov [#allocation9]   ;;  %s10683_s13 = smov [#allocation6]  }
   0x7   :  { %s41_s12 = sshll.u32 %s10682_s11, 4  ;;  %s27_s14 = sshll.u32 %s10683_s13, 4  ;;  %s42_s12 = int_to_ptr.vmem [resolvable:$true] %s41_s12  ;;  %s10759_s14 = int_to_ptr.vmem [resolvable:$true] %s27_s14 }
   0x8   :  { %s10564_s17 = scalar_lea.hbm %s17345_s3, 384 }
   0x9   :  { %p10565_p0 = scmp.ne.s32.totalorder %s17345_s3, %s10564_s17  ;;  %p10568_p1 = scmp.lt.u32.totalorder %s10564_s17, %s17345_s3 }
   0xb   :  { %p10570_p2 = pnand %p10568_p1, %p10565_p0 }
   0xd   :  { %10573 = shalt.err (!%p10570_p2)
}
   0xe   :  { %s10574_s21 = scalar_lea.vmem %s42_s12, 384  ;;  %p10579_p4 = scmp.lt.s32.totalorder %s42_s12, %s42_s12 }
   0xf   :  { %p10575_p3 = scmp.ne.s32.totalorder %s42_s12, %s10574_s21  ;;  %p10580_p5 = scmp.lt.s32.totalorder %s10574_s21, %s10574_s21 }
  0x11   :  { %p10581_p6 = por %p10580_p5, %p10579_p4 }
  0x13   :  { %p10582_p7 = pnand %p10581_p6, %p10575_p3 }
  0x15   :  { %10585 = shalt.err (!%p10582_p7)
}
  0x16   :  { %s10684_s22 = smov 128   ;;  %s10685_s23 = smov 8  }
  0x17   :  { %47 = dma.hbm_to_vmem [thread:$0]  %s17345_s3, 384, %s42_s12, [#allocation10], %s10684_s22, %s10684_s22, %s10685_s23  }
  0x18   :  { %s10586_s28 = scalar_lea.hbm %s17343_s1, 384 }
  0x19   :  { %p10587_p8 = scmp.ne.s32.totalorder %s17343_s1, %s10586_s28  ;;  %p10590_p9 = scmp.lt.u32.totalorder %s10586_s28, %s17343_s1 }
  0x1b   :  { %p10592_p10 = pnand %p10590_p9, %p10587_p8 }
  0x1d   :  { %10595 = shalt.err (!%p10592_p10)
}
  0x1e   :  { %s10596_s13 = scalar_lea.vmem %s10759_s14, 384  ;;  %p10601_p12 = scmp.lt.s32.totalorder %s10759_s14, %s10759_s14 }
  0x1f   :  { %p10597_p11 = scmp.ne.s32.totalorder %s10759_s14, %s10596_s13  ;;  %p10602_p13 = scmp.lt.s32.totalorder %s10596_s13, %s10596_s13 }
  0x21   :  { %p10603_p0 = por %p10602_p13, %p10601_p12 }
  0x23   :  { %p10604_p1 = pnand %p10603_p0, %p10597_p11 }
  0x25   :  { %10607 = shalt.err (!%p10604_p1)
}
  0x26   :  { %33 = dma.hbm_to_vmem [thread:$0]  %s17343_s1, 384, %s10759_s14, [#allocation7], %s10684_s22, %s10684_s22, %s10685_s23  }
  0x27   :  { %s10686_s15 = smov [#allocation11]   ;;  %s10687_s17 = smov [#allocation12]  }
  0x28   :  { %s55_s16 = sshll.u32 %s10686_s15, 4  ;;  %s68_s18 = sshll.u32 %s10687_s17, 4  ;;  %s56_s16 = int_to_ptr.vmem [resolvable:$true] %s55_s16  ;;  %s69_s18 = int_to_ptr.vmem [resolvable:$true] %s68_s18 }
  0x29   :  { %s10608_s20 = scalar_lea.hbm %s17347_s5, 40960 }
  0x2a   :  { %p10609_p2 = scmp.ne.s32.totalorder %s17347_s5, %s10608_s20  ;;  %p10612_p3 = scmp.lt.u32.totalorder %s10608_s20, %s17347_s5 }
  0x2c   :  { %p10614_p4 = pnand %p10612_p3, %p10609_p2 }
  0x2e   :  { %10617 = shalt.err (!%p10614_p4)
}
  0x2f   :  { %s10618_s1 = scalar_lea.vmem %s56_s16, 40960  ;;  %p10623_p6 = scmp.lt.s32.totalorder %s56_s16, %s56_s16 }
  0x30   :  { %p10619_p5 = scmp.ne.s32.totalorder %s56_s16, %s10618_s1  ;;  %p10624_p7 = scmp.lt.s32.totalorder %s10618_s1, %s10618_s1 }
  0x32   :  { %p10625_p8 = por %p10624_p7, %p10623_p6 }
  0x34   :  { %p10626_p9 = pnand %p10625_p8, %p10619_p5 }
  0x36   :  { %10629 = shalt.err (!%p10626_p9)
}
  0x37   :  { %61 = dma.hbm_to_vmem [thread:$0]  %s17347_s5, 40960, %s56_s16, [#allocation10], %s10684_s22, %s10684_s22, %s10685_s23  }
  0x38   :  { %s10630_s30 = scalar_lea.hbm %s17348_s6, 16 }
  0x39   :  { %p10631_p10 = scmp.ne.s32.totalorder %s17348_s6, %s10630_s30  ;;  %p10634_p11 = scmp.lt.u32.totalorder %s10630_s30, %s17348_s6 }
  0x3b   :  { %p10636_p12 = pnand %p10634_p11, %p10631_p10 }
  0x3d   :  { %10639 = shalt.err (!%p10636_p12)
}
  0x3e   :  { %s10640_s12 = scalar_lea.vmem %s69_s18, 16  ;;  %s10644_s15 = scalar_lea.vmem %s69_s18, 32 }
  0x3f   :  { %p10641_p13 = scmp.ne.s32.totalorder %s69_s18, %s10640_s12  ;;  %p10645_p0 = scmp.lt.s32.totalorder %s69_s18, %s69_s18 }
  0x40   :  { %p10646_p1 = scmp.lt.s32.totalorder %s10644_s15, %s10640_s12 }
  0x42   :  { %p10647_p2 = por %p10646_p1, %p10645_p0 }
  0x44   :  { %p10648_p3 = pnand %p10647_p2, %p10641_p13 }
  0x46   :  { %10651 = shalt.err (!%p10648_p3)
}
  0x47   :  { %71 = dma.hbm_to_vmem [thread:$0]  %s17348_s6, 16, %s69_s18, [#allocation13]  }
  0x48   :  { %10674 = dma.done.wait [#allocation7], 384  }
  0x49   :  { %10675 = vsyncadd [#allocation7], 4294966912 }
  0x4a   :  { %10676 = dma.done.wait [#allocation10], 41344  }
  0x4b   :  { %10677 = vsyncadd [#allocation10], 4294925952 }
  0x4c   :  { %10678 = dma.done.wait [#allocation13], 16  }
  0x4d   :  { %10679 = vsyncadd [#allocation13], 4294967280  ;;  %v89_v1 = vld [vmem:[%s17342_s0 + $0x8] sm:$0xff]  ;;  %v88_v2 = vld [vmem:[%s17342_s0] sm:$0xff]  ;;  %s10688_s6 = smov 126   ;;  %s10689_s18 = smov 127  }
  0x4e   :  { %v10832_v3 = vld [vmem:[%s17342_s0 + $0x10] sm:$0xff]  ;;  %190 = vrot.lane.b32.xlu1 %v89_v1, %s10688_s6  ;;  %112 = vst [vmem:[#allocation2 + $0x10] sm:$0xf] %v89_v1  ;;  %129 = vrot.lane.b32.xlu0 %v88_v2, %s10689_s18  ;;  %110 = vst [vmem:[#allocation2] sm:$0xf] %v88_v2  ;;  %v100_v4 = vcombine.high %v88_v2, %v88_v2  ;;  %v10840_v5 = vld [vmem:[%s17342_s0 + $0x18] sm:$0xff]  ;;  %v101_v7 = vcombine.high %v89_v1, %v89_v1 }
  0x4f   :  { %114 = vst [vmem:[#allocation2 + $0x20] sm:$0xf] %v10832_v3  ;;  %v10845_v6 = vld [vmem:[%s17342_s0 + $0x20] sm:$0xff]  ;;  %116 = vst [vmem:[#allocation2 + $0x30] sm:$0xf] %v10840_v5  ;;  %v102_v8 = vcombine.high %v10832_v3, %v10832_v3  ;;  %v10854_v9 = vld [vmem:[%s17342_s0 + $0x28] sm:$0xff]  ;;  %v103_v10 = vcombine.high %v10840_v5, %v10840_v5  ;;  %v122_v12 = vcombine.low %v89_v1, %v89_v1 }
  0x50   :  { %118 = vst [vmem:[#allocation2 + $0x40] sm:$0xf] %v10845_v6  ;;  %111 = vst [vmem:[#allocation2 + $0x8] sm:$0xf] %v100_v4  ;;  %v10861_v11 = vcombine.high %v10845_v6, %v10845_v6  ;;  %s10690_s27 = smov 125   ;;  %v121_v13 = vcombine.low %v88_v2, %v88_v2  ;;  %s10691_s0 = smov 124   ;;  %v123_v14 = vcombine.low %v10832_v3, %v10832_v3 }
  0x51   :  { %120 = vst [vmem:[#allocation2 + $0x50] sm:$0xf] %v10854_v9  ;;  %113 = vst [vmem:[#allocation2 + $0x18] sm:$0xf] %v101_v7  ;;  %s10692_s28 = smov 123   ;;  %v124_v15 = vcombine.low %v10840_v5, %v10840_v5  ;;  %v17354_v16 = vmov 0.0   ;;  %v125_v17 = vcombine.low %v10845_v6, %v10845_v6  ;;  %v126_v18 = vcombine.low %v10854_v9, %v10854_v9 }
  0x52   :  { %115 = vst [vmem:[#allocation2 + $0x28] sm:$0xf] %v102_v8  ;;  %246 = vrot.lane.b32.xlu0 %v88_v2, %s10690_s27  ;;  %188 = vrot.lane.b32.xlu1 %v100_v4, %s10688_s6  ;;  %117 = vst [vmem:[#allocation2 + $0x38] sm:$0xf] %v103_v10  ;;  %v185_v19 = vcombine.high %v10854_v9, %v10854_v9  ;;  %vm17387_vm0 = vcmask 1031168   ;;  %vm17389_vm1 = vcmask 1039360  }
  0x53   :  { %119 = vst [vmem:[#allocation2 + $0x48] sm:$0xf] %v10861_v11  ;;  %546 = vmatprep.mubr.f32.mxu0 %v17354_v16  ;;  %629 = vmatprep.mubr.f32.mxu1 %v17354_v16  ;;  %vm17386_vm2 = vcmask 1022976   ;;  %v454_v29 = vld [vmem:[%s17344_s2] sm:$0xff]  ;;  %v455_v30 = vld [vmem:[%s17344_s2 + $0x8] sm:$0xff]  ;;  %v10694_v31 = vmov 0  }
  0x54   :  { %9732 = vset.pattern.permute.xlu1 %v10694_v31  ;;  %9731 = vset.pattern.permute.xlu0 %v10694_v31  ;;  %v456_v34 = vld [vmem:[%s17344_s2 + $0x10] sm:$0xf]  ;;  %vm17379_vm3 = vcmask 1014784   ;;  %vm17380_vm4 = vcmask 1006592   ;;  %vm472_vm5 = vcmask 195584   ;;  %vm17361_vm6 = vmmov 0  }
  0x55   :  { %v10991_v0 = vld [vmem:[#allocation6] sm:$0xff]  ;;  %vm17363_vm7 = vcmask 1043456   ;;  %vm17364_vm8 = vcmask 982016   ;;  %s10698_s16 = smov 121   ;;  %s10699_s17 = smov 120  }
  0x56   :  { %131 = vrot.lane.b32.xlu0 %v122_v12, %s10689_s18  ;;  %248 = vrot.lane.b32.xlu1 %v122_v12, %s10690_s27  ;;  %s10700_s19 = smov 119   ;;  %s10701_s8 = smov 118  }
  0x57   :  { %s10702_s20 = smov 117   ;;  %s10703_s21 = smov 116  }
  0x5a   :  { %127 = vrot.lane.b32.xlu0 %v121_v13, %s10689_s18  ;;  %186 = vrot.lane.b32.xlu1 %v88_v2, %s10688_s6 }
  0x5e   :  { %244 = vrot.lane.b32.xlu0 %v121_v13, %s10690_s27  ;;  %304 = vrot.lane.b32.xlu1 %v100_v4, %s10691_s0 }
  0x62   :  { %306 = vrot.lane.b32.xlu0 %v89_v1, %s10691_s0  ;;  %362 = vrot.lane.b32.xlu1 %v88_v2, %s10692_s28 }
  0x66   :  { %364 = vrot.lane.b32.xlu0 %v122_v12, %s10692_s28  ;;  %302 = vrot.lane.b32.xlu1 %v88_v2, %s10691_s0 }
  0x6a   :  { %360 = vrot.lane.b32.xlu0 %v121_v13, %s10692_s28  ;;  %133 = vrot.lane.b32.xlu1 %v89_v1, %s10689_s18 }
  0x6e   :  { %135 = vrot.lane.b32.xlu0 %v123_v14, %s10689_s18  ;;  %192 = vrot.lane.b32.xlu1 %v101_v7, %s10688_s6 }
  0x72   :  { %194 = vrot.lane.b32.xlu0 %v10832_v3, %s10688_s6  ;;  %250 = vrot.lane.b32.xlu1 %v89_v1, %s10690_s27 }
  0x76   :  { %252 = vrot.lane.b32.xlu0 %v123_v14, %s10690_s27  ;;  %137 = vrot.lane.b32.xlu1 %v10832_v3, %s10689_s18 }
  0x7a   :  { %139 = vrot.lane.b32.xlu0 %v124_v15, %s10689_s18  ;;  %196 = vrot.lane.b32.xlu1 %v102_v8, %s10688_s6 }
  0x7e   :  { %198 = vrot.lane.b32.xlu0 %v10840_v5, %s10688_s6  ;;  %254 = vrot.lane.b32.xlu1 %v10832_v3, %s10690_s27 }
  0x82   :  { %256 = vrot.lane.b32.xlu0 %v124_v15, %s10690_s27  ;;  %308 = vrot.lane.b32.xlu1 %v101_v7, %s10691_s0 }
  0x86   :  { %310 = vrot.lane.b32.xlu0 %v10832_v3, %s10691_s0  ;;  %366 = vrot.lane.b32.xlu1 %v89_v1, %s10692_s28 }
  0x8a   :  { %368 = vrot.lane.b32.xlu0 %v123_v14, %s10692_s28  ;;  %312 = vrot.lane.b32.xlu1 %v102_v8, %s10691_s0 }
  0x8e   :  { %314 = vrot.lane.b32.xlu0 %v10840_v5, %s10691_s0  ;;  %370 = vrot.lane.b32.xlu1 %v10832_v3, %s10692_s28 }
  0x92   :  { %372 = vrot.lane.b32.xlu0 %v124_v15, %s10692_s28  ;;  %141 = vrot.lane.b32.xlu1 %v10840_v5, %s10689_s18 }
  0x96   :  { %143 = vrot.lane.b32.xlu0 %v125_v17, %s10689_s18  ;;  %200 = vrot.lane.b32.xlu1 %v103_v10, %s10688_s6 }
  0x9a   :  { %202 = vrot.lane.b32.xlu0 %v10845_v6, %s10688_s6  ;;  %258 = vrot.lane.b32.xlu1 %v10840_v5, %s10690_s27 }
  0x9e   :  { %260 = vrot.lane.b32.xlu0 %v125_v17, %s10690_s27  ;;  %316 = vrot.lane.b32.xlu1 %v103_v10, %s10691_s0 }
  0xa2   :  { %318 = vrot.lane.b32.xlu0 %v10845_v6, %s10691_s0  ;;  %374 = vrot.lane.b32.xlu1 %v10840_v5, %s10692_s28 }
  0xa6   :  { %376 = vrot.lane.b32.xlu0 %v125_v17, %s10692_s28  ;;  %145 = vrot.lane.b32.xlu1 %v10845_v6, %s10689_s18 }
  0xaa   :  { %147 = vrot.lane.b32.xlu0 %v126_v18, %s10689_s18  ;;  %204 = vrot.lane.b32.xlu1 %v10861_v11, %s10688_s6 }
  0xae   :  { %206 = vrot.lane.b32.xlu0 %v10854_v9, %s10688_s6  ;;  %262 = vrot.lane.b32.xlu1 %v10845_v6, %s10690_s27 }
  0xb2   :  { %264 = vrot.lane.b32.xlu0 %v126_v18, %s10690_s27  ;;  %320 = vrot.lane.b32.xlu1 %v10861_v11, %s10691_s0  ;;  %v11006_v11 = vld [vmem:[#allocation6 + $0x10] sm:$0xf] }
  0xb6   :  { %322 = vrot.lane.b32.xlu0 %v10854_v9, %s10691_s0  ;;  %378 = vrot.lane.b32.xlu1 %v10845_v6, %s10692_s28  ;;  %v10999_v6 = vld [vmem:[#allocation6 + $0x8] sm:$0xff] }
  0xba   :  { %380 = vrot.lane.b32.xlu0 %v126_v18, %s10692_s28  ;;  %149 = vrot.lane.b32.xlu1 %v10854_v9, %s10689_s18 }
  0xbe   :  { %208 = vrot.lane.b32.xlu0 %v185_v19, %s10688_s6  ;;  %266 = vrot.lane.b32.xlu1 %v10854_v9, %s10690_s27 }
  0xc0   :  { %v10953_v20 = vpop.permute.xlu1 %190  ;;  %v130_v21 = vpop.permute.xlu0 %129 }
  0xc2   :  { %324 = vrot.lane.b32.xlu0 %v185_v19, %s10691_s0  ;;  %382 = vrot.lane.b32.xlu1 %v10854_v9, %s10692_s28 }
  0xc4   :  { %v247_v22 = vpop.permute.xlu0 %246  ;;  %v189_v23 = vpop.permute.xlu1 %188 }
  0xc5   :  { %v212_v24 = vsel %vm17387_vm0, %v189_v23, %v10953_v20 }
  0xc6   :  { %234 = vst [vmem:[#allocation2 + $0x60] sm:$0xf] %v212_v24  ;;  %459 = vperm.xlu0 %9731, %v454_v29   ;;  %464 = vperm.xlu1 %9732, %v455_v30  }
  0xc8   :  { %v132_v25 = vpop.permute.xlu0 %131  ;;  %v10960_v26 = vpop.permute.xlu1 %248 }
  0xc9   :  { %v153_v27 = vsel %vm17389_vm1, %v130_v21, %v132_v25  ;;  %v270_v28 = vsel %vm17386_vm2, %v247_v22, %v10960_v26 }
  0xca   :  { %175 = vst [vmem:[#allocation2 + $0x8] sm:$0xf0] %v153_v27  ;;  %292 = vst [vmem:[#allocation2 + $0x60] sm:$0xf0] %v270_v28  ;;  %469 = vperm.xlu1 %9732, %v456_v34  }
  0xcc   :  { %v128_v32 = vpop.permute.xlu0 %127  ;;  %v187_v33 = vpop.permute.xlu1 %186 }
  0xcd   :  { %v152_v35 = vsel %vm17389_vm1, %v128_v32, %v130_v21  ;;  %v211_v36 = vsel %vm17387_vm0, %v187_v33, %v189_v23 }
  0xce   :  { %174 = vst [vmem:[#allocation2] sm:$0xf0] %v152_v35  ;;  %233 = vst [vmem:[#allocation2 + $0x58] sm:$0xf] %v211_v36 }
  0xd0   :  { %v245_v37 = vpop.permute.xlu0 %244  ;;  %v305_v38 = vpop.permute.xlu1 %304 }
  0xd1   :  { %v269_v39 = vsel %vm17386_vm2, %v245_v37, %v247_v22  ;;  %v422_v40 = vld [vmem:[#allocation2 + $0x8] sm:$0xff]  ;;  %v433_v41 = vld [vmem:[#allocation2 + $0x60] sm:$0xff] }
  0xd2   :  { %291 = vst [vmem:[#allocation2 + $0x58] sm:$0xf0] %v269_v39  ;;  %v8829_v42 = vpack.c.bf16 %v433_v41, %v422_v40 }
  0xd4   :  { %v10977_v43 = vpop.permute.xlu0 %306  ;;  %v363_v44 = vpop.permute.xlu1 %362  ;;  %8830 = vmatprep.subr.bf16.mxu0 %v8829_v42 }
  0xd5   :  { %v328_v45 = vsel %vm17379_vm3, %v305_v38, %v10977_v43  ;;  %v421_v50 = vld [vmem:[#allocation2] sm:$0xff] }
  0xd6   :  { %350 = vst [vmem:[#allocation2 + $0xb8] sm:$0xf] %v328_v45 }
  0xd8   :  { %v10981_v46 = vpop.permute.xlu0 %364  ;;  %v303_v47 = vpop.permute.xlu1 %302 }
  0xd9   :  { %v386_v48 = vsel %vm17380_vm4, %v363_v44, %v10981_v46  ;;  %v327_v49 = vsel %vm17379_vm3, %v303_v47, %v305_v38  ;;  %v432_v51 = vld [vmem:[#allocation2 + $0x58] sm:$0xff] }
  0xda   :  { %408 = vst [vmem:[#allocation2 + $0xb8] sm:$0xf0] %v386_v48  ;;  %349 = vst [vmem:[#allocation2 + $0xb0] sm:$0xf] %v327_v49  ;;  %v8831_v52 = vpack.c.bf16 %v432_v51, %v421_v50 }
  0xdc   :  { %v361_v53 = vpop.permute.xlu0 %360  ;;  %v134_v54 = vpop.permute.xlu1 %133  ;;  %8832 = vmatpush1.bf16.msra.mxu0 %v8831_v52 }
  0xdd   :  { %v385_v55 = vsel %vm17380_vm4, %v361_v53, %v363_v44  ;;  %v154_v56 = vsel %vm17389_vm1, %v132_v25, %v134_v54 }
  0xde   :  { %407 = vst [vmem:[#allocation2 + $0xb0] sm:$0xf0] %v385_v55  ;;  %176 = vst [vmem:[#allocation2 + $0x10] sm:$0xf0] %v154_v56 }
  0xe0   :  { %v136_v57 = vpop.permute.xlu0 %135  ;;  %v193_v58 = vpop.permute.xlu1 %192 }
  0xe1   :  { %v155_v59 = vsel %vm17389_vm1, %v134_v54, %v136_v57  ;;  %v213_v60 = vsel %vm17387_vm0, %v10953_v20, %v193_v58  ;;  %v444_v61 = vld [vmem:[#allocation2 + $0xb8] sm:$0xff] }
  0xe2   :  { %177 = vst [vmem:[#allocation2 + $0x18] sm:$0xf0] %v155_v59  ;;  %235 = vst [vmem:[#allocation2 + $0x68] sm:$0xf] %v213_v60  ;;  %486 = vmatprep.subr.mxu0 %v444_v61 }
  0xe4   :  { %v195_v62 = vpop.permute.xlu0 %194  ;;  %v251_v63 = vpop.permute.xlu1 %250 }
  0xe5   :  { %v214_v1 = vsel %vm17387_vm0, %v193_v58, %v195_v62  ;;  %v271_v2 = vsel %vm17386_vm2, %v10960_v26, %v251_v63  ;;  %v443_v3 = vld [vmem:[#allocation2 + $0xb0] sm:$0xff] }
  0xe6   :  { %236 = vst [vmem:[#allocation2 + $0x70] sm:$0xf] %v214_v1  ;;  %293 = vst [vmem:[#allocation2 + $0x68] sm:$0xf0] %v271_v2  ;;  %487 = vmatpush1.msra.mxu0 %v443_v3  ;;  %v423_v23 = vld [vmem:[#allocation2 + $0x10] sm:$0xff] }
  0xe7   :  { %7357 = vmatmul.mubr.msk.f32.vlgmr.msra.gmra.mrb[0].mxu0 %vm472_vm5, %v10991_v0 }
  0xe8   :  { %v253_v4 = vpop.permute.xlu0 %252  ;;  %v138_v5 = vpop.permute.xlu1 %137  ;;  %552 = vmatprep.mubr.f32.mxu0 %v17354_v16 }
  0xe9   :  { %v272_v7 = vsel %vm17386_vm2, %v251_v63, %v253_v4  ;;  %v156_v8 = vsel %vm17389_vm1, %v136_v57, %v138_v5  ;;  %v424_v20 = vld [vmem:[#allocation2 + $0x18] sm:$0xff] }
  0xea   :  { %294 = vst [vmem:[#allocation2 + $0x70] sm:$0xf0] %v272_v7  ;;  %178 = vst [vmem:[#allocation2 + $0x20] sm:$0xf0] %v156_v8 }
  0xeb   :  { %7358 = vmatmul.mubr.msk.f32.gmra.mrb[2].mxu0 %vm472_vm5, %v10999_v6 }
  0xec   :  { %v140_v9 = vpop.permute.xlu0 %139  ;;  %v197_v10 = vpop.permute.xlu1 %196  ;;  %558 = vmatprep.mubr.f32.mxu0 %v17354_v16 }
  0xed   :  { %v157_v12 = vsel %vm17389_vm1, %v138_v5, %v140_v9  ;;  %v215_v13 = vsel %vm17387_vm0, %v195_v62, %v197_v10  ;;  %v434_v17 = vld [vmem:[#allocation2 + $0x68] sm:$0xff] }
  0xee   :  { %179 = vst [vmem:[#allocation2 + $0x28] sm:$0xf0] %v157_v12  ;;  %237 = vst [vmem:[#allocation2 + $0x78] sm:$0xf] %v215_v13  ;;  %v8835_v24 = vpack.c.bf16 %v434_v17, %v423_v23 }
  0xef   :  { %7359 = vmatmul.mubr.msk.f32.gmra.mrb[4].mxu0 %vm472_vm5, %v11006_v11 }
  0xf0   :  { %v199_v14 = vpop.permute.xlu0 %198  ;;  %v255_v15 = vpop.permute.xlu1 %254  ;;  %712 = vmatprep.mubr.f32.mxu0 %v17354_v16 }
  0xf1   :  { %v216_v18 = vsel %vm17387_vm0, %v197_v10, %v199_v14  ;;  %v273_v19 = vsel %vm17386_vm2, %v253_v4, %v255_v15  ;;  %v435_v21 = vld [vmem:[#allocation2 + $0x70] sm:$0xff]  ;;  %v425_v41 = vld [vmem:[#allocation2 + $0x20] sm:$0xff] }
  0xf2   :  { %238 = vst [vmem:[#allocation2 + $0x80] sm:$0xf] %v216_v18  ;;  %295 = vst [vmem:[#allocation2 + $0x78] sm:$0xf0] %v273_v19  ;;  %v8833_v22 = vpack.c.bf16 %v435_v21, %v424_v20 }
  0xf4   :  { %v257_v25 = vpop.permute.xlu0 %256  ;;  %8834 = vmatprep.subr.bf16.mxu1 %v8833_v22  ;;  %v309_v26 = vpop.permute.xlu1 %308 }
  0xf5   :  { %v274_v27 = vsel %vm17386_vm2, %v255_v15, %v257_v25  ;;  %v329_v28 = vsel %vm17379_vm3, %v10977_v43, %v309_v26  ;;  %8836 = vmatpush1.bf16.msra.mxu1 %v8835_v24  ;;  %v426_v38 = vld [vmem:[#allocation2 + $0x28] sm:$0xff] }
  0xf6   :  { %296 = vst [vmem:[#allocation2 + $0x80] sm:$0xf0] %v274_v27  ;;  %351 = vst [vmem:[#allocation2 + $0xc0] sm:$0xf] %v329_v28 }
  0xf8   :  { %v311_v29 = vpop.permute.xlu0 %310  ;;  %v367_v30 = vpop.permute.xlu1 %366 }
  0xf9   :  { %v330_v31 = vsel %vm17379_vm3, %v309_v26, %v311_v29  ;;  %v387_v32 = vsel %vm17380_vm4, %v10981_v46, %v367_v30  ;;  %v436_v35 = vld [vmem:[#allocation2 + $0x78] sm:$0xff] }
  0xfa   :  { %352 = vst [vmem:[#allocation2 + $0xc8] sm:$0xf] %v330_v31  ;;  %409 = vst [vmem:[#allocation2 + $0xc0] sm:$0xf0] %v387_v32  ;;  %v8839_v42 = vpack.c.bf16 %v436_v35, %v425_v41 }
  0xfc   :  { %v369_v33 = vpop.permute.xlu0 %368  ;;  %v313_v34 = vpop.permute.xlu1 %312 }
  0xfd   :  { %v388_v36 = vsel %vm17380_vm4, %v367_v30, %v369_v33  ;;  %v331_v37 = vsel %vm17379_vm3, %v311_v29, %v313_v34  ;;  %v437_v39 = vld [vmem:[#allocation2 + $0x80] sm:$0xff] }
  0xfe   :  { %410 = vst [vmem:[#allocation2 + $0xc8] sm:$0xf0] %v388_v36  ;;  %353 = vst [vmem:[#allocation2 + $0xd0] sm:$0xf] %v331_v37  ;;  %v8837_v40 = vpack.c.bf16 %v437_v39, %v426_v38 }
 0x100   :  { %v315_v43 = vpop.permute.xlu0 %314  ;;  %v371_v44 = vpop.permute.xlu1 %370  ;;  %8838 = vmatprep.subr.bf16.mxu0 %v8837_v40 }
 0x101   :  { %v332_v45 = vsel %vm17379_vm3, %v313_v34, %v315_v43  ;;  %v389_v46 = vsel %vm17380_vm4, %v369_v33, %v371_v44  ;;  %8840 = vmatpush1.bf16.msra.mxu0 %v8839_v42  ;;  %v445_v52 = vld [vmem:[#allocation2 + $0xc0] sm:$0xff]  ;;  %v17352_v33 = vmov 0.0|0.0  }
 0x102   :  { %354 = vst [vmem:[#allocation2 + $0xd8] sm:$0xf] %v332_v45  ;;  %411 = vst [vmem:[#allocation2 + $0xd0] sm:$0xf0] %v389_v46 }
 0x104   :  { %v373_v47 = vpop.permute.xlu0 %372  ;;  %v142_v48 = vpop.permute.xlu1 %141 }
 0x105   :  { %v390_v49 = vsel %vm17380_vm4, %v371_v44, %v373_v47  ;;  %v158_v50 = vsel %vm17389_vm1, %v140_v9, %v142_v48  ;;  %v446_v51 = vld [vmem:[#allocation2 + $0xc8] sm:$0xff] }
 0x106   :  { %412 = vst [vmem:[#allocation2 + $0xd8] sm:$0xf0] %v390_v49  ;;  %180 = vst [vmem:[#allocation2 + $0x30] sm:$0xf0] %v158_v50  ;;  %569 = vmatprep.subr.mxu1 %v446_v51 }
 0x107   :  { %570 = vmatpush1.msra.mxu1 %v445_v52 }
 0x108   :  { %v144_v53 = vpop.permute.xlu0 %143  ;;  %7360 = vmatmul.mubr.msk.f32.vlgmr.msra.gmra.mrb[0].mxu1 %vm472_vm5, %v10991_v0  ;;  %v201_v54 = vpop.permute.xlu1 %200 }
 0x109   :  { %v159_v55 = vsel %vm17389_vm1, %v142_v48, %v144_v53  ;;  %v217_v56 = vsel %vm17387_vm0, %v199_v14, %v201_v54  ;;  %635 = vmatprep.mubr.f32.mxu1 %v17354_v16  ;;  %v447_v62 = vld [vmem:[#allocation2 + $0xd0] sm:$0xff] }
 0x10a   :  { %181 = vst [vmem:[#allocation2 + $0x38] sm:$0xf0] %v159_v55  ;;  %239 = vst [vmem:[#allocation2 + $0x88] sm:$0xf] %v217_v56 }
 0x10c   :  { %v203_v57 = vpop.permute.xlu0 %202  ;;  %7361 = vmatmul.mubr.msk.f32.gmra.mrb[2].mxu1 %vm472_vm5, %v10999_v6  ;;  %v259_v58 = vpop.permute.xlu1 %258 }
 0x10d   :  { %v218_v59 = vsel %vm17387_vm0, %v201_v54, %v203_v57  ;;  %v275_v60 = vsel %vm17386_vm2, %v257_v25, %v259_v58  ;;  %v448_v61 = vld [vmem:[#allocation2 + $0xd8] sm:$0xff]  ;;  %641 = vmatprep.mubr.f32.mxu1 %v17354_v16  ;;  %v427_v19 = vld [vmem:[#allocation2 + $0x30] sm:$0xff] }
 0x10e   :  { %240 = vst [vmem:[#allocation2 + $0x90] sm:$0xf] %v218_v59  ;;  %297 = vst [vmem:[#allocation2 + $0x88] sm:$0xf0] %v275_v60  ;;  %652 = vmatprep.subr.mxu0 %v448_v61 }
 0x10f   :  { %653 = vmatpush1.msra.mxu0 %v447_v62 }
 0x110   :  { %v261_v63 = vpop.permute.xlu0 %260  ;;  %v317_v1 = vpop.permute.xlu1 %316  ;;  %7363 = vmatmul.mubr.msk.f32.vlgmr.msra.gmra.mrb[6].mxu0 %vm472_vm5, %v10991_v0  ;;  %7362 = vmatmul.mubr.msk.f32.gmra.mrb[4].mxu1 %vm472_vm5, %v11006_v11 }
 0x111   :  { %v276_v2 = vsel %vm17386_vm2, %v259_v58, %v261_v63  ;;  %v333_v3 = vsel %vm17379_vm3, %v315_v43, %v317_v1  ;;  %718 = vmatprep.mubr.f32.mxu0 %v17354_v16  ;;  %795 = vmatprep.mubr.f32.mxu1 %v17354_v16  ;;  %v428_v9 = vld [vmem:[#allocation2 + $0x38] sm:$0xff] }
 0x112   :  { %298 = vst [vmem:[#allocation2 + $0x90] sm:$0xf0] %v276_v2  ;;  %355 = vst [vmem:[#allocation2 + $0xe0] sm:$0xf] %v333_v3 }
 0x114   :  { %v319_v4 = vpop.permute.xlu0 %318  ;;  %v375_v5 = vpop.permute.xlu1 %374  ;;  %7364 = vmatmul.mubr.msk.f32.gmra.mrb[8].mxu0 %vm472_vm5, %v10999_v6 }
 0x115   :  { %v334_v7 = vsel %vm17379_vm3, %v317_v1, %v319_v4  ;;  %v391_v8 = vsel %vm17380_vm4, %v373_v47, %v375_v5  ;;  %724 = vmatprep.mubr.f32.mxu0 %v17354_v16  ;;  %v438_v13 = vld [vmem:[#allocation2 + $0x88] sm:$0xff] }
 0x116   :  { %356 = vst [vmem:[#allocation2 + $0xe8] sm:$0xf] %v334_v7  ;;  %413 = vst [vmem:[#allocation2 + $0xe0] sm:$0xf0] %v391_v8  ;;  %v8843_v20 = vpack.c.bf16 %v438_v13, %v427_v19 }
 0x118   :  { %v377_v10 = vpop.permute.xlu0 %376  ;;  %v146_v12 = vpop.permute.xlu1 %145  ;;  %7365 = vmatmul.mubr.msk.f32.gmra.mrb[10].mxu0 %vm472_vm5, %v11006_v11 }
 0x119   :  { %v392_v14 = vsel %vm17380_vm4, %v375_v5, %v377_v10  ;;  %v160_v15 = vsel %vm17389_vm1, %v144_v53, %v146_v12  ;;  %v439_v17 = vld [vmem:[#allocation2 + $0x90] sm:$0xff]  ;;  %878 = vmatprep.mubr.f32.mxu0 %v17354_v16 }
 0x11a   :  { %414 = vst [vmem:[#allocation2 + $0xe8] sm:$0xf0] %v392_v14  ;;  %182 = vst [vmem:[#allocation2 + $0x40] sm:$0xf0] %v160_v15  ;;  %v8841_v18 = vpack.c.bf16 %v439_v17, %v428_v9 }
 0x11c   :  { %v148_v21 = vpop.permute.xlu0 %147  ;;  %8842 = vmatprep.subr.bf16.mxu1 %v8841_v18  ;;  %v205_v22 = vpop.permute.xlu1 %204 }
 0x11d   :  { %v161_v23 = vsel %vm17389_vm1, %v146_v12, %v148_v21  ;;  %v219_v24 = vsel %vm17387_vm0, %v203_v57, %v205_v22  ;;  %8844 = vmatpush1.bf16.msra.mxu1 %v8843_v20  ;;  %v449_v27 = vld [vmem:[#allocation2 + $0xe0] sm:$0xff] }
 0x11e   :  { %183 = vst [vmem:[#allocation2 + $0x48] sm:$0xf0] %v161_v23  ;;  %241 = vst [vmem:[#allocation2 + $0x98] sm:$0xf] %v219_v24 }
 0x120   :  { %v207_v25 = vpop.permute.xlu0 %206  ;;  %v263_v26 = vpop.permute.xlu1 %262 }
 0x121   :  { %v220_v28 = vsel %vm17387_vm0, %v205_v22, %v207_v25  ;;  %v277_v29 = vsel %vm17386_vm2, %v261_v63, %v263_v26  ;;  %v450_v30 = vld [vmem:[#allocation2 + $0xe8] sm:$0xff]  ;;  %v429_v40 = vld [vmem:[#allocation2 + $0x40] sm:$0xff] }
 0x122   :  { %242 = vst [vmem:[#allocation2 + $0xa0] sm:$0xf] %v220_v28  ;;  %299 = vst [vmem:[#allocation2 + $0x98] sm:$0xf0] %v277_v29  ;;  %735 = vmatprep.subr.mxu1 %v450_v30 }
 0x123   :  { %736 = vmatpush1.msra.mxu1 %v449_v27 }
 0x124   :  { %v265_v31 = vpop.permute.xlu0 %264  ;;  %7366 = vmatmul.mubr.msk.f32.vlgmr.msra.gmra.mrb[6].mxu1 %vm472_vm5, %v10991_v0  ;;  %v321_v32 = vpop.permute.xlu1 %320  ;;  %8849 = vmatprep.subr.bf16.mxu1 %v17352_v33 }
 0x125   :  { %v278_v34 = vsel %vm17386_vm2, %v263_v26, %v265_v31  ;;  %v335_v35 = vsel %vm17379_vm3, %v319_v4, %v321_v32  ;;  %801 = vmatprep.mubr.f32.mxu1 %v17354_v16  ;;  %v430_v42 = vld [vmem:[#allocation2 + $0x48] sm:$0xff] }
 0x126   :  { %300 = vst [vmem:[#allocation2 + $0xa0] sm:$0xf0] %v278_v34  ;;  %357 = vst [vmem:[#allocation2 + $0xf0] sm:$0xf] %v335_v35 }
 0x128   :  { %v323_v36 = vpop.permute.xlu0 %322  ;;  %7367 = vmatmul.mubr.msk.f32.gmra.mrb[8].mxu1 %vm472_vm5, %v10999_v6  ;;  %v379_v37 = vpop.permute.xlu1 %378 }
 0x129   :  { %v336_v38 = vsel %vm17379_vm3, %v321_v32, %v323_v36  ;;  %v393_v39 = vsel %vm17380_vm4, %v377_v10, %v379_v37  ;;  %807 = vmatprep.mubr.f32.mxu1 %v17354_v16  ;;  %v440_v41 = vld [vmem:[#allocation2 + $0x98] sm:$0xff] }
 0x12a   :  { %358 = vst [vmem:[#allocation2 + $0xf8] sm:$0xf] %v336_v38  ;;  %415 = vst [vmem:[#allocation2 + $0xf0] sm:$0xf0] %v393_v39  ;;  %v8847_v48 = vpack.c.bf16 %v440_v41, %v429_v40 }
 0x12c   :  { %v381_v43 = vpop.permute.xlu0 %380  ;;  %v150_v44 = vpop.permute.xlu1 %149  ;;  %7368 = vmatmul.mubr.msk.f32.gmra.mrb[10].mxu1 %vm472_vm5, %v11006_v11 }
 0x12d   :  { %v394_v45 = vsel %vm17380_vm4, %v379_v37, %v381_v43  ;;  %v162_v46 = vsel %vm17389_vm1, %v148_v21, %v150_v44  ;;  %v441_v47 = vld [vmem:[#allocation2 + $0xa0] sm:$0xff]  ;;  %8085 = vmatprep.mubr.msk.f32.mxu1 %vm17361_vm6, %v17354_v16 }
 0x12e   :  { %416 = vst [vmem:[#allocation2 + $0xf8] sm:$0xf0] %v394_v45  ;;  %184 = vst [vmem:[#allocation2 + $0x50] sm:$0xf0] %v162_v46  ;;  %v8845_v49 = vpack.c.bf16 %v441_v47, %v430_v42 }
 0x130   :  { %v209_v50 = vpop.permute.xlu0 %208  ;;  %v267_v51 = vpop.permute.xlu1 %266  ;;  %8846 = vmatprep.subr.bf16.mxu0 %v8845_v49 }
 0x131   :  { %v221_v52 = vsel %vm17387_vm0, %v207_v25, %v209_v50  ;;  %v279_v53 = vsel %vm17386_vm2, %v265_v31, %v267_v51  ;;  %8848 = vmatpush1.bf16.msra.mxu0 %v8847_v48  ;;  %v451_v56 = vld [vmem:[#allocation2 + $0xf0] sm:$0xff] }
 0x132   :  { %243 = vst [vmem:[#allocation2 + $0xa8] sm:$0xf] %v221_v52  ;;  %301 = vst [vmem:[#allocation2 + $0xa8] sm:$0xf0] %v279_v53 }
 0x134   :  { %v325_v54 = vpop.permute.xlu0 %324  ;;  %v383_v55 = vpop.permute.xlu1 %382 }
 0x135   :  { %v337_v57 = vsel %vm17379_vm3, %v323_v36, %v325_v54  ;;  %v395_v58 = vsel %vm17380_vm4, %v381_v43, %v383_v55  ;;  %v452_v59 = vld [vmem:[#allocation2 + $0xf8] sm:$0xff]  ;;  %v431_v60 = vld [vmem:[#allocation2 + $0x50] sm:$0xff] }
 0x136   :  { %359 = vst [vmem:[#allocation2 + $0x100] sm:$0xf] %v337_v57  ;;  %417 = vst [vmem:[#allocation2 + $0x100] sm:$0xf0] %v395_v58  ;;  %818 = vmatprep.subr.mxu0 %v452_v59 }
 0x137   :  { %819 = vmatpush1.msra.mxu0 %v451_v56 }
 0x138   :  { %7369 = vmatmul.mubr.msk.f32.vlgmr.msra.gmra.mrb[12].mxu0 %vm472_vm5, %v10991_v0 }
 0x139   :  { %884 = vmatprep.mubr.f32.mxu0 %v17354_v16  ;;  %v442_v61 = vld [vmem:[#allocation2 + $0xa8] sm:$0xff] }
 0x13a   :  { %v8850_v62 = vpack.c.bf16 %v442_v61, %v431_v60 }
 0x13c   :  { %7370 = vmatmul.mubr.msk.f32.gmra.mrb[14].mxu0 %vm472_vm5, %v10999_v6  ;;  %8851 = vmatpush3.bf16.msra.mxu1 %v8850_v62 }
 0x13d   :  { %890 = vmatprep.mubr.f32.mxu0 %v17354_v16  ;;  %8083 = vmatprep.subr.mxu1 %v17354_v16  ;;  %v453_v63 = vld [vmem:[#allocation2 + $0x100] sm:$0xff] }
 0x140   :  { %7371 = vmatmul.mubr.msk.f32.gmra.mrb[16].mxu0 %vm472_vm5, %v11006_v11  ;;  %8084 = vmatpush3.msra.mxu1 %v453_v63 }
 0x141   :  { %8086 = vmatmul.mubr.msk.f32.vlgmr.msra.gmra.mrb[12].mxu1 %vm472_vm5, %v10991_v0  ;;  %2154 = vmatprep.mubr.f32.mxu0 %v17354_v16 }
 0x142   :  { %8088 = vmatprep.mubr.msk.f32.mxu1 %vm17361_vm6, %v17354_v16 }
 0x145   :  { %8089 = vmatmul.mubr.msk.f32.gmra.mrb[14].mxu1 %vm472_vm5, %v10999_v6  ;;  %v11101_v1 = vpop.permute.xlu0 %459  ;;  %v11104_v4 = vpop.permute.xlu1 %464 }
 0x146   :  { %8091 = vmatprep.mubr.msk.f32.mxu1 %vm17361_vm6, %v17354_v16 }
 0x149   :  { %8092 = vmatmul.mubr.msk.f32.gmra.mrb[16].mxu1 %vm472_vm5, %v11006_v11  ;;  %v11113_v12 = vpop.permute.xlu1 %469 }
 0x14a   :  { %2237 = vmatprep.mubr.f32.mxu1 %v17354_v16 }
 0x1ba   :  { %v548_v2 = vpop.f32.mrb[0].mxu0 }
 0x1bb   :  { %v550_v0 = vpop.f32.mrb[1].mxu0  ;;  %v549_v3 = vadd.f32 %v548_v2, %v11101_v1 }
 0x1bc   :  { %v551_v5 = vadd.f32 %v550_v0, %v11101_v1 }
 0x1bd   :  { %v11107_v7 = vmax.f32 %v549_v3, 0.0 }
 0x1be   :  { %v554_v6 = vpop.f32.mrb[2].mxu0  ;;  %v11109_v8 = vmax.f32 %v551_v5, 0.0 }
 0x1bf   :  { %v555_v9 = vadd.f32 %v554_v6, %v11104_v4  ;;  %v556_v11 = vpop.f32.mrb[3].mxu0  ;;  %v11195_v5 = vrot.slane %v11107_v7, 4 }
 0x1c0   :  { %v557_v10 = vadd.f32 %v556_v11, %v11104_v4 }
 0x1c1   :  { %v11115_v13 = vmax.f32 %v555_v9, 0.0 }
 0x1c2   :  { %v11117_v14 = vmax.f32 %v557_v10, 0.0  ;;  %v560_v15 = vpop.f32.mrb[4].mxu0 }
 0x1c3   :  { %v562_v17 = vpop.f32.mrb[5].mxu0  ;;  %v8854_v18 = vpack.c.bf16 %v11115_v13, %v11107_v7  ;;  %v561_v19 = vadd.f32 %v560_v15, %v11113_v12 }
 0x1c4   :  { %v8852_v20 = vpack.c.bf16 %v11117_v14, %v11109_v8  ;;  %v563_v21 = vadd.f32 %v562_v17, %v11113_v12 }
 0x1c5   :  { %v11125_v22 = vmax.f32 %v561_v19, 0.0 }
 0x1c6   :  { %8853 = vmatprep.subr.bf16.mxu0 %v8852_v20  ;;  %v11127_v23 = vmax.f32 %v563_v21, 0.0 }
 0x1c7   :  { %8855 = vmatpush1.bf16.msra.mxu0 %v8854_v18  ;;  %1030 = vst [vmem:[#allocation3 + $0xa0] sm:$0xf] %v11125_v22 }
 0x1c8   :  { %1031 = vst [vmem:[#allocation3 + $0xa8] sm:$0xf] %v11127_v23 }
 0x1db   :  { %v631_v24 = vpop.f32.mrb[0].mxu1 }
 0x1dc   :  { %v632_v25 = vadd.f32 %v631_v24, %v11101_v1  ;;  %v633_v26 = vpop.f32.mrb[1].mxu1 }
 0x1dd   :  { %v634_v27 = vadd.f32 %v633_v26, %v11101_v1  ;;  %v11229_v26 = vrot.slane %v11109_v8, 4 }
 0x1de   :  { %v979_v28 = vmax.f32 %v632_v25, 0.0 }
 0x1df   :  { %v980_v29 = vmax.f32 %v634_v27, 0.0  ;;  %v637_v30 = vpop.f32.mrb[2].mxu1 }
 0x1e0   :  { %v638_v31 = vadd.f32 %v637_v30, %v11104_v4  ;;  %v639_v32 = vpop.f32.mrb[3].mxu1  ;;  %1601 = vrot.lane.b32.xlu0 %v979_v28, %s10691_s0  ;;  %1289 = vrot.lane.b32.xlu1 %v979_v28, %s10688_s6  ;;  %v1076_v38 = vrot.slane %v979_v28, 4 }
 0x1e1   :  { %v640_v34 = vadd.f32 %v639_v32, %v11104_v4  ;;  %v11141_v40 = vrot.slane %v980_v29, 4 }
 0x1e2   :  { %v11137_v35 = vmax.f32 %v638_v31, 0.0 }
 0x1e3   :  { %v11139_v36 = vmax.f32 %v640_v34, 0.0  ;;  %v714_v37 = vpop.f32.mrb[6].mxu0  ;;  %v643_v39 = vpop.f32.mrb[4].mxu1 }
 0x1e4   :  { %v715_v41 = vadd.f32 %v714_v37, %v11101_v1  ;;  %v716_v42 = vpop.f32.mrb[7].mxu0  ;;  %1287 = vrot.lane.b32.xlu0 %v11109_v8, %s10688_s6  ;;  %1285 = vrot.lane.b32.xlu1 %v11107_v7, %s10688_s6  ;;  %v8882_v43 = vpack.c.bf16 %v11137_v35, %v979_v28  ;;  %v645_v44 = vpop.f32.mrb[5].mxu1  ;;  %v1089_v45 = vrot.slane %v11137_v35, 4  ;;  %v644_v46 = vadd.f32 %v643_v39, %v11113_v12 }
 0x1e5   :  { %v717_v47 = vadd.f32 %v716_v42, %v11101_v1  ;;  %v8880_v48 = vpack.c.bf16 %v11139_v36, %v980_v29  ;;  %v1091_v49 = vrot.slane %v11139_v36, 4  ;;  %v646_v50 = vadd.f32 %v645_v44, %v11113_v12 }
 0x1e6   :  { %v11155_v51 = vmax.f32 %v715_v41, 0.0  ;;  %v11160_v52 = vsel %vm17363_vm7, %v1076_v38, %v1089_v45  ;;  %v11162_v53 = vmax.f32 %v644_v46, 0.0 }
 0x1e7   :  { %v11164_v54 = vmax.f32 %v717_v47, 0.0  ;;  %v720_v55 = vpop.f32.mrb[8].mxu0  ;;  %8881 = vmatprep.subr.bf16.mxu1 %v8880_v48  ;;  %v11170_v56 = vsel %vm17363_vm7, %v11141_v40, %v1091_v49  ;;  %v11172_v57 = vmax.f32 %v646_v50, 0.0 }
 0x1e8   :  { %1014 = vst [vmem:[#allocation3 + $0x20] sm:$0xff] %v11155_v51  ;;  %v721_v58 = vadd.f32 %v720_v55, %v11104_v4  ;;  %v722_v59 = vpop.f32.mrb[9].mxu0  ;;  %1291 = vrot.lane.b32.xlu0 %v980_v29, %s10688_s6  ;;  %1597 = vrot.lane.b32.xlu1 %v11107_v7, %s10691_s0  ;;  %1032 = vst [vmem:[#allocation3 + $0xb0] sm:$0xf] %v11162_v53 }
 0x1e9   :  { %1015 = vst [vmem:[#allocation3 + $0x28] sm:$0xff] %v11164_v54  ;;  %v723_v60 = vadd.f32 %v722_v59, %v11104_v4  ;;  %8883 = vmatpush1.bf16.msra.mxu1 %v8882_v43  ;;  %1033 = vst [vmem:[#allocation3 + $0xb8] sm:$0xf] %v11172_v57 }
 0x1ea   :  { %v11183_v61 = vmax.f32 %v721_v58, 0.0 }
 0x1eb   :  { %v11185_v62 = vmax.f32 %v723_v60, 0.0  ;;  %v726_v63 = vpop.f32.mrb[10].mxu0 }
 0x1ec   :  { %1024 = vst [vmem:[#allocation3 + $0x70] sm:$0xff] %v11183_v61  ;;  %1603 = vrot.lane.b32.xlu0 %v980_v29, %s10691_s0  ;;  %1599 = vrot.lane.b32.xlu1 %v11109_v8, %s10691_s0  ;;  %v728_v2 = vpop.f32.mrb[11].mxu0  ;;  %v727_v0 = vadd.f32 %v726_v63, %v11113_v12 }
 0x1ed   :  { %1025 = vst [vmem:[#allocation3 + $0x78] sm:$0xff] %v11185_v62  ;;  %v729_v3 = vadd.f32 %v728_v2, %v11113_v12 }
 0x1ee   :  { %v11197_v6 = vmax.f32 %v727_v0, 0.0 }
 0x1ef   :  { %v11199_v9 = vmax.f32 %v729_v3, 0.0 }
 0x1f0   :  { %1133 = vrot.lane.b32.xlu1 %v1076_v38, %s10689_s18  ;;  %1129 = vrot.lane.b32.xlu0 %v11195_v5, %s10689_s18  ;;  %1034 = vst [vmem:[#allocation3 + $0xc0] sm:$0xf] %v11197_v6 }
 0x1f1   :  { %1035 = vst [vmem:[#allocation3 + $0xc8] sm:$0xf] %v11199_v9 }
 0x1f4   :  { %1445 = vrot.lane.b32.xlu1 %v1076_v38, %s10690_s27  ;;  %1441 = vrot.lane.b32.xlu0 %v11195_v5, %s10690_s27 }
 0x1f7   :  { %v797_v7 = vpop.f32.mrb[6].mxu1 }
 0x1f8   :  { %v798_v11 = vadd.f32 %v797_v7, %v11101_v1  ;;  %v799_v10 = vpop.f32.mrb[7].mxu1  ;;  %1135 = vrot.lane.b32.xlu1 %v11141_v40, %s10689_s18  ;;  %1757 = vrot.lane.b32.xlu0 %v1076_v38, %s10692_s28  ;;  %v1085_v7 = vrot.slane %v11115_v13, 4 }
 0x1f9   :  { %v800_v15 = vadd.f32 %v799_v10, %v11101_v1 }
 0x1fa   :  { %v11214_v17 = vmax.f32 %v798_v11, 0.0 }
 0x1fb   :  { %v11216_v18 = vmax.f32 %v800_v15, 0.0  ;;  %v803_v19 = vpop.f32.mrb[8].mxu1 }
 0x1fc   :  { %1016 = vst [vmem:[#allocation3 + $0x30] sm:$0xff] %v11214_v17  ;;  %v804_v20 = vadd.f32 %v803_v19, %v11104_v4  ;;  %v805_v21 = vpop.f32.mrb[9].mxu1  ;;  %1447 = vrot.lane.b32.xlu1 %v11141_v40, %s10690_s27  ;;  %1753 = vrot.lane.b32.xlu0 %v11195_v5, %s10692_s28 }
 0x1fd   :  { %1017 = vst [vmem:[#allocation3 + $0x38] sm:$0xff] %v11216_v18  ;;  %v806_v24 = vadd.f32 %v805_v21, %v11104_v4 }
 0x1fe   :  { %v11226_v25 = vmax.f32 %v804_v20, 0.0  ;;  %v1087_v20 = vrot.slane %v11117_v14, 4 }
 0x1ff   :  { %v11231_v27 = vmax.f32 %v806_v24, 0.0  ;;  %v809_v28 = vpop.f32.mrb[10].mxu1 }
 0x200   :  { %1026 = vst [vmem:[#allocation3 + $0x80] sm:$0xff] %v11226_v25  ;;  %1755 = vrot.lane.b32.xlu1 %v11229_v26, %s10692_s28  ;;  %1131 = vrot.lane.b32.xlu0 %v11229_v26, %s10689_s18  ;;  %v811_v29 = vpop.f32.mrb[11].mxu1  ;;  %v810_v30 = vadd.f32 %v809_v28, %v11113_v12 }
 0x201   :  { %1027 = vst [vmem:[#allocation3 + $0x88] sm:$0xff] %v11231_v27  ;;  %v812_v31 = vadd.f32 %v811_v29, %v11113_v12 }
 0x202   :  { %v11241_v8 = vmax.f32 %v810_v30, 0.0 }
 0x203   :  { %v11243_v32 = vmax.f32 %v812_v31, 0.0 }
 0x204   :  { %1759 = vrot.lane.b32.xlu1 %v11141_v40, %s10692_s28  ;;  %1443 = vrot.lane.b32.xlu0 %v11229_v26, %s10690_s27  ;;  %1036 = vst [vmem:[#allocation3 + $0xd0] sm:$0xf] %v11241_v8 }
 0x205   :  { %1037 = vst [vmem:[#allocation3 + $0xd8] sm:$0xf] %v11243_v32 }
 0x208   :  { %1311 = vrot.lane.b32.xlu1 %v11137_v35, %s10688_s6  ;;  %1307 = vrot.lane.b32.xlu0 %v11115_v13, %s10688_s6 }
 0x20b   :  { %v880_v34 = vpop.f32.mrb[12].mxu0 }
 0x20c   :  { %v881_v37 = vadd.f32 %v880_v34, %v11101_v1  ;;  %v882_v38 = vpop.f32.mrb[13].mxu0  ;;  %1313 = vrot.lane.b32.xlu1 %v11139_v36, %s10688_s6  ;;  %1623 = vrot.lane.b32.xlu0 %v11137_v35, %s10691_s0  ;;  %v1109_v35 = vrot.slane %v11127_v23, 4 }
 0x20d   :  { %v883_v39 = vadd.f32 %v882_v38, %v11101_v1 }
 0x20e   :  { %v11261_v40 = vmax.f32 %v881_v37, 0.0 }
 0x20f   :  { %v11263_v41 = vmax.f32 %v883_v39, 0.0  ;;  %v886_v42 = vpop.f32.mrb[14].mxu0 }
 0x210   :  { %1018 = vst [vmem:[#allocation3 + $0x40] sm:$0xff] %v11261_v40  ;;  %v887_v43 = vadd.f32 %v886_v42, %v11104_v4  ;;  %v888_v44 = vpop.f32.mrb[15].mxu0  ;;  %1621 = vrot.lane.b32.xlu1 %v11117_v14, %s10691_s0  ;;  %1619 = vrot.lane.b32.xlu0 %v11115_v13, %s10691_s0  ;;  %v1086_v13 = vsel %vm17363_vm7, %v11195_v5, %v1085_v7 }
 0x211   :  { %1019 = vst [vmem:[#allocation3 + $0x48] sm:$0xff] %v11263_v41  ;;  %v889_v46 = vadd.f32 %v888_v44, %v11104_v4  ;;  %v1088_v5 = vsel %vm17363_vm7, %v11229_v26, %v1087_v20  ;;  %v1111_v26 = vrot.slane %v11162_v53, 4 }
 0x212   :  { %v11273_v47 = vmax.f32 %v887_v43, 0.0 }
 0x213   :  { %v11275_v48 = vmax.f32 %v889_v46, 0.0  ;;  %v892_v50 = vpop.f32.mrb[16].mxu0  ;;  %v1112_v34 = vsel %vm17363_vm7, %v1089_v45, %v1111_v26  ;;  %v1110_v45 = vsel %vm17363_vm7, %v1087_v20, %v1109_v35 }
 0x214   :  { %1028 = vst [vmem:[#allocation3 + $0x90] sm:$0xff] %v11273_v47  ;;  %v893_v55 = vadd.f32 %v892_v50, %v11113_v12  ;;  %v894_v58 = vpop.f32.mrb[17].mxu0  ;;  %v963_v59 = vpop.f32.mrb[12].mxu1  ;;  %1625 = vrot.lane.b32.xlu1 %v11139_v36, %s10691_s0  ;;  %1309 = vrot.lane.b32.xlu0 %v11117_v14, %s10688_s6  ;;  %v11399_v50 = vrot.slane %v11155_v51, 4 }
 0x215   :  { %1029 = vst [vmem:[#allocation3 + $0x98] sm:$0xff] %v11275_v48  ;;  %v895_v60 = vadd.f32 %v894_v58, %v11113_v12  ;;  %v964_v63 = vadd.f32 %v963_v59, %v11101_v1  ;;  %v8087_v2 = vpop.f32.mrb[13].mxu1 }
 0x216   :  { %v11286_v0 = vmax.f32 %v893_v55, 0.0 }
 0x217   :  { %v11288_v3 = vmax.f32 %v895_v60, 0.0  ;;  %v11297_v10 = vmax.f32 %v964_v63, 0.0 }
 0x218   :  { %1038 = vst [vmem:[#allocation3 + $0xe0] sm:$0xf] %v11286_v0  ;;  %v968_v11 = vpop.f32.mrb[14].mxu1  ;;  %1155 = vrot.lane.b32.xlu1 %v11160_v52, %s10689_s18  ;;  %1467 = vrot.lane.b32.xlu0 %v11160_v52, %s10690_s27 }
 0x219   :  { %1039 = vst [vmem:[#allocation3 + $0xe8] sm:$0xf] %v11288_v3  ;;  %v969_v1 = vadd.f32 %v968_v11, %v11104_v4  ;;  %v8090_v15 = vpop.f32.mrb[15].mxu1  ;;  %v11309_v24 = vrot.slane %v11297_v10, 4 }
 0x21b   :  { %v11300_v19 = vmax.f32 %v969_v1, 0.0  ;;  %v1080_v1 = vrot.slane %v11214_v17, 4 }
 0x21c   :  { %v973_v21 = vpop.f32.mrb[16].mxu1  ;;  %1779 = vrot.lane.b32.xlu0 %v11160_v52, %s10692_s28  ;;  %1151 = vrot.lane.b32.xlu1 %v1086_v13, %s10689_s18 }
 0x21d   :  { %v1105_v28 = vrot.slane %v11300_v19, 4  ;;  %v974_v4 = vadd.f32 %v973_v21, %v11113_v12  ;;  %v8093_v29 = vpop.f32.mrb[17].mxu1  ;;  %v1107_v12 = vrot.slane %v11125_v22, 4  ;;  %v11432_v21 = vrot.slane %v11164_v54, 4 }
 0x21f   :  { %v11313_v30 = vmax.f32 %v974_v4, 0.0  ;;  %v11319_v14 = vsel %vm17363_vm7, %v11309_v24, %v1105_v28 }
 0x220   :  { %1153 = vrot.lane.b32.xlu0 %v1088_v5, %s10689_s18  ;;  %1463 = vrot.lane.b32.xlu1 %v1086_v13, %s10690_s27 }
 0x221   :  { %v1127_v52 = vrot.slane %v11313_v30, 4 }
 0x223   :  { %v11325_v31 = vsel %vm17363_vm7, %v1105_v28, %v1127_v52 }
 0x224   :  { %1157 = vrot.lane.b32.xlu0 %v11170_v56, %s10689_s18  ;;  %1775 = vrot.lane.b32.xlu1 %v1086_v13, %s10692_s28 }
 0x228   :  { %1469 = vrot.lane.b32.xlu0 %v11170_v56, %s10690_s27  ;;  %1333 = vrot.lane.b32.xlu1 %v11162_v53, %s10688_s6 }
 0x22c   :  { %1645 = vrot.lane.b32.xlu0 %v11162_v53, %s10691_s0  ;;  %1329 = vrot.lane.b32.xlu1 %v11125_v22, %s10688_s6 }
 0x230   :  { %1781 = vrot.lane.b32.xlu0 %v11170_v56, %s10692_s28  ;;  %1465 = vrot.lane.b32.xlu1 %v1088_v5, %s10690_s27  ;;  %v1108_v56 = vsel %vm17363_vm7, %v1085_v7, %v1107_v12 }
 0x234   :  { %1331 = vrot.lane.b32.xlu0 %v11127_v23, %s10688_s6  ;;  %1777 = vrot.lane.b32.xlu1 %v1088_v5, %s10692_s28 }
 0x238   :  { %1335 = vrot.lane.b32.xlu0 %v11172_v57, %s10688_s6  ;;  %1641 = vrot.lane.b32.xlu1 %v11125_v22, %s10691_s0  ;;  %v1113_v22 = vrot.slane %v11172_v57, 4 }
 0x23a   :  { %v1114_v53 = vsel %vm17363_vm7, %v1091_v49, %v1113_v22 }
 0x23c   :  { %1647 = vrot.lane.b32.xlu0 %v11172_v57, %s10691_s0  ;;  %1643 = vrot.lane.b32.xlu1 %v11127_v23, %s10691_s0 }
 0x240   :  { %1173 = vrot.lane.b32.xlu0 %v1108_v56, %s10689_s18  ;;  %1177 = vrot.lane.b32.xlu1 %v1112_v34, %s10689_s18 }
 0x244   :  { %1489 = vrot.lane.b32.xlu0 %v1112_v34, %s10690_s27  ;;  %1801 = vrot.lane.b32.xlu1 %v1112_v34, %s10692_s28 }
 0x248   :  { %1485 = vrot.lane.b32.xlu0 %v1108_v56, %s10690_s27  ;;  %1179 = vrot.lane.b32.xlu1 %v1114_v53, %s10689_s18 }
 0x24c   :  { %1797 = vrot.lane.b32.xlu0 %v1108_v56, %s10692_s28  ;;  %1293 = vrot.lane.b32.xlu1 %v11155_v51, %s10688_s6 }
 0x250   :  { %1175 = vrot.lane.b32.xlu0 %v1110_v45, %s10689_s18  ;;  %1487 = vrot.lane.b32.xlu1 %v1110_v45, %s10690_s27 }
 0x252   :  { %v1602_v36 = vpop.permute.xlu0 %1601  ;;  %v1290_v57 = vpop.permute.xlu1 %1289 }
 0x254   :  { %1799 = vrot.lane.b32.xlu0 %v1110_v45, %s10692_s28  ;;  %1491 = vrot.lane.b32.xlu1 %v1114_v53, %s10690_s27  ;;  %v11457_v45 = vrot.slane %v11216_v18, 4 }
 0x256   :  { %v1288_v49 = vpop.permute.xlu0 %1287  ;;  %v1286_v37 = vpop.permute.xlu1 %1285 }
 0x257   :  { %v11378_v23 = vsel %vm17387_vm0, %v1288_v49, %v1290_v57  ;;  %v11381_v38 = vsel %vm17387_vm0, %v1286_v37, %v1288_v49 }
 0x258   :  { %1297 = vrot.lane.b32.xlu0 %v11214_v17, %s10688_s6  ;;  %1605 = vrot.lane.b32.xlu1 %v11155_v51, %s10691_s0 }
 0x25a   :  { %v11387_v39 = vpop.permute.xlu0 %1291  ;;  %v1598_v42 = vpop.permute.xlu1 %1597 }
 0x25b   :  { %v11391_v43 = vsel %vm17387_vm0, %v1290_v57, %v11387_v39 }
 0x25c   :  { %1609 = vrot.lane.b32.xlu0 %v11214_v17, %s10691_s0  ;;  %1803 = vrot.lane.b32.xlu1 %v1114_v53, %s10692_s28 }
 0x25e   :  { %v11396_v44 = vpop.permute.xlu0 %1603  ;;  %v1600_v46 = vpop.permute.xlu1 %1599 }
 0x25f   :  { %v1665_v55 = vsel %vm17379_vm3, %v1602_v36, %v11396_v44  ;;  %v11404_v58 = vsel %vm17379_vm3, %v1598_v42, %v1600_v46  ;;  %v11407_v59 = vsel %vm17379_vm3, %v1600_v46, %v1602_v36 }
 0x260   :  { %1725 = vst [vmem:[#allocation3 + $0x330] sm:$0xff] %v1665_v55  ;;  %1137 = vrot.lane.b32.xlu0 %v11399_v50, %s10689_s18  ;;  %1295 = vrot.lane.b32.xlu1 %v11164_v54, %s10688_s6  ;;  %v1097_v55 = vrot.slane %v11226_v25, 4 }
 0x262   :  { %v1134_v60 = vpop.permute.xlu1 %1133  ;;  %v1130_v63 = vpop.permute.xlu0 %1129 }
 0x264   :  { %1449 = vrot.lane.b32.xlu0 %v11399_v50, %s10690_s27  ;;  %1607 = vrot.lane.b32.xlu1 %v11164_v54, %s10691_s0 }
 0x266   :  { %v1446_v51 = vpop.permute.xlu1 %1445  ;;  %v1442_v2 = vpop.permute.xlu0 %1441 }
 0x268   :  { %1761 = vrot.lane.b32.xlu0 %v11399_v50, %s10692_s28  ;;  %1299 = vrot.lane.b32.xlu1 %v11216_v18, %s10688_s6 }
 0x26a   :  { %v11421_v7 = vpop.permute.xlu1 %1135  ;;  %v1758_v11 = vpop.permute.xlu0 %1757 }
 0x26b   :  { %v1197_v15 = vsel %vm17389_vm1, %v1134_v60, %v11421_v7 }
 0x26c   :  { %1257 = vst [vmem:[#allocation3 + $0xb0] sm:$0xf0] %v1197_v15  ;;  %1141 = vrot.lane.b32.xlu0 %v1080_v1, %s10689_s18  ;;  %1611 = vrot.lane.b32.xlu1 %v11216_v18, %s10691_s0 }
 0x26e   :  { %v11429_v13 = vpop.permute.xlu1 %1447  ;;  %v1754_v20 = vpop.permute.xlu0 %1753 }
 0x26f   :  { %v1509_v28 = vsel %vm17386_vm2, %v1446_v51, %v11429_v13 }
 0x270   :  { %1569 = vst [vmem:[#allocation3 + $0x240] sm:$0xf0] %v1509_v28  ;;  %1453 = vrot.lane.b32.xlu0 %v1080_v1, %s10690_s27  ;;  %1139 = vrot.lane.b32.xlu1 %v11432_v21, %s10689_s18  ;;  %v1098_v28 = vsel %vm17363_vm7, %v1080_v1, %v1097_v55 }
 0x272   :  { %v1756_v17 = vpop.permute.xlu1 %1755  ;;  %v1132_v4 = vpop.permute.xlu0 %1131 }
 0x273   :  { %v1819_v29 = vsel %vm17380_vm4, %v1754_v20, %v1756_v17  ;;  %v1820_v5 = vsel %vm17380_vm4, %v1756_v17, %v1758_v11  ;;  %v1195_v52 = vsel %vm17389_vm1, %v1130_v63, %v1132_v4  ;;  %v1196_v54 = vsel %vm17389_vm1, %v1132_v4, %v1134_v60 }
 0x274   :  { %1879 = vst [vmem:[#allocation3 + $0x3c0] sm:$0xf0] %v1819_v29  ;;  %1880 = vst [vmem:[#allocation3 + $0x3c8] sm:$0xf0] %v1820_v5  ;;  %1765 = vrot.lane.b32.xlu0 %v1080_v1, %s10692_s28  ;;  %1451 = vrot.lane.b32.xlu1 %v11432_v21, %s10690_s27 }
 0x275   :  { %1255 = vst [vmem:[#allocation3 + $0xa0] sm:$0xf0] %v1195_v52  ;;  %1256 = vst [vmem:[#allocation3 + $0xa8] sm:$0xf0] %v1196_v54  ;;  %v1093_v52 = vrot.slane %v11183_v61, 4 }
 0x276   :  { %v11446_v12 = vpop.permute.xlu1 %1759  ;;  %v1444_v26 = vpop.permute.xlu0 %1443 }
 0x277   :  { %v1821_v56 = vsel %vm17380_vm4, %v1758_v11, %v11446_v12  ;;  %v1507_v34 = vsel %vm17386_vm2, %v1442_v2, %v1444_v26  ;;  %v1508_v22 = vsel %vm17386_vm2, %v1444_v26, %v1446_v51 }
 0x278   :  { %1881 = vst [vmem:[#allocation3 + $0x3d0] sm:$0xf0] %v1821_v56  ;;  %1567 = vst [vmem:[#allocation3 + $0x230] sm:$0xf0] %v1507_v34  ;;  %1315 = vrot.lane.b32.xlu0 %v11183_v61, %s10688_s6  ;;  %1763 = vrot.lane.b32.xlu1 %v11432_v21, %s10692_s28  ;;  %v1094_v34 = vsel %vm17363_vm7, %v11399_v50, %v1093_v52 }
 0x279   :  { %1568 = vst [vmem:[#allocation3 + $0x238] sm:$0xf0] %v1508_v22 }
 0x27a   :  { %v1312_v53 = vpop.permute.xlu1 %1311  ;;  %v1308_v35 = vpop.permute.xlu0 %1307 }
 0x27c   :  { %1627 = vrot.lane.b32.xlu0 %v11183_v61, %s10691_s0  ;;  %1143 = vrot.lane.b32.xlu1 %v11457_v45, %s10689_s18  ;;  %v1933_v22 = vld [vmem:[#allocation3 + $0xa8] sm:$0xff] }
 0x27e   :  { %v11463_v36 = vpop.permute.xlu1 %1313  ;;  %v1624_v57 = vpop.permute.xlu0 %1623 }
 0x27f   :  { %v11467_v49 = vsel %vm17387_vm0, %v1312_v53, %v11463_v36 }
 0x280   :  { %17613 = vst [vmem:[#allocation19_spill] sm:$0xff] %v11467_v49  ;;  %1319 = vrot.lane.b32.xlu0 %v11226_v25, %s10688_s6  ;;  %1455 = vrot.lane.b32.xlu1 %v11457_v45, %s10690_s27 }
 0x282   :  { %v1622_v18 = vpop.permute.xlu1 %1621  ;;  %v1620_v37 = vpop.permute.xlu0 %1619 }
 0x283   :  { %v11474_v42 = vsel %vm17379_vm3, %v1622_v18, %v1624_v57  ;;  %v11477_v46 = vsel %vm17379_vm3, %v1620_v37, %v1622_v18 }
 0x284   :  { %1631 = vrot.lane.b32.xlu0 %v11226_v25, %s10691_s0  ;;  %1317 = vrot.lane.b32.xlu1 %v11185_v62, %s10688_s6 }
 0x286   :  { %v11488_v51 = vpop.permute.xlu1 %1625  ;;  %v1310_v2 = vpop.permute.xlu0 %1309 }
 0x287   :  { %v11492_v11 = vsel %vm17379_vm3, %v1624_v57, %v11488_v51  ;;  %v11495_v15 = vsel %vm17387_vm0, %v1308_v35, %v1310_v2  ;;  %v11498_v20 = vsel %vm17387_vm0, %v1310_v2, %v1312_v53  ;;  %v1932_v53 = vld [vmem:[#allocation3 + $0xa0] sm:$0xff]  ;;  %v1115_v2 = vrot.slane %v11197_v6, 4 }
 0x288   :  { %17614 = vst [vmem:[#allocation20_spill] sm:$0xff] %v11492_v11  ;;  %1163 = vrot.lane.b32.xlu0 %v1098_v28, %s10689_s18  ;;  %1629 = vrot.lane.b32.xlu1 %v11185_v62, %s10691_s0 }
 0x28a   :  { %v1156_v17 = vpop.permute.xlu1 %1155  ;;  %v1468_v4 = vpop.permute.xlu0 %1467 }
 0x28c   :  { %1475 = vrot.lane.b32.xlu0 %v1098_v28, %s10690_s27  ;;  %1321 = vrot.lane.b32.xlu1 %v11231_v27, %s10688_s6 }
 0x28e   :  { %v1780_v29 = vpop.permute.xlu0 %1779  ;;  %v1152_v5 = vpop.permute.xlu1 %1151 }
 0x290   :  { %1787 = vrot.lane.b32.xlu0 %v1098_v28, %s10692_s28  ;;  %1633 = vrot.lane.b32.xlu1 %v11231_v27, %s10691_s0 }
 0x292   :  { %v1154_v1 = vpop.permute.xlu0 %1153  ;;  %v1464_v54 = vpop.permute.xlu1 %1463 }
 0x293   :  { %v1205_v26 = vsel %vm17389_vm1, %v1152_v5, %v1154_v1  ;;  %v1206_v56 = vsel %vm17389_vm1, %v1154_v1, %v1156_v17  ;;  %v1116_v1 = vsel %vm17363_vm7, %v1093_v52, %v1115_v2 }
 0x294   :  { %1341 = vrot.lane.b32.xlu0 %v11241_v8, %s10688_s6  ;;  %1159 = vrot.lane.b32.xlu1 %v1094_v34, %s10689_s18  ;;  %v8856_v61 = vpack.c.bf16 %v1206_v56, %v1933_v22  ;;  %v8858_v35 = vpack.c.bf16 %v1205_v26, %v1932_v53  ;;  %v1119_v53 = vrot.slane %v11241_v8, 4 }
 0x296   :  { %v11520_v57 = vpop.permute.xlu0 %1157  ;;  %v1776_v18 = vpop.permute.xlu1 %1775  ;;  %8857 = vmatprep.subr.bf16.mxu0 %v8856_v61  ;;  %v17357_v61 = vrot.slane %v11185_v62, 4 }
 0x297   :  { %v11524_v37 = vsel %vm17389_vm1, %v1156_v17, %v11520_v57  ;;  %8859 = vmatpush1.bf16.msra.mxu0 %v8858_v35 }
 0x298   :  { %1653 = vrot.lane.b32.xlu0 %v11241_v8, %s10691_s0  ;;  %1471 = vrot.lane.b32.xlu1 %v1094_v34, %s10690_s27  ;;  %v1120_v8 = vsel %vm17363_vm7, %v1097_v55, %v1119_v53 }
 0x29a   :  { %v11530_v50 = vpop.permute.xlu0 %1469  ;;  %v1334_v28 = vpop.permute.xlu1 %1333 }
 0x29b   :  { %v11534_v5 = vsel %vm17386_vm2, %v1468_v4, %v11530_v50 }
 0x29c   :  { %1181 = vrot.lane.b32.xlu0 %v1116_v1, %s10689_s18  ;;  %1783 = vrot.lane.b32.xlu1 %v1094_v34, %s10692_s28 }
 0x29e   :  { %v1646_v17 = vpop.permute.xlu0 %1645  ;;  %v1330_v26 = vpop.permute.xlu1 %1329 }
 0x2a0   :  { %1493 = vrot.lane.b32.xlu0 %v1116_v1, %s10690_s27  ;;  %1337 = vrot.lane.b32.xlu1 %v11197_v6, %s10688_s6 }
 0x2a2   :  { %v11542_v56 = vpop.permute.xlu0 %1781  ;;  %v1466_v22 = vpop.permute.xlu1 %1465 }
 0x2a3   :  { %v11548_v52 = vsel %vm17380_vm4, %v1780_v29, %v11542_v56  ;;  %v11551_v34 = vsel %vm17386_vm2, %v1464_v54, %v1466_v22  ;;  %v11554_v35 = vsel %vm17386_vm2, %v1466_v22, %v1468_v4  ;;  %v1096_v54 = vsel %vm17363_vm7, %v11432_v21, %v17357_v61 }
 0x2a4   :  { %17615 = vst [vmem:[#allocation21_spill] sm:$0xff] %v11548_v52  ;;  %1805 = vrot.lane.b32.xlu0 %v1116_v1, %s10692_s28  ;;  %1649 = vrot.lane.b32.xlu1 %v11197_v6, %s10691_s0  ;;  %v17356_v22 = vrot.slane %v11231_v27, 4 }
 0x2a6   :  { %v1332_v2 = vpop.permute.xlu0 %1331  ;;  %v1778_v33 = vpop.permute.xlu1 %1777 }
 0x2a7   :  { %v1371_v16 = vsel %vm17387_vm0, %v1330_v26, %v1332_v2  ;;  %v1372_v4 = vsel %vm17387_vm0, %v1332_v2, %v1334_v28  ;;  %v11569_v1 = vsel %vm17380_vm4, %v1776_v18, %v1778_v33  ;;  %v11572_v6 = vsel %vm17380_vm4, %v1778_v33, %v1780_v29 }
 0x2a8   :  { %1431 = vst [vmem:[#allocation3 + $0x230] sm:$0xf] %v1371_v16  ;;  %1432 = vst [vmem:[#allocation3 + $0x238] sm:$0xf] %v1372_v4  ;;  %1185 = vrot.lane.b32.xlu0 %v1120_v8, %s10689_s18  ;;  %1161 = vrot.lane.b32.xlu1 %v1096_v54, %s10689_s18  ;;  %v11595_v2 = vsel %vm17363_vm7, %v11457_v45, %v17356_v22 }
 0x2aa   :  { %v11576_v25 = vpop.permute.xlu0 %1335  ;;  %v1642_v55 = vpop.permute.xlu1 %1641 }
 0x2ab   :  { %v1373_v21 = vsel %vm17387_vm0, %v1334_v28, %v11576_v25 }
 0x2ac   :  { %1433 = vst [vmem:[#allocation3 + $0x240] sm:$0xf] %v1373_v21  ;;  %1497 = vrot.lane.b32.xlu0 %v1120_v8, %s10690_s27  ;;  %1473 = vrot.lane.b32.xlu1 %v1096_v54, %s10690_s27 }
 0x2ae   :  { %v11582_v18 = vpop.permute.xlu0 %1647  ;;  %v1644_v33 = vpop.permute.xlu1 %1643 }
 0x2af   :  { %17616 = vst [vmem:[#allocation22_spill] sm:$0xff] %v11582_v18  ;;  %v1685_v16 = vsel %vm17379_vm3, %v1646_v17, %v11582_v18  ;;  %v1683_v29 = vsel %vm17379_vm3, %v1642_v55, %v1644_v33  ;;  %v1684_v26 = vsel %vm17379_vm3, %v1644_v33, %v1646_v17  ;;  %v1082_v55 = vrot.slane %v11261_v40, 4  ;;  %v1983_v11 = vld [vmem:[#allocation3 + $0x238] sm:$0xff] }
 0x2b0   :  { %1745 = vst [vmem:[#allocation3 + $0x3d0] sm:$0xf] %v1685_v16  ;;  %1743 = vst [vmem:[#allocation3 + $0x3c0] sm:$0xf] %v1683_v29  ;;  %1809 = vrot.lane.b32.xlu0 %v1120_v8, %s10692_s28  ;;  %1785 = vrot.lane.b32.xlu1 %v1096_v54, %s10692_s28 }
 0x2b1   :  { %1744 = vst [vmem:[#allocation3 + $0x3c8] sm:$0xf] %v1684_v26 }
 0x2b2   :  { %v1174_v28 = vpop.permute.xlu0 %1173  ;;  %v1178_v53 = vpop.permute.xlu1 %1177 }
 0x2b4   :  { %1301 = vrot.lane.b32.xlu0 %v11261_v40, %s10688_s6  ;;  %1165 = vrot.lane.b32.xlu1 %v11595_v2, %s10689_s18 }
 0x2b6   :  { %v1490_v17 = vpop.permute.xlu0 %1489  ;;  %v1802_v4 = vpop.permute.xlu1 %1801 }
 0x2b8   :  { %1613 = vrot.lane.b32.xlu0 %v11261_v40, %s10691_s0  ;;  %1477 = vrot.lane.b32.xlu1 %v11595_v2, %s10690_s27 }
 0x2ba   :  { %v1486_v8 = vpop.permute.xlu0 %1485  ;;  %v11605_v54 = vpop.permute.xlu1 %1179 }
 0x2bb   :  { %v11610_v21 = vsel %vm17389_vm1, %v1178_v53, %v11605_v54 }
 0x2bc   :  { %1145 = vrot.lane.b32.xlu0 %v1082_v55, %s10689_s18  ;;  %1339 = vrot.lane.b32.xlu1 %v11199_v9, %s10688_s6 }
 0x2be   :  { %v1798_v33 = vpop.permute.xlu0 %1797  ;;  %v1294_v16 = vpop.permute.xlu1 %1293 }
 0x2bf   :  { %v11617_v29 = vsel %vm17387_vm0, %v11387_v39, %v1294_v16 }
 0x2c0   :  { %1457 = vrot.lane.b32.xlu0 %v1082_v55, %s10690_s27  ;;  %1651 = vrot.lane.b32.xlu1 %v11199_v9, %s10691_s0 }
 0x2c2   :  { %v1176_v40 = vpop.permute.xlu0 %1175  ;;  %v1488_v26 = vpop.permute.xlu1 %1487 }
 0x2c3   :  { %v1215_v22 = vsel %vm17389_vm1, %v1174_v28, %v1176_v40  ;;  %v1216_v63 = vsel %vm17389_vm1, %v1176_v40, %v1178_v53  ;;  %v1527_v60 = vsel %vm17386_vm2, %v1486_v8, %v1488_v26  ;;  %v1528_v61 = vsel %vm17386_vm2, %v1488_v26, %v1490_v17  ;;  %v1982_v53 = vld [vmem:[#allocation3 + $0x230] sm:$0xff] }
 0x2c4   :  { %1769 = vrot.lane.b32.xlu0 %v1082_v55, %s10692_s28  ;;  %1343 = vrot.lane.b32.xlu1 %v11243_v32, %s10688_s6  ;;  %v8860_v39 = vpack.c.bf16 %v11378_v23, %v1216_v63  ;;  %v8862_v52 = vpack.c.bf16 %v11381_v38, %v1215_v22  ;;  %v1117_v28 = vrot.slane %v11199_v9, 4  ;;  %v8864_v23 = vpack.c.bf16 %v1983_v11, %v11498_v20 }
 0x2c5   :  { %v8866_v38 = vpack.c.bf16 %v1982_v53, %v11495_v15  ;;  %v17617_v11 = vrot.slane %v11185_v62, 4  ;;  %v8870_v15 = vpack.c.bf16 %v1527_v60, %v11551_v34  ;;  %v17618_v60 = vpack.c.bf16 %v11474_v42, %v11407_v59 }
 0x2c6   :  { %v1800_v49 = vpop.permute.xlu0 %1799  ;;  %v11631_v18 = vpop.permute.xlu1 %1491  ;;  %8861 = vmatprep.subr.bf16.mxu0 %v8860_v39 }
 0x2c7   :  { %v11635_v8 = vsel %vm17380_vm4, %v1798_v33, %v1800_v49  ;;  %v1840_v40 = vsel %vm17380_vm4, %v1800_v49, %v1802_v4  ;;  %v11640_v26 = vsel %vm17386_vm2, %v1490_v17, %v11631_v18  ;;  %8863 = vmatpush1.bf16.msra.mxu0 %v8862_v52  ;;  %v1118_v20 = vsel %vm17363_vm7, %v17617_v11, %v1117_v28 }
 0x2c8   :  { %1323 = vrot.lane.b32.xlu0 %v11273_v47, %s10688_s6  ;;  %1655 = vrot.lane.b32.xlu1 %v11243_v32, %s10691_s0  ;;  %v1101_v52 = vrot.slane %v11273_v47, 4  ;;  %v8868_v17 = vpack.c.bf16 %v1528_v61, %v11554_v35  ;;  %v2033_v61 = vld [vmem:[#allocation3 + $0x3c8] sm:$0xff]  ;;  %v1121_v28 = vrot.slane %v11243_v32, 4 }
 0x2c9   :  { %8865 = vmatprep.subr.bf16.mxu0 %v8864_v23  ;;  %v8876_v59 = vpack.c.bf16 %v11572_v6, %v2033_v61 }
 0x2ca   :  { %v1298_v49 = vpop.permute.xlu0 %1297  ;;  %v1606_v63 = vpop.permute.xlu1 %1605  ;;  %v1102_v39 = vsel %vm17363_vm7, %v1082_v55, %v1101_v52 }
 0x2cb   :  { %v11652_v22 = vsel %vm17379_vm3, %v11396_v44, %v1606_v63  ;;  %8867 = vmatpush1.bf16.msra.mxu0 %v8866_v38  ;;  %v17619_v38 = vpack.c.bf16 %v11477_v46, %v11404_v58  ;;  %v17620_v46 = vrot.slane %v11231_v27, 4 }
 0x2cc   :  { %1635 = vrot.lane.b32.xlu0 %v11273_v47, %s10691_s0  ;;  %1183 = vrot.lane.b32.xlu1 %v1118_v20, %s10689_s18 }
 0x2cd   :  { %8869 = vmatprep.subr.bf16.mxu0 %v8868_v17  ;;  %v1122_v6 = vsel %vm17363_vm7, %v17620_v46, %v1121_v28 }
 0x2ce   :  { %v1610_v33 = vpop.permute.xlu0 %1609  ;;  %v11663_v44 = vpop.permute.xlu1 %1803 }
 0x2cf   :  { %v11667_v62 = vsel %vm17380_vm4, %v1802_v4, %v11663_v44  ;;  %8871 = vmatpush1.bf16.msra.mxu0 %v8870_v15  ;;  %v2032_v4 = vld [vmem:[#allocation3 + $0x3c0] sm:$0xff]  ;;  %v1917_v15 = vld [vmem:[#allocation3 + $0x28] sm:$0xff] }
 0x2d0   :  { %1167 = vrot.lane.b32.xlu0 %v1102_v39, %s10689_s18  ;;  %1495 = vrot.lane.b32.xlu1 %v1118_v20, %s10690_s27  ;;  %v8878_v32 = vpack.c.bf16 %v11569_v1, %v2032_v4  ;;  %v1927_v1 = vld [vmem:[#allocation3 + $0x78] sm:$0xff]  ;;  %v1123_v4 = vrot.slane %v11286_v0, 4 }
 0x2d1   :  { %8873 = vmatprep.subr.bf16.mxu0 %v17618_v60  ;;  %v1916_v60 = vld [vmem:[#allocation3 + $0x20] sm:$0xff] }
 0x2d2   :  { %v1138_v34 = vpop.permute.xlu0 %1137  ;;  %v1296_v35 = vpop.permute.xlu1 %1295 }
 0x2d3   :  { %v1198_v53 = vsel %vm17389_vm1, %v11421_v7, %v1138_v34  ;;  %v11681_v55 = vsel %vm17387_vm0, %v1294_v16, %v1296_v35  ;;  %v11684_v23 = vsel %vm17387_vm0, %v1296_v35, %v1298_v49  ;;  %8875 = vmatpush1.bf16.msra.mxu0 %v17619_v38 }
 0x2d4   :  { %1258 = vst [vmem:[#allocation3 + $0xb8] sm:$0xf0] %v1198_v53  ;;  %1479 = vrot.lane.b32.xlu0 %v1102_v39, %s10690_s27  ;;  %1807 = vrot.lane.b32.xlu1 %v1118_v20, %s10692_s28  ;;  %v1926_v20 = vld [vmem:[#allocation3 + $0x70] sm:$0xff] }
 0x2d5   :  { %8877 = vmatprep.subr.bf16.mxu0 %v8876_v59  ;;  %v11739_v59 = vld [vmem:[#allocation9 + $0x10] sm:$0xf] }
 0x2d6   :  { %v1450_v7 = vpop.permute.xlu0 %1449  ;;  %v1608_v42 = vpop.permute.xlu1 %1607 }
 0x2d7   :  { %v1510_v16 = vsel %vm17386_vm2, %v11429_v13, %v1450_v7  ;;  %v11696_v11 = vsel %vm17379_vm3, %v1606_v63, %v1608_v42  ;;  %v11699_v58 = vsel %vm17379_vm3, %v1608_v42, %v1610_v33  ;;  %8879 = vmatpush1.bf16.msra.mxu0 %v8878_v32  ;;  %v11708_v63 = vld [vmem:[#allocation9] sm:$0xff] }
 0x2d8   :  { %1570 = vst [vmem:[#allocation3 + $0x248] sm:$0xf0] %v1510_v16  ;;  %1791 = vrot.lane.b32.xlu0 %v1102_v39, %s10692_s28  ;;  %1187 = vrot.lane.b32.xlu1 %v1122_v6, %s10689_s18  ;;  %v8908_v39 = vpack.c.bf16 %v1927_v1, %v1917_v15  ;;  %v11759_v16 = vrot.slane %v11263_v41, 4 }
 0x2d9   :  { %2118 = vmatprep.subr.mxu0 %v1840_v40  ;;  %v8910_v40 = vpack.c.bf16 %v1926_v20, %v1916_v60  ;;  %v1103_v20 = vrot.slane %v11275_v48, 4 }
 0x2da   :  { %v1762_v13 = vpop.permute.xlu0 %1761  ;;  %v11706_v17 = vpop.permute.xlu1 %1299 }
 0x2db   :  { %v1822_v27 = vsel %vm17380_vm4, %v11446_v12, %v1762_v13  ;;  %v11714_v61 = vsel %vm17387_vm0, %v1298_v49, %v11706_v17  ;;  %2119 = vmatpush1.msra.mxu0 %v11635_v8  ;;  %v17621_v49 = vmov 0.0   ;;  %v11725_v8 = vld [vmem:[#allocation9 + $0x8] sm:$0xff] }
 0x2dc   :  { %1882 = vst [vmem:[#allocation3 + $0x3d8] sm:$0xf0] %v1822_v27  ;;  %1345 = vrot.lane.b32.xlu0 %v11286_v0, %s10688_s6  ;;  %1499 = vrot.lane.b32.xlu1 %v1122_v6, %s10690_s27  ;;  %v11782_v27 = vsel %vm17363_vm7, %v11759_v16, %v1103_v20 }
 0x2dd   :  { %7375 = vmatmul.mubr.msk.f32.vlgmr.msra.gmra.mrb[18].mxu0 %vm17364_vm8, %v11708_v63  ;;  %8909 = vmatprep.subr.bf16.mxu0 %v8908_v39  ;;  %v1125_v39 = vrot.slane %v11288_v3, 4 }
 0x2de   :  { %v1142_v12 = vpop.permute.xlu0 %1141  ;;  %v11722_v35 = vpop.permute.xlu1 %1611  ;;  %8911 = vmatpush1.bf16.msra.mxu0 %v8910_v40  ;;  %2160 = vmatprep.mubr.f32.mxu0 %v17621_v49 }
 0x2df   :  { %v11729_v28 = vsel %vm17379_vm3, %v1610_v33, %v11722_v35 }
 0x2e0   :  { %17622 = vst [vmem:[#allocation23_spill] sm:$0xff] %v11729_v28  ;;  %1657 = vrot.lane.b32.xlu0 %v11286_v0, %s10691_s0  ;;  %1767 = vrot.lane.b32.xlu1 %v11457_v45, %s10692_s28  ;;  %v1124_v0 = vsel %vm17363_vm7, %v1101_v52, %v1123_v4 }
 0x2e1   :  { %7376 = vmatmul.mubr.msk.f32.gmra.mrb[20].mxu0 %vm17364_vm8, %v11725_v8 }
 0x2e2   :  { %v1454_v53 = vpop.permute.xlu0 %1453  ;;  %v1140_v38 = vpop.permute.xlu1 %1139  ;;  %2166 = vmatprep.mubr.f32.mxu0 %v17621_v49 }
 0x2e3   :  { %v1199_v33 = vsel %vm17389_vm1, %v1138_v34, %v1140_v38  ;;  %v1200_v32 = vsel %vm17389_vm1, %v1140_v38, %v1142_v12 }
 0x2e4   :  { %1259 = vst [vmem:[#allocation3 + $0xc0] sm:$0xf0] %v1199_v33  ;;  %1260 = vst [vmem:[#allocation3 + $0xc8] sm:$0xf0] %v1200_v32  ;;  %1189 = vrot.lane.b32.xlu0 %v1124_v0, %s10689_s18  ;;  %1789 = vrot.lane.b32.xlu1 %v11595_v2, %s10692_s28 }
 0x2e5   :  { %7377 = vmatmul.mubr.msk.f32.gmra.mrb[22].mxu0 %vm17364_vm8, %v11739_v59 }
 0x2e6   :  { %v11751_v45 = vpop.permute.xlu0 %1765  ;;  %v1452_v42 = vpop.permute.xlu1 %1451  ;;  %2320 = vmatprep.mubr.f32.mxu0 %v17621_v49 }
 0x2e7   :  { %v1511_v34 = vsel %vm17386_vm2, %v1450_v7, %v1452_v42  ;;  %v1512_v47 = vsel %vm17386_vm2, %v1452_v42, %v1454_v53 }
 0x2e8   :  { %1571 = vst [vmem:[#allocation3 + $0x250] sm:$0xf0] %v1511_v34  ;;  %1572 = vst [vmem:[#allocation3 + $0x258] sm:$0xf0] %v1512_v47  ;;  %1501 = vrot.lane.b32.xlu0 %v1124_v0, %s10690_s27  ;;  %1811 = vrot.lane.b32.xlu1 %v1122_v6, %s10692_s28 }
 0x2ea   :  { %v1316_v52 = vpop.permute.xlu0 %1315  ;;  %v1764_v2 = vpop.permute.xlu1 %1763 }
 0x2eb   :  { %v11763_v46 = vsel %vm17387_vm0, %v11463_v36, %v1316_v52  ;;  %v1823_v1 = vsel %vm17380_vm4, %v1762_v13, %v1764_v2  ;;  %v1824_v7 = vsel %vm17380_vm4, %v1764_v2, %v11751_v45 }
 0x2ec   :  { %1883 = vst [vmem:[#allocation3 + $0x3e0] sm:$0xf0] %v1823_v1  ;;  %1884 = vst [vmem:[#allocation3 + $0x3e8] sm:$0xf0] %v1824_v7  ;;  %1813 = vrot.lane.b32.xlu0 %v1124_v0, %s10692_s28  ;;  %1147 = vrot.lane.b32.xlu1 %v11759_v16, %s10689_s18 }
 0x2ee   :  { %v1628_v6 = vpop.permute.xlu0 %1627  ;;  %v11772_v15 = vpop.permute.xlu1 %1143 }
 0x2ef   :  { %v11776_v36 = vsel %vm17379_vm3, %v11488_v51, %v1628_v6  ;;  %v1201_v13 = vsel %vm17389_vm1, %v1142_v12, %v11772_v15  ;;  %v11794_v12 = vsel %vm17363_vm7, %v1103_v20, %v1125_v39 }
 0x2f0   :  { %1261 = vst [vmem:[#allocation3 + $0xd0] sm:$0xf0] %v1201_v13  ;;  %1149 = vrot.lane.b32.xlu0 %v11309_v24, %s10689_s18  ;;  %1169 = vrot.lane.b32.xlu1 %v11782_v27, %s10689_s18 }
 0x2f2   :  { %v1320_v60 = vpop.permute.xlu0 %1319  ;;  %v11789_v40 = vpop.permute.xlu1 %1455 }
 0x2f3   :  { %v1513_v51 = vsel %vm17386_vm2, %v1454_v53, %v11789_v40 }
 0x2f4   :  { %1573 = vst [vmem:[#allocation3 + $0x260] sm:$0xf0] %v1513_v51  ;;  %1171 = vrot.lane.b32.xlu0 %v11319_v14, %s10689_s18  ;;  %1191 = vrot.lane.b32.xlu1 %v11794_v12, %s10689_s18 }
 0x2f6   :  { %v1632_v4 = vpop.permute.xlu0 %1631  ;;  %v1318_v38 = vpop.permute.xlu1 %1317 }
 0x2f7   :  { %v11801_v33 = vsel %vm17387_vm0, %v1316_v52, %v1318_v38  ;;  %v11804_v32 = vsel %vm17387_vm0, %v1318_v38, %v1320_v60  ;;  %v1934_v52 = vld [vmem:[#allocation3 + $0xb0] sm:$0xff] }
 0x2f8   :  { %1193 = vrot.lane.b32.xlu0 %v11325_v31, %s10689_s18  ;;  %1303 = vrot.lane.b32.xlu1 %v11263_v41, %s10688_s6  ;;  %v8886_v47 = vpack.c.bf16 %v11524_v37, %v1934_v52 }
 0x2fa   :  { %v11810_v53 = vpop.permute.xlu0 %1163  ;;  %v1630_v0 = vpop.permute.xlu1 %1629 }
 0x2fb   :  { %v11813_v42 = vsel %vm17379_vm3, %v1628_v6, %v1630_v0  ;;  %v11816_v34 = vsel %vm17379_vm3, %v1630_v0, %v1632_v4  ;;  %v1935_v0 = vld [vmem:[#allocation3 + $0xb8] sm:$0xff] }
 0x2fc   :  { %1305 = vrot.lane.b32.xlu0 %v11297_v10, %s10688_s6  ;;  %1325 = vrot.lane.b32.xlu1 %v11275_v48, %s10688_s6 }
 0x2fe   :  { %v11826_v2 = vpop.permute.xlu0 %1475  ;;  %v11828_v1 = vpop.permute.xlu1 %1321 }
 0x2ff   :  { %v11832_v7 = vsel %vm17387_vm0, %v1320_v60, %v11828_v1 }
 0x300   :  { %17623 = vst [vmem:[#allocation24_spill] sm:$0xff] %v11832_v7  ;;  %1327 = vrot.lane.b32.xlu0 %v11300_v19, %s10688_s6  ;;  %1347 = vrot.lane.b32.xlu1 %v11288_v3, %s10688_s6 }
 0x302   :  { %v11838_v20 = vpop.permute.xlu0 %1787  ;;  %v11840_v6 = vpop.permute.xlu1 %1633 }
 0x303   :  { %v11844_v13 = vsel %vm17379_vm3, %v1632_v4, %v11840_v6 }
 0x304   :  { %17624 = vst [vmem:[#allocation25_spill] sm:$0xff] %v11844_v13  ;;  %1349 = vrot.lane.b32.xlu0 %v11313_v30, %s10688_s6  ;;  %1459 = vrot.lane.b32.xlu1 %v11759_v16, %s10690_s27 }
 0x306   :  { %v11852_v60 = vpop.permute.xlu0 %1341  ;;  %v1160_v51 = vpop.permute.xlu1 %1159 }
 0x307   :  { %v1208_v38 = vsel %vm17389_vm1, %v11520_v57, %v1160_v51 }
 0x308   :  { %1461 = vrot.lane.b32.xlu0 %v11309_v24, %s10690_s27  ;;  %1481 = vrot.lane.b32.xlu1 %v11782_v27, %s10690_s27  ;;  %v8884_v4 = vpack.c.bf16 %v1208_v38, %v1935_v0 }
 0x30a   :  { %v11861_v9 = vpop.permute.xlu0 %1653  ;;  %v1472_v39 = vpop.permute.xlu1 %1471  ;;  %8885 = vmatprep.subr.bf16.mxu1 %v8884_v4 }
 0x30b   :  { %v1520_v28 = vsel %vm17386_vm2, %v11530_v50, %v1472_v39  ;;  %8887 = vmatpush1.bf16.msra.mxu1 %v8886_v47  ;;  %v8890_v47 = vpack.c.bf16 %v11391_v43, %v11610_v21  ;;  %v17625_v21 = vld [vmem:[#allocation22_spill] sm:$0xff] }
 0x30c   :  { %1483 = vrot.lane.b32.xlu0 %v11319_v14, %s10690_s27  ;;  %1503 = vrot.lane.b32.xlu1 %v11794_v12, %s10690_s27 }
 0x30e   :  { %v11869_v57 = vpop.permute.xlu0 %1181  ;;  %v1784_v38 = vpop.permute.xlu1 %1783 }
 0x30f   :  { %v1218_v37 = vsel %vm17389_vm1, %v11605_v54, %v11869_v57  ;;  %v11876_v52 = vsel %vm17380_vm4, %v11542_v56, %v1784_v38 }
 0x310   :  { %1505 = vrot.lane.b32.xlu0 %v11325_v31, %s10690_s27  ;;  %1615 = vrot.lane.b32.xlu1 %v11263_v41, %s10691_s0  ;;  %v8888_v50 = vpack.c.bf16 %v11617_v29, %v1218_v37  ;;  %v1984_v29 = vld [vmem:[#allocation3 + $0x240] sm:$0xff] }
 0x312   :  { %v11885_v0 = vpop.permute.xlu0 %1493  ;;  %v11887_v4 = vpop.permute.xlu1 %1337  ;;  %8889 = vmatprep.subr.bf16.mxu1 %v8888_v50 }
 0x313   :  { %v1530_v56 = vsel %vm17386_vm2, %v11631_v18, %v11885_v0  ;;  %v1374_v54 = vsel %vm17387_vm0, %v11576_v25, %v11887_v4  ;;  %8891 = vmatpush1.bf16.msra.mxu1 %v8890_v47  ;;  %v1937_v47 = vld [vmem:[#allocation3 + $0xc8] sm:$0xff] }
 0x314   :  { %1434 = vst [vmem:[#allocation3 + $0x248] sm:$0xf] %v1374_v54  ;;  %1617 = vrot.lane.b32.xlu0 %v11297_v10, %s10691_s0  ;;  %1637 = vrot.lane.b32.xlu1 %v11275_v48, %s10691_s0  ;;  %v1936_v54 = vld [vmem:[#allocation3 + $0xc0] sm:$0xff] }
 0x316   :  { %v11899_v41 = vpop.permute.xlu0 %1805  ;;  %v11901_v43 = vpop.permute.xlu1 %1649 }
 0x317   :  { %v11906_v18 = vsel %vm17380_vm4, %v11663_v44, %v11899_v41  ;;  %v1686_v25 = vsel %vm17379_vm3, %v17625_v21, %v11901_v43 }
 0x318   :  { %1746 = vst [vmem:[#allocation3 + $0x3d8] sm:$0xf] %v1686_v25  ;;  %1639 = vrot.lane.b32.xlu0 %v11300_v19, %s10691_s0  ;;  %1659 = vrot.lane.b32.xlu1 %v11288_v3, %s10691_s0  ;;  %v17626_v25 = vld [vmem:[#allocation19_spill] sm:$0xff] }
 0x319   :  { %v8894_v13 = vpack.c.bf16 %v1984_v29, %v17626_v25  ;;  %v1919_v25 = vld [vmem:[#allocation3 + $0x38] sm:$0xff] }
 0x31a   :  { %v11915_v48 = vpop.permute.xlu0 %1185  ;;  %v1162_v10 = vpop.permute.xlu1 %1161 }
 0x31b   :  { %v1209_v37 = vsel %vm17389_vm1, %v1160_v51, %v1162_v10  ;;  %v1210_v44 = vsel %vm17389_vm1, %v1162_v10, %v11810_v53  ;;  %v1985_v50 = vld [vmem:[#allocation3 + $0x248] sm:$0xff] }
 0x31c   :  { %1661 = vrot.lane.b32.xlu0 %v11313_v30, %s10691_s0  ;;  %1771 = vrot.lane.b32.xlu1 %v11759_v16, %s10692_s28  ;;  %v8892_v3 = vpack.c.bf16 %v1985_v50, %v11763_v46  ;;  %v8912_v19 = vpack.c.bf16 %v1210_v44, %v1937_v47  ;;  %v8914_v21 = vpack.c.bf16 %v1209_v37, %v1936_v54  ;;  %v2062_v44 = vld [vmem:[%s17346_s4] sm:$0xff]  ;;  %v17629_v50 = vld [vmem:[#allocation21_spill] sm:$0xff] }
 0x31d   :  { %v8896_v16 = vpack.c.bf16 %v1530_v56, %v1520_v28  ;;  %v17627_v28 = vpack.c.bf16 %v11640_v26, %v11534_v5  ;;  %v2064_v54 = vld [vmem:[%s17346_s4 + $0x10] sm:$0xf] }
 0x31e   :  { %v11926_v7 = vpop.permute.xlu0 %1497  ;;  %8893 = vmatprep.subr.bf16.mxu1 %v8892_v3  ;;  %v1474_v51 = vpop.permute.xlu1 %1473  ;;  %8913 = vmatprep.subr.bf16.mxu0 %v8912_v19  ;;  %v1929_v19 = vld [vmem:[#allocation3 + $0x88] sm:$0xff] }
 0x31f   :  { %v11929_v10 = vsel %vm17386_vm2, %v1472_v39, %v1474_v51  ;;  %v11933_v30 = vsel %vm17386_vm2, %v1474_v51, %v11826_v2  ;;  %8895 = vmatpush1.bf16.msra.mxu1 %v8894_v13  ;;  %8915 = vmatpush1.bf16.msra.mxu0 %v8914_v21  ;;  %v2035_v13 = vld [vmem:[#allocation3 + $0x3d8] sm:$0xff]  ;;  %v1928_v21 = vld [vmem:[#allocation3 + $0x80] sm:$0xff] }
 0x320   :  { %1773 = vrot.lane.b32.xlu0 %v11309_v24, %s10692_s28  ;;  %1793 = vrot.lane.b32.xlu1 %v11782_v27, %s10692_s28  ;;  %v8900_v24 = vpack.c.bf16 %v11776_v36, %v11652_v22  ;;  %v2014_v27 = vld [vmem:[#allocation3 + $0x330] sm:$0xff] }
 0x321   :  { %8897 = vmatprep.subr.bf16.mxu1 %v8896_v16  ;;  %v2034_v22 = vld [vmem:[#allocation3 + $0x3d0] sm:$0xff] }
 0x322   :  { %v11939_v46 = vpop.permute.xlu0 %1809  ;;  %v1786_v29 = vpop.permute.xlu1 %1785  ;;  %v8906_v47 = vpack.c.bf16 %v17629_v50, %v2034_v22 }
 0x323   :  { %v11942_v39 = vsel %vm17380_vm4, %v1784_v38, %v1786_v29  ;;  %v11946_v37 = vsel %vm17380_vm4, %v1786_v29, %v11838_v20  ;;  %8899 = vmatpush1.bf16.msra.mxu1 %v17627_v28  ;;  %v17628_v38 = vld [vmem:[#allocation20_spill] sm:$0xff]  ;;  %v8936_v29 = vpack.c.bf16 %v1929_v19, %v1919_v25  ;;  %v1918_v28 = vld [vmem:[#allocation3 + $0x30] sm:$0xff] }
 0x324   :  { %1795 = vrot.lane.b32.xlu0 %v11319_v14, %s10692_s28  ;;  %1815 = vrot.lane.b32.xlu1 %v11794_v12, %s10692_s28  ;;  %v8902_v56 = vpack.c.bf16 %v17628_v38, %v2014_v27  ;;  %v8904_v12 = vpack.c.bf16 %v11876_v52, %v2035_v13  ;;  %v8938_v27 = vpack.c.bf16 %v1928_v21, %v1918_v28 }
 0x325   :  { %8901 = vmatprep.subr.bf16.mxu1 %v8900_v24 }
 0x326   :  { %v11961_v5 = vpop.permute.xlu0 %1301  ;;  %v11963_v26 = vpop.permute.xlu1 %1165 }
 0x327   :  { %v11968_v14 = vsel %vm17387_vm0, %v11706_v17, %v11961_v5  ;;  %v11973_v36 = vsel %vm17389_vm1, %v11810_v53, %v11963_v26  ;;  %8903 = vmatpush1.bf16.msra.mxu1 %v8902_v56  ;;  %v2063_v17 = vld [vmem:[%s17346_s4 + $0x8] sm:$0xff]  ;;  %s10697_s4 = smov 122  }
 0x328   :  { %1817 = vrot.lane.b32.xlu0 %v11325_v31, %s10692_s28  ;;  %2067 = vperm.xlu1 %9732, %v2062_v44  }
 0x329   :  { %8905 = vmatprep.subr.bf16.mxu1 %v8904_v12 }
 0x32a   :  { %v11985_v53 = vpop.permute.xlu0 %1613  ;;  %v11987_v3 = vpop.permute.xlu1 %1477 }
 0x32b   :  { %v11992_v31 = vsel %vm17379_vm3, %v11722_v35, %v11985_v53  ;;  %v11997_v52 = vsel %vm17386_vm2, %v11826_v2, %v11987_v3  ;;  %8907 = vmatpush1.bf16.msra.mxu1 %v8906_v47 }
 0x32c   :  { %2072 = vperm.xlu0 %9731, %v2063_v17   ;;  %2077 = vperm.xlu1 %9732, %v2064_v54  }
 0x32d   :  { %2201 = vmatprep.subr.mxu1 %v11906_v18 }
 0x32e   :  { %v12000_v51 = vpop.permute.xlu0 %1145  ;;  %v1340_v16 = vpop.permute.xlu1 %1339 }
 0x32f   :  { %v1202_v35 = vsel %vm17389_vm1, %v11772_v15, %v12000_v51  ;;  %v1375_v2 = vsel %vm17387_vm0, %v11887_v4, %v1340_v16  ;;  %v1376_v24 = vsel %vm17387_vm0, %v1340_v16, %v11852_v60  ;;  %2202 = vmatpush1.msra.mxu1 %v11667_v62 }
 0x330   :  { %1262 = vst [vmem:[#allocation3 + $0xd8] sm:$0xf0] %v1202_v35  ;;  %1435 = vst [vmem:[#allocation3 + $0x250] sm:$0xf] %v1375_v2  ;;  %7378 = vmatmul.mubr.msk.f32.vlgmr.msra.gmra.mrb[18].mxu1 %vm17364_vm8, %v11708_v63  ;;  %8937 = vmatprep.subr.bf16.mxu1 %v8936_v29  ;;  %v1938_v35 = vld [vmem:[#allocation3 + $0xd0] sm:$0xff] }
 0x331   :  { %1436 = vst [vmem:[#allocation3 + $0x258] sm:$0xf] %v1376_v24  ;;  %8939 = vmatpush1.bf16.msra.mxu1 %v8938_v27  ;;  %2243 = vmatprep.mubr.f32.mxu1 %v17621_v49 }
 0x332   :  { %v12013_v15 = vpop.permute.xlu0 %1457  ;;  %v1652_v18 = vpop.permute.xlu1 %1651 }
 0x333   :  { %v1514_v4 = vsel %vm17386_vm2, %v11789_v40, %v12013_v15  ;;  %v1687_v62 = vsel %vm17379_vm3, %v11901_v43, %v1652_v18  ;;  %v1688_v13 = vsel %vm17379_vm3, %v1652_v18, %v11861_v9 }
 0x334   :  { %1574 = vst [vmem:[#allocation3 + $0x268] sm:$0xf0] %v1514_v4  ;;  %1747 = vst [vmem:[#allocation3 + $0x3e0] sm:$0xf] %v1687_v62  ;;  %7379 = vmatmul.mubr.msk.f32.gmra.mrb[20].mxu1 %vm17364_vm8, %v11725_v8 }
 0x335   :  { %1748 = vst [vmem:[#allocation3 + $0x3e8] sm:$0xf] %v1688_v13  ;;  %2249 = vmatprep.mubr.f32.mxu1 %v17621_v49  ;;  %v17630_v13 = vpack.c.bf16 %v11816_v34, %v11699_v58 }
 0x336   :  { %v12025_v38 = vpop.permute.xlu0 %1769  ;;  %v1344_v56 = vpop.permute.xlu1 %1343 }
 0x337   :  { %v1377_v40 = vsel %vm17387_vm0, %v11852_v60, %v1344_v56  ;;  %v1986_v29 = vld [vmem:[#allocation3 + $0x250] sm:$0xff] }
 0x338   :  { %1437 = vst [vmem:[#allocation3 + $0x260] sm:$0xf] %v1377_v40  ;;  %7380 = vmatmul.mubr.msk.f32.gmra.mrb[22].mxu1 %vm17364_vm8, %v11739_v59  ;;  %v8922_v2 = vpack.c.bf16 %v1986_v29, %v11801_v33 }
 0x339   :  { %2403 = vmatprep.mubr.f32.mxu1 %v17621_v49 }
 0x33a   :  { %v12032_v43 = vpop.permute.xlu0 %1323  ;;  %v1656_v44 = vpop.permute.xlu1 %1655 }
 0x33b   :  { %v12037_v22 = vsel %vm17387_vm0, %v11828_v1, %v12032_v43  ;;  %v1689_v12 = vsel %vm17379_vm3, %v11861_v9, %v1656_v44  ;;  %v1987_v1 = vld [vmem:[#allocation3 + $0x258] sm:$0xff] }
 0x33c   :  { %1749 = vst [vmem:[#allocation3 + $0x3f0] sm:$0xf] %v1689_v12  ;;  %v8920_v16 = vpack.c.bf16 %v1987_v1, %v11804_v32  ;;  %v8942_v32 = vpack.c.bf16 %v11973_v36, %v1938_v35  ;;  %v1931_v1 = vld [vmem:[#allocation3 + $0x98] sm:$0xff] }
 0x33e   :  { %v12041_v50 = vpop.permute.xlu0 %1635  ;;  %v1184_v60 = vpop.permute.xlu1 %1183 }
 0x33f   :  { %v12046_v47 = vsel %vm17379_vm3, %v11840_v6, %v12041_v50  ;;  %v1219_v17 = vsel %vm17389_vm1, %v11869_v57, %v1184_v60  ;;  %v1220_v54 = vsel %vm17389_vm1, %v1184_v60, %v11915_v48  ;;  %v2036_v60 = vld [vmem:[#allocation3 + $0x3e0] sm:$0xff] }
 0x340   :  { %v8916_v19 = vpack.c.bf16 %v11684_v23, %v1220_v54  ;;  %v8918_v9 = vpack.c.bf16 %v11681_v55, %v1219_v17  ;;  %v1939_v23 = vld [vmem:[#allocation3 + $0xd8] sm:$0xff]  ;;  %v8934_v58 = vpack.c.bf16 %v11942_v39, %v2036_v60  ;;  %v1988_v35 = vld [vmem:[#allocation3 + $0x260] sm:$0xff] }
 0x342   :  { %v12054_v21 = vpop.permute.xlu0 %1167  ;;  %v1496_v25 = vpop.permute.xlu1 %1495  ;;  %8917 = vmatprep.subr.bf16.mxu0 %v8916_v19 }
 0x343   :  { %v1212_v6 = vsel %vm17389_vm1, %v11963_v26, %v12054_v21  ;;  %v1531_v57 = vsel %vm17386_vm2, %v11885_v0, %v1496_v25  ;;  %v1532_v28 = vsel %vm17386_vm2, %v1496_v25, %v11926_v7  ;;  %8919 = vmatpush1.bf16.msra.mxu0 %v8918_v9  ;;  %v1920_v25 = vld [vmem:[#allocation3 + $0x40] sm:$0xff] }
 0x344   :  { %8921 = vmatprep.subr.bf16.mxu0 %v8920_v16  ;;  %v8940_v55 = vpack.c.bf16 %v1212_v6, %v1939_v23  ;;  %v8924_v26 = vpack.c.bf16 %v1532_v28, %v11933_v30  ;;  %v8926_v33 = vpack.c.bf16 %v1531_v57, %v11929_v10 }
 0x346   :  { %v12066_v24 = vpop.permute.xlu0 %1479  ;;  %v1808_v27 = vpop.permute.xlu1 %1807  ;;  %8941 = vmatprep.subr.bf16.mxu1 %v8940_v55 }
 0x347   :  { %v12072_v0 = vsel %vm17386_vm2, %v11987_v3, %v12066_v24  ;;  %v1843_v18 = vsel %vm17380_vm4, %v11899_v41, %v1808_v27  ;;  %v1844_v4 = vsel %vm17380_vm4, %v1808_v27, %v11939_v46  ;;  %8923 = vmatpush1.bf16.msra.mxu0 %v8922_v2  ;;  %8943 = vmatpush1.bf16.msra.mxu1 %v8942_v32  ;;  %v2037_v3 = vld [vmem:[#allocation3 + $0x3e8] sm:$0xff] }
 0x348   :  { %8925 = vmatprep.subr.bf16.mxu0 %v8924_v26  ;;  %v8932_v12 = vpack.c.bf16 %v11946_v37, %v2037_v3 }
 0x34a   :  { %v12079_v36 = vpop.permute.xlu0 %1791  ;;  %v1188_v62 = vpop.permute.xlu1 %1187 }
 0x34b   :  { %v1221_v30 = vsel %vm17389_vm1, %v11915_v48, %v1188_v62  ;;  %8927 = vmatpush1.bf16.msra.mxu0 %v8926_v33  ;;  %v17631_v48 = vpack.c.bf16 %v11813_v42, %v11696_v11  ;;  %v1930_v11 = vld [vmem:[#allocation3 + $0x90] sm:$0xff]  ;;  %v1921_v42 = vld [vmem:[#allocation3 + $0x48] sm:$0xff] }
 0x34c   :  { %8929 = vmatprep.subr.bf16.mxu0 %v17630_v13  ;;  %v8964_v9 = vpack.c.bf16 %v1931_v1, %v1921_v42  ;;  %v8966_v29 = vpack.c.bf16 %v1930_v11, %v1920_v25  ;;  %v8946_v28 = vpack.c.bf16 %v11714_v61, %v1221_v30  ;;  %v17632_v61 = vld [vmem:[#allocation24_spill] sm:$0xff] }
 0x34e   :  { %v12086_v41 = vpop.permute.xlu0 %1345  ;;  %v1500_v40 = vpop.permute.xlu1 %1499 }
 0x34f   :  { %v1378_v10 = vsel %vm17387_vm0, %v1344_v56, %v12086_v41  ;;  %v12093_v17 = vsel %vm17386_vm2, %v11926_v7, %v1500_v40  ;;  %8931 = vmatpush1.bf16.msra.mxu0 %v17631_v48  ;;  %v17634_v48 = vld [vmem:[#allocation23_spill] sm:$0xff] }
 0x350   :  { %1438 = vst [vmem:[#allocation3 + $0x268] sm:$0xf] %v1378_v10  ;;  %8933 = vmatprep.subr.bf16.mxu0 %v8932_v12 }
 0x352   :  { %v12099_v34 = vpop.permute.xlu0 %1657  ;;  %v1768_v54 = vpop.permute.xlu1 %1767 }
 0x353   :  { %v1690_v37 = vsel %vm17379_vm3, %v1656_v44, %v12099_v34  ;;  %v1825_v56 = vsel %vm17380_vm4, %v11751_v45, %v1768_v54  ;;  %v1826_v7 = vsel %vm17380_vm4, %v1768_v54, %v12025_v38  ;;  %8935 = vmatpush1.bf16.msra.mxu0 %v8934_v58 }
 0x354   :  { %1750 = vst [vmem:[#allocation3 + $0x3f8] sm:$0xf] %v1690_v37  ;;  %1885 = vst [vmem:[#allocation3 + $0x3f0] sm:$0xf0] %v1825_v56  ;;  %2284 = vmatprep.subr.mxu0 %v1844_v4  ;;  %v8954_v4 = vpack.c.bf16 %v12093_v17, %v11997_v52  ;;  %v17633_v17 = vld [vmem:[#allocation25_spill] sm:$0xff] }
 0x355   :  { %1886 = vst [vmem:[#allocation3 + $0x3f8] sm:$0xf0] %v1826_v7 }
 0x356   :  { %v1190_v39 = vpop.permute.xlu0 %1189  ;;  %v1790_v19 = vpop.permute.xlu1 %1789 }
 0x357   :  { %v1222_v44 = vsel %vm17389_vm1, %v1188_v62, %v1190_v39  ;;  %v1835_v45 = vsel %vm17380_vm4, %v11838_v20, %v1790_v19  ;;  %v1836_v16 = vsel %vm17380_vm4, %v1790_v19, %v12079_v36  ;;  %2285 = vmatpush1.msra.mxu0 %v1843_v18  ;;  %v1989_v6 = vld [vmem:[#allocation3 + $0x268] sm:$0xff] }
 0x358   :  { %7381 = vmatmul.mubr.msk.f32.vlgmr.msra.gmra.mrb[24].mxu0 %vm17364_vm8, %v11708_v63  ;;  %8965 = vmatprep.subr.bf16.mxu0 %v8964_v9  ;;  %v8944_v57 = vpack.c.bf16 %v11968_v14, %v1222_v44  ;;  %v8948_v55 = vpack.c.bf16 %v1989_v6, %v12037_v22  ;;  %v8950_v14 = vpack.c.bf16 %v1988_v35, %v17632_v61 }
 0x359   :  { %8967 = vmatpush1.bf16.msra.mxu0 %v8966_v29  ;;  %2326 = vmatprep.mubr.f32.mxu0 %v17621_v49 }
 0x35a   :  { %v12117_v23 = vpop.permute.xlu0 %1501  ;;  %v1812_v20 = vpop.permute.xlu1 %1811  ;;  %8945 = vmatprep.subr.bf16.mxu1 %v8944_v57 }
 0x35b   :  { %v1534_v2 = vsel %vm17386_vm2, %v1500_v40, %v12117_v23  ;;  %v1845_v32 = vsel %vm17380_vm4, %v11939_v46, %v1812_v20  ;;  %8947 = vmatpush1.bf16.msra.mxu1 %v8946_v28  ;;  %v2038_v52 = vld [vmem:[#allocation3 + $0x3f0] sm:$0xff] }
 0x35c   :  { %7382 = vmatmul.mubr.msk.f32.gmra.mrb[26].mxu0 %vm17364_vm8, %v11725_v8  ;;  %8949 = vmatprep.subr.bf16.mxu1 %v8948_v55  ;;  %v8952_v22 = vpack.c.bf16 %v1534_v2, %v12072_v0  ;;  %v8956_v0 = vpack.c.bf16 %v12046_v47, %v11992_v31  ;;  %v2039_v3 = vld [vmem:[#allocation3 + $0x3f8] sm:$0xff]  ;;  %v17635_v31 = vpack.c.bf16 %v17633_v17, %v17634_v48 }
 0x35d   :  { %2332 = vmatprep.mubr.f32.mxu0 %v17621_v49  ;;  %v8960_v12 = vpack.c.bf16 %v1836_v16, %v2039_v3  ;;  %v8962_v47 = vpack.c.bf16 %v1835_v45, %v2038_v52 }
 0x35e   :  { %v12128_v27 = vpop.permute.xlu0 %1813  ;;  %v1148_v26 = vpop.permute.xlu1 %1147 }
 0x35f   :  { %v1846_v18 = vsel %vm17380_vm4, %v1812_v20, %v12128_v27  ;;  %v1203_v46 = vsel %vm17389_vm1, %v12000_v51, %v1148_v26  ;;  %8951 = vmatpush1.bf16.msra.mxu1 %v8950_v14 }
 0x360   :  { %1263 = vst [vmem:[#allocation3 + $0xe0] sm:$0xf0] %v1203_v46  ;;  %7383 = vmatmul.mubr.msk.f32.gmra.mrb[28].mxu0 %vm17364_vm8, %v11739_v59  ;;  %8953 = vmatprep.subr.bf16.mxu1 %v8952_v22 }
 0x361   :  { %2486 = vmatprep.mubr.f32.mxu0 %v17621_v49 }
 0x362   :  { %v1150_v33 = vpop.permute.xlu0 %1149  ;;  %v1170_v62 = vpop.permute.xlu1 %1169 }
 0x363   :  { %v1204_v30 = vsel %vm17389_vm1, %v1148_v26, %v1150_v33  ;;  %v1213_v51 = vsel %vm17389_vm1, %v12054_v21, %v1170_v62  ;;  %8955 = vmatpush1.bf16.msra.mxu1 %v8954_v4 }
 0x364   :  { %1264 = vst [vmem:[#allocation3 + $0xe8] sm:$0xf0] %v1204_v30  ;;  %8957 = vmatprep.subr.bf16.mxu1 %v8956_v0 }
 0x366   :  { %v1172_v13 = vpop.permute.xlu0 %1171  ;;  %v1192_v40 = vpop.permute.xlu1 %1191 }
 0x367   :  { %v1214_v60 = vsel %vm17389_vm1, %v1170_v62, %v1172_v13  ;;  %v1223_v10 = vsel %vm17389_vm1, %v1190_v39, %v1192_v40  ;;  %8959 = vmatpush1.bf16.msra.mxu1 %v17635_v31  ;;  %v1940_v54 = vld [vmem:[#allocation3 + $0xe0] sm:$0xff] }
 0x368   :  { %8961 = vmatprep.subr.bf16.mxu1 %v8960_v12  ;;  %v8970_v11 = vpack.c.bf16 %v1213_v51, %v1940_v54 }
 0x36a   :  { %v1194_v58 = vpop.permute.xlu0 %1193  ;;  %v1304_v21 = vpop.permute.xlu1 %1303 }
 0x36b   :  { %v1224_v37 = vsel %vm17389_vm1, %v1192_v40, %v1194_v58  ;;  %v1359_v56 = vsel %vm17387_vm0, %v11961_v5, %v1304_v21  ;;  %v1941_v7 = vld [vmem:[#allocation3 + $0xe8] sm:$0xff]  ;;  %8963 = vmatpush1.bf16.msra.mxu1 %v8962_v47 }
 0x36c   :  { %v8968_v1 = vpack.c.bf16 %v1214_v60, %v1941_v7  ;;  %2367 = vmatprep.subr.mxu1 %v1846_v18  ;;  %v8974_v5 = vpack.c.bf16 %v1359_v56, %v1223_v10 }
 0x36e   :  { %v1306_v42 = vpop.permute.xlu0 %1305  ;;  %v1326_v39 = vpop.permute.xlu1 %1325  ;;  %8969 = vmatprep.subr.bf16.mxu0 %v8968_v1 }
 0x36f   :  { %v1360_v19 = vsel %vm17387_vm0, %v1304_v21, %v1306_v42  ;;  %v1369_v9 = vsel %vm17387_vm0, %v12032_v43, %v1326_v39  ;;  %8971 = vmatpush1.bf16.msra.mxu0 %v8970_v11  ;;  %2368 = vmatpush1.msra.mxu1 %v1845_v32 }
 0x370   :  { %7384 = vmatmul.mubr.msk.f32.vlgmr.msra.gmra.mrb[24].mxu1 %vm17364_vm8, %v11708_v63  ;;  %v8972_v25 = vpack.c.bf16 %v1360_v19, %v1224_v37 }
 0x371   :  { %2409 = vmatprep.mubr.f32.mxu1 %v17621_v49 }
 0x372   :  { %v1328_v44 = vpop.permute.xlu0 %1327  ;;  %v1348_v45 = vpop.permute.xlu1 %1347  ;;  %8973 = vmatprep.subr.bf16.mxu0 %v8972_v25 }
 0x373   :  { %v1370_v16 = vsel %vm17387_vm0, %v1326_v39, %v1328_v44  ;;  %v1379_v29 = vsel %vm17387_vm0, %v12086_v41, %v1348_v45  ;;  %8975 = vmatpush1.bf16.msra.mxu0 %v8974_v5  ;;  %v17636_v39 = vmov 0.0|0.0  }
 0x374   :  { %1439 = vst [vmem:[#allocation3 + $0x270] sm:$0xf] %v1379_v29  ;;  %7385 = vmatmul.mubr.msk.f32.gmra.mrb[26].mxu1 %vm17364_vm8, %v11725_v8 }
 0x375   :  { %2415 = vmatprep.mubr.f32.mxu1 %v17621_v49 }
 0x376   :  { %v1350_v63 = vpop.permute.xlu0 %1349  ;;  %v1460_v43 = vpop.permute.xlu1 %1459 }
 0x377   :  { %v1380_v6 = vsel %vm17387_vm0, %v1348_v45, %v1350_v63  ;;  %v1515_v57 = vsel %vm17386_vm2, %v12013_v15, %v1460_v43 }
 0x378   :  { %1440 = vst [vmem:[#allocation3 + $0x278] sm:$0xf] %v1380_v6  ;;  %1575 = vst [vmem:[#allocation3 + $0x270] sm:$0xf0] %v1515_v57  ;;  %7386 = vmatmul.mubr.msk.f32.gmra.mrb[28].mxu1 %vm17364_vm8, %v11739_v59 }
 0x37a   :  { %v1462_v41 = vpop.permute.xlu0 %1461  ;;  %v1482_v28 = vpop.permute.xlu1 %1481 }
 0x37b   :  { %v1516_v20 = vsel %vm17386_vm2, %v1460_v43, %v1462_v41  ;;  %v1525_v55 = vsel %vm17386_vm2, %v12066_v24, %v1482_v28 }
 0x37c   :  { %1576 = vst [vmem:[#allocation3 + $0x278] sm:$0xf0] %v1516_v20 }
 0x37e   :  { %v1484_v35 = vpop.permute.xlu0 %1483  ;;  %v1504_v2 = vpop.permute.xlu1 %1503 }
 0x37f   :  { %v1526_v32 = vsel %vm17386_vm2, %v1482_v28, %v1484_v35  ;;  %v1535_v15 = vsel %vm17386_vm2, %v12117_v23, %v1504_v2  ;;  %v1990_v26 = vld [vmem:[#allocation3 + $0x270] sm:$0xff] }
 0x380   :  { %v8978_v33 = vpack.c.bf16 %v1990_v26, %v1369_v9  ;;  %v8982_v51 = vpack.c.bf16 %v1535_v15, %v1525_v55 }
 0x382   :  { %v1506_v61 = vpop.permute.xlu0 %1505  ;;  %v1616_v14 = vpop.permute.xlu1 %1615 }
 0x383   :  { %v1536_v22 = vsel %vm17386_vm2, %v1504_v2, %v1506_v61  ;;  %v1671_v18 = vsel %vm17379_vm3, %v11985_v53, %v1616_v14  ;;  %v1991_v46 = vld [vmem:[#allocation3 + $0x278] sm:$0xff] }
 0x384   :  { %v8976_v4 = vpack.c.bf16 %v1991_v46, %v1370_v16  ;;  %v8980_v0 = vpack.c.bf16 %v1536_v22, %v1526_v32 }
 0x386   :  { %v1618_v24 = vpop.permute.xlu0 %1617  ;;  %v1638_v62 = vpop.permute.xlu1 %1637  ;;  %8977 = vmatprep.subr.bf16.mxu0 %v8976_v4 }
 0x387   :  { %v1672_v30 = vsel %vm17379_vm3, %v1616_v14, %v1618_v24  ;;  %v1681_v23 = vsel %vm17379_vm3, %v12041_v50, %v1638_v62  ;;  %8979 = vmatpush1.bf16.msra.mxu0 %v8978_v33 }
 0x388   :  { %8981 = vmatprep.subr.bf16.mxu0 %v8980_v0  ;;  %v8986_v52 = vpack.c.bf16 %v1681_v23, %v1671_v18  ;;  %v4395_v0 = vlaneseq }
 0x38a   :  { %v1640_v3 = vpop.permute.xlu0 %1639  ;;  %v1660_v13 = vpop.permute.xlu1 %1659 }
 0x38b   :  { %v1682_v40 = vsel %vm17379_vm3, %v1638_v62, %v1640_v3  ;;  %v1691_v53 = vsel %vm17379_vm3, %v12099_v34, %v1660_v13  ;;  %8983 = vmatpush1.bf16.msra.mxu0 %v8982_v51  ;;  %v12264_v3 = vshrl.u32 %v4395_v0, 7 }
 0x38c   :  { %1751 = vst [vmem:[#allocation3 + $0x400] sm:$0xf] %v1691_v53  ;;  %v8984_v12 = vpack.c.bf16 %v1682_v40, %v1672_v30 }
 0x38e   :  { %v1662_v60 = vpop.permute.xlu0 %1661  ;;  %v1772_v10 = vpop.permute.xlu1 %1771  ;;  %8985 = vmatprep.subr.bf16.mxu0 %v8984_v12 }
 0x38f   :  { %v1692_v17 = vsel %vm17379_vm3, %v1660_v13, %v1662_v60  ;;  %v1827_v50 = vsel %vm17380_vm4, %v12025_v38, %v1772_v10  ;;  %8987 = vmatpush1.bf16.msra.mxu0 %v8986_v52  ;;  %v12266_v13 = vand.u32 127, %v4395_v0  ;;  %v4412_v60 = vadd.s32 128, %v12264_v3 }
 0x390   :  { %1752 = vst [vmem:[#allocation3 + $0x408] sm:$0xf] %v1692_v17  ;;  %1887 = vst [vmem:[#allocation3 + $0x400] sm:$0xf0] %v1827_v50 }
 0x391   :  { %v12280_v50 = vmul.u32 13, %v12266_v13  ;;  %vm17400_vm9 = vcmp.lt.s32.totalorder %v12266_v13, 91 }
 0x392   :  { %v1774_v48 = vpop.permute.xlu0 %1773  ;;  %v1794_v31 = vpop.permute.xlu1 %1793 }
 0x393   :  { %v1828_v47 = vsel %vm17380_vm4, %v1772_v10, %v1774_v48  ;;  %v1837_v34 = vsel %vm17380_vm4, %v12079_v36, %v1794_v31  ;;  %v10529_v36 = vld [vmem:[#allocation9] sm:$0xff]  ;;  %v4413_v10 = vadd.s32 136, %v12264_v3  ;;  %v4397_v48 = vadd.s32 8, %v12264_v3 }
 0x394   :  { %1888 = vst [vmem:[#allocation3 + $0x408] sm:$0xf0] %v1828_v47  ;;  %vm4574_vm10 = vcmp.eq.s32.totalorder %v4412_v60, %v12280_v50  ;;  %vm4558_vm13 = vcmp.eq.s32.totalorder %v12264_v3, %v12280_v50 }
 0x395   :  { %vm4575_vm11 = vcmp.eq.s32.totalorder %v4413_v10, %v12280_v50  ;;  %vm4734_vm12 = vmand %vm4574_vm10, %vm17400_vm9  ;;  %vm4559_vm15 = vcmp.eq.s32.totalorder %v4397_v48, %v12280_v50  ;;  %v4409_v10 = vadd.s32 104, %v12264_v3 }
 0x396   :  { %v1796_v58 = vpop.permute.xlu0 %1795  ;;  %v1816_v21 = vpop.permute.xlu1 %1815  ;;  %vm4735_vm14 = vmand %vm4575_vm11, %vm17400_vm9 }
 0x397   :  { %v1838_v54 = vsel %vm17380_vm4, %v1794_v31, %v1796_v58  ;;  %v1847_v37 = vsel %vm17380_vm4, %v12128_v27, %v1816_v21  ;;  %v2040_v38 = vld [vmem:[#allocation3 + $0x400] sm:$0xff]  ;;  %v4415_v58 = vadd.s32 152, %v12264_v3  ;;  %vm8992_vm5 = vmpackc.low %vm4735_vm14, %vm4734_vm12 }
 0x398   :  { %v8990_v42 = vpack.c.bf16 %v1837_v34, %v2040_v38  ;;  %v4414_v34 = vadd.s32 144, %v12264_v3  ;;  %vm4718_vm10 = vmand %vm4558_vm13, %vm17400_vm9  ;;  %v4417_v38 = vadd.s32 168, %v12264_v3 }
 0x399   :  { %vm4577_vm12 = vcmp.eq.s32.totalorder %v4415_v58, %v12280_v50 }
 0x39a   :  { %v1818_v56 = vpop.permute.xlu0 %1817  ;;  %vm4576_vm11 = vcmp.eq.s32.totalorder %v4414_v34, %v12280_v50  ;;  %vm4579_vm7 = vcmp.eq.s32.totalorder %v4417_v38, %v12280_v50 }
 0x39b   :  { %v1848_v7 = vsel %vm17380_vm4, %v1816_v21, %v1818_v56  ;;  %v2041_v1 = vld [vmem:[#allocation3 + $0x408] sm:$0xff]  ;;  %v4398_v21 = vadd.s32 16, %v12264_v3  ;;  %v4416_v56 = vadd.s32 160, %v12264_v3  ;;  %vm4736_vm13 = vmand %vm4576_vm11, %vm17400_vm9 }
 0x39c   :  { %v8988_v11 = vpack.c.bf16 %v1838_v54, %v2041_v1  ;;  %v17370_v54 = vmov 1.0|1.0   ;;  %v4401_v1 = vadd.s32 40, %v12264_v3 }
 0x39d   :  { %8993 = vmatprep.subr.msk.bf16.mxu1 %vm8992_vm5, %v17370_v54  ;;  %vm4560_vm5 = vcmp.eq.s32.totalorder %v4398_v21, %v12280_v50 }
 0x39e   :  { %8989 = vmatprep.subr.bf16.mxu0 %v8988_v11  ;;  %vm4720_vm11 = vmand %vm4560_vm5, %vm17400_vm9  ;;  %v4418_v11 = vadd.s32 176, %v12264_v3 }
 0x39f   :  { %8991 = vmatpush1.bf16.msra.mxu0 %v8990_v42  ;;  %v4419_v42 = vadd.s32 184, %v12264_v3 }
 0x3a0   :  { %2450 = vmatprep.subr.mxu0 %v1848_v7  ;;  %v4400_v7 = vadd.s32 32, %v12264_v3 }
 0x3a3   :  { %2451 = vmatpush1.msra.mxu0 %v1847_v37  ;;  %v4399_v37 = vadd.s32 24, %v12264_v3 }
 0x3a4   :  { %7387 = vmatmul.mubr.msk.f32.vlgmr.msra.gmra.mrb[30].mxu0 %vm17364_vm8, %v10529_v36  ;;  %9333 = vmatprep.subr.bf16.mxu0 %v17636_v39  ;;  %v4402_v36 = vadd.s32 48, %v12264_v3 }
 0x3a5   :  { %2492 = vmatprep.mubr.f32.mxu0 %v17621_v49 }
 0x3a7   :  { %v12205_v27 = vpop.permute.xlu1 %2067 }
 0x3a8   :  { %7388 = vmatmul.mubr.msk.f32.gmra.mrb[32].mxu0 %vm17364_vm8, %v11725_v8 }
 0x3a9   :  { %2498 = vmatprep.mubr.f32.mxu0 %v17621_v49 }
 0x3ab   :  { %v12214_v44 = vpop.permute.xlu0 %2072  ;;  %v12222_v6 = vpop.permute.xlu1 %2077 }
 0x3ac   :  { %7389 = vmatmul.mubr.msk.f32.gmra.mrb[34].mxu0 %vm17364_vm8, %v11739_v59 }
 0x3ad   :  { %8371 = vmatprep.mubr.msk.f32.mxu0 %vm17361_vm6, %v17621_v49  ;;  %vm4719_vm6 = vmand %vm4559_vm15, %vm17400_vm9  ;;  %vm4561_vm15 = vcmp.eq.s32.totalorder %v4399_v37, %v12280_v50  ;;  %v4410_v37 = vadd.s32 112, %v12264_v3 }
 0x3ae   :  { %vm8994_vm14 = vmpackc.low %vm4719_vm6, %vm4718_vm10 }
 0x3af   :  { %8995 = vmatpush3.bf16.msk.msra.mxu1 %vm8994_vm14, %v17370_v54  ;;  %vm4737_vm6 = vmand %vm4577_vm12, %vm17400_vm9  ;;  %vm4578_vm14 = vcmp.eq.s32.totalorder %v4416_v56, %v12280_v50 }
 0x3b0   :  { %v2156_v19 = vpop.f32.mrb[18].mxu0  ;;  %vm8996_vm10 = vmpackc.low %vm4737_vm6, %vm4736_vm13  ;;  %vm4562_vm6 = vcmp.eq.s32.totalorder %v4400_v7, %v12280_v50 }
 0x3b1   :  { %v12208_v9 = vadd.f32 %v2156_v19, %v12205_v27  ;;  %v2158_v25 = vpop.f32.mrb[19].mxu0  ;;  %8997 = vmatprep.subr.msk.bf16.mxu1 %vm8996_vm10, %v17370_v54  ;;  %vm4721_vm12 = vmand %vm4561_vm15, %vm17400_vm9  ;;  %vm4563_vm10 = vcmp.eq.s32.totalorder %v4401_v1, %v12280_v50  ;;  %v4403_v19 = vadd.s32 56, %v12264_v3 }
 0x3b2   :  { %v12211_v5 = vadd.f32 %v2158_v25, %v12205_v27  ;;  %vm8998_vm13 = vmpackc.low %vm4721_vm12, %vm4720_vm11  ;;  %vm4580_vm12 = vcmp.eq.s32.totalorder %v4418_v11, %v12280_v50  ;;  %v4420_v25 = vadd.s32 192, %v12264_v3 }
 0x3b3   :  { %v2505_v8 = vmax.f32 %v12208_v9, 0.0  ;;  %8999 = vmatpush3.bf16.msk.msra.mxu1 %vm8998_vm13, %v17370_v54  ;;  %vm4738_vm5 = vmand %vm4578_vm14, %vm17400_vm9  ;;  %vm4581_vm13 = vcmp.eq.s32.totalorder %v4419_v42, %v12280_v50 }
 0x3b4   :  { %v2506_v45 = vmax.f32 %v12211_v5, 0.0  ;;  %v2162_v59 = vpop.f32.mrb[20].mxu0  ;;  %vm4739_vm15 = vmand %vm4579_vm7, %vm17400_vm9 }
 0x3b5   :  { %v12218_v16 = vadd.f32 %v2162_v59, %v12214_v44  ;;  %v2164_v29 = vpop.f32.mrb[21].mxu0  ;;  %vm9000_vm11 = vmpackc.low %vm4739_vm15, %vm4738_vm5  ;;  %vm4564_vm15 = vcmp.eq.s32.totalorder %v4402_v36, %v12280_v50  ;;  %v4421_v59 = vadd.s32 200, %v12264_v3 }
 0x3b6   :  { %v2165_v63 = vadd.f32 %v2164_v29, %v12214_v44  ;;  %9001 = vmatprep.subr.msk.bf16.mxu1 %vm9000_vm11, %v17370_v54  ;;  %vm4722_vm14 = vmand %vm4562_vm6, %vm17400_vm9  ;;  %vm4565_vm11 = vcmp.eq.s32.totalorder %v4403_v19, %v12280_v50  ;;  %v4404_v29 = vadd.s32 64, %v12264_v3 }
 0x3b7   :  { %v2515_v43 = vmax.f32 %v12218_v16, 0.0  ;;  %vm4723_vm7 = vmand %vm4563_vm10, %vm17400_vm9 }
 0x3b8   :  { %v2516_v57 = vmax.f32 %v2165_v63, 0.0  ;;  %v2168_v41 = vpop.f32.mrb[22].mxu0  ;;  %vm9002_vm5 = vmpackc.low %vm4723_vm7, %vm4722_vm14  ;;  %vm4582_vm7 = vcmp.eq.s32.totalorder %v4420_v25, %v12280_v50  ;;  %v4405_v63 = vadd.s32 72, %v12264_v3 }
 0x3b9   :  { %2545 = vst [vmem:[#allocation4 + $0x50] sm:$0xff] %v2515_v43  ;;  %v2169_v28 = vadd.f32 %v2168_v41, %v12222_v6  ;;  %v2170_v20 = vpop.f32.mrb[23].mxu0  ;;  %9003 = vmatpush3.bf16.msk.msra.mxu1 %vm9002_vm5, %v17370_v54  ;;  %vm4740_vm6 = vmand %vm4580_vm12, %vm17400_vm9  ;;  %vm4583_vm5 = vcmp.eq.s32.totalorder %v4421_v59, %v12280_v50  ;;  %v4423_v41 = vadd.s32 216, %v12264_v3 }
 0x3ba   :  { %2546 = vst [vmem:[#allocation4 + $0x58] sm:$0xff] %v2516_v57  ;;  %v2171_v55 = vadd.f32 %v2170_v20, %v12222_v6  ;;  %v9733_v35 = vpack.i.bf16 %v2516_v57, %v2505_v8  ;;  %vm4741_vm10 = vmand %vm4581_vm13, %vm17400_vm9  ;;  %v4422_v57 = vadd.s32 208, %v12264_v3 }
 0x3bb   :  { %v2525_v2 = vmax.f32 %v2169_v28, 0.0  ;;  %vm9004_vm14 = vmpackc.low %vm4741_vm10, %vm4740_vm6  ;;  %vm4566_vm10 = vcmp.eq.s32.totalorder %v4404_v29, %v12280_v50  ;;  %v4406_v28 = vadd.s32 80, %v12264_v3 }
 0x3bc   :  { %v2526_v32 = vmax.f32 %v2171_v55, 0.0  ;;  %9734 = vrot.lane.b32.xlu1 %v9733_v35, %s10689_s18  ;;  %9005 = vmatprep.subr.msk.bf16.mxu1 %vm9004_vm14, %v17370_v54  ;;  %vm4724_vm12 = vmand %vm4564_vm15, %vm17400_vm9  ;;  %vm4567_vm14 = vcmp.eq.s32.totalorder %v4405_v63, %v12280_v50  ;;  %v4407_v55 = vadd.s32 88, %v12264_v3 }
 0x3bd   :  { %2555 = vst [vmem:[#allocation4 + $0xa0] sm:$0xf] %v2525_v2  ;;  %vm4725_vm13 = vmand %vm4565_vm11, %vm17400_vm9 }
 0x3be   :  { %2556 = vst [vmem:[#allocation4 + $0xa8] sm:$0xf] %v2526_v32  ;;  %vm9006_vm6 = vmpackc.low %vm4725_vm13, %vm4724_vm12  ;;  %vm4584_vm13 = vcmp.eq.s32.totalorder %v4422_v57, %v12280_v50 }
 0x3bf   :  { %9007 = vmatpush3.bf16.msk.msra.mxu1 %vm9006_vm6, %v17370_v54  ;;  %vm4742_vm15 = vmand %vm4582_vm7, %vm17400_vm9  ;;  %vm4585_vm6 = vcmp.eq.s32.totalorder %v4423_v41, %v12280_v50 }
 0x3c0   :  { %9739 = vrot.lane.b32.xlu1 %v9733_v35, %s10688_s6  ;;  %vm4743_vm11 = vmand %vm4583_vm5, %vm17400_vm9 }
 0x3c1   :  { %vm9008_vm12 = vmpackc.low %vm4743_vm11, %vm4742_vm15  ;;  %vm4568_vm11 = vcmp.eq.s32.totalorder %v4406_v28, %v12280_v50 }
 0x3c2   :  { %9009 = vmatprep.subr.msk.bf16.mxu1 %vm9008_vm12, %v17370_v54  ;;  %vm4726_vm7 = vmand %vm4566_vm10, %vm17400_vm9  ;;  %vm4569_vm12 = vcmp.eq.s32.totalorder %v4407_v55, %v12280_v50 }
 0x3c3   :  { %vm4727_vm5 = vmand %vm4567_vm14, %vm17400_vm9 }
 0x3c4   :  { %9744 = vrot.lane.b32.xlu1 %v9733_v35, %s10690_s27  ;;  %v2585_v4 = vld [vmem:[#allocation4 + $0xa0] sm:$0xf]  ;;  %vm9010_vm15 = vmpackc.low %vm4727_vm5, %vm4726_vm7 }
 0x3c5   :  { %9011 = vmatpush3.bf16.msk.msra.mxu1 %vm9010_vm15, %v17370_v54  ;;  %vm12421_vm10 = vmand %vm4584_vm13, %vm17400_vm9  ;;  %v2586_v7 = vld [vmem:[#allocation4 + $0xa8] sm:$0xf] }
 0x3c6   :  { %vm4745_vm14 = vmand %vm4585_vm6, %vm17400_vm9 }
 0x3c7   :  { %vm9012_vm7 = vmpackc.low %vm4745_vm14, %vm12421_vm10 }
 0x3c8   :  { %9749 = vrot.lane.b32.xlu1 %v9733_v35, %s10691_s0  ;;  %9013 = vmatprep.subr.msk.bf16.mxu1 %vm9012_vm7, %v17370_v54  ;;  %vm12457_vm13 = vmand %vm4568_vm11, %vm17400_vm9  ;;  %vm4571_vm7 = vcmp.eq.s32.totalorder %v4409_v10, %v12280_v50 }
 0x3c9   :  { %vm4729_vm6 = vmand %vm4569_vm12, %vm17400_vm9 }
 0x3ca   :  { %vm9014_vm10 = vmpackc.low %vm4729_vm6, %vm12457_vm13 }
 0x3cb   :  { %9015 = vmatpush3.bf16.msk.msra.mxu1 %vm9014_vm10, %v17370_v54 }
 0x3cc   :  { %9754 = vrot.lane.b32.xlu1 %v9733_v35, %s10692_s28 }
 0x3d0   :  { %9759 = vrot.lane.b32.xlu1 %v9733_v35, %s10697_s4 }
 0x3d4   :  { %9764 = vrot.lane.b32.xlu1 %v9733_v35, %s10698_s16 }
 0x3d8   :  { %9769 = vrot.lane.b32.xlu1 %v9733_v35, %s10699_s17 }
 0x3dc   :  { %9774 = vrot.lane.b32.xlu1 %v9733_v35, %s10700_s19 }
 0x3e0   :  { %9779 = vrot.lane.b32.xlu1 %v9733_v35, %s10701_s8 }
 0x3e4   :  { %9784 = vrot.lane.b32.xlu1 %v9733_v35, %s10702_s20 }
 0x3e8   :  { %9789 = vrot.lane.b32.xlu1 %v9733_v35, %s10703_s21 }
 0x403   :  { %v2239_v15 = vpop.f32.mrb[18].mxu1 }
 0x404   :  { %v12243_v61 = vadd.f32 %v2239_v15, %v12205_v27  ;;  %v2241_v14 = vpop.f32.mrb[19].mxu1  ;;  %v4424_v15 = vadd.s32 224, %v12264_v3 }
 0x405   :  { %v2242_v26 = vadd.f32 %v2241_v14, %v12205_v27 }
 0x406   :  { %v2507_v22 = vmax.f32 %v12243_v61, 0.0  ;;  %vm4586_vm5 = vcmp.eq.s32.totalorder %v4424_v15, %v12280_v50 }
 0x407   :  { %v2508_v18 = vmax.f32 %v2242_v26, 0.0  ;;  %v2245_v46 = vpop.f32.mrb[20].mxu1  ;;  %vm12485_vm11 = vmand %vm4586_vm5, %vm17400_vm9 }
 0x408   :  { %v12248_v33 = vadd.f32 %v2245_v46, %v12214_v44  ;;  %v2247_v24 = vpop.f32.mrb[21].mxu1  ;;  %v12254_v62 = vpack.i.bf16 %v2507_v22, %v2506_v45 }
 0x409   :  { %2538 = vst [vmem:[#allocation4 + $0x18] sm:$0xff] %v2508_v18  ;;  %v12257_v30 = vadd.f32 %v2247_v24, %v12214_v44  ;;  %v12259_v23 = vpack.i.bf16 %v2508_v18, %v2585_v4  ;;  %v4425_v18 = vadd.s32 232, %v12264_v3 }
 0x40a   :  { %v2517_v51 = vmax.f32 %v12248_v33, 0.0  ;;  %9794 = vrot.lane.b32.xlu0 %v12254_v62, %s10689_s18 }
 0x40b   :  { %v2518_v40 = vmax.f32 %v12257_v30, 0.0  ;;  %v2251_v53 = vpop.f32.mrb[22].mxu1  ;;  %9859 = vrot.lane.b32.xlu1 %v12259_v23, %s10688_s6  ;;  %vm4587_vm15 = vcmp.eq.s32.totalorder %v4425_v18, %v12280_v50 }
 0x40c   :  { %2547 = vst [vmem:[#allocation4 + $0x60] sm:$0xff] %v2517_v51  ;;  %v2252_v12 = vadd.f32 %v2251_v53, %v12222_v6  ;;  %v2253_v52 = vpop.f32.mrb[23].mxu1  ;;  %v4408_v53 = vadd.s32 96, %v12264_v3  ;;  %vm4747_vm12 = vmand %vm4587_vm15, %vm17400_vm9 }
 0x40d   :  { %2548 = vst [vmem:[#allocation4 + $0x68] sm:$0xff] %v2518_v40  ;;  %v2254_v17 = vadd.f32 %v2253_v52, %v12222_v6  ;;  %v12450_v52 = vpack.i.bf16 %v2515_v43, %v2517_v51  ;;  %v4426_v51 = vadd.s32 240, %v12264_v3  ;;  %vm9016_vm13 = vmpackc.low %vm4747_vm12, %vm12485_vm11  ;;  %vm4572_vm12 = vcmp.eq.s32.totalorder %v4410_v37, %v12280_v50 }
 0x40e   :  { %v2527_v31 = vmax.f32 %v2252_v12, 0.0  ;;  %9799 = vrot.lane.b32.xlu0 %v12254_v62, %s10688_s6  ;;  %vm4570_vm14 = vcmp.eq.s32.totalorder %v4408_v53, %v12280_v50  ;;  %9017 = vmatprep.subr.msk.bf16.mxu1 %vm9016_vm13, %v17370_v54  ;;  %vm4731_vm15 = vmand %vm4571_vm7, %vm17400_vm9 }
 0x40f   :  { %v2528_v47 = vmax.f32 %v2254_v17, 0.0  ;;  %9864 = vrot.lane.b32.xlu1 %v12259_v23, %s10690_s27  ;;  %vm4730_vm5 = vmand %vm4570_vm14, %vm17400_vm9  ;;  %vm4588_vm6 = vcmp.eq.s32.totalorder %v4426_v51, %v12280_v50 }
 0x410   :  { %2557 = vst [vmem:[#allocation4 + $0xb0] sm:$0xf] %v2527_v31  ;;  %vm9018_vm11 = vmpackc.low %vm4731_vm15, %vm4730_vm5 }
 0x411   :  { %2558 = vst [vmem:[#allocation4 + $0xb8] sm:$0xf] %v2528_v47  ;;  %v4427_v47 = vadd.s32 248, %v12264_v3  ;;  %9019 = vmatpush3.bf16.msk.msra.mxu1 %vm9018_vm11, %v17370_v54  ;;  %vm4748_vm14 = vmand %vm4588_vm6, %vm17400_vm9 }
 0x412   :  { %9804 = vrot.lane.b32.xlu0 %v12254_v62, %s10690_s27  ;;  %vm4732_vm5 = vmand %vm4572_vm12, %vm17400_vm9 }
 0x413   :  { %9869 = vrot.lane.b32.xlu1 %v12259_v23, %s10691_s0  ;;  %vm4589_vm10 = vcmp.eq.s32.totalorder %v4427_v47, %v12280_v50 }
 0x414   :  { %vm4749_vm7 = vmand %vm4589_vm10, %vm17400_vm9 }
 0x415   :  { %vm9020_vm8 = vmpackc.low %vm4749_vm7, %vm4748_vm14  ;;  %vm17385_vm7 = vcmask 998400  }
 0x416   :  { %9809 = vrot.lane.b32.xlu0 %v12254_v62, %s10691_s0  ;;  %9021 = vmatprep.subr.msk.bf16.mxu1 %vm9020_vm8, %v17370_v54 }
 0x417   :  { %9874 = vrot.lane.b32.xlu1 %v12259_v23, %s10692_s28  ;;  %v2587_v58 = vld [vmem:[#allocation4 + $0xb0] sm:$0xf] }
 0x418   :  { %v12520_v1 = vpack.i.bf16 %v2587_v58, %v2586_v7  ;;  %v2588_v31 = vld [vmem:[#allocation4 + $0xb8] sm:$0xf] }
 0x41a   :  { %9814 = vrot.lane.b32.xlu0 %v12254_v62, %s10692_s28 }
 0x41b   :  { %9879 = vrot.lane.b32.xlu1 %v12259_v23, %s10697_s4 }
 0x41e   :  { %9819 = vrot.lane.b32.xlu0 %v12254_v62, %s10697_s4 }
 0x41f   :  { %9884 = vrot.lane.b32.xlu1 %v12259_v23, %s10698_s16 }
 0x422   :  { %9824 = vrot.lane.b32.xlu0 %v12254_v62, %s10698_s16 }
 0x423   :  { %9889 = vrot.lane.b32.xlu1 %v12259_v23, %s10699_s17 }
 0x426   :  { %9829 = vrot.lane.b32.xlu0 %v12254_v62, %s10699_s17 }
 0x427   :  { %9894 = vrot.lane.b32.xlu1 %v12259_v23, %s10700_s19 }
 0x42a   :  { %9834 = vrot.lane.b32.xlu0 %v12254_v62, %s10700_s19 }
 0x42b   :  { %v2322_v20 = vpop.f32.mrb[24].mxu0  ;;  %9899 = vrot.lane.b32.xlu1 %v12259_v23, %s10701_s8 }
 0x42c   :  { %v12406_v35 = vadd.f32 %v2322_v20, %v12205_v27  ;;  %v2324_v2 = vpop.f32.mrb[25].mxu0 }
 0x42d   :  { %v12412_v32 = vadd.f32 %v2324_v2, %v12205_v27 }
 0x42e   :  { %v2509_v14 = vmax.f32 %v12406_v35, 0.0  ;;  %9839 = vrot.lane.b32.xlu0 %v12254_v62, %s10701_s8  ;;  %v12504_v38 = vpop.permute.xlu1 %9734  ;;  %v4444_v35 = vadd.s32 384, %v12264_v3 }
 0x42f   :  { %v2510_v46 = vmax.f32 %v12412_v32, 0.0  ;;  %v2328_v4 = vpop.f32.mrb[26].mxu0  ;;  %9909 = vrot.lane.b32.xlu1 %v12259_v23, %s10703_s21 }
 0x430   :  { %2539 = vst [vmem:[#allocation4 + $0x20] sm:$0xff] %v2509_v14  ;;  %v12436_v24 = vadd.f32 %v2328_v4, %v12214_v44  ;;  %v2330_v0 = vpop.f32.mrb[27].mxu0  ;;  %vm4606_vm8 = vcmp.eq.s32.totalorder %v4444_v35, %v12280_v50 }
 0x431   :  { %2540 = vst [vmem:[#allocation4 + $0x28] sm:$0xff] %v2510_v46  ;;  %v12444_v12 = vadd.f32 %v2330_v0, %v12214_v44  ;;  %vm4766_vm11 = vmand %vm4606_vm8, %vm17400_vm9  ;;  %vm17392_vm8 = vcmask 965632  }
 0x432   :  { %v2519_v33 = vmax.f32 %v12436_v24, 0.0  ;;  %9844 = vrot.lane.b32.xlu0 %v12254_v62, %s10702_s20  ;;  %v12533_v11 = vpop.permute.xlu1 %9739 }
 0x433   :  { %v2520_v16 = vmax.f32 %v12444_v12, 0.0  ;;  %v2334_v43 = vpop.f32.mrb[28].mxu0  ;;  %9919 = vrot.lane.b32.xlu1 %v12450_v52, %s10688_s6 }
 0x434   :  { %2549 = vst [vmem:[#allocation4 + $0x70] sm:$0xff] %v2519_v33  ;;  %v2335_v17 = vadd.f32 %v2334_v43, %v12222_v6  ;;  %v2336_v48 = vpop.f32.mrb[29].mxu0  ;;  %v12628_v30 = vpack.i.bf16 %v2588_v31, %v2519_v33 }
 0x435   :  { %2550 = vst [vmem:[#allocation4 + $0x78] sm:$0xff] %v2520_v16  ;;  %v2337_v34 = vadd.f32 %v2336_v48, %v12222_v6 }
 0x436   :  { %v2529_v21 = vmax.f32 %v2335_v17, 0.0  ;;  %9849 = vrot.lane.b32.xlu0 %v12254_v62, %s10703_s21  ;;  %v4411_v62 = vadd.s32 120, %v12264_v3  ;;  %v12547_v42 = vpop.permute.xlu1 %9744  ;;  %v12614_v17 = vpack.i.bf16 %v2518_v40, %v2509_v14  ;;  %v4445_v14 = vadd.s32 392, %v12264_v3 }
 0x437   :  { %v2530_v56 = vmax.f32 %v2337_v34, 0.0  ;;  %9924 = vrot.lane.b32.xlu1 %v12450_v52, %s10690_s27 }
 0x438   :  { %2559 = vst [vmem:[#allocation4 + $0xc0] sm:$0xf] %v2529_v21  ;;  %vm4573_vm13 = vcmp.eq.s32.totalorder %v4411_v62, %v12280_v50  ;;  %vm4607_vm10 = vcmp.eq.s32.totalorder %v4445_v14, %v12280_v50 }
 0x439   :  { %2560 = vst [vmem:[#allocation4 + $0xc8] sm:$0xf] %v2530_v56  ;;  %vm4733_vm6 = vmand %vm4573_vm13, %vm17400_vm9  ;;  %vm17390_vm13 = vcmask 990208  }
 0x43a   :  { %9854 = vrot.lane.b32.xlu0 %v12259_v23, %s10689_s18  ;;  %vm9022_vm15 = vmpackc.low %vm4733_vm6, %vm4732_vm5  ;;  %v12568_v28 = vpop.permute.xlu1 %9749  ;;  %vm17391_vm5 = vcmask 973824  }
 0x43b   :  { %9979 = vrot.lane.b32.xlu1 %v12520_v1, %s10688_s6  ;;  %9023 = vmatpush3.bf16.msk.msra.mxu1 %vm9022_vm15, %v17370_v54  ;;  %vm4767_vm14 = vmand %vm4607_vm10, %vm17400_vm9 }
 0x43c   :  { %vm9024_vm12 = vmpackc.low %vm4767_vm14, %vm4766_vm11 }
 0x43d   :  { %9025 = vmatprep.subr.msk.bf16.mxu1 %vm9024_vm12, %v17370_v54  ;;  %vm17647_vm12 = vcmask 982016  }
 0x43e   :  { %9904 = vrot.lane.b32.xlu0 %v12259_v23, %s10702_s20  ;;  %v12584_v53 = vpop.permute.xlu1 %9754 }
 0x43f   :  { %9984 = vrot.lane.b32.xlu1 %v12520_v1, %s10690_s27 }
 0x442   :  { %9914 = vrot.lane.b32.xlu0 %v12450_v52, %s10689_s18  ;;  %v12592_v10 = vpop.permute.xlu1 %9759 }
 0x443   :  { %v2405_v36 = vpop.f32.mrb[24].mxu1  ;;  %9989 = vrot.lane.b32.xlu1 %v12520_v1, %s10691_s0 }
 0x444   :  { %v12552_v23 = vadd.f32 %v2405_v36, %v12205_v27  ;;  %v2407_v19 = vpop.f32.mrb[25].mxu1 }
 0x445   :  { %v12555_v25 = vadd.f32 %v2407_v19, %v12205_v27 }
 0x446   :  { %v2511_v59 = vmax.f32 %v12552_v23, 0.0  ;;  %9929 = vrot.lane.b32.xlu0 %v12450_v52, %s10691_s0  ;;  %v12600_v43 = vpop.permute.xlu1 %9764 }
 0x447   :  { %v17368_v29 = vmax.f32 %v12555_v25, 0.0  ;;  %v2411_v63 = vpop.f32.mrb[26].mxu1  ;;  %9994 = vrot.lane.b32.xlu1 %v12520_v1, %s10692_s28 }
 0x448   :  { %2541 = vst [vmem:[#allocation4 + $0x30] sm:$0xff] %v2511_v59  ;;  %v12566_v57 = vadd.f32 %v2411_v63, %v12214_v44  ;;  %v2413_v41 = vpop.f32.mrb[27].mxu1 }
 0x449   :  { %2542 = vst [vmem:[#allocation4 + $0x38] sm:$0xff] %v17368_v29  ;;  %v2414_v20 = vadd.f32 %v2413_v41, %v12214_v44 }
 0x44a   :  { %v17372_v55 = vmax.f32 %v12566_v57, 0.0  ;;  %9934 = vrot.lane.b32.xlu0 %v12450_v52, %s10692_s28  ;;  %v12608_v51 = vpop.permute.xlu1 %9769 }
 0x44b   :  { %v2522_v2 = vmax.f32 %v2414_v20, 0.0  ;;  %v2417_v15 = vpop.f32.mrb[28].mxu1  ;;  %9999 = vrot.lane.b32.xlu1 %v12520_v1, %s10697_s4 }
 0x44c   :  { %2551 = vst [vmem:[#allocation4 + $0x80] sm:$0xff] %v17372_v55  ;;  %v2418_v26 = vadd.f32 %v2417_v15, %v12222_v6  ;;  %v2419_v18 = vpop.f32.mrb[29].mxu1 }
 0x44d   :  { %2552 = vst [vmem:[#allocation4 + $0x88] sm:$0xff] %v2522_v2  ;;  %v2420_v4 = vadd.f32 %v2419_v18, %v12222_v6 }
 0x44e   :  { %v2531_v0 = vmax.f32 %v2418_v26, 0.0  ;;  %9939 = vrot.lane.b32.xlu0 %v12450_v52, %s10697_s4  ;;  %v12622_v48 = vpop.permute.xlu1 %9774 }
 0x44f   :  { %v2532_v60 = vmax.f32 %v2420_v4, 0.0  ;;  %10004 = vrot.lane.b32.xlu1 %v12520_v1, %s10698_s16 }
 0x450   :  { %2561 = vst [vmem:[#allocation4 + $0xd0] sm:$0xf] %v2531_v0  ;;  %v2589_v0 = vld [vmem:[#allocation4 + $0xc0] sm:$0xf] }
 0x451   :  { %2562 = vst [vmem:[#allocation4 + $0xd8] sm:$0xf] %v2532_v60 }
 0x452   :  { %9944 = vrot.lane.b32.xlu0 %v12450_v52, %s10698_s16  ;;  %v12634_v40 = vpop.permute.xlu1 %9779 }
 0x453   :  { %10009 = vrot.lane.b32.xlu1 %v12520_v1, %s10699_s17 }
 0x456   :  { %9949 = vrot.lane.b32.xlu0 %v12450_v52, %s10699_s17  ;;  %v12650_v24 = vpop.permute.xlu1 %9784 }
 0x457   :  { %10014 = vrot.lane.b32.xlu1 %v12520_v1, %s10700_s19 }
 0x45a   :  { %9954 = vrot.lane.b32.xlu0 %v12450_v52, %s10700_s19  ;;  %v12660_v34 = vpop.permute.xlu1 %9789 }
 0x45b   :  { %10019 = vrot.lane.b32.xlu1 %v12520_v1, %s10701_s8  ;;  %17643 = vst [vmem:[#allocation22_spill] sm:$0xff] %v12660_v34 }
 0x45e   :  { %9959 = vrot.lane.b32.xlu0 %v12450_v52, %s10701_s8 }
 0x45f   :  { %10024 = vrot.lane.b32.xlu1 %v12520_v1, %s10702_s20 }
 0x462   :  { %9964 = vrot.lane.b32.xlu0 %v12450_v52, %s10702_s20 }
 0x463   :  { %10079 = vrot.lane.b32.xlu1 %v12614_v17, %s10701_s8 }
 0x466   :  { %9969 = vrot.lane.b32.xlu0 %v12450_v52, %s10703_s21 }
 0x467   :  { %10089 = vrot.lane.b32.xlu1 %v12614_v17, %s10703_s21 }
 0x46a   :  { %9974 = vrot.lane.b32.xlu0 %v12520_v1, %s10689_s18 }
 0x46b   :  { %10099 = vrot.lane.b32.xlu1 %v12628_v30, %s10688_s6 }
 0x46e   :  { %10029 = vrot.lane.b32.xlu0 %v12520_v1, %s10703_s21 }
 0x46f   :  { %10104 = vrot.lane.b32.xlu1 %v12628_v30, %s10690_s27 }
 0x472   :  { %10034 = vrot.lane.b32.xlu0 %v12614_v17, %s10689_s18 }
 0x473   :  { %10109 = vrot.lane.b32.xlu1 %v12628_v30, %s10691_s0 }
 0x476   :  { %10039 = vrot.lane.b32.xlu0 %v12614_v17, %s10688_s6 }
 0x477   :  { %v2488_v52 = vpop.f32.mrb[30].mxu0  ;;  %10119 = vrot.lane.b32.xlu1 %v12628_v30, %s10697_s4 }
 0x478   :  { %v2489_v33 = vadd.f32 %v2488_v52, %v12205_v27  ;;  %v2490_v47 = vpop.f32.mrb[31].mxu0 }
 0x479   :  { %v2491_v58 = vadd.f32 %v2490_v47, %v12205_v27  ;;  %v12702_v47 = vpack.i.bf16 %v2510_v46, %v2589_v0  ;;  %v9756_v0 = vunpack.i.l.bf16 %v12584_v53 }
 0x47a   :  { %v2513_v21 = vmax.f32 %v2489_v33, 0.0  ;;  %10044 = vrot.lane.b32.xlu0 %v12614_v17, %s10690_s27 }
 0x47b   :  { %v2514_v37 = vmax.f32 %v2491_v58, 0.0  ;;  %v2494_v56 = vpop.f32.mrb[32].mxu0  ;;  %10129 = vrot.lane.b32.xlu1 %v12628_v30, %s10699_s17 }
 0x47c   :  { %2543 = vst [vmem:[#allocation4 + $0x40] sm:$0xff] %v2513_v21  ;;  %v2495_v62 = vadd.f32 %v2494_v56, %v12214_v44  ;;  %v2496_v7 = vpop.f32.mrb[33].mxu0  ;;  %v12668_v1 = vpop.permute.xlu0 %9794 }
 0x47d   :  { %2544 = vst [vmem:[#allocation4 + $0x48] sm:$0xff] %v2514_v37  ;;  %v2497_v36 = vadd.f32 %v2496_v7, %v12214_v44  ;;  %v12671_v19 = vpop.permute.xlu1 %9859 }
 0x47e   :  { %17644 = vst [vmem:[#allocation19_spill] sm:$0xff] %v12671_v19  ;;  %v2523_v27 = vmax.f32 %v2495_v62, 0.0  ;;  %10049 = vrot.lane.b32.xlu0 %v12614_v17, %s10691_s0  ;;  %v17367_v26 = vunpack.i.h.bf16 %v12671_v19  ;;  %v9736_v62 = vunpack.i.l.bf16 %v12504_v38 }
 0x47f   :  { %v2524_v63 = vmax.f32 %v2497_v36, 0.0  ;;  %v2500_v41 = vpop.f32.mrb[34].mxu0  ;;  %10139 = vrot.lane.b32.xlu1 %v12628_v30, %s10701_s8 }
 0x480   :  { %2553 = vst [vmem:[#allocation4 + $0x90] sm:$0xff] %v2523_v27  ;;  %v2501_v20 = vadd.f32 %v2500_v41, %v12222_v6  ;;  %v2502_v2 = vpop.f32.mrb[35].mxu0  ;;  %v12678_v15 = vpop.permute.xlu0 %9799  ;;  %v9741_v27 = vunpack.i.l.bf16 %v12533_v11 }
 0x481   :  { %2554 = vst [vmem:[#allocation4 + $0x98] sm:$0xff] %v2524_v63  ;;  %v2503_v44 = vadd.f32 %v2502_v2, %v12222_v6  ;;  %v9802_v18 = vunpack.i.h.bf16 %v12678_v15  ;;  %v12683_v4 = vpop.permute.xlu1 %9864  ;;  %v9746_v63 = vunpack.i.l.bf16 %v12547_v42 }
 0x482   :  { %v2533_v60 = vmax.f32 %v2501_v20, 0.0  ;;  %10054 = vrot.lane.b32.xlu0 %v12614_v17, %s10692_s28  ;;  %v17366_v14 = vunpack.i.h.bf16 %v12683_v4 }
 0x483   :  { %v2534_v31 = vmax.f32 %v2503_v44, 0.0  ;;  %v2834_v35 = vsel %vm17387_vm0, %v9802_v18, %v17367_v26  ;;  %10149 = vrot.lane.b32.xlu1 %v12628_v30, %s10703_s21  ;;  %v9751_v44 = vunpack.i.l.bf16 %v12568_v28 }
 0x484   :  { %2563 = vst [vmem:[#allocation4 + $0xe0] sm:$0xf] %v2533_v60  ;;  %v12694_v6 = vpop.permute.xlu0 %9804  ;;  %v2744_v58 = vmax.f32 %v2507_v22, %v2834_v35  ;;  %v17373_v35 = vunpack.i.h.bf16 %v12668_v1 }
 0x485   :  { %2564 = vst [vmem:[#allocation4 + $0xe8] sm:$0xf] %v2534_v31  ;;  %v9807_v52 = vunpack.i.h.bf16 %v12694_v6  ;;  %v12698_v33 = vpop.permute.xlu1 %9869 }
 0x486   :  { %10059 = vrot.lane.b32.xlu0 %v12614_v17, %s10697_s4  ;;  %v17365_v32 = vunpack.i.h.bf16 %v12698_v33 }
 0x487   :  { %v2981_v21 = vsel %vm17386_vm2, %v9807_v52, %v17366_v14  ;;  %10164 = vrot.lane.b32.xlu1 %v12702_v47, %s10690_s27  ;;  %v9801_v14 = vunpack.i.l.bf16 %v12678_v15  ;;  %v12821_v15 = vadd.s32 280, %v12264_v3 }
 0x488   :  { %v2891_v37 = vmax.f32 %v2744_v58, %v2981_v21  ;;  %v12715_v56 = vpop.permute.xlu0 %9809  ;;  %v9796_v58 = vunpack.i.l.bf16 %v12668_v1 }
 0x489   :  { %v9812_v61 = vunpack.i.h.bf16 %v12715_v56  ;;  %v12719_v22 = vpop.permute.xlu1 %9874 }
 0x48a   :  { %10064 = vrot.lane.b32.xlu0 %v12614_v17, %s10698_s16  ;;  %v17369_v41 = vunpack.i.h.bf16 %v12719_v22  ;;  %v2685_v54 = vsel %vm17389_vm1, %v9736_v62, %v9796_v58  ;;  %v12799_v62 = vadd.s32 408, %v12264_v3 }
 0x48b   :  { %v3128_v46 = vsel %vm17379_vm3, %v9812_v61, %v17365_v32  ;;  %10174 = vrot.lane.b32.xlu1 %v12702_v47, %s10692_s28 }
 0x48c   :  { %v3038_v7 = vmax.f32 %v2891_v37, %v3128_v46  ;;  %v12731_v36 = vpop.permute.xlu0 %9814  ;;  %v12758_v37 = vpack.i.bf16 %v2520_v16, %v2511_v59  ;;  %v12775_v59 = vadd.s32 256, %v12264_v3  ;;  %v9806_v16 = vunpack.i.l.bf16 %v12694_v6 }
 0x48d   :  { %v17376_v20 = vunpack.i.h.bf16 %v12731_v36  ;;  %v12737_v2 = vpop.permute.xlu1 %9879  ;;  %v2832_v46 = vsel %vm17387_vm0, %v9741_v27, %v9801_v14  ;;  %v9816_v5 = vunpack.i.l.bf16 %v12731_v36  ;;  %vm4609_vm11 = vcmp.eq.s32.totalorder %v12799_v62, %v12280_v50 }
 0x48e   :  { %10069 = vrot.lane.b32.xlu0 %v12614_v17, %s10699_s17  ;;  %v17374_v55 = vunpack.i.h.bf16 %v12737_v2  ;;  %vm4590_vm6 = vcmp.eq.s32.totalorder %v12775_v59, %v12280_v50  ;;  %v2980_v9 = vsel %vm17386_vm2, %v9806_v16, %v9807_v52  ;;  %v4450_v59 = vadd.s32 432, %v12264_v3 }
 0x48f   :  { %v3275_v21 = vsel %vm17380_vm4, %v17376_v20, %v17369_v41  ;;  %10184 = vrot.lane.b32.xlu1 %v12702_v47, %s10698_s16  ;;  %v2686_v41 = vsel %vm17389_vm1, %v9796_v58, %v17373_v35  ;;  %v12802_v58 = vadd.s32 272, %v12264_v3  ;;  %v2833_v35 = vsel %vm17387_vm0, %v9801_v14, %v9802_v18  ;;  %vm12916_vm1 = vmand %vm4590_vm6, %vm17400_vm9 }
 0x490   :  { %v3185_v26 = vmax.f32 %v3038_v7, %v3275_v21  ;;  %v12763_v29 = vpop.permute.xlu0 %9819  ;;  %v12778_v7 = vadd.s32 264, %v12264_v3  ;;  %v12781_v21 = vadd.s32 400, %v12264_v3  ;;  %v2743_v20 = vmax.f32 %v2506_v45, %v2686_v41 }
 0x491   :  { %v17375_v23 = vunpack.i.h.bf16 %v12763_v29  ;;  %v12769_v12 = vpop.permute.xlu1 %9884  ;;  %v12824_v18 = vadd.s32 416, %v12264_v3  ;;  %v2979_v14 = vsel %vm17386_vm2, %v9746_v63, %v9806_v16  ;;  %vm4592_vm14 = vcmp.eq.s32.totalorder %v12802_v58, %v12280_v50 }
 0x492   :  { %10074 = vrot.lane.b32.xlu0 %v12614_v17, %s10700_s19  ;;  %vm4591_vm15 = vcmp.eq.s32.totalorder %v12778_v7, %v12280_v50  ;;  %vm4608_vm10 = vcmp.eq.s32.totalorder %v12781_v21, %v12280_v50  ;;  %vm17653_vm0 = vcmask 982016   ;;  %vm17684_vm2 = vcmp.eq.s32.totalorder %v4450_v59, %v12280_v50 }
 0x493   :  { %v3423_v32 = vsel %vm17385_vm7, %v17375_v23, %v17374_v55  ;;  %10194 = vrot.lane.b32.xlu1 %v12702_v47, %s10700_s19  ;;  %v9811_v55 = vunpack.i.l.bf16 %v12715_v56  ;;  %v17377_v23 = vunpack.i.h.bf16 %v12769_v12  ;;  %v12857_v56 = vadd.s32 424, %v12264_v3 }
 0x494   :  { %v3332_v31 = vmax.f32 %v3185_v26, %v3423_v32  ;;  %v12796_v60 = vpop.permute.xlu0 %9824  ;;  %v2742_v32 = vmax.f32 %v2505_v8, %v2685_v54  ;;  %v2890_v54 = vmax.f32 %v2743_v20, %v2833_v35  ;;  %v4436_v59 = vadd.s32 320, %v12264_v3 }
 0x495   :  { %v17378_v27 = vunpack.i.h.bf16 %v12796_v60  ;;  %v12810_v26 = vpop.permute.xlu1 %9889  ;;  %v3126_v63 = vsel %vm17379_vm3, %v9751_v44, %v9811_v55  ;;  %v3127_v41 = vsel %vm17379_vm3, %v9811_v55, %v9812_v61  ;;  %v12860_v55 = vadd.s32 288, %v12264_v3 }
 0x496   :  { %17645 = vst [vmem:[#allocation20_spill] sm:$0xff] %v12810_v26  ;;  %10084 = vrot.lane.b32.xlu0 %v12614_v17, %s10702_s20  ;;  %v2889_v45 = vmax.f32 %v2742_v32, %v2832_v46  ;;  %v9821_v17 = vunpack.i.l.bf16 %v12763_v29  ;;  %v17381_v16 = vunpack.i.h.bf16 %v12810_v26  ;;  %v3273_v61 = vsel %vm17380_vm4, %v9756_v0, %v9816_v5 }
 0x497   :  { %v3571_v8 = vsel %vm17390_vm13, %v17378_v27, %v17377_v23  ;;  %10204 = vrot.lane.b32.xlu1 %v12702_v47, %s10702_s20  ;;  %v17646_v44 = vunpack.i.h.bf16 %v12731_v36  ;;  %v9826_v46 = vunpack.i.l.bf16 %v12796_v60  ;;  %vm4593_vm3 = vcmp.eq.s32.totalorder %v12821_v15, %v12280_v50 }
 0x498   :  { %v3480_v6 = vmax.f32 %v3332_v31, %v3571_v8  ;;  %v9830_v52 = vpop.permute.xlu0 %9829  ;;  %v3036_v20 = vmax.f32 %v2889_v45, %v2979_v14  ;;  %v3037_v31 = vmax.f32 %v2890_v54, %v2980_v9  ;;  %v17648_v0 = vunpack.i.l.bf16 %v12592_v10 }
 0x499   :  { %v9832_v23 = vunpack.i.h.bf16 %v9830_v52  ;;  %v12848_v27 = vpop.permute.xlu1 %9894  ;;  %v3274_v35 = vsel %vm17380_vm4, %v9816_v5, %v17646_v44  ;;  %vm17393_vm4 = vcmask 957440   ;;  %v17649_v45 = vunpack.i.h.bf16 %v12763_v29 }
 0x49a   :  { %10094 = vrot.lane.b32.xlu0 %v12628_v30, %s10689_s18  ;;  %v3183_v14 = vmax.f32 %v3036_v20, %v3126_v63  ;;  %v3184_v9 = vmax.f32 %v3037_v31, %v3127_v41  ;;  %v3421_v36 = vsel %vm17385_vm7, %v17648_v0, %v9821_v17  ;;  %v9831_v44 = vunpack.i.l.bf16 %v9830_v52 }
 0x49b   :  { %v3718_v32 = vsel %vm17647_vm12, %v9832_v23, %v17381_v16  ;;  %10209 = vrot.lane.b32.xlu1 %v12702_v47, %s10703_s21  ;;  %v3422_v54 = vsel %vm17385_vm7, %v9821_v17, %v17649_v45  ;;  %v17388_v16 = vunpack.i.h.bf16 %v12848_v27  ;;  %vm4610_vm12 = vcmp.eq.s32.totalorder %v12824_v18, %v12280_v50 }
 0x49c   :  { %v3628_v8 = vmax.f32 %v3480_v6, %v3718_v32  ;;  %v9835_v5 = vpop.permute.xlu0 %9834  ;;  %v3330_v26 = vmax.f32 %v3183_v14, %v3273_v61  ;;  %v3331_v63 = vmax.f32 %v3184_v9, %v3274_v35  ;;  %v12890_v6 = vadd.s32 296, %v12264_v3 }
 0x49d   :  { %v9837_v49 = vunpack.i.h.bf16 %v9835_v5  ;;  %v12883_v39 = vpop.permute.xlu1 %9899  ;;  %v17650_v29 = vunpack.i.l.bf16 %v12600_v43  ;;  %v9836_v52 = vunpack.i.l.bf16 %v9835_v5  ;;  %vm4611_vm7 = vcmp.eq.s32.totalorder %v12857_v56, %v12280_v50 }
 0x49e   :  { %10114 = vrot.lane.b32.xlu0 %v12628_v30, %s10692_s28  ;;  %v3478_v20 = vmax.f32 %v3330_v26, %v3421_v36  ;;  %v3479_v31 = vmax.f32 %v3331_v63, %v3422_v54  ;;  %v17651_v61 = vunpack.i.h.bf16 %v12796_v60  ;;  %v17652_v9 = vunpack.i.l.bf16 %v12608_v51 }
 0x49f   :  { %v3569_v17 = vsel %vm17390_vm13, %v17650_v29, %v9826_v46  ;;  %v3866_v41 = vsel %vm17391_vm5, %v9837_v49, %v17388_v16  ;;  %10219 = vrot.lane.b32.xlu1 %v12758_v37, %s10688_s6  ;;  %v17397_v5 = vunpack.i.h.bf16 %v12883_v39  ;;  %vm4594_vm6 = vcmp.eq.s32.totalorder %v12860_v55, %v12280_v50 }
 0x4a0   :  { %v3570_v35 = vsel %vm17390_vm13, %v9826_v46, %v17651_v61  ;;  %v3775_v32 = vmax.f32 %v3628_v8, %v3866_v41  ;;  %v9840_v14 = vpop.permute.xlu0 %9839  ;;  %v3716_v0 = vsel %vm17653_vm0, %v17652_v9, %v9831_v44  ;;  %v3626_v26 = vmax.f32 %v3478_v20, %v3569_v17  ;;  %vm17657_vm13 = vmmov %vm17653_vm0 }
 0x4a1   :  { %v9842_v45 = vunpack.i.h.bf16 %v9840_v14  ;;  %v9841_v29 = vunpack.i.l.bf16 %v9840_v14  ;;  %v12909_v16 = vpop.permute.xlu1 %9909  ;;  %v3717_v46 = vsel %vm17657_vm13, %v9831_v44, %v9832_v23  ;;  %vm12928_vm0 = vmand %vm4591_vm15, %vm17400_vm9  ;;  %v3627_v8 = vmax.f32 %v3479_v31, %v3570_v35 }
 0x4a2   :  { %17654 = vst [vmem:[#allocation21_spill] sm:$0xff] %v12909_v16  ;;  %10124 = vrot.lane.b32.xlu0 %v12628_v30, %s10698_s16  ;;  %v17660_v23 = vunpack.i.l.bf16 %v12622_v48  ;;  %vm12948_vm13 = vmand %vm4608_vm10, %vm17400_vm9  ;;  %v4451_v63 = vadd.s32 440, %v12264_v3  ;;  %v3773_v17 = vmax.f32 %v3626_v26, %v3716_v0  ;;  %v3865_v41 = vsel %vm17391_vm5, %v9836_v52, %v9837_v49 }
 0x4a3   :  { %v4014_v44 = vsel %vm17392_vm8, %v9842_v45, %v17397_v5  ;;  %10229 = vrot.lane.b32.xlu1 %v12758_v37, %s10691_s0  ;;  %vm12963_vm15 = vmand %vm4609_vm11, %vm17400_vm9  ;;  %vm4595_vm10 = vcmp.eq.s32.totalorder %v12890_v6, %v12280_v50  ;;  %v3774_v61 = vmax.f32 %v3627_v8, %v3717_v46  ;;  %v17665_v35 = vunpack.i.l.bf16 %v12634_v40 }
 0x4a4   :  { %v3864_v54 = vsel %vm17391_vm5, %v17660_v23, %v9836_v52  ;;  %v12954_v20 = vmax.f32 %v3775_v32, %v4014_v44  ;;  %v12956_v31 = vpop.permute.xlu0 %9844  ;;  %vm12981_vm11 = vmand %vm4592_vm14, %vm17400_vm9  ;;  %v4013_v0 = vsel %vm17392_vm8, %v9841_v29, %v9842_v45  ;;  %v4434_v26 = vadd.s32 304, %v12264_v3 }
 0x4a5   :  { %v4012_v49 = vsel %vm17392_vm8, %v17665_v35, %v9841_v29  ;;  %v9847_v52 = vunpack.i.h.bf16 %v12956_v31  ;;  %v9846_v32 = vunpack.i.l.bf16 %v12956_v31  ;;  %v12974_v14 = vpop.permute.xlu1 %9919  ;;  %v3921_v9 = vmax.f32 %v3773_v17, %v3864_v54  ;;  %vm12997_vm14 = vmand %vm4593_vm3, %vm17400_vm9 }
 0x4a6   :  { %17666 = vst [vmem:[#allocation24_spill] sm:$0xff] %v12974_v14  ;;  %10134 = vrot.lane.b32.xlu0 %v12628_v30, %s10700_s19  ;;  %v4435_v45 = vadd.s32 312, %v12264_v3  ;;  %v3922_v29 = vmax.f32 %v3774_v61, %v3865_v41  ;;  %v17671_v46 = vunpack.i.l.bf16 %v12650_v24  ;;  %vm13017_vm8 = vmand %vm4610_vm12, %vm17400_vm9  ;;  %v17672_v15 = vmov 0 }
 0x4a7   :  { %10239 = vrot.lane.b32.xlu1 %v12758_v37, %s10697_s4  ;;  %v17673_v15 = vsel %vm13017_vm8, 4294967295, %v17672_v15  ;;  %v4069_v23 = vmax.f32 %v3921_v9, %v4012_v49  ;;  %v4161_v44 = vsel %vm17393_vm4, %v9846_v32, %v9847_v52  ;;  %vm13031_vm3 = vmand %vm4611_vm7, %vm17400_vm9  ;;  %v17674_v18 = vmov 0 }
 0x4a8   :  { %v4160_v8 = vsel %vm17393_vm4, %v17671_v46, %v9846_v32  ;;  %v9850_v54 = vpop.permute.xlu0 %9849  ;;  %v17675_v18 = vsel %vm13031_vm3, 4294967295, %v17674_v18  ;;  %v4452_v17 = vadd.s32 448, %v12264_v3  ;;  %v4453_v41 = vadd.s32 456, %v12264_v3  ;;  %vm13045_vm7 = vmand %vm4594_vm6, %vm17400_vm9 }
 0x4a9   :  { %v17394_v61 = vunpack.i.h.bf16 %v12909_v16  ;;  %v9852_v35 = vunpack.i.h.bf16 %v9850_v54  ;;  %v9851_v49 = vunpack.i.l.bf16 %v9850_v54  ;;  %v13038_v9 = vpop.permute.xlu1 %9924  ;;  %v4070_v32 = vmax.f32 %v3922_v29, %v4013_v0  ;;  %vm13060_vm4 = vmand %vm4595_vm10, %vm17400_vm9 }
 0x4aa   :  { %v17676_v56 = vmov 0  ;;  %v4217_v46 = vmax.f32 %v4069_v23, %v4160_v8  ;;  %10144 = vrot.lane.b32.xlu0 %v12628_v30, %s10702_s20  ;;  %v17678_v55 = vmov 0  ;;  %v17680_v30 = vunpack.i.l.bf16 %v12660_v34 }
 0x4ab   :  { %v17677_v56 = vsel %vm13045_vm7, 4294967295, %v17676_v56  ;;  %v17679_v55 = vsel %vm13060_vm4, 4294967295, %v17678_v55  ;;  %vm17681_vm5 = vcmask 949248   ;;  %10249 = vrot.lane.b32.xlu1 %v12758_v37, %s10699_s17  ;;  %v4218_v6 = vmax.f32 %v4070_v32, %v4161_v44  ;;  %vm17710_vm4 = vmpackc.low %vm12963_vm15, %vm12948_vm13 }
 0x4ac   :  { %v4308_v0 = vsel %vm17681_vm5, %v17680_v30, %v9851_v49  ;;  %vm17682_vm12 = vmmov %vm17681_vm5  ;;  %vm17694_vm3 = vcmp.eq.s32.totalorder %v4435_v45, %v12280_v50  ;;  %vm17699_vm6 = vcmp.eq.s32.totalorder %v4452_v17, %v12280_v50  ;;  %v17700_v45 = vmov 0 }
 0x4ad   :  { %v4310_v29 = vsel %vm17682_vm12, %v9852_v35, %v17394_v61  ;;  %vm17683_vm10 = vmmov %vm17681_vm5  ;;  %v4365_v30 = vmax.f32 %v4217_v46, %v4308_v0  ;;  %v13088_v61 = vpop.permute.xlu0 %9854  ;;  %vm17688_vm12 = vcmp.eq.s32.totalorder %v4451_v63, %v12280_v50  ;;  %v4437_v63 = vadd.s32 328, %v12264_v3 }
 0x4ae   :  { %v4309_v8 = vsel %vm17683_vm10, %v9851_v49, %v9852_v35  ;;  %vm13083_vm5 = vmand %vm17684_vm2, %vm17400_vm9  ;;  %v4071_v54 = vmax.f32 %v12954_v20, %v4310_v29  ;;  %17687 = vst [vmem:[#allocation25_spill] sm:$0xff] %v13088_v61  ;;  %v17399_v35 = vunpack.i.h.bf16 %v13088_v61  ;;  %v13101_v49 = vpop.permute.xlu1 %9979  ;;  %vm17691_vm2 = vcmp.eq.s32.totalorder %v4434_v26, %v12280_v50  ;;  %10154 = vrot.lane.b32.xlu0 %v12702_v47, %s10689_s18 }
 0x4af   :  { %vm13094_vm10 = vmand %vm17688_vm12, %vm17400_vm9  ;;  %v4366_v20 = vmax.f32 %v4218_v6, %v4309_v8  ;;  %v4454_v46 = vadd.s32 464, %v12264_v3  ;;  %v17697_v0 = vunpack.i.h.bf16 %v12668_v1  ;;  %vm17698_vm12 = vcmask 1039360   ;;  %10269 = vrot.lane.b32.xlu1 %v12758_v37, %s10703_s21  ;;  %v2590_v8 = vld [vmem:[#allocation4 + $0xc8] sm:$0xf] }
 0x4b0   :  { %vm13107_vm8 = vmand %vm17691_vm2, %vm17400_vm9  ;;  %v4455_v6 = vadd.s32 472, %v12264_v3  ;;  %v4438_v17 = vadd.s32 336, %v12264_v3  ;;  %vm17713_vm13 = vcmp.lt.s32.totalorder %v12266_v13, 91  ;;  %vm17714_vm15 = vcmp.eq.s32.totalorder %v4436_v59, %v12280_v50 }
 0x4b1   :  { %vm13123_vm2 = vmand %vm17694_vm3, %vm17400_vm9  ;;  %v2687_v29 = vsel %vm17698_vm12, %v17697_v0, %v17399_v35  ;;  %5112 = vmatprep.mubr.f32.mxu1 %v4366_v20  ;;  %v13146_v1 = vpop.permute.xlu0 %9904  ;;  %vm17704_vm12 = vcmp.eq.s32.totalorder %v4453_v41, %v12280_v50  ;;  %v4439_v41 = vadd.s32 344, %v12264_v3  ;;  %v4456_v21 = vadd.s32 480, %v12264_v3 }
 0x4b2   :  { %vm13139_vm3 = vmand %vm17699_vm6, %vm17400_vm9  ;;  %v13144_v5 = vmax.f32 %v4071_v54, %v2687_v29  ;;  %5113 = vmatmul.mubr.f32.vlgmr.msra.gmra.mrb[30].mxu1 %v4365_v30  ;;  %17703 = vst [vmem:[#allocation26_spill] sm:$0xff] %v13146_v1  ;;  %v17402_v0 = vunpack.i.h.bf16 %v13146_v1  ;;  %v13159_v35 = vpop.permute.xlu1 %9984  ;;  %v17707_v54 = vmax.f32 %v12566_v57, 0.0  ;;  %v17708_v29 = vmov 1.0|1.0   ;;  %10159 = vrot.lane.b32.xlu0 %v12702_v47, %s10688_s6  ;;  %v10531_v1 = vld [vmem:[#allocation4 + $0x58] sm:$0xff] }
 0x4b3   :  { %v17701_v45 = vsel %vm13139_vm3, 4294967295, %v17700_v45  ;;  %vm13152_vm7 = vmand %vm17704_vm12, %vm17400_vm9  ;;  %vm4599_vm9 = vcmp.eq.s32.totalorder %v4437_v63, %v12280_v50  ;;  %v9737_v57 = vunpack.i.h.bf16 %v12504_v38  ;;  %vm4617_vm6 = vcmp.eq.s32.totalorder %v4455_v6, %v12280_v50 }
 0x4b4   :  { %17702 = vst [vmem:[#allocation23_spill] sm:$0xff] %v13144_v5  ;;  %v13163_v30 = vpack.i.bf16 %v2590_v8, %v17707_v54  ;;  %vm17709_vm12 = vmpackc.low %vm12928_vm0, %vm12916_vm1  ;;  %vm4616_vm0 = vcmp.eq.s32.totalorder %v4454_v46, %v12280_v50  ;;  %v4457_v62 = vadd.s32 488, %v12264_v3  ;;  %v4440_v6 = vadd.s32 352, %v12264_v3 }
 0x4b5   :  { %9027 = vmatpush3.bf16.msk.msra.mxu1 %vm17709_vm12, %v17708_v29  ;;  %vm17711_vm12 = vcmask 957440   ;;  %vm13209_vm1 = vmand %vm17714_vm15, %vm17713_vm13  ;;  %v17735_v60 = vmax.f32 %v12555_v25, 0.0  ;;  %v9861_v8 = vunpack.i.l.bf16 %v12671_v19  ;;  %v4458_v25 = vadd.s32 496, %v12264_v3  ;;  %v10530_v19 = vld [vmem:[#allocation4 + $0x50] sm:$0xff] }
 0x4b6   :  { %9029 = vmatprep.subr.msk.bf16.mxu1 %vm17710_vm4, %v17708_v29  ;;  %v13197_v36 = vsel %vm17711_vm12, %v9847_v52, %v17402_v0  ;;  %10279 = vrot.lane.b32.xlu1 %v13163_v30, %s10688_s6  ;;  %v13218_v52 = vpop.permute.xlu0 %9914  ;;  %vm17718_vm12 = vmmov %vm17713_vm13  ;;  %v2591_v0 = vld [vmem:[#allocation4 + $0xd0] sm:$0xf]  ;;  %v13231_v31 = vpop.permute.xlu1 %9989  ;;  %vm4601_vm13 = vcmp.eq.s32.totalorder %v4439_v41, %v12280_v50  ;;  %v13344_v23 = vadd.s32 368, %v12264_v3  ;;  %v9922_v44 = vunpack.i.h.bf16 %v12974_v14 }
 0x4b7   :  { %17712 = vst [vmem:[#allocation27_spill] sm:$0xff] %v13197_v36  ;;  %17717 = vst [vmem:[#allocation28_spill] sm:$0xff] %v13218_v52  ;;  %10169 = vrot.lane.b32.xlu0 %v12702_v47, %s10691_s0  ;;  %v9917_v54 = vunpack.i.h.bf16 %v13218_v52  ;;  %v4441_v36 = vadd.s32 360, %v12264_v3  ;;  %v9927_v58 = vunpack.i.h.bf16 %v13038_v9  ;;  %v9986_v20 = vunpack.i.l.bf16 %v13159_v35 }
 0x4b8   :  { %vm13224_vm4 = vmand %vm4599_vm9, %vm17718_vm12  ;;  %v17786_v63 = vunpack.i.l.bf16 %v12683_v4  ;;  %v17818_v32 = vunpack.i.h.bf16 %v12584_v53  ;;  %v17822_v53 = vunpack.i.l.bf16 %v12737_v2 }
 0x4b9   :  { %vm17721_vm15 = vmpackc.low %vm12997_vm14, %vm12981_vm11  ;;  %vm17725_vm11 = vnez %v17675_v18  ;;  %vm17726_vm14 = vnez %v17673_v15  ;;  %v17733_v15 = vmov 0  ;;  %v13289_v18 = vpack.i.bf16 %v17735_v60, %v2591_v0 }
 0x4ba   :  { %9031 = vmatpush3.bf16.msk.msra.mxu1 %vm17721_vm15, %v17708_v29  ;;  %vm17722_vm9 = vmmov %vm17718_vm12  ;;  %10284 = vrot.lane.b32.xlu1 %v13163_v30, %s10690_s27  ;;  %v13285_v7 = vpop.permute.xlu0 %9929  ;;  %v13302_v5 = vpop.permute.xlu1 %9994  ;;  %v17745_v60 = vunpack.i.l.bf16 %v13218_v52 }
 0x4bb   :  { %vm13243_vm12 = vmand %vm4616_vm0, %vm17722_vm9  ;;  %17739 = vst [vmem:[#allocation29_spill] sm:$0xff] %v13302_v5  ;;  %10179 = vrot.lane.b32.xlu0 %v12702_v47, %s10697_s4 }
 0x4bc   :  { %vm17727_vm0 = vmpackc.low %vm17725_vm11, %vm17726_vm14  ;;  %vm17732_vm14 = vcmp.eq.s32.totalorder %v4438_v17, %v12280_v50  ;;  %v17419_v17 = vunpack.i.h.bf16 %v13302_v5 }
 0x4bd   :  { %9033 = vmatprep.subr.msk.bf16.mxu1 %vm17727_vm0, %v17708_v29  ;;  %vm17728_vm15 = vmmov %vm17722_vm9 }
 0x4be   :  { %vm13264_vm9 = vmand %vm4617_vm6, %vm17728_vm15  ;;  %10289 = vrot.lane.b32.xlu1 %v13163_v30, %s10691_s0  ;;  %v13348_v0 = vpop.permute.xlu0 %9934  ;;  %v13365_v52 = vpop.permute.xlu1 %9999 }
 0x4bf   :  { %vm17731_vm11 = vmmov %vm17728_vm15  ;;  %10189 = vrot.lane.b32.xlu0 %v12702_v47, %s10699_s17 }
 0x4c0   :  { %vm13278_vm0 = vmand %vm17732_vm14, %vm17731_vm11  ;;  %vm17741_vm14 = vnez %v17677_v56  ;;  %v4459_v56 = vadd.s32 504, %v12264_v3 }
 0x4c1   :  { %v17734_v15 = vsel %vm13278_vm0, 4294967295, %v17733_v15  ;;  %vm17736_vm6 = vmmov %vm17731_vm11  ;;  %vm17740_vm11 = vnez %v17679_v55 }
 0x4c2   :  { %vm13295_vm15 = vmand %vm4601_vm13, %vm17736_vm6  ;;  %vm17744_vm13 = vcmask 1039360   ;;  %10299 = vrot.lane.b32.xlu1 %v13163_v30, %s10697_s4  ;;  %v13439_v34 = vpop.permute.xlu1 %10004 }
 0x4c3   :  { %vm17742_vm3 = vmpackc.low %vm17740_vm11, %vm17741_vm14  ;;  %vm4619_vm14 = vcmp.eq.s32.totalorder %v4457_v62, %v12280_v50  ;;  %v2694_v55 = vsel %vm17744_vm13, %v9917_v54, %v9737_v57  ;;  %v9981_v54 = vunpack.i.l.bf16 %v13101_v49  ;;  %17772 = vst [vmem:[#allocation30_spill] sm:$0xff] %v13439_v34  ;;  %10199 = vrot.lane.b32.xlu0 %v12702_v47, %s10701_s8 }
 0x4c4   :  { %9035 = vmatpush3.bf16.msk.msra.mxu1 %vm17742_vm3, %v17708_v29  ;;  %vm17743_vm3 = vmpackc.low %vm13094_vm10, %vm13083_vm5  ;;  %vm4602_vm10 = vcmp.eq.s32.totalorder %v4440_v6, %v12280_v50  ;;  %vm4620_vm5 = vcmp.eq.s32.totalorder %v4458_v25, %v12280_v50  ;;  %v2752_v16 = vmax.f32 %v10530_v19, %v2694_v55  ;;  %v17769_v6 = vunpack.i.l.bf16 %v12974_v14 }
 0x4c5   :  { %9037 = vmatprep.subr.msk.bf16.mxu1 %vm17743_vm3, %v17708_v29  ;;  %vm17746_vm6 = vmmov %vm17744_vm13  ;;  %vm17747_vm13 = vcmp.lt.s32.totalorder %v12266_v13, 91  ;;  %v9991_v25 = vunpack.i.l.bf16 %v13231_v31 }
 0x4c6   :  { %v2695_v41 = vsel %vm17746_vm6, %v9737_v57, %v17745_v60  ;;  %vm17748_vm6 = vcmp.eq.s32.totalorder %v4456_v21, %v12280_v50  ;;  %v13360_v60 = vadd.s32 376, %v12264_v3  ;;  %10309 = vrot.lane.b32.xlu1 %v13163_v30, %s10699_s17  ;;  %v17420_v21 = vunpack.i.l.bf16 %v13348_v0 }
 0x4c7   :  { %vm13354_vm3 = vmand %vm17748_vm6, %vm17747_vm13  ;;  %vm17752_vm6 = vcmp.lt.s32.totalorder %v12266_v13, 91  ;;  %v2753_v26 = vmax.f32 %v10531_v1, %v2695_v41  ;;  %v13417_v41 = vpop.permute.xlu0 %9939  ;;  %v17767_v1 = vunpack.i.h.bf16 %v12533_v11  ;;  %v4477_v11 = vadd.s32 648, %v12264_v3  ;;  %10214 = vrot.lane.b32.xlu0 %v12758_v37, %s10689_s18 }
 0x4c8   :  { %vm17751_vm13 = vmpackc.low %vm13123_vm2, %vm13107_vm8  ;;  %vm17755_vm8 = vnez %v17701_v45 }
 0x4c9   :  { %9039 = vmatpush3.bf16.msk.msra.mxu1 %vm17751_vm13, %v17708_v29  ;;  %vm13377_vm11 = vmand %vm4619_vm14, %vm17752_vm6  ;;  %v17770_v19 = vmov %v17767_v1 }
 0x4ca   :  { %vm17756_vm2 = vmpackc.low %vm13152_vm7, %vm17755_vm8  ;;  %vm17761_vm8 = vcmp.eq.s32.totalorder %v4441_v36, %v12280_v50  ;;  %v4476_v36 = vadd.s32 640, %v12264_v3  ;;  %10319 = vrot.lane.b32.xlu1 %v13163_v30, %s10701_s8 }
 0x4cb   :  { %9041 = vmatprep.subr.msk.bf16.mxu1 %vm17756_vm2, %v17708_v29  ;;  %vm17757_vm14 = vmmov %vm17752_vm6  ;;  %10224 = vrot.lane.b32.xlu0 %v12758_v37, %s10690_s27 }
 0x4cc   :  { %vm13395_vm13 = vmand %vm4602_vm10, %vm17757_vm14  ;;  %vm4604_vm10 = vcmp.eq.s32.totalorder %v13344_v23, %v12280_v50  ;;  %vm17764_vm14 = vcmask 1031168  }
 0x4cd   :  { %vm17760_vm7 = vmmov %vm17752_vm6  ;;  %v2850_v62 = vsel %vm17764_vm14, %v9861_v8, %v9981_v54 }
 0x4ce   :  { %vm13409_vm2 = vmand %vm17761_vm8, %vm17760_vm7  ;;  %10329 = vrot.lane.b32.xlu1 %v13163_v30, %s10703_s21 }
 0x4cf   :  { %vm13423_vm0 = vmand %vm4620_vm5, %vm17752_vm6  ;;  %10234 = vrot.lane.b32.xlu0 %v12758_v37, %s10692_s28 }
 0x4d0   :  { %vm17768_vm8 = vmmov %vm17764_vm14 }
 0x4d1   :  { %v2841_v8 = vsel %vm17768_vm8, %v9922_v44, %v17767_v1  ;;  %vm17771_vm14 = vmmov %vm17768_vm8  ;;  %vm17774_vm8 = vcmp.eq.s32.totalorder %v4459_v56, %v12280_v50  ;;  %v17781_v56 = vunpack.i.l.bf16 %v13038_v9 }
 0x4d2   :  { %v2842_v61 = vsel %vm17771_vm14, %v17770_v19, %v17769_v6  ;;  %vm17773_vm5 = vmpackc.low %vm13224_vm4, %vm13209_vm1  ;;  %v17777_v19 = vld [vmem:[#allocation20_spill] sm:$0xff]  ;;  %v17778_v6 = vunpack.i.h.bf16 %v12547_v42  ;;  %vm17779_vm14 = vcmask 1022976   ;;  %v2899_v14 = vmax.f32 %v2752_v16, %v2841_v8  ;;  %10344 = vrot.lane.b32.xlu1 %v13289_v18, %s10690_s27 }
 0x4d3   :  { %9043 = vmatpush3.bf16.msk.msra.mxu1 %vm17773_vm5, %v17708_v29  ;;  %vm13451_vm7 = vmand %vm17774_vm8, %vm17752_vm6  ;;  %v2900_v38 = vmax.f32 %v2753_v26, %v2842_v61  ;;  %v17784_v26 = vunpack.i.h.bf16 %v13101_v49  ;;  %vm17785_vm6 = vcmask 1031168   ;;  %v17788_v42 = vunpack.i.h.bf16 %v13159_v35  ;;  %10244 = vrot.lane.b32.xlu0 %v12758_v37, %s10698_s16 }
 0x4d4   :  { %v2988_v59 = vsel %vm17779_vm14, %v9927_v58, %v17778_v6  ;;  %vm17780_vm1 = vmpackc.low %vm13264_vm9, %vm13243_vm12  ;;  %v17782_v16 = vmov %v17778_v6  ;;  %v10532_v58 = vld [vmem:[#allocation4 + $0xa0] sm:$0xf]  ;;  %v17418_v6 = vunpack.i.h.bf16 %v13231_v31 }
 0x4d5   :  { %9045 = vmatprep.subr.msk.bf16.mxu1 %vm17780_vm1, %v17708_v29  ;;  %vm9048_vm4 = vmpackc.low %vm13377_vm11, %vm13354_vm3  ;;  %v2762_v47 = vmax.f32 %v10532_v58, %v2850_v62  ;;  %v2851_v46 = vsel %vm17785_vm6, %v9981_v54, %v17784_v26  ;;  %v9932_v54 = vunpack.i.h.bf16 %v13285_v7  ;;  %vm4638_vm1 = vcmp.eq.s32.totalorder %v4476_v36, %v12280_v50 }
 0x4d6   :  { %vm17783_vm5 = vmmov %vm17779_vm14  ;;  %vm17793_vm6 = vnez %v17734_v15  ;;  %v3046_v1 = vmax.f32 %v2899_v14, %v2988_v59  ;;  %v9937_v59 = vunpack.i.h.bf16 %v13348_v0  ;;  %10354 = vrot.lane.b32.xlu1 %v13289_v18, %s10692_s28 }
 0x4d7   :  { %v2989_v61 = vsel %vm17783_vm5, %v17782_v16, %v17781_v56  ;;  %vm17787_vm12 = vmmov %vm17783_vm5  ;;  %v13494_v56 = vpop.permute.xlu0 %9944  ;;  %v17790_v16 = vunpack.i.l.bf16 %v12698_v33  ;;  %10254 = vrot.lane.b32.xlu0 %v12758_v37, %s10700_s19 }
 0x4d8   :  { %v2997_v8 = vsel %vm17787_vm12, %v17786_v63, %v9986_v20  ;;  %vm9050_vm9 = vmpackc.low %vm13409_vm2, %vm13395_vm13  ;;  %v13506_v63 = vpop.permute.xlu1 %10009  ;;  %v3047_v26 = vmax.f32 %v2900_v38, %v2989_v61  ;;  %v17806_v61 = vunpack.i.h.bf16 %v12568_v28  ;;  %v9947_v44 = vunpack.i.h.bf16 %v13494_v56 }
 0x4d9   :  { %vm17789_vm8 = vmmov %vm17783_vm5  ;;  %vm17791_vm5 = vcmask 1014784   ;;  %17792 = vst [vmem:[#allocation20_spill] sm:$0xff] %v13506_v63  ;;  %v17425_v55 = vunpack.i.l.bf16 %v13494_v56 }
 0x4da   :  { %v2998_v62 = vsel %vm17789_vm8, %v9986_v20, %v17788_v42  ;;  %v3144_v58 = vsel %vm17791_vm5, %v17790_v16, %v9991_v25  ;;  %v9996_v20 = vunpack.i.l.bf16 %v13302_v5  ;;  %vm17794_vm12 = vmpackc.low %vm13295_vm15, %vm17793_vm6  ;;  %vm17795_vm8 = vcmp.lt.s32.totalorder %v12266_v13, 91  ;;  %10364 = vrot.lane.b32.xlu1 %v13289_v18, %s10698_s16 }
 0x4db   :  { %9047 = vmatpush3.bf16.msk.msra.mxu1 %vm17794_vm12, %v17708_v29  ;;  %vm13519_vm14 = vmand %vm4604_vm10, %vm17795_vm8  ;;  %vm4639_vm5 = vcmp.eq.s32.totalorder %v4477_v11, %v12280_v50  ;;  %v2909_v16 = vmax.f32 %v2762_v47, %v2997_v8  ;;  %vm17799_vm10 = vcmp.eq.s32.totalorder %v13360_v60, %v12280_v50  ;;  %v2910_v23 = vmax.f32 %v2998_v62, %v2851_v46  ;;  %v13562_v8 = vpop.permute.xlu0 %9949 }
 0x4dc   :  { %9049 = vmatprep.subr.msk.bf16.mxu1 %vm9048_vm4, %v17708_v29  ;;  %vm17798_vm15 = vmmov %vm17795_vm8  ;;  %vm17805_vm4 = vcmask 1014784   ;;  %v10001_v46 = vunpack.i.l.bf16 %v13365_v52  ;;  %v17810_v62 = vunpack.i.l.bf16 %v13285_v7  ;;  %v13582_v15 = vpop.permute.xlu1 %10014  ;;  %10259 = vrot.lane.b32.xlu0 %v12758_v37, %s10701_s8 }
 0x4dd   :  { %vm13538_vm6 = vmand %vm17799_vm10, %vm17798_vm15  ;;  %v3056_v60 = vmax.f32 %v2909_v16, %v3144_v58  ;;  %v3145_v38 = vsel %vm17805_vm4, %v9991_v25, %v17418_v6  ;;  %v17811_v25 = vmov %v17806_v61  ;;  %vm17814_vm10 = vcmask 1006592   ;;  %17815 = vst [vmem:[#allocation31_spill] sm:$0xff] %v13582_v15 }
 0x4de   :  { %vm17802_vm11 = vmmov %vm17795_vm8  ;;  %v17427_v6 = vunpack.i.l.bf16 %v13417_v41  ;;  %10374 = vrot.lane.b32.xlu1 %v13289_v18, %s10700_s19 }
 0x4df   :  { %vm13551_vm3 = vmand %vm4638_vm1, %vm17802_vm11  ;;  %9051 = vmatpush3.bf16.msk.msra.mxu1 %vm9050_vm9, %v17708_v29 }
 0x4e0   :  { %vm17807_vm12 = vmmov %vm17805_vm4  ;;  %10264 = vrot.lane.b32.xlu0 %v12758_v37, %s10702_s20 }
 0x4e1   :  { %v3135_v47 = vsel %vm17807_vm12, %v9932_v54, %v17806_v61  ;;  %vm13568_vm1 = vmand %vm4639_vm5, %vm17795_vm8  ;;  %v17813_v54 = vunpack.i.l.bf16 %v12719_v22  ;;  %v9942_v61 = vunpack.i.h.bf16 %v13417_v41  ;;  %vm17830_vm8 = vcmask 990208  }
 0x4e2   :  { %vm17812_vm15 = vmmov %vm17805_vm4  ;;  %v3193_v11 = vmax.f32 %v3046_v1, %v3135_v47  ;;  %v17820_v1 = vmov %v17818_v32  ;;  %v17421_v47 = vunpack.i.h.bf16 %v13365_v52  ;;  %10384 = vrot.lane.b32.xlu1 %v13289_v18, %s10702_s20 }
 0x4e3   :  { %v3136_v58 = vsel %vm17812_vm15, %v17811_v25, %v17810_v62  ;;  %v3291_v16 = vsel %vm17814_vm10, %v17813_v54, %v9996_v20  ;;  %vm17816_vm5 = vmmov %vm17814_vm10  ;;  %v13626_v54 = vpop.permute.xlu0 %9954  ;;  %vm17842_vm10 = vcmask 973824  }
 0x4e4   :  { %v3194_v62 = vmax.f32 %v3047_v26, %v3136_v58  ;;  %v3292_v25 = vsel %vm17816_vm5, %v9996_v20, %v17419_v17  ;;  %vm17817_vm11 = vmpackc.low %vm13451_vm7, %vm13423_vm0  ;;  %v3057_v20 = vmax.f32 %v2910_v23, %v3145_v38  ;;  %vm17823_vm7 = vcmask 998400   ;;  %v13638_v38 = vpop.permute.xlu1 %10019  ;;  %10274 = vrot.lane.b32.xlu0 %v13163_v30, %s10689_s18 }
 0x4e5   :  { %9053 = vmatprep.subr.msk.bf16.mxu1 %vm17817_vm11, %v17708_v29  ;;  %vm9054_vm13 = vmpackc.low %vm13538_vm6, %vm13519_vm14  ;;  %v3439_v58 = vsel %vm17823_vm7, %v17822_v53, %v10001_v46  ;;  %v9952_v23 = vunpack.i.h.bf16 %v13562_v8  ;;  %17828 = vst [vmem:[#allocation32_spill] sm:$0xff] %v13638_v38  ;;  %vm17846_vm11 = vcmask 965632   ;;  %v17433_v28 = vunpack.i.h.bf16 %v13638_v38 }
 0x4e6   :  { %vm17819_vm2 = vmmov %vm17816_vm5  ;;  %9055 = vmatpush3.bf16.msk.msra.mxu1 %vm9054_vm13, %v17708_v29  ;;  %10389 = vrot.lane.b32.xlu1 %v13289_v18, %s10703_s21 }
 0x4e7   :  { %v3282_v45 = vsel %vm17819_vm2, %v9937_v59, %v17818_v32  ;;  %vm17821_vm9 = vmmov %vm17819_vm2  ;;  %v3203_v59 = vmax.f32 %v3056_v60, %v3291_v16  ;;  %v17824_v32 = vunpack.i.h.bf16 %v12592_v10  ;;  %v17424_v60 = vunpack.i.l.bf16 %v13562_v8 }
 0x4e8   :  { %v3283_v26 = vsel %vm17821_vm9, %v17820_v1, %v17420_v21  ;;  %vm9056_vm0 = vmpackc.low %vm13568_vm1, %vm13551_vm3  ;;  %v3204_v16 = vmax.f32 %v3057_v20, %v3292_v25  ;;  %v10006_v10 = vunpack.i.l.bf16 %v13439_v34  ;;  %v17422_v25 = vunpack.i.l.bf16 %v13626_v54  ;;  %10294 = vrot.lane.b32.xlu0 %v13163_v30, %s10692_s28 }
 0x4e9   :  { %vm17825_vm4 = vmmov %vm17823_vm7  ;;  %v17826_v17 = vmov %v17824_v32  ;;  %v3341_v53 = vmax.f32 %v3194_v62, %v3283_v26  ;;  %9057 = vmatprep.subr.msk.bf16.mxu1 %vm9056_vm0, %v17708_v29  ;;  %v9957_v62 = vunpack.i.h.bf16 %v13626_v54  ;;  %v3350_v57 = vmax.f32 %v3203_v59, %v3439_v58 }
 0x4ea   :  { %v3430_v1 = vsel %vm17825_vm4, %v9942_v61, %v17824_v32  ;;  %vm17827_vm12 = vmmov %vm17825_vm4  ;;  %v3340_v61 = vmax.f32 %v3193_v11, %v3282_v45  ;;  %vm17835_vm3 = vcmask 982016   ;;  %vm17854_vm0 = vcmask 957440  }
 0x4eb   :  { %v3431_v21 = vsel %vm17827_vm12, %v17826_v17, %v17427_v6  ;;  %v17829_v17 = vunpack.i.h.bf16 %v12600_v43  ;;  %vm17832_vm14 = vmmov %vm17830_vm8  ;;  %v17834_v43 = vunpack.i.h.bf16 %v12608_v51  ;;  %v17839_v51 = vunpack.i.l.bf16 %v12769_v12 }
 0x4ec   :  { %vm17833_vm6 = vmmov %vm17825_vm4  ;;  %v3488_v45 = vmax.f32 %v3340_v61, %v3430_v1  ;;  %v3489_v26 = vmax.f32 %v3341_v53, %v3431_v21  ;;  %v17423_v21 = vunpack.i.h.bf16 %v13439_v34  ;;  %v10011_v61 = vunpack.i.l.bf16 %v13506_v63  ;;  %10304 = vrot.lane.b32.xlu0 %v13163_v30, %s10698_s16 }
 0x4ed   :  { %v3578_v42 = vsel %vm17830_vm8, %v9947_v44, %v17829_v17  ;;  %v17831_v14 = vmov %v17829_v17  ;;  %v3440_v36 = vsel %vm17833_vm6, %v10001_v46, %v17421_v47  ;;  %v13670_v44 = vpop.permute.xlu0 %9959  ;;  %v3725_v20 = vsel %vm17835_vm3, %v9952_v23, %v17834_v43  ;;  %vm17837_vm1 = vmmov %vm17835_vm3 }
 0x4ee   :  { %v3579_v11 = vsel %vm17832_vm14, %v17831_v14, %v17425_v55  ;;  %v17836_v32 = vmov %v17834_v43  ;;  %v9962_v59 = vunpack.i.h.bf16 %v13670_v44  ;;  %v17426_v58 = vunpack.i.l.bf16 %v13670_v44  ;;  %v13682_v14 = vpop.permute.xlu1 %10024  ;;  %vm17840_vm15 = vmmov %vm17830_vm8 }
 0x4ef   :  { %v3726_v17 = vsel %vm17837_vm1, %v17836_v32, %v17424_v60  ;;  %17838 = vst [vmem:[#allocation33_spill] sm:$0xff] %v13682_v14  ;;  %v3636_v46 = vmax.f32 %v3488_v45, %v3578_v42  ;;  %v3637_v1 = vmax.f32 %v3489_v26, %v3579_v11  ;;  %v3351_v23 = vmax.f32 %v3204_v16, %v3440_v36  ;;  %vm17844_vm5 = vmmov %vm17842_vm10 }
 0x4f0   :  { %v3587_v53 = vsel %vm17840_vm15, %v17839_v51, %v10006_v10  ;;  %v17841_v43 = vunpack.i.h.bf16 %v12622_v48  ;;  %v17429_v11 = vunpack.i.h.bf16 %v13506_v63  ;;  %v10016_v45 = vunpack.i.l.bf16 %v13582_v15  ;;  %vm17848_vm13 = vmmov %vm17846_vm11  ;;  %10314 = vrot.lane.b32.xlu0 %v13163_v30, %s10700_s19 }
 0x4f1   :  { %v3783_v16 = vmax.f32 %v3636_v46, %v3725_v20  ;;  %v3784_v36 = vmax.f32 %v3637_v1, %v3726_v17  ;;  %v13703_v26 = vpop.permute.xlu0 %9964  ;;  %v17845_v51 = vunpack.i.h.bf16 %v12634_v40  ;;  %vm17850_vm2 = vmmov %vm17830_vm8  ;;  %v17851_v46 = vunpack.i.l.bf16 %v17777_v19 }
 0x4f2   :  { %v3873_v32 = vsel %vm17842_vm10, %v9957_v62, %v17841_v43  ;;  %v17843_v47 = vmov %v17841_v43  ;;  %v9967_v43 = vunpack.i.h.bf16 %v13703_v26  ;;  %v13715_v20 = vpop.permute.xlu1 %10079  ;;  %v3588_v17 = vsel %vm17850_vm2, %v10006_v10, %v17423_v21  ;;  %vm17852_vm9 = vmmov %vm17837_vm1 }
 0x4f3   :  { %v3874_v42 = vsel %vm17844_vm5, %v17843_v47, %v17422_v25  ;;  %v4021_v62 = vsel %vm17846_vm11, %v9962_v59, %v17845_v51  ;;  %v17847_v48 = vmov %v17845_v51  ;;  %v17430_v25 = vunpack.i.l.bf16 %v13703_v26  ;;  %17849 = vst [vmem:[#allocation34_spill] sm:$0xff] %v13715_v20  ;;  %vm17856_vm7 = vmmov %vm17854_vm0 }
 0x4f4   :  { %v4022_v47 = vsel %vm17848_vm13, %v17847_v48, %v17426_v58  ;;  %v3734_v59 = vsel %vm17852_vm9, %v17851_v46, %v10011_v61  ;;  %v3931_v1 = vmax.f32 %v3783_v16, %v3873_v32  ;;  %v3932_v51 = vmax.f32 %v3784_v36, %v3874_v42  ;;  %vm17857_vm4 = vmmov %vm17837_vm1  ;;  %10324 = vrot.lane.b32.xlu0 %v13163_v30, %s10702_s20  ;;  %v10537_v30 = vld [vmem:[#allocation4 + $0x90] sm:$0xff] }
 0x4f5   :  { %v17428_v40 = vunpack.i.h.bf16 %v13582_v15  ;;  %v10021_v48 = vunpack.i.l.bf16 %v13638_v38  ;;  %v17853_v10 = vunpack.i.h.bf16 %v12650_v24  ;;  %v3498_v42 = vmax.f32 %v3350_v57, %v3587_v53  ;;  %v13740_v36 = vpop.permute.xlu0 %9969  ;;  %vm17859_vm12 = vmmov %vm17844_vm5 }
 0x4f6   :  { %v3735_v16 = vsel %vm17857_vm4, %v10011_v61, %v17429_v11  ;;  %v4080_v60 = vmax.f32 %v3932_v51, %v4022_v47  ;;  %v4079_v55 = vmax.f32 %v3931_v1, %v4021_v62  ;;  %v17858_v58 = vunpack.i.l.bf16 %v12848_v27  ;;  %vm17860_vm8 = vmmov %vm17844_vm5 }
 0x4f7   :  { %v4170_v21 = vsel %vm17854_vm0, %v17853_v10, %v17430_v25  ;;  %v17855_v46 = vmov %v17853_v10  ;;  %v9972_v10 = vunpack.i.h.bf16 %v13740_v36  ;;  %v17437_v24 = vunpack.i.l.bf16 %v13740_v36  ;;  %vm17862_vm14 = vmmov %vm17846_vm11 }
 0x4f8   :  { %v4169_v32 = vsel %vm17856_vm7, %v9967_v43, %v17855_v46  ;;  %v3882_v6 = vsel %vm17859_vm12, %v17858_v58, %v10016_v45  ;;  %v13748_v43 = vpop.permute.xlu1 %10089  ;;  %v3499_v57 = vmax.f32 %v3351_v23, %v3588_v17  ;;  %v3646_v53 = vmax.f32 %v3498_v42, %v3734_v59  ;;  %v17863_v23 = vld [vmem:[#allocation22_spill] sm:$0xff]  ;;  %v17868_v42 = vld [vmem:[#allocation25_spill] sm:$0xff]  ;;  %vm17869_vm1 = vmmov %vm17846_vm11  ;;  %10334 = vrot.lane.b32.xlu0 %v13289_v18, %s10689_s18 }
 0x4f9   :  { %v4228_v61 = vmax.f32 %v4080_v60, %v4170_v21  ;;  %v4227_v47 = vmax.f32 %v4079_v55, %v4169_v32  ;;  %v3883_v62 = vsel %vm17860_vm8, %v10016_v45, %v17428_v40  ;;  %v17861_v58 = vunpack.i.l.bf16 %v12883_v39  ;;  %v13768_v45 = vpop.permute.xlu0 %9974  ;;  %vm17875_vm5 = vmmov %vm17854_vm0 }
 0x4fa   :  { %v17864_v17 = vunpack.i.h.bf16 %v17863_v23  ;;  %vm17865_vm6 = vcmask 949248   ;;  %v3647_v21 = vmax.f32 %v3499_v57, %v3735_v16  ;;  %v3793_v51 = vmax.f32 %v3646_v53, %v3882_v6  ;;  %v17872_v53 = vld [vmem:[#allocation26_spill] sm:$0xff]  ;;  %vm17876_vm11 = vmmov %vm17854_vm0 }
 0x4fb   :  { %v4030_v1 = vsel %vm17862_vm14, %v17861_v58, %v10021_v48  ;;  %vm17867_vm3 = vmmov %vm17865_vm6  ;;  %v9856_v58 = vunpack.i.l.bf16 %v17868_v42  ;;  %v4031_v40 = vsel %vm17869_vm1, %v10021_v48, %v17433_v28  ;;  %v17434_v11 = vunpack.i.h.bf16 %v13768_v45  ;;  %v10536_v28 = vld [vmem:[#allocation4 + $0x60] sm:$0xff] }
 0x4fc   :  { %v4318_v59 = vsel %vm17865_vm6, %v17864_v17, %v17437_v24  ;;  %v17866_v60 = vmov %v17864_v17  ;;  %v9976_v17 = vunpack.i.l.bf16 %v13768_v45  ;;  %v13776_v25 = vpop.permute.xlu1 %10099  ;;  %v3794_v23 = vmax.f32 %v3647_v21, %v3883_v62  ;;  %vm17877_vm13 = vmmov %vm17867_vm3  ;;  %v2592_v24 = vld [vmem:[#allocation4 + $0xd8] sm:$0xf]  ;;  %10339 = vrot.lane.b32.xlu0 %v13289_v18, %s10688_s6 }
 0x4fd   :  { %v4317_v55 = vsel %vm17867_vm3, %v9972_v10, %v17866_v60  ;;  %v4376_v46 = vmax.f32 %v4228_v61, %v4318_v59  ;;  %v3941_v10 = vmax.f32 %v3793_v51, %v4030_v1  ;;  %v10026_v6 = vunpack.i.l.bf16 %v13682_v14  ;;  %v10533_v1 = vld [vmem:[#allocation4 + $0xa8] sm:$0xf]  ;;  %v13789_v37 = vpop.permute.xlu0 %10029  ;;  %v17874_v51 = vld [vmem:[#allocation21_spill] sm:$0xff]  ;;  %vm17879_vm2 = vmmov %vm17867_vm3 }
 0x4fe   :  { %v4375_v32 = vmax.f32 %v4227_v47, %v4317_v55  ;;  %v17431_v16 = vunpack.i.h.bf16 %v13682_v14  ;;  %vm17870_vm15 = vcmask 1039360   ;;  %v9906_v61 = vunpack.i.l.bf16 %v17872_v53  ;;  %17873 = vst [vmem:[#allocation22_spill] sm:$0xff] %v13789_v37 }
 0x4ff   :  { %5117 = vmatprep.mubr.f32.mxu1 %v4376_v46  ;;  %v2703_v57 = vsel %vm17870_vm15, %v9856_v58, %v9976_v17  ;;  %vm17871_vm10 = vmmov %vm17870_vm15  ;;  %v3942_v47 = vmax.f32 %v3794_v23, %v4031_v40  ;;  %v17432_v60 = vunpack.i.h.bf16 %v13789_v37  ;;  %v10031_v55 = vunpack.i.l.bf16 %v13789_v37 }
 0x500   :  { %v2704_v48 = vsel %vm17871_vm10, %v9976_v17, %v17434_v11  ;;  %5118 = vmatmul.mubr.f32.gmra.mrb[32].mxu1 %v4375_v32  ;;  %v4089_v62 = vmax.f32 %v3941_v10, %v2703_v57  ;;  %v13793_v21 = vpop.permute.xlu1 %10104  ;;  %v9911_v46 = vunpack.i.l.bf16 %v17874_v51  ;;  %v4178_v32 = vsel %vm17875_vm5, %v9906_v61, %v10026_v6  ;;  %vm17882_vm9 = vmmov %vm17871_vm10  ;;  %10349 = vrot.lane.b32.xlu0 %v13289_v18, %s10691_s0 }
 0x501   :  { %v2763_v59 = vmax.f32 %v10533_v1, %v2704_v48  ;;  %v4179_v40 = vsel %vm17876_vm11, %v10026_v6, %v17431_v16  ;;  %v13804_v23 = vpop.permute.xlu0 %10034  ;;  %v13809_v1 = vld [vmem:[#allocation4 + $0x40] sm:$0xff]  ;;  %vm17885_vm0 = vcmask 1031168   ;;  %vm17888_vm7 = vcmask 1022976   ;;  %vm17897_vm12 = vmmov %vm17882_vm9 }
 0x502   :  { %v4237_v17 = vmax.f32 %v4089_v62, %v4178_v32  ;;  %v4326_v57 = vsel %vm17877_vm13, %v9911_v46, %v10031_v55  ;;  %17878 = vst [vmem:[#allocation25_spill] sm:$0xff] %v13809_v1  ;;  %v17436_v62 = vunpack.i.h.bf16 %v13804_v23  ;;  %vm17892_vm4 = vcmask 1014784   ;;  %vm17904_vm8 = vmmov %vm17885_vm0 }
 0x503   :  { %v4090_v58 = vmax.f32 %v3942_v47, %v2763_v59  ;;  %v10534_v47 = vld [vmem:[#allocation4 + $0x88] sm:$0xff]  ;;  %v4327_v59 = vsel %vm17879_vm2, %v10031_v55, %v17432_v60  ;;  %v17895_v14 = vunpack.i.l.bf16 %v13804_v23  ;;  %v17906_v34 = vunpack.i.l.bf16 %v13348_v0  ;;  %vm17911_vm1 = vmmov %vm17888_vm7 }
 0x504   :  { %v13807_v48 = vpop.permute.xlu1 %10109  ;;  %v13812_v61 = vpack.i.bf16 %v10534_v47, %v13809_v1  ;;  %v4385_v46 = vmax.f32 %v4237_v17, %v4326_v57  ;;  %v17880_v55 = vld [vmem:[#allocation28_spill] sm:$0xff]  ;;  %vm17907_vm14 = vcmask 1006592   ;;  %v13928_v0 = vadd.s32 536, %v12264_v3  ;;  %vm17915_vm5 = vmmov %vm17892_vm4  ;;  %10359 = vrot.lane.b32.xlu0 %v13289_v18, %s10697_s4 }
 0x505   :  { %v4238_v10 = vmax.f32 %v4090_v58, %v4179_v40  ;;  %v13822_v58 = vpop.permute.xlu0 %10039  ;;  %v17883_v57 = vld [vmem:[#allocation24_spill] sm:$0xff]  ;;  %vm17917_vm11 = vcmask 998400  }
 0x506   :  { %10399 = vrot.lane.b32.xlu1 %v13812_v61, %s10688_s6  ;;  %v17435_v32 = vunpack.i.h.bf16 %v13822_v58  ;;  %vm4625_vm2 = vcmp.eq.s32.totalorder %v13928_v0, %v12280_v50  ;;  %v17968_v0 = vmov 0 }
 0x507   :  { %v4386_v6 = vmax.f32 %v4238_v10, %v4327_v59  ;;  %v17881_v10 = vunpack.i.l.bf16 %v17880_v55  ;;  %v17887_v55 = vunpack.i.l.bf16 %v13038_v9  ;;  %v13863_v9 = vld [vmem:[#allocation4 + $0xe0] sm:$0xf] }
 0x508   :  { %v13825_v40 = vpop.permute.xlu1 %10119  ;;  %17890 = vst [vmem:[#allocation28_spill] sm:$0xff] %v13863_v9  ;;  %v13900_v38 = vpack.i.bf16 %v13863_v9, %v2592_v24  ;;  %10369 = vrot.lane.b32.xlu0 %v13289_v18, %s10699_s17 }
 0x509   :  { %5122 = vmatprep.mubr.f32.mxu1 %v4386_v6  ;;  %v2696_v59 = vsel %vm17882_vm9, %v17881_v10, %v17436_v62  ;;  %v13836_v17 = vpop.permute.xlu0 %10044  ;;  %v17884_v6 = vunpack.i.l.bf16 %v17883_v57  ;;  %vm17920_vm9 = vmmov %vm17907_vm14 }
 0x50a   :  { %5123 = vmatmul.mubr.f32.gmra.mrb[34].mxu1 %v4385_v46  ;;  %10409 = vrot.lane.b32.xlu1 %v13812_v61, %s10691_s0  ;;  %v17438_v16 = vunpack.i.h.bf16 %v13836_v17  ;;  %v2754_v11 = vmax.f32 %v10536_v28, %v2696_v59  ;;  %17900 = vst [vmem:[#allocation38_spill] sm:$0xff] %v13900_v38  ;;  %v17914_v38 = vunpack.i.h.bf16 %v12698_v33  ;;  %v17926_v33 = vunpack.i.h.bf16 %v12737_v2 }
 0x50b   :  { %v2843_v46 = vsel %vm17885_vm0, %v17884_v6, %v17435_v32  ;;  %v13878_v32 = vpack.i.bf16 %v2592_v24, %v10537_v30  ;;  %v13921_v24 = vadd.s32 528, %v12264_v3  ;;  %v17932_v2 = vunpack.i.h.bf16 %v12883_v39 }
 0x50c   :  { %v13844_v60 = vpop.permute.xlu1 %10129  ;;  %v2990_v10 = vsel %vm17888_vm7, %v17887_v55, %v17438_v16  ;;  %v2901_v57 = vmax.f32 %v2754_v11, %v2843_v46  ;;  %v17891_v11 = vunpack.i.l.bf16 %v13285_v7  ;;  %v13874_v16 = vadd.s32 512, %v12264_v3  ;;  %10379 = vrot.lane.b32.xlu0 %v13289_v18, %s10701_s8 }
 0x50d   :  { %17886 = vst [vmem:[#allocation26_spill] sm:$0xff] %v13844_v60  ;;  %v13855_v6 = vpop.permute.xlu0 %10049  ;;  %17894 = vst [vmem:[#allocation35_spill] sm:$0xff] %v13878_v32  ;;  %v13881_v55 = vadd.s32 520, %v12264_v3  ;;  %v17896_v7 = vunpack.i.h.bf16 %v17868_v42  ;;  %v13903_v42 = vadd.s32 664, %v12264_v3  ;;  %vm4624_vm13 = vcmp.eq.s32.totalorder %v13921_v24, %v12280_v50 }
 0x50e   :  { %10419 = vrot.lane.b32.xlu1 %v13812_v61, %s10697_s4  ;;  %v17440_v62 = vunpack.i.h.bf16 %v13855_v6  ;;  %v3048_v59 = vmax.f32 %v2901_v57, %v2990_v10  ;;  %vm4622_vm6 = vcmp.eq.s32.totalorder %v13874_v16, %v12280_v50  ;;  %v17929_v60 = vunpack.i.l.bf16 %v13494_v56 }
 0x50f   :  { %vm4623_vm3 = vcmp.eq.s32.totalorder %v13881_v55, %v12280_v50  ;;  %vm4641_vm10 = vcmp.eq.s32.totalorder %v13903_v42, %v12280_v50  ;;  %v17942_v16 = vunpack.i.l.bf16 %v13562_v8  ;;  %v14145_v42 = vadd.s32 576, %v12264_v3 }
 0x510   :  { %v13859_v28 = vpop.permute.xlu1 %10139  ;;  %v3137_v46 = vsel %vm17892_vm4, %v17891_v11, %v17440_v62  ;;  %v2688_v11 = vsel %vm17897_vm12, %v17896_v7, %v17895_v14  ;;  %v17901_v14 = vunpack.i.l.bf16 %v13822_v58  ;;  %v17902_v7 = vld [vmem:[#allocation19_spill] sm:$0xff]  ;;  %vm17924_vm4 = vcmask 965632   ;;  %vm17927_vm12 = vmmov %vm17917_vm11  ;;  %10394 = vrot.lane.b32.xlu0 %v13812_v61, %s10689_s18 }
 0x511   :  { %17889 = vst [vmem:[#allocation21_spill] sm:$0xff] %v13859_v28  ;;  %v3195_v10 = vmax.f32 %v3048_v59, %v3137_v46  ;;  %v13876_v57 = vpop.permute.xlu0 %10054  ;;  %v13893_v59 = vadd.s32 656, %v12264_v3  ;;  %v13897_v46 = vpack.i.bf16 %v10537_v30, %v10534_v47  ;;  %v17903_v62 = vunpack.i.h.bf16 %v17902_v7  ;;  %v10538_v30 = vld [vmem:[#allocation4 + $0x18] sm:$0xff] }
 0x512   :  { %3672 = vrot.lane.b32.xlu1 %v13809_v1, %s10699_s17  ;;  %17893 = vst [vmem:[#allocation24_spill] sm:$0xff] %v13876_v57  ;;  %v2745_v7 = vmax.f32 %v10538_v30, %v2688_v11  ;;  %v13952_v30 = vadd.s32 544, %v12264_v3  ;;  %v17962_v24 = vunpack.i.l.bf16 %v13626_v54  ;;  %v14173_v54 = vadd.s32 584, %v12264_v3 }
 0x513   :  { %17899 = vst [vmem:[#allocation37_spill] sm:$0xff] %v13897_v46  ;;  %v2835_v37 = vsel %vm17904_vm8, %v17903_v62, %v17901_v14  ;;  %vm4640_vm15 = vcmp.eq.s32.totalorder %v13893_v59, %v12280_v50  ;;  %vm17930_vm8 = vcmask 990208   ;;  %v17979_v18 = vunpack.i.h.bf16 %v17872_v53 }
 0x514   :  { %v13890_v15 = vpop.permute.xlu1 %10149  ;;  %v17984_v53 = vmov 0  ;;  %10404 = vrot.lane.b32.xlu0 %v13812_v61, %s10690_s27 }
 0x515   :  { %17898 = vst [vmem:[#allocation36_spill] sm:$0xff] %v13890_v15  ;;  %v17905_v15 = vunpack.i.h.bf16 %v13876_v57  ;;  %v13923_v14 = vpop.permute.xlu0 %10059 }
 0x516   :  { %4263 = vrot.lane.b32.xlu1 %v13809_v1, %s10703_s21  ;;  %17908 = vst [vmem:[#allocation19_spill] sm:$0xff] %v13923_v14  ;;  %v17454_v9 = vunpack.i.h.bf16 %v13923_v14  ;;  %v13966_v1 = vld [vmem:[#allocation4 + $0x48] sm:$0xff] }
 0x517   :  { %v3284_v47 = vsel %vm17907_vm14, %v17906_v34, %v17905_v15  ;;  %v17909_v34 = vunpack.i.l.bf16 %v13836_v17  ;;  %v17910_v15 = vunpack.i.h.bf16 %v12683_v4  ;;  %v13949_v4 = vadd.s32 680, %v12264_v3 }
 0x518   :  { %v3342_v62 = vmax.f32 %v3195_v10, %v3284_v47  ;;  %v13937_v11 = vpop.permute.xlu1 %10164  ;;  %v13942_v10 = vadd.s32 672, %v12264_v3  ;;  %v2892_v47 = vmax.f32 %v2745_v7, %v2835_v37  ;;  %vm4626_vm14 = vcmp.eq.s32.totalorder %v13952_v30, %v12280_v50  ;;  %10414 = vrot.lane.b32.xlu0 %v13812_v61, %s10692_s28 }
 0x519   :  { %v2982_v63 = vsel %vm17911_vm1, %v17910_v15, %v17909_v34  ;;  %17912 = vst [vmem:[#allocation39_spill] sm:$0xff] %v13937_v11  ;;  %v17913_v15 = vunpack.i.l.bf16 %v13855_v6  ;;  %v17916_v11 = vunpack.i.l.bf16 %v13417_v41  ;;  %v13978_v41 = vadd.s32 552, %v12264_v3  ;;  %vm17933_vm1 = vmmov %vm17924_vm4  ;;  %v18048_v61 = vld [vmem:[#allocation24_spill] sm:$0xff] }
 0x51a   :  { %2790 = vrot.lane.b32.xlu1 %v13966_v1, %s10688_s6  ;;  %v3039_v34 = vmax.f32 %v2892_v47, %v2982_v63  ;;  %vm4642_vm0 = vcmp.eq.s32.totalorder %v13942_v10, %v12280_v50  ;;  %vm4643_vm7 = vcmp.eq.s32.totalorder %v13949_v4, %v12280_v50  ;;  %v17922_v47 = vunpack.i.h.bf16 %v13715_v20 }
 0x51b   :  { %v3129_v37 = vsel %vm17915_vm5, %v17914_v38, %v17913_v15  ;;  %v3432_v46 = vsel %vm17917_vm11, %v17916_v11, %v17454_v9  ;;  %v13973_v15 = vpop.permute.xlu0 %10064  ;;  %v17918_v11 = vunpack.i.l.bf16 %v13876_v57  ;;  %v17919_v9 = vunpack.i.h.bf16 %v12719_v22  ;;  %vm17936_vm11 = vmmov %vm17930_vm8 }
 0x51c   :  { %v3490_v38 = vmax.f32 %v3342_v62, %v3432_v46  ;;  %v13987_v63 = vpop.permute.xlu1 %10174  ;;  %v3186_v46 = vmax.f32 %v3039_v34, %v3129_v37  ;;  %v13996_v22 = vadd.s32 688, %v12264_v3  ;;  %v14002_v62 = vadd.s32 560, %v12264_v3 }
 0x51d   :  { %v3276_v7 = vsel %vm17920_vm9, %v17919_v9, %v17918_v11  ;;  %17921 = vst [vmem:[#allocation40_spill] sm:$0xff] %v13987_v63  ;;  %v13999_v9 = vadd.s32 696, %v12264_v3  ;;  %v17923_v11 = vunpack.i.l.bf16 %v13670_v44  ;;  %v17925_v37 = vunpack.i.l.bf16 %v13923_v14 }
 0x51e   :  { %v17928_v63 = vunpack.i.h.bf16 %v13973_v15  ;;  %3084 = vrot.lane.b32.xlu1 %v13966_v1, %s10691_s0  ;;  %v14026_v44 = vadd.s32 568, %v12264_v3  ;;  %v3333_v56 = vmax.f32 %v3186_v46, %v3276_v7  ;;  %vm4627_vm5 = vcmp.eq.s32.totalorder %v13978_v41, %v12280_v50 }
 0x51f   :  { %v14009_v34 = vsel %vm17924_vm4, %v17923_v11, %v17922_v47  ;;  %v3424_v28 = vsel %vm17927_vm12, %v17926_v33, %v17925_v37  ;;  %v17931_v47 = vunpack.i.l.bf16 %v13715_v20  ;;  %v17465_v11 = vunpack.i.l.bf16 %v13748_v43 }
 0x520   :  { %v3580_v5 = vsel %vm17930_vm8, %v17929_v60, %v17928_v63  ;;  %v14034_v60 = vpop.permute.xlu0 %10069  ;;  %v17468_v63 = vunpack.i.h.bf16 %v13748_v43  ;;  %v17934_v14 = vunpack.i.l.bf16 %v13973_v15  ;;  %v17935_v57 = vunpack.i.h.bf16 %v12769_v12 }
 0x521   :  { %v4015_v33 = vsel %vm17933_vm1, %v17932_v2, %v17931_v47  ;;  %v3638_v37 = vmax.f32 %v3490_v38, %v3580_v5  ;;  %v17470_v39 = vunpack.i.h.bf16 %v14034_v60  ;;  %v17466_v47 = vunpack.i.l.bf16 %v14034_v60  ;;  %v14046_v2 = vpop.permute.xlu1 %10184 }
 0x522   :  { %v3572_v20 = vsel %vm17936_vm11, %v17935_v57, %v17934_v14  ;;  %v3481_v5 = vmax.f32 %v3333_v56, %v3424_v28  ;;  %vm17937_vm9 = vcmp.lt.s32.totalorder %v12266_v13, 91  ;;  %vm4644_vm12 = vcmp.eq.s32.totalorder %v13996_v22, %v12280_v50  ;;  %3378 = vrot.lane.b32.xlu1 %v13966_v1, %s10697_s4  ;;  %v18089_v22 = vld [vmem:[#allocation20_spill] sm:$0xff] }
 0x523   :  { %vm14055_vm4 = vmand %vm4622_vm6, %vm17937_vm9  ;;  %v14062_v12 = vadd.s32 704, %v12264_v3  ;;  %v14065_v28 = vadd.s32 712, %v12264_v3  ;;  %v17940_v57 = vunpack.i.h.bf16 %v17777_v19  ;;  %vm17941_vm8 = vcmask 982016  }
 0x524   :  { %vm17943_vm6 = vmmov %vm17941_vm8  ;;  %v3629_v19 = vmax.f32 %v3481_v5, %v3572_v20  ;;  %v14092_v56 = vpop.permute.xlu0 %10074  ;;  %v17471_v20 = vunpack.i.h.bf16 %v13776_v25  ;;  %v14231_v4 = vadd.s32 592, %v12264_v3  ;;  %v17981_v30 = vunpack.i.l.bf16 %v13703_v26 }
 0x525   :  { %v3719_v14 = vsel %vm17941_vm8, %v17940_v57, %v17466_v47  ;;  %v3727_v38 = vsel %vm17943_vm6, %v17942_v16, %v17470_v39  ;;  %vm17944_vm1 = vmmov %vm17937_vm9  ;;  %v17947_v57 = vunpack.i.h.bf16 %v17874_v51  ;;  %vm17948_vm6 = vcmask 949248   ;;  %v14113_v5 = vpop.permute.xlu1 %10194 }
 0x526   :  { %vm14084_vm11 = vmand %vm4623_vm3, %vm17944_vm1  ;;  %v3785_v8 = vmax.f32 %v3638_v37, %v3727_v38  ;;  %v17469_v37 = vunpack.i.h.bf16 %v14092_v56  ;;  %v17467_v51 = vunpack.i.l.bf16 %v14092_v56  ;;  %17952 = vst [vmem:[#allocation41_spill] sm:$0xff] %v14113_v5  ;;  %v17953_v38 = vunpack.i.l.bf16 %v13740_v36  ;;  %3674 = vrot.lane.b32.xlu1 %v13966_v1, %s10699_s17 }
 0x527   :  { %v4311_v55 = vsel %vm17948_vm6, %v17947_v57, %v17465_v11  ;;  %vm17949_vm3 = vmmov %vm17944_vm1  ;;  %v3776_v11 = vmax.f32 %v3629_v19, %v3719_v14  ;;  %v17960_v14 = vunpack.i.h.bf16 %v12848_v27  ;;  %v18009_v26 = vmov 0 }
 0x528   :  { %vm14104_vm1 = vmand %vm4640_vm15, %vm17949_vm3  ;;  %v4319_v59 = vsel %vm17948_vm6, %v17953_v38, %v17468_v63  ;;  %v14179_v63 = vpop.permute.xlu0 %10084  ;;  %v18018_v5 = vmov 0  ;;  %v18024_v7 = vunpack.i.l.bf16 %v13793_v21  ;;  %v18032_v57 = vunpack.i.h.bf16 %v13825_v40 }
 0x529   :  { %vm17954_vm15 = vmmov %vm17949_vm3  ;;  %v17472_v39 = vunpack.i.l.bf16 %v14179_v63  ;;  %v14205_v10 = vpop.permute.xlu1 %10204  ;;  %v18049_v27 = vunpack.i.h.bf16 %v18048_v61 }
 0x52a   :  { %vm14125_vm3 = vmand %vm4641_vm10, %vm17954_vm15  ;;  %vm17961_vm15 = vcmask 973824   ;;  %17972 = vst [vmem:[#allocation42_spill] sm:$0xff] %v14205_v10  ;;  %10429 = vrot.lane.b32.xlu1 %v13878_v32, %s10688_s6 }
 0x52b   :  { %vm17957_vm8 = vmmov %vm17937_vm9  ;;  %v3867_v19 = vsel %vm17961_vm15, %v17960_v14, %v17467_v51  ;;  %v14176_v14 = vadd.s32 720, %v12264_v3 }
 0x52c   :  { %vm14136_vm9 = vmand %vm4624_vm13, %vm17957_vm8  ;;  %v3924_v47 = vmax.f32 %v3776_v11, %v3867_v19  ;;  %v17970_v11 = vunpack.i.h.bf16 %v13101_v49  ;;  %v17474_v19 = vunpack.i.h.bf16 %v13793_v21 }
 0x52d   :  { %vm17963_vm13 = vmmov %vm17961_vm15 }
 0x52e   :  { %v3875_v38 = vsel %vm17963_vm13, %v17962_v24, %v17469_v37  ;;  %vm17964_vm10 = vmmov %vm17957_vm8  ;;  %v14195_v37 = vadd.s32 728, %v12264_v3  ;;  %v17974_v24 = vmov 0  ;;  %v4072_v49 = vmax.f32 %v3924_v47, %v4015_v33  ;;  %v14263_v47 = vpop.permute.xlu0 %10094  ;;  %10434 = vrot.lane.b32.xlu1 %v13878_v32, %s10690_s27 }
 0x52f   :  { %vm14168_vm15 = vmand %vm4625_vm2, %vm17964_vm10  ;;  %v3933_v51 = vmax.f32 %v3785_v8, %v3875_v38  ;;  %v17475_v38 = vunpack.i.h.bf16 %v14179_v63 }
 0x530   :  { %vm17967_vm10 = vmmov %vm17957_vm8  ;;  %vm17971_vm8 = vcmask 1031168  }
 0x531   :  { %vm14190_vm13 = vmand %vm4642_vm0, %vm17967_vm10  ;;  %v2852_v8 = vsel %vm17971_vm8, %v17970_v11, %v17471_v20  ;;  %v4081_v11 = vmax.f32 %v3933_v51, %v14009_v34  ;;  %v17977_v20 = vmov 0 }
 0x532   :  { %v17969_v0 = vsel %vm14190_vm13, 4294967295, %v17968_v0  ;;  %vm17973_vm0 = vmmov %vm17967_vm10  ;;  %10439 = vrot.lane.b32.xlu1 %v13878_v32, %s10691_s0 }
 0x533   :  { %vm14212_vm10 = vmand %vm4643_vm7, %vm17973_vm0 }
 0x534   :  { %v17975_v24 = vsel %vm14212_vm10, 4294967295, %v17974_v24  ;;  %vm17976_vm8 = vmmov %vm17973_vm0  ;;  %vm17980_vm0 = vcmask 957440   ;;  %vm18004_vm10 = vcmp.eq.s32.totalorder %v14026_v44, %v12280_v50  ;;  %v14360_v44 = vadd.s32 744, %v12264_v3 }
 0x535   :  { %vm14224_vm2 = vmand %vm4626_vm14, %vm17976_vm8  ;;  %v4163_v34 = vsel %vm17980_vm0, %v17979_v18, %v17472_v39 }
 0x536   :  { %v17978_v20 = vsel %vm14224_vm2, 4294967295, %v17977_v20  ;;  %vm17982_vm14 = vmmov %vm17980_vm0  ;;  %v4220_v51 = vmax.f32 %v4072_v49, %v4163_v34  ;;  %v17988_v49 = vunpack.i.h.bf16 %v13159_v35  ;;  %vm17989_vm0 = vcmask 1022976   ;;  %10444 = vrot.lane.b32.xlu1 %v13878_v32, %s10692_s28 }
 0x537   :  { %v4171_v33 = vsel %vm17982_vm14, %v17981_v30, %v17475_v38  ;;  %vm17983_vm7 = vmmov %vm17976_vm8  ;;  %v17478_v34 = vunpack.i.h.bf16 %v14263_v47  ;;  %v17477_v30 = vunpack.i.l.bf16 %v14263_v47  ;;  %v14301_v35 = vadd.s32 600, %v12264_v3 }
 0x538   :  { %vm14254_vm6 = vmand %vm4627_vm5, %vm17983_vm7  ;;  %v4229_v18 = vmax.f32 %v4081_v11, %v4171_v33  ;;  %v14285_v11 = vsel %vm17989_vm0, %v17988_v49, %v17474_v19  ;;  %v14289_v33 = vpop.permute.xlu1 %10209  ;;  %v4368_v49 = vmax.f32 %v4220_v51, %v4311_v55  ;;  %vm17996_vm14 = vcmp.eq.s32.totalorder %v14002_v62, %v12280_v50  ;;  %v14348_v55 = vpop.permute.xlu0 %10114 }
 0x539   :  { %v17985_v53 = vsel %vm14254_vm6, 4294967295, %v17984_v53  ;;  %vm14274_vm8 = vmand %vm4644_vm12, %vm17983_vm7  ;;  %17990 = vst [vmem:[#allocation43_spill] sm:$0xff] %v14289_v33  ;;  %v14319_v19 = vadd.s32 736, %v12264_v3  ;;  %v18001_v51 = vunpack.i.h.bf16 %v13768_v45  ;;  %v10540_v45 = vld [vmem:[#allocation4 + $0x68] sm:$0xff]  ;;  %v14363_v38 = vadd.s32 608, %v12264_v3 }
 0x53a   :  { %vm17991_vm12 = vmmov %vm17983_vm7  ;;  %vm17992_vm7 = vcmp.eq.s32.totalorder %v13999_v9, %v12280_v50  ;;  %v14305_v39 = vmax.f32 %v4229_v18, %v4319_v59  ;;  %v17999_v59 = vunpack.i.h.bf16 %v13804_v23  ;;  %5192 = vmatprep.mubr.f32.mxu1 %v4368_v49  ;;  %v18015_v33 = vld [vmem:[#allocation27_spill] sm:$0xff]  ;;  %vm18023_vm6 = vcmask 1014784  }
 0x53b   :  { %vm14296_vm5 = vmand %vm17992_vm7, %vm17991_vm12  ;;  %vm18000_vm7 = vcmask 1039360   ;;  %v18113_v9 = vunpack.i.h.bf16 %v14092_v56 }
 0x53c   :  { %vm17995_vm0 = vmmov %vm17991_vm12  ;;  %v2697_v62 = vsel %vm18000_vm7, %v17999_v59, %v17477_v30 }
 0x53d   :  { %vm14312_vm13 = vmand %vm17996_vm14, %vm17995_vm0  ;;  %v2755_v30 = vmax.f32 %v10540_v45, %v2697_v62  ;;  %v18011_v62 = vunpack.i.l.bf16 %v13776_v25 }
 0x53e   :  { %vm18002_vm14 = vmmov %vm18000_vm7 }
 0x53f   :  { %v2705_v18 = vsel %vm18002_vm14, %v18001_v51, %v17478_v34  ;;  %vm18003_vm12 = vmmov %vm17995_vm0  ;;  %v10541_v51 = vld [vmem:[#allocation4 + $0xb0] sm:$0xf] }
 0x540   :  { %vm14344_vm7 = vmand %vm18004_vm10, %vm18003_vm12  ;;  %v2764_v34 = vmax.f32 %v10541_v51, %v2705_v18  ;;  %v18012_v18 = vunpack.i.h.bf16 %v13822_v58  ;;  %vm18013_vm10 = vcmask 1031168   ;;  %v14371_v51 = vpop.permute.xlu1 %10219 }
 0x541   :  { %vm18007_vm14 = vmmov %vm17995_vm0  ;;  %vm18008_vm0 = vcmp.eq.s32.totalorder %v14062_v12, %v12280_v50  ;;  %v18014_v12 = vld [vmem:[#allocation23_spill] sm:$0xff] }
 0x542   :  { %vm14355_vm2 = vmand %vm18008_vm0, %vm18007_vm14  ;;  %v2844_v49 = vsel %vm18013_vm10, %v18012_v18, %v18011_v62  ;;  %v18016_v10 = vmax.f32 %v18014_v12, %v18015_v33  ;;  %vm18017_vm0 = vcmp.eq.s32.totalorder %v14065_v28, %v12280_v50  ;;  %v14388_v62 = vadd.s32 616, %v12264_v3 }
 0x543   :  { %v18010_v26 = vsel %vm14355_vm2, 4294967295, %v18009_v26  ;;  %vm14381_vm14 = vmand %vm18017_vm0, %vm18003_vm12  ;;  %v2902_v18 = vmax.f32 %v2755_v30, %v2844_v49  ;;  %v2911_v45 = vmax.f32 %v2764_v34, %v2852_v8  ;;  %v14405_v28 = vadd.s32 752, %v12264_v3 }
 0x544   :  { %5193 = vmatmul.mubr.f32.vlgmr.msra.gmra.mrb[36].mxu1 %v18016_v10  ;;  %v18019_v5 = vsel %vm14381_vm14, 4294967295, %v18018_v5  ;;  %vm18020_vm12 = vmpackc.low %vm14084_vm11, %vm14055_vm4  ;;  %v18021_v8 = vunpack.i.h.bf16 %v13807_v48  ;;  %v18022_v10 = vunpack.i.h.bf16 %v13231_v31  ;;  %v18025_v34 = vunpack.i.h.bf16 %v13836_v17 }
 0x545   :  { %9059 = vmatpush3.bf16.msk.msra.mxu1 %vm18020_vm12, %v17708_v29  ;;  %vm18026_vm4 = vcmask 1022976   ;;  %v17485_v33 = vunpack.i.h.bf16 %v14348_v55  ;;  %v17484_v49 = vunpack.i.l.bf16 %v14348_v55  ;;  %vm18027_vm11 = vmpackc.low %vm14125_vm3, %vm14104_vm1  ;;  %v3058_v12 = vmax.f32 %v2911_v45, %v14285_v11 }
 0x546   :  { %v3146_v46 = vsel %vm18023_vm6, %v18022_v10, %v18021_v8  ;;  %v2991_v30 = vsel %vm18026_vm4, %v18025_v34, %v18024_v7  ;;  %9061 = vmatprep.subr.msk.bf16.mxu1 %vm18027_vm11, %v17708_v29  ;;  %v14432_v8 = vpop.permute.xlu0 %10124  ;;  %vm18028_vm4 = vcmp.lt.s32.totalorder %v12266_v13, 91  ;;  %vm18029_vm1 = vcmp.eq.s32.totalorder %v14145_v42, %v12280_v50  ;;  %v14461_v7 = vpop.permute.xlu1 %10229 }
 0x547   :  { %v3049_v31 = vmax.f32 %v2902_v18, %v2991_v30  ;;  %vm14443_vm3 = vmand %vm18029_vm1, %vm18028_vm4  ;;  %v18033_v11 = vunpack.i.h.bf16 %v13365_v52  ;;  %vm18034_vm12 = vcmask 998400   ;;  %v18035_v18 = vunpack.i.l.bf16 %v13807_v48  ;;  %18038 = vst [vmem:[#allocation23_spill] sm:$0xff] %v14461_v7 }
 0x548   :  { %v18036_v42 = vunpack.i.h.bf16 %v13855_v6  ;;  %vm18037_vm4 = vmmov %vm18023_vm6  ;;  %vm18039_vm1 = vcmp.lt.s32.totalorder %v12266_v13, 91  ;;  %vm18040_vm11 = vcmp.eq.s32.totalorder %v14173_v54, %v12280_v50  ;;  %v14475_v52 = vadd.s32 760, %v12264_v3  ;;  %v10542_v54 = vld [vmem:[#allocation4 + $0x20] sm:$0xff] }
 0x549   :  { %v3441_v45 = vsel %vm18034_vm12, %v18033_v11, %v18032_v57  ;;  %vm14468_vm6 = vmand %vm18040_vm11, %vm18039_vm1  ;;  %v17486_v30 = vunpack.i.l.bf16 %v13825_v40  ;;  %v3205_v11 = vmax.f32 %v3058_v12, %v3146_v46  ;;  %vm18050_vm0 = vcmask 1006592   ;;  %v18051_v46 = vld [vmem:[#allocation29_spill] sm:$0xff] }
 0x54a   :  { %v3138_v10 = vsel %vm18037_vm4, %v18036_v42, %v18035_v18  ;;  %vm18043_vm11 = vmpackc.low %vm14168_vm15, %vm14136_vm9  ;;  %v3285_v36 = vsel %vm18050_vm0, %v18049_v27, %v17484_v49  ;;  %vm18054_vm15 = vnez %v17975_v24  ;;  %v14527_v49 = vpop.permute.xlu0 %10134  ;;  %v18074_v18 = vld [vmem:[#allocation25_spill] sm:$0xff]  ;;  %vm18080_vm2 = vcmask 990208  }
 0x54b   :  { %v3196_v57 = vmax.f32 %v3049_v31, %v3138_v10  ;;  %9063 = vmatpush3.bf16.msk.msra.mxu1 %vm18043_vm11, %v17708_v29  ;;  %vm18044_vm4 = vmmov %vm18039_vm1  ;;  %vm18045_vm1 = vcmp.eq.s32.totalorder %v14176_v14, %v12280_v50  ;;  %v18052_v31 = vunpack.i.h.bf16 %v18051_v46  ;;  %vm18055_vm11 = vnez %v17969_v0  ;;  %v18061_v10 = vld [vmem:[#allocation26_spill] sm:$0xff]  ;;  %v18073_v0 = vld [vmem:[#allocation21_spill] sm:$0xff]  ;;  %3524 = vrot.lane.b32.xlu0 %v18074_v18, %s10698_s16 }
 0x54c   :  { %vm14491_vm12 = vmand %vm18045_vm1, %vm18044_vm4  ;;  %vm18058_vm1 = vcmp.eq.s32.totalorder %v14195_v37, %v12280_v50  ;;  %v14539_v37 = vadd.s32 624, %v12264_v3  ;;  %v18088_v41 = vunpack.i.h.bf16 %v18061_v10  ;;  %v18112_v59 = vunpack.i.l.bf16 %v14527_v49 }
 0x54d   :  { %vm18053_vm9 = vmmov %vm18050_vm0  ;;  %vm18057_vm0 = vcmp.lt.s32.totalorder %v12266_v13, 91  ;;  %v3343_v46 = vmax.f32 %v3196_v57, %v3285_v36  ;;  %v18066_v57 = vld [vmem:[#allocation19_spill] sm:$0xff]  ;;  %v18171_v24 = vunpack.i.l.bf16 %v13822_v58  ;;  %v18208_v58 = vunpack.i.h.bf16 %v13825_v40 }
 0x54e   :  { %v3293_v12 = vsel %vm18053_vm9, %v18052_v31, %v17485_v33  ;;  %vm18056_vm4 = vmpackc.low %vm18054_vm15, %vm18055_vm11  ;;  %vm18063_vm15 = vcmp.eq.s32.totalorder %v14231_v4, %v12280_v50  ;;  %v14561_v33 = vadd.s32 632, %v12264_v3 }
 0x54f   :  { %9065 = vmatprep.subr.msk.bf16.mxu1 %vm18056_vm4, %v17708_v29  ;;  %vm14522_vm9 = vmand %vm18058_vm1, %vm18057_vm0  ;;  %v3352_v31 = vmax.f32 %v3205_v11, %v3293_v12  ;;  %v18067_v11 = vunpack.i.h.bf16 %v18066_v57  ;;  %vm18068_vm4 = vcmask 998400   ;;  %v14547_v12 = vpop.permute.xlu1 %10239  ;;  %3819 = vrot.lane.b32.xlu0 %v18074_v18, %s10700_s19 }
 0x550   :  { %vm18062_vm10 = vmmov %vm18057_vm0  ;;  %18069 = vst [vmem:[#allocation27_spill] sm:$0xff] %v14547_v12  ;;  %v18085_v12 = vld [vmem:[#allocation37_spill] sm:$0xff] }
 0x551   :  { %vm14534_vm11 = vmand %vm18063_vm15, %vm18062_vm10  ;;  %v3433_v36 = vsel %vm18068_vm4, %v18067_v11, %v17486_v30  ;;  %vm18070_vm10 = vcmp.eq.s32.totalorder %v14301_v35, %v12280_v50  ;;  %v3500_v14 = vmax.f32 %v3352_v31, %v3441_v45  ;;  %vm18075_vm4 = vnez %v17985_v53  ;;  %10454 = vrot.lane.b32.xlu1 %v18085_v12, %s10698_s16 }
 0x552   :  { %vm14554_vm1 = vmand %vm18070_vm10, %vm18057_vm0  ;;  %v3491_v30 = vmax.f32 %v3343_v46, %v3433_v36  ;;  %vm18076_vm0 = vnez %v17978_v20  ;;  %v18078_v35 = vunpack.i.l.bf16 %v14432_v8  ;;  %v18079_v46 = vunpack.i.h.bf16 %v13973_v15  ;;  %v18082_v36 = vld [vmem:[#allocation30_spill] sm:$0xff] }
 0x553   :  { %vm18077_vm10 = vmpackc.low %vm18075_vm4, %vm18076_vm0  ;;  %v18081_v31 = vunpack.i.h.bf16 %v14432_v8  ;;  %v18083_v27 = vunpack.i.h.bf16 %v18082_v36  ;;  %v14602_v36 = vpop.permute.xlu0 %10144  ;;  %v18090_v20 = vunpack.i.h.bf16 %v18089_v22  ;;  %3967 = vrot.lane.b32.xlu0 %v18074_v18, %s10701_s8 }
 0x554   :  { %9067 = vmatpush3.bf16.msk.msra.mxu1 %vm18077_vm10, %v17708_v29  ;;  %vm9074_vm15 = vmpackc.low %vm14468_vm6, %vm14443_vm3  ;;  %v3581_v45 = vsel %vm18080_vm2, %v18079_v46, %v18078_v35  ;;  %vm18096_vm10 = vcmp.lt.s32.totalorder %v12266_v13, 91  ;;  %vm18159_vm3 = vcmask 957440  }
 0x555   :  { %vm18084_vm14 = vmmov %vm18080_vm2  ;;  %v3639_v46 = vmax.f32 %v3491_v30, %v3581_v45  ;;  %v18092_v30 = vunpack.i.l.bf16 %v18061_v10  ;;  %10464 = vrot.lane.b32.xlu1 %v18085_v12, %s10700_s19 }
 0x556   :  { %v3589_v53 = vsel %vm18084_vm14, %v18083_v27, %v18081_v31  ;;  %vm18086_vm4 = vmpackc.low %vm14296_vm5, %vm14274_vm8  ;;  %v18087_v27 = vld [vmem:[#allocation36_spill] sm:$0xff]  ;;  %vm18091_vm5 = vcmask 982016   ;;  %vm18103_vm14 = vcmask 965632  }
 0x557   :  { %9069 = vmatprep.subr.msk.bf16.mxu1 %vm18086_vm4, %v17708_v29  ;;  %v3648_v31 = vmax.f32 %v3500_v14, %v3589_v53  ;;  %v3736_v11 = vsel %vm18091_vm5, %v18090_v20, %v18088_v41  ;;  %v18093_v14 = vunpack.i.h.bf16 %v14034_v60  ;;  %vm18094_vm0 = vmmov %vm18091_vm5  ;;  %v14621_v53 = vpop.permute.xlu1 %10249  ;;  %vm18097_vm4 = vcmp.eq.s32.totalorder %v14319_v19, %v12280_v50  ;;  %v18101_v41 = vld [vmem:[#allocation34_spill] sm:$0xff]  ;;  %4115 = vrot.lane.b32.xlu0 %v18074_v18, %s10702_s20 }
 0x558   :  { %18095 = vst [vmem:[#allocation24_spill] sm:$0xff] %v14621_v53  ;;  %vm14628_vm8 = vmand %vm18097_vm4, %vm18096_vm10  ;;  %v18100_v20 = vunpack.i.l.bf16 %v18073_v0  ;;  %v18102_v22 = vunpack.i.h.bf16 %v18101_v41  ;;  %vm18105_vm4 = vcmp.eq.s32.totalorder %v14360_v44, %v12280_v50  ;;  %vm18111_vm5 = vcmask 965632   ;;  %v18116_v53 = vld [vmem:[#allocation31_spill] sm:$0xff] }
 0x559   :  { %v3728_v45 = vsel %vm18094_vm0, %v18093_v14, %v18092_v30  ;;  %v3795_v35 = vmax.f32 %v3648_v31, %v3736_v11  ;;  %vm18104_vm0 = vmpackc.low %vm14344_vm7, %vm14312_vm13  ;;  %v18108_v11 = vunpack.i.h.bf16 %v18073_v0  ;;  %vm18114_vm13 = vcmask 973824   ;;  %v18142_v41 = vld [vmem:[#allocation39_spill] sm:$0xff]  ;;  %10474 = vrot.lane.b32.xlu1 %v18085_v12, %s10702_s20 }
 0x55a   :  { %v4024_v30 = vsel %vm18103_vm14, %v18102_v22, %v18100_v20  ;;  %v3786_v14 = vmax.f32 %v3639_v46, %v3728_v45  ;;  %9071 = vmatpush3.bf16.msk.msra.mxu1 %vm18104_vm0, %v17708_v29  ;;  %vm14653_vm14 = vmand %vm18105_vm4, %vm18096_vm10  ;;  %v18109_v46 = vld [vmem:[#allocation32_spill] sm:$0xff]  ;;  %v3876_v20 = vsel %vm18114_vm13, %v18113_v9, %v18112_v59  ;;  %v18115_v22 = vunpack.i.h.bf16 %v14527_v49 }
 0x55b   :  { %v18110_v31 = vunpack.i.h.bf16 %v18109_v46  ;;  %v18117_v44 = vunpack.i.h.bf16 %v18116_v53  ;;  %vm18118_vm7 = vmmov %vm18114_vm13  ;;  %vm18120_vm0 = vnez %v18010_v26  ;;  %vm18122_vm4 = vcmp.lt.s32.totalorder %v12266_v13, 91  ;;  %v14709_v9 = vpop.permute.xlu1 %10269  ;;  %2643 = vrot.lane.b32.xlu0 %v13966_v1, %s10689_s18 }
 0x55c   :  { %vm18123_vm13 = vcmp.eq.s32.totalorder %v14363_v38, %v12280_v50  ;;  %v18126_v59 = vunpack.i.l.bf16 %v18087_v27  ;;  %18133 = vst [vmem:[#allocation29_spill] sm:$0xff] %v14709_v9  ;;  %v18168_v18 = vunpack.i.h.bf16 %v18142_v41 }
 0x55d   :  { %v4032_v45 = vsel %vm18111_vm5, %v18110_v31, %v18108_v11  ;;  %v3884_v32 = vsel %vm18118_vm7, %v18117_v44, %v18115_v22  ;;  %vm18119_vm5 = vnez %v18019_v5  ;;  %vm14686_vm2 = vmand %vm18123_vm13, %vm18122_vm4  ;;  %v3934_v11 = vmax.f32 %v3786_v14, %v3876_v20  ;;  %v14690_v31 = vpop.permute.xlu0 %10154  ;;  %v18135_v22 = vld [vmem:[#allocation22_spill] sm:$0xff] }
 0x55e   :  { %vm18121_vm10 = vmpackc.low %vm18119_vm5, %vm18120_vm0  ;;  %v3943_v46 = vmax.f32 %v3795_v35, %v3884_v32  ;;  %v18127_v5 = vunpack.i.h.bf16 %v13748_v43  ;;  %vm18128_vm7 = vcmask 949248   ;;  %vm18130_vm0 = vcmp.eq.s32.totalorder %v14388_v62, %v12280_v50 }
 0x55f   :  { %9073 = vmatprep.subr.msk.bf16.mxu1 %vm18121_vm10, %v17708_v29  ;;  %vm18129_vm5 = vmmov %vm18122_vm4  ;;  %v4508_v14 = vadd.s32 896, %v12264_v3  ;;  %v18134_v20 = vunpack.i.h.bf16 %v18087_v27  ;;  %v18136_v44 = vunpack.i.h.bf16 %v18135_v22  ;;  %v4082_v32 = vmax.f32 %v3934_v11, %v4024_v30  ;;  %2937 = vrot.lane.b32.xlu0 %v13966_v1, %s10690_s27 }
 0x560   :  { %v4320_v26 = vsel %vm18128_vm7, %v18127_v5, %v18126_v59  ;;  %vm14702_vm10 = vmand %vm18130_vm0, %vm18129_vm5  ;;  %v4509_v5 = vadd.s32 904, %v12264_v3  ;;  %v18143_v22 = vunpack.i.l.bf16 %v14602_v36  ;;  %vm18145_vm0 = vcmask 957440   ;;  %9075 = vmatpush3.bf16.msk.msra.mxu1 %vm9074_vm15, %v17708_v29 }
 0x561   :  { %vm18137_vm4 = vmmov %vm18128_vm7  ;;  %vm18139_vm7 = vcmp.eq.s32.totalorder %v14405_v28, %v12280_v50  ;;  %v4091_v9 = vmax.f32 %v3943_v46, %v4032_v45  ;;  %v18150_v45 = vunpack.i.h.bf16 %v14690_v31  ;;  %v18151_v11 = vunpack.i.l.bf16 %v13804_v23  ;;  %v18161_v23 = vld [vmem:[#allocation40_spill] sm:$0xff] }
 0x562   :  { %v4328_v59 = vsel %vm18137_vm4, %v18136_v44, %v18134_v20  ;;  %vm18138_vm13 = vmmov %vm18129_vm5  ;;  %v18144_v20 = vunpack.i.h.bf16 %v14179_v63  ;;  %v18153_v16 = vunpack.i.l.bf16 %v14690_v31  ;;  %v18154_v46 = vunpack.i.h.bf16 %v14263_v47 }
 0x563   :  { %vm14721_vm5 = vmand %vm18139_vm7, %vm18138_vm13  ;;  %v18200_v62 = vunpack.i.h.bf16 %v14348_v55  ;;  %3231 = vrot.lane.b32.xlu0 %v13966_v1, %s10692_s28 }
 0x564   :  { %v4172_v44 = vsel %vm18145_vm0, %v18144_v20, %v18143_v22  ;;  %vm18146_vm4 = vmmov %vm18138_vm13  ;;  %vm18147_vm13 = vcmp.eq.s32.totalorder %v14475_v52, %v12280_v50  ;;  %vm18152_vm0 = vcmask 1039360   ;;  %v18156_v52 = vunpack.i.h.bf16 %v14602_v36  ;;  %v18157_v20 = vld [vmem:[#allocation33_spill] sm:$0xff] }
 0x565   :  { %vm14745_vm7 = vmand %vm18147_vm13, %vm18146_vm4  ;;  %v2689_v34 = vsel %vm18152_vm0, %v18151_v11, %v18150_v45  ;;  %v18158_v35 = vunpack.i.h.bf16 %v18157_v20  ;;  %v10177_v45 = vunpack.i.h.bf16 %v18161_v23  ;;  %v14778_v11 = vpop.permute.xlu0 %10159  ;;  %v14787_v20 = vpop.permute.xlu1 %10279  ;;  %vm18170_vm13 = vcmask 1022976  }
 0x566   :  { %vm18155_vm6 = vmmov %vm18152_vm0  ;;  %vm4670_vm0 = vcmp.eq.s32.totalorder %v4508_v14, %v12280_v50  ;;  %v2746_v42 = vmax.f32 %v10542_v54, %v2689_v34  ;;  %18162 = vst [vmem:[#allocation26_spill] sm:$0xff] %v14787_v20  ;;  %v18181_v54 = vunpack.i.h.bf16 %v13793_v21 }
 0x567   :  { %v2706_v22 = vsel %vm18155_vm6, %v18154_v46, %v18153_v16  ;;  %v4180_v30 = vsel %vm18159_vm3, %v18158_v35, %v18156_v52  ;;  %vm18160_vm15 = vmpackc.low %vm14522_vm9, %vm14491_vm12  ;;  %v4230_v16 = vmax.f32 %v4082_v32, %v4172_v44  ;;  %v10162_v35 = vunpack.i.h.bf16 %v14778_v11  ;;  %v10543_v32 = vld [vmem:[#allocation4 + $0xb8] sm:$0xf]  ;;  %3526 = vrot.lane.b32.xlu0 %v13966_v1, %s10698_s16 }
 0x568   :  { %9077 = vmatprep.subr.msk.bf16.mxu1 %vm18160_vm15, %v17708_v29  ;;  %vm9080_vm4 = vmpackc.low %vm14653_vm14, %vm14628_vm8  ;;  %v4239_v46 = vmax.f32 %v4091_v9, %v4180_v30  ;;  %v10161_v52 = vunpack.i.l.bf16 %v14778_v11  ;;  %vm4671_vm9 = vcmp.eq.s32.totalorder %v4509_v5, %v12280_v50  ;;  %v2765_v9 = vmax.f32 %v10543_v32, %v2706_v22  ;;  %v10546_v11 = vld [vmem:[#allocation4 + $0x70] sm:$0xff] }
 0x569   :  { %v17496_v44 = vunpack.i.h.bf16 %v14787_v20  ;;  %v4378_v30 = vmax.f32 %v4230_v16, %v4320_v26  ;;  %vm18163_vm6 = vmpackc.low %vm14554_vm1, %vm14534_vm11  ;;  %vm18164_vm3 = vcmp.lt.s32.totalorder %v12266_v13, 91  ;;  %vm18165_vm15 = vcmp.eq.s32.totalorder %v14539_v37, %v12280_v50 }
 0x56a   :  { %v14797_v34 = vmax.f32 %v4239_v46, %v4328_v59  ;;  %9079 = vmatpush3.bf16.msk.msra.mxu1 %vm18163_vm6, %v17708_v29  ;;  %vm14810_vm12 = vmand %vm18165_vm15, %vm18164_vm3  ;;  %v18169_v26 = vunpack.i.l.bf16 %v13836_v17  ;;  %vm18172_vm11 = vcmask 1031168   ;;  %v18173_v16 = vunpack.i.h.bf16 %v13776_v25  ;;  %v18175_v46 = vld [vmem:[#allocation28_spill] sm:$0xff] }
 0x56b   :  { %v2836_v4 = vsel %vm18172_vm11, %v18171_v24, %v10162_v35  ;;  %vm18174_vm1 = vmmov %vm18172_vm11  ;;  %3122 = vrot.lane.b32.xlu1 %v18175_v46, %s10691_s0  ;;  %9081 = vmatprep.subr.msk.bf16.mxu1 %vm9080_vm4, %v17708_v29  ;;  %vm18177_vm6 = vcmp.eq.s32.totalorder %v14561_v33, %v12280_v50  ;;  %v18180_v17 = vunpack.i.l.bf16 %v18142_v41  ;;  %vm18182_vm15 = vcmask 1022976  }
 0x56c   :  { %v2983_v59 = vsel %vm18170_vm13, %v18169_v26, %v18168_v18  ;;  %v2853_v37 = vsel %vm18174_vm1, %v18173_v16, %v10161_v52  ;;  %vm18176_vm13 = vmmov %vm18164_vm3  ;;  %v2893_v19 = vmax.f32 %v2746_v42, %v2836_v4  ;;  %v14852_v26 = vpop.permute.xlu0 %10169  ;;  %5197 = vmatprep.mubr.f32.mxu1 %v4378_v30  ;;  %v18187_v42 = vunpack.i.l.bf16 %v18048_v61  ;;  %v14870_v4 = vpop.permute.xlu1 %10284 }
 0x56d   :  { %vm14840_vm3 = vmand %vm18177_vm6, %vm18176_vm13  ;;  %v3000_v32 = vsel %vm18182_vm15, %v18181_v54, %v18180_v17  ;;  %v2912_v18 = vmax.f32 %v2765_v9, %v2853_v37  ;;  %vm18188_vm11 = vcmask 1006592   ;;  %v17497_v24 = vunpack.i.l.bf16 %v18161_v23  ;;  %5198 = vmatmul.mubr.f32.gmra.mrb[38].mxu1 %v14305_v39  ;;  %v18193_v39 = vld [vmem:[#allocation41_spill] sm:$0xff]  ;;  %v10544_v54 = vld [vmem:[#allocation4 + $0xc0] sm:$0xf] }
 0x56e   :  { %vm18183_vm8 = vmmov %vm18174_vm1  ;;  %v3277_v9 = vsel %vm18188_vm11, %v18187_v42, %v10177_v45  ;;  %v10171_v30 = vunpack.i.l.bf16 %v14852_v26  ;;  %v17501_v61 = vunpack.i.h.bf16 %v14046_v2  ;;  %v3040_v16 = vmax.f32 %v2893_v19, %v2983_v59 }
 0x56f   :  { %v2854_v7 = vsel %vm18183_vm8, %v10161_v52, %v17496_v44  ;;  %vm18184_vm14 = vmmov %vm18176_vm13  ;;  %v10172_v52 = vunpack.i.h.bf16 %v14852_v26  ;;  %v3059_v37 = vmax.f32 %v2912_v18, %v3000_v32  ;;  %v17495_v17 = vunpack.i.h.bf16 %v14870_v4  ;;  %3416 = vrot.lane.b32.xlu1 %v18175_v46, %s10697_s4 }
 0x570   :  { %vm14858_vm4 = vmand %vm4670_vm0, %vm18184_vm14  ;;  %v17498_v5 = vunpack.i.h.bf16 %v18193_v39  ;;  %v2766_v42 = vmax.f32 %v10544_v54, %v2854_v7  ;;  %v18194_v59 = vunpack.i.l.bf16 %v13855_v6  ;;  %v18196_v19 = vunpack.i.h.bf16 %v13807_v48  ;;  %v14918_v28 = vpop.permute.xlu0 %10179 }
 0x571   :  { %vm18189_vm0 = vmmov %vm18176_vm13  ;;  %v17500_v6 = vunpack.i.l.bf16 %v14046_v2  ;;  %v18199_v46 = vunpack.i.l.bf16 %v18142_v41  ;;  %v17503_v54 = vunpack.i.h.bf16 %v14918_v28  ;;  %vm18203_vm8 = vcmask 990208  }
 0x572   :  { %vm14877_vm1 = vmand %vm4671_vm9, %vm18189_vm0  ;;  %vm18195_vm9 = vcmask 1014784   ;;  %vm18205_vm14 = vcmask 973824  }
 0x573   :  { %vm18192_vm13 = vmpackc.low %vm14702_vm10, %vm14686_vm2  ;;  %v3130_v32 = vsel %vm18195_vm9, %v18194_v59, %v10172_v52  ;;  %v3001_v7 = vsel %vm18182_vm15, %v18199_v46, %v17495_v17  ;;  %v10181_v59 = vunpack.i.l.bf16 %v14918_v28 }
 0x574   :  { %9083 = vmatpush3.bf16.msk.msra.mxu1 %vm18192_vm13, %v17708_v29  ;;  %vm18197_vm6 = vmmov %vm18195_vm9  ;;  %v3187_v53 = vmax.f32 %v3040_v16, %v3130_v32  ;;  %v14931_v32 = vpop.permute.xlu1 %10289  ;;  %vm18221_vm13 = vcmask 957440  }
 0x575   :  { %v3147_v18 = vsel %vm18197_vm6, %v18196_v19, %v10171_v30  ;;  %vm18198_vm2 = vmpackc.low %vm14745_vm7, %vm14721_vm5  ;;  %v18202_v19 = vunpack.i.l.bf16 %v13973_v15  ;;  %v17499_v44 = vunpack.i.h.bf16 %v14931_v32  ;;  %v18204_v15 = vunpack.i.l.bf16 %v14092_v56  ;;  %v18211_v56 = vld [vmem:[#allocation42_spill] sm:$0xff] }
 0x576   :  { %9085 = vmatprep.subr.msk.bf16.mxu1 %vm18198_vm2, %v17708_v29  ;;  %vm9086_vm10 = vmpackc.low %vm14840_vm3, %vm14810_vm12  ;;  %v3206_v38 = vmax.f32 %v3059_v37, %v3147_v18  ;;  %v2913_v37 = vmax.f32 %v2766_v42, %v3001_v7  ;;  %v3334_v46 = vmax.f32 %v3187_v53, %v3277_v9  ;;  %v17505_v9 = vunpack.i.l.bf16 %v18193_v39  ;;  %v18210_v7 = vld [vmem:[#allocation38_spill] sm:$0xff] }
 0x577   :  { %vm9088_vm5 = vmpackc.low %vm14877_vm1, %vm14858_vm4  ;;  %v3573_v18 = vsel %vm18203_vm8, %v18202_v19, %v17501_v61  ;;  %v3868_v42 = vsel %vm18205_vm14, %v18204_v15, %v17498_v5  ;;  %v18206_v53 = vunpack.i.l.bf16 %v18066_v57  ;;  %10489 = vrot.lane.b32.xlu1 %v18210_v7, %s10699_s17  ;;  %v14973_v15 = vpop.permute.xlu0 %10189  ;;  %vm18217_vm4 = vcmask 982016  }
 0x578   :  { %vm18201_vm7 = vmmov %vm18188_vm11  ;;  %9087 = vmatpush3.bf16.msk.msra.mxu1 %vm9086_vm10, %v17708_v29  ;;  %vm18207_vm11 = vcmask 998400   ;;  %v17502_v33 = vunpack.i.h.bf16 %v14973_v15  ;;  %v14982_v5 = vpop.permute.xlu1 %10299  ;;  %vm18227_vm2 = vcmask 949248   ;;  %vm18230_vm10 = vcmask 965632  }
 0x579   :  { %v3294_v16 = vsel %vm18201_vm7, %v18200_v62, %v17497_v24  ;;  %vm18209_vm0 = vmmov %vm18207_vm11  ;;  %9089 = vmatprep.subr.msk.bf16.mxu1 %vm9088_vm5, %v17708_v29  ;;  %v17507_v62 = vunpack.i.h.bf16 %v18211_v56  ;;  %v10191_v24 = vunpack.i.l.bf16 %v14973_v15 }
 0x57a   :  { %v3353_v17 = vmax.f32 %v3206_v38, %v3294_v16  ;;  %v3425_v38 = vsel %vm18207_vm11, %v18206_v53, %v17503_v54  ;;  %v3442_v22 = vsel %vm18209_vm0, %v18208_v58, %v10181_v59  ;;  %vm18212_vm12 = vmmov %vm18197_vm6  ;;  %v18213_v53 = vunpack.i.h.bf16 %v14432_v8 }
 0x57b   :  { %v3482_v16 = vmax.f32 %v3334_v46, %v3425_v38  ;;  %v3148_v19 = vsel %vm18212_vm12, %v10171_v30, %v17499_v44  ;;  %vm18214_vm3 = vmmov %vm18203_vm8  ;;  %v17504_v30 = vunpack.i.h.bf16 %v14982_v5  ;;  %10499 = vrot.lane.b32.xlu1 %v18210_v7, %s10701_s8 }
 0x57c   :  { %v3501_v57 = vmax.f32 %v3353_v17, %v3442_v22  ;;  %v3590_v14 = vsel %vm18214_vm3, %v18213_v53, %v17500_v6  ;;  %v3060_v58 = vmax.f32 %v2913_v37, %v3148_v19  ;;  %v17511_v17 = vunpack.i.l.bf16 %v18211_v56  ;;  %v18215_v22 = vld [vmem:[#allocation43_spill] sm:$0xff]  ;;  %vm18219_vm1 = vmmov %vm18217_vm4 }
 0x57d   :  { %v3630_v46 = vmax.f32 %v3482_v16, %v3573_v18  ;;  %v17506_v44 = vunpack.i.h.bf16 %v18215_v22  ;;  %v17510_v53 = vunpack.i.l.bf16 %v18215_v22  ;;  %v18216_v37 = vunpack.i.l.bf16 %v14034_v60  ;;  %vm18222_vm9 = vmmov %vm18209_vm0 }
 0x57e   :  { %v3649_v38 = vmax.f32 %v3501_v57, %v3590_v14  ;;  %v18218_v6 = vunpack.i.h.bf16 %v18061_v10  ;;  %v18220_v16 = vunpack.i.l.bf16 %v14179_v63  ;;  %v3443_v60 = vsel %vm18222_vm9, %v10181_v59, %v17504_v30  ;;  %vm18224_vm6 = vmmov %vm18205_vm14 }
 0x57f   :  { %v3720_v19 = vsel %vm18217_vm4, %v18216_v37, %v17502_v33  ;;  %v15008_v37 = vpop.permute.xlu0 %10199  ;;  %v3207_v33 = vmax.f32 %v3060_v58, %v3443_v60  ;;  %v18228_v60 = vld [vmem:[#allocation34_spill] sm:$0xff]  ;;  %vm18232_vm15 = vmmov %vm18230_vm10  ;;  %3821 = vrot.lane.b32.xlu1 %v13966_v1, %s10700_s19  ;;  %vm18240_vm14 = vcmask 1031168   ;;  %vm18245_vm0 = vcmask 1039360  }
 0x580   :  { %v3737_v18 = vsel %vm18219_vm1, %v18218_v6, %v10191_v24  ;;  %v4164_v57 = vsel %vm18221_vm13, %v18220_v16, %v17507_v62  ;;  %v3777_v14 = vmax.f32 %v3630_v46, %v3720_v19  ;;  %v18223_v6 = vunpack.i.h.bf16 %v14527_v49  ;;  %v15017_v16 = vpop.permute.xlu1 %10309  ;;  %vm18234_vm5 = vmmov %vm18227_vm2 }
 0x581   :  { %v3796_v61 = vmax.f32 %v3649_v38, %v3737_v18  ;;  %v17508_v54 = vunpack.i.h.bf16 %v15008_v37  ;;  %v10201_v63 = vunpack.i.l.bf16 %v15008_v37  ;;  %18225 = vst [vmem:[#allocation19_spill] sm:$0xff] %v15017_v16  ;;  %v17514_v46 = vunpack.i.h.bf16 %v14371_v51  ;;  %vm18235_vm7 = vmmov %vm18219_vm1 }
 0x582   :  { %v3885_v7 = vsel %vm18224_vm6, %v18223_v6, %v17505_v9  ;;  %v3925_v38 = vmax.f32 %v3777_v14, %v3868_v42  ;;  %v17509_v59 = vunpack.i.h.bf16 %v15017_v16  ;;  %v18226_v18 = vunpack.i.l.bf16 %v13748_v43  ;;  %vm18238_vm8 = vmmov %vm18221_vm13 }
 0x583   :  { %v3944_v19 = vmax.f32 %v3796_v61, %v3885_v7  ;;  %v18229_v6 = vunpack.i.l.bf16 %v18228_v60  ;;  %v18231_v42 = vunpack.i.h.bf16 %v18073_v0  ;;  %v18233_v61 = vunpack.i.h.bf16 %v18087_v27  ;;  %vm18243_vm11 = vmmov %vm18240_vm14  ;;  %3969 = vrot.lane.b32.xlu1 %v13966_v1, %s10701_s8 }
 0x584   :  { %v4312_v58 = vsel %vm18227_vm2, %v18226_v18, %v17506_v44  ;;  %v17512_v7 = vunpack.i.l.bf16 %v14371_v51  ;;  %v3738_v60 = vsel %vm18235_vm7, %v10191_v24, %v17509_v59  ;;  %v18239_v24 = vunpack.i.l.bf16 %v13776_v25  ;;  %v18242_v59 = vld [vmem:[#allocation23_spill] sm:$0xff]  ;;  %vm18247_vm12 = vmmov %vm18245_vm0 }
 0x585   :  { %v4016_v30 = vsel %vm18230_vm10, %v18229_v6, %v17508_v54  ;;  %v4033_v14 = vsel %vm18232_vm15, %v18231_v42, %v10201_v63  ;;  %v4329_v43 = vsel %vm18234_vm5, %v18233_v61, %v17510_v53  ;;  %v15047_v6 = vpop.permute.xlu0 %10214  ;;  %v3354_v42 = vmax.f32 %v3207_v33, %v3738_v60  ;;  %v15051_v54 = vpop.permute.xlu1 %10319  ;;  %vm18248_vm3 = vmmov %vm18230_vm10 }
 0x586   :  { %v4073_v18 = vmax.f32 %v3925_v38, %v4016_v30  ;;  %v4092_v9 = vmax.f32 %v3944_v19, %v4033_v14  ;;  %v17515_v44 = vunpack.i.h.bf16 %v15047_v6  ;;  %v17513_v62 = vunpack.i.l.bf16 %v15047_v6  ;;  %18236 = vst [vmem:[#allocation21_spill] sm:$0xff] %v15051_v54  ;;  %v18241_v14 = vld [vmem:[#allocation35_spill] sm:$0xff] }
 0x587   :  { %v18237_v61 = vunpack.i.h.bf16 %v14602_v36  ;;  %v2845_v38 = vsel %vm18240_vm14, %v18239_v24, %v17514_v46  ;;  %v17516_v33 = vunpack.i.h.bf16 %v15051_v54  ;;  %10424 = vrot.lane.b32.xlu0 %v18241_v14, %s10689_s18  ;;  %v17531_v53 = vunpack.i.h.bf16 %v18242_v59  ;;  %4265 = vrot.lane.b32.xlu1 %v13966_v1, %s10703_s21 }
 0x588   :  { %v4221_v19 = vmax.f32 %v4073_v18, %v4164_v57  ;;  %v18244_v25 = vunpack.i.h.bf16 %v14690_v31  ;;  %v18246_v18 = vunpack.i.l.bf16 %v14263_v47  ;;  %vm18250_vm4 = vcmask 1022976  }
 0x589   :  { %v4181_v30 = vsel %vm18238_vm8, %v18237_v61, %v17511_v17  ;;  %v2837_v61 = vsel %vm18243_vm11, %v10162_v35, %v17512_v7  ;;  %v4034_v35 = vsel %vm18248_vm3, %v10201_v63, %v17516_v33  ;;  %v15087_v7 = vpop.permute.xlu0 %10224  ;;  %v15093_v46 = vpop.permute.xlu1 %10329  ;;  %v17520_v63 = vunpack.i.l.bf16 %v18242_v59  ;;  %vm18252_vm1 = vmmov %vm18250_vm4 }
 0x58a   :  { %v4240_v60 = vmax.f32 %v4092_v9, %v4181_v30  ;;  %v2690_v57 = vsel %vm18245_vm0, %v18244_v25, %v17513_v62  ;;  %v2698_v9 = vsel %vm18247_vm12, %v18246_v18, %v17515_v44  ;;  %v10545_v30 = vld [vmem:[#allocation4 + $0x28] sm:$0xff]  ;;  %v15089_v62 = vmax.f32 %v3354_v42, %v4034_v35 }
 0x58b   :  { %v2747_v24 = vmax.f32 %v10545_v30, %v2690_v57  ;;  %v2756_v17 = vmax.f32 %v10546_v11, %v2698_v9  ;;  %v17532_v47 = vunpack.i.h.bf16 %v15087_v7  ;;  %v17522_v18 = vunpack.i.l.bf16 %v15087_v7  ;;  %10449 = vrot.lane.b32.xlu0 %v18241_v14, %s10697_s4 }
 0x58c   :  { %v4388_v25 = vmax.f32 %v4240_v60, %v4329_v43  ;;  %v15095_v44 = vmax.f32 %v4221_v19, %v4312_v58  ;;  %v18249_v43 = vunpack.i.h.bf16 %v18142_v41  ;;  %v18251_v60 = vunpack.i.l.bf16 %v13793_v21 }
 0x58d   :  { %v2894_v57 = vmax.f32 %v2747_v24, %v2837_v61  ;;  %v2903_v30 = vmax.f32 %v2756_v17, %v2845_v38  ;;  %v4492_v17 = vadd.s32 768, %v12264_v3  ;;  %v18253_v38 = vld [vmem:[#allocation27_spill] sm:$0xff]  ;;  %v15115_v41 = vpop.permute.xlu0 %10234  ;;  %v18254_v9 = vunpack.i.l.bf16 %v13807_v48  ;;  %v15129_v11 = vpop.permute.xlu1 %10344 }
 0x58e   :  { %5202 = vmatprep.mubr.f32.mxu1 %v4388_v25  ;;  %v2984_v42 = vsel %vm18250_vm4, %v18249_v43, %v17522_v18  ;;  %v2992_v58 = vsel %vm18252_vm1, %v18251_v60, %v17532_v47  ;;  %v17527_v19 = vunpack.i.h.bf16 %v18253_v38  ;;  %vm18255_vm13 = vcmask 1014784   ;;  %v15145_v43 = vld [vmem:[#allocation4 + $0x98] sm:$0xff] }
 0x58f   :  { %5203 = vmatmul.mubr.f32.gmra.mrb[40].mxu1 %v14797_v34  ;;  %v3041_v14 = vmax.f32 %v2894_v57, %v2984_v42  ;;  %v3050_v61 = vmax.f32 %v2903_v30, %v2992_v58  ;;  %v3139_v21 = vsel %vm18255_vm13, %v18254_v9, %v17531_v53  ;;  %vm18256_vm9 = vmmov %vm18255_vm13  ;;  %v17530_v34 = vunpack.i.h.bf16 %v15115_v41  ;;  %10459 = vrot.lane.b32.xlu0 %v18085_v12, %s10699_s17 }
 0x590   :  { %v3131_v1 = vsel %vm18256_vm9, %v10172_v52, %v17520_v63  ;;  %v17519_v24 = vunpack.i.l.bf16 %v15115_v41  ;;  %v4493_v48 = vadd.s32 776, %v12264_v3  ;;  %v17517_v57 = vunpack.i.l.bf16 %v18253_v38  ;;  %18260 = vst [vmem:[#allocation25_spill] sm:$0xff] %v15145_v43  ;;  %2810 = vrot.lane.b32.xlu1 %v15145_v43, %s10688_s6 }
 0x591   :  { %v3188_v35 = vmax.f32 %v3041_v14, %v3131_v1  ;;  %v3197_v25 = vmax.f32 %v3050_v61, %v3139_v21  ;;  %vm18257_vm6 = vcmask 1006592   ;;  %v18258_v52 = vunpack.i.l.bf16 %v14348_v55  ;;  %v15155_v14 = vpop.permute.xlu0 %10244  ;;  %v18263_v61 = vld [vmem:[#allocation24_spill] sm:$0xff]  ;;  %v15166_v33 = vpop.permute.xlu1 %10354 }
 0x592   :  { %v3278_v26 = vsel %vm18257_vm6, %v10177_v45, %v17519_v24  ;;  %vm18259_vm2 = vmmov %vm18257_vm6  ;;  %vm4654_vm10 = vcmp.eq.s32.totalorder %v4492_v17, %v12280_v50  ;;  %v18261_v42 = vunpack.i.l.bf16 %v13825_v40  ;;  %vm18262_vm15 = vcmask 998400   ;;  %18266 = vst [vmem:[#allocation30_spill] sm:$0xff] %v15166_v33 }
 0x593   :  { %v3286_v30 = vsel %vm18259_vm2, %v18258_v52, %v17530_v34  ;;  %v3335_v45 = vmax.f32 %v3188_v35, %v3278_v26  ;;  %v4510_v55 = vadd.s32 912, %v12264_v3  ;;  %v17526_v9 = vunpack.i.h.bf16 %v18263_v61  ;;  %vm18265_vm5 = vmmov %vm18262_vm15  ;;  %10469 = vrot.lane.b32.xlu0 %v18085_v12, %s10701_s8 }
 0x594   :  { %v3434_v60 = vsel %vm18262_vm15, %v18261_v42, %v17527_v19  ;;  %v3344_v58 = vmax.f32 %v3197_v25, %v3286_v30  ;;  %v18264_v21 = vunpack.i.h.bf16 %v14918_v28  ;;  %v17525_v52 = vunpack.i.h.bf16 %v15155_v14  ;;  %3104 = vrot.lane.b32.xlu1 %v15145_v43, %s10691_s0 }
 0x595   :  { %v17518_v40 = vunpack.i.l.bf16 %v15155_v14  ;;  %vm4655_vm7 = vcmp.eq.s32.totalorder %v4493_v48, %v12280_v50  ;;  %v4511_v26 = vadd.s32 920, %v12264_v3  ;;  %v18267_v28 = vunpack.i.h.bf16 %v14046_v2 }
 0x596   :  { %v3426_v1 = vsel %vm18265_vm5, %v18264_v21, %v17517_v57  ;;  %v3492_v25 = vmax.f32 %v3344_v58, %v3434_v60  ;;  %vm18268_vm8 = vcmask 990208   ;;  %v18269_v42 = vunpack.i.l.bf16 %v14432_v8  ;;  %v15186_v57 = vpop.permute.xlu0 %10254 }
 0x597   :  { %v3483_v35 = vmax.f32 %v3335_v45, %v3426_v1  ;;  %v3574_v30 = vsel %vm18268_vm8, %v18267_v28, %v17518_v40  ;;  %vm18270_vm14 = vmmov %vm18268_vm8  ;;  %v4494_v60 = vadd.s32 784, %v12264_v3  ;;  %v4495_v58 = vadd.s32 792, %v12264_v3  ;;  %10479 = vrot.lane.b32.xlu0 %v18085_v12, %s10703_s21 }
 0x598   :  { %v3582_v45 = vsel %vm18270_vm14, %v18269_v42, %v17525_v52  ;;  %vm4672_vm11 = vcmp.eq.s32.totalorder %v4510_v55, %v12280_v50  ;;  %v4512_v28 = vadd.s32 928, %v12264_v3  ;;  %v17521_v40 = vunpack.i.l.bf16 %v18263_v61  ;;  %3398 = vrot.lane.b32.xlu1 %v15145_v43, %s10697_s4 }
 0x599   :  { %v3631_v21 = vmax.f32 %v3483_v35, %v3574_v30  ;;  %v3640_v1 = vmax.f32 %v3492_v25, %v3582_v45  ;;  %v18271_v8 = vunpack.i.l.bf16 %v18061_v10  ;;  %vm18272_vm0 = vcmask 982016   ;;  %v15198_v35 = vpop.permute.xlu1 %10364 }
 0x59a   :  { %v17523_v24 = vunpack.i.h.bf16 %v15186_v57  ;;  %v17524_v63 = vunpack.i.l.bf16 %v15186_v57  ;;  %18273 = vst [vmem:[#allocation37_spill] sm:$0xff] %v15198_v35  ;;  %vm18274_vm12 = vcmp.lt.s32.totalorder %v12266_v13, 91  ;;  %vm4673_vm4 = vcmp.eq.s32.totalorder %v4511_v26, %v12280_v50  ;;  %vm18278_vm1 = vmmov %vm18272_vm0 }
 0x59b   :  { %v3729_v42 = vsel %vm18272_vm0, %v18271_v8, %v17526_v9  ;;  %vm15206_vm3 = vmand %vm4654_vm10, %vm18274_vm12  ;;  %v4513_v10 = vadd.s32 936, %v12264_v3  ;;  %v4496_v45 = vadd.s32 800, %v12264_v3  ;;  %v18279_v17 = vunpack.i.l.bf16 %v14527_v49  ;;  %v15235_v49 = vpop.permute.xlu0 %10259 }
 0x59c   :  { %v3787_v25 = vmax.f32 %v3640_v1, %v3729_v42  ;;  %v18277_v1 = vunpack.i.h.bf16 %v14973_v15  ;;  %vm18280_vm13 = vcmask 973824   ;;  %vm18281_vm9 = vmmov %vm18274_vm12  ;;  %vm4656_vm2 = vcmp.eq.s32.totalorder %v4494_v60, %v12280_v50  ;;  %3694 = vrot.lane.b32.xlu1 %v15145_v43, %s10699_s17 }
 0x59d   :  { %v3877_v8 = vsel %vm18280_vm13, %v18279_v17, %v17523_v24  ;;  %vm15229_vm6 = vmand %vm4655_vm7, %vm18281_vm9  ;;  %vm4657_vm10 = vcmp.eq.s32.totalorder %v4495_v58, %v12280_v50  ;;  %vm4674_vm7 = vcmp.eq.s32.totalorder %v4512_v28, %v12280_v50  ;;  %v4497_v48 = vadd.s32 808, %v12264_v3  ;;  %v15265_v24 = vld [vmem:[#allocation4 + $0xe0] sm:$0xf] }
 0x59e   :  { %v3721_v12 = vsel %vm18278_vm1, %v18277_v1, %v17521_v40  ;;  %v3935_v1 = vmax.f32 %v3787_v25, %v3877_v8  ;;  %vm18284_vm15 = vmmov %vm18281_vm9  ;;  %v18287_v40 = vunpack.i.h.bf16 %v18193_v39  ;;  %v17529_v25 = vunpack.i.h.bf16 %v15235_v49  ;;  %v15254_v8 = vpop.permute.xlu1 %10374  ;;  %2681 = vrot.lane.b32.xlu0 %v15265_v24, %s10689_s18 }
 0x59f   :  { %v3778_v15 = vmax.f32 %v3631_v21, %v3721_v12  ;;  %vm15241_vm5 = vmand %vm4672_vm11, %vm18284_vm15  ;;  %v17528_v12 = vunpack.i.l.bf16 %v15235_v49  ;;  %18289 = vst [vmem:[#allocation36_spill] sm:$0xff] %v15254_v8  ;;  %v4514_v18 = vadd.s32 944, %v12264_v3  ;;  %vm4658_vm1 = vcmp.eq.s32.totalorder %v4496_v45, %v12280_v50  ;;  %v15308_v34 = vpop.permute.xlu0 %10264 }
 0x5a0   :  { %vm18288_vm8 = vmmov %vm18280_vm13  ;;  %v4515_v26 = vadd.s32 952, %v12264_v3  ;;  %v18296_v52 = vunpack.i.h.bf16 %v15008_v37  ;;  %vm18297_vm13 = vcmask 965632   ;;  %v18298_v60 = vunpack.i.l.bf16 %v18073_v0  ;;  %3989 = vrot.lane.b32.xlu1 %v15145_v43, %s10701_s8 }
 0x5a1   :  { %v3869_v21 = vsel %vm18288_vm8, %v18287_v40, %v17524_v63  ;;  %vm18290_vm14 = vmmov %vm18281_vm9  ;;  %v18294_v40 = vmov 0  ;;  %v4498_v63 = vadd.s32 816, %v12264_v3  ;;  %v4499_v0 = vadd.s32 824, %v12264_v3 }
 0x5a2   :  { %vm15260_vm11 = vmand %vm4673_vm4, %vm18290_vm14  ;;  %vm4675_vm4 = vcmp.eq.s32.totalorder %v4513_v10, %v12280_v50  ;;  %v4017_v9 = vsel %vm18297_vm13, %v18296_v52, %v17528_v12  ;;  %v4516_v52 = vadd.s32 960, %v12264_v3  ;;  %v18304_v58 = vmov 0  ;;  %v15327_v12 = vpop.permute.xlu1 %10384  ;;  %2828 = vrot.lane.b32.xlu0 %v15265_v24, %s10688_s6 }
 0x5a3   :  { %vm18293_vm0 = vmmov %vm18281_vm9  ;;  %v4517_v53 = vadd.s32 968, %v12264_v3  ;;  %v17535_v47 = vunpack.i.l.bf16 %v15308_v34  ;;  %18306 = vst [vmem:[#allocation20_spill] sm:$0xff] %v15327_v12  ;;  %v18308_v28 = vmov 0  ;;  %v18312_v10 = vunpack.i.h.bf16 %v18211_v56 }
 0x5a4   :  { %vm15273_vm12 = vmand %vm4656_vm2, %vm18293_vm0  ;;  %vm18313_vm2 = vcmask 957440   ;;  %4285 = vrot.lane.b32.xlu1 %v15145_v43, %s10703_s21  ;;  %v18349_v43 = vunpack.i.l.bf16 %v14787_v20  ;;  %v4519_v33 = vadd.s32 984, %v12264_v3  ;;  %v15489_v20 = vld [vmem:[#allocation4 + $0xe8] sm:$0xf]  ;;  %v18360_v17 = vunpack.i.h.bf16 %v18242_v59 }
 0x5a5   :  { %v18295_v40 = vsel %vm15273_vm12, 4294967295, %v18294_v40  ;;  %vm18299_vm9 = vmmov %vm18297_vm13  ;;  %vm4659_vm13 = vcmp.eq.s32.totalorder %v4497_v48, %v12280_v50  ;;  %v4165_v12 = vsel %vm18313_vm2, %v18312_v10, %v17535_v47  ;;  %vm18358_vm12 = vcmask 1022976  }
 0x5a6   :  { %v4025_v19 = vsel %vm18299_vm9, %v18298_v60, %v17529_v25  ;;  %vm18300_vm15 = vmmov %vm18293_vm0  ;;  %v18303_v60 = vld [vmem:[#allocation29_spill] sm:$0xff]  ;;  %v3926_v25 = vmax.f32 %v3778_v15, %v3869_v21  ;;  %v18310_v21 = vmov 0  ;;  %2975 = vrot.lane.b32.xlu0 %v15265_v24, %s10690_s27  ;;  %v18370_v37 = vunpack.i.h.bf16 %v15115_v41 }
 0x5a7   :  { %vm15301_vm8 = vmand %vm4657_vm10, %vm18300_vm15  ;;  %v4083_v8 = vmax.f32 %v3935_v1, %v4025_v19  ;;  %v18314_v19 = vunpack.i.h.bf16 %v15308_v34  ;;  %v18317_v1 = vmov 0  ;;  %v18319_v10 = vunpack.i.l.bf16 %v18303_v60 }
 0x5a8   :  { %vm15318_vm10 = vmand %vm4674_vm7, %vm18293_vm0  ;;  %v4074_v15 = vmax.f32 %v3926_v25, %v4017_v9  ;;  %v18315_v9 = vunpack.i.l.bf16 %v14602_v36  ;;  %v15376_v36 = vpop.permute.xlu0 %10274  ;;  %2830 = vrot.lane.b32.xlu1 %v15489_v20, %s10688_s6  ;;  %v4523_v35 = vadd.s32 1016, %v12264_v3  ;;  %v17559_v48 = vunpack.i.l.bf16 %v15051_v54 }
 0x5a9   :  { %v18305_v58 = vsel %vm15318_vm10, 4294967295, %v18304_v58  ;;  %vm18307_vm9 = vmmov %vm18293_vm0  ;;  %vm18334_vm10 = vcmp.eq.s32.totalorder %v4498_v63, %v12280_v50 }
 0x5aa   :  { %vm15333_vm7 = vmand %vm4675_vm4, %vm18307_vm9  ;;  %v4222_v25 = vmax.f32 %v4074_v15, %v4165_v12  ;;  %3269 = vrot.lane.b32.xlu0 %v15265_v24, %s10692_s28 }
 0x5ab   :  { %v18309_v28 = vsel %vm15333_vm7, 4294967295, %v18308_v28  ;;  %vm15344_vm14 = vmand %vm4658_vm1, %vm18293_vm0  ;;  %vm18321_vm1 = vcmask 949248  }
 0x5ac   :  { %v18311_v21 = vsel %vm15344_vm14, 4294967295, %v18310_v21  ;;  %vm18316_vm15 = vmmov %vm18313_vm2  ;;  %vm18322_vm2 = vcmp.eq.s32.totalorder %v4514_v18, %v12280_v50  ;;  %3124 = vrot.lane.b32.xlu1 %v15489_v20, %s10691_s0 }
 0x5ad   :  { %v4173_v45 = vsel %vm18316_vm15, %v18315_v9, %v18314_v19  ;;  %vm15370_vm9 = vmand %vm4659_vm13, %vm18293_vm0  ;;  %v18320_v19 = vunpack.i.h.bf16 %v18215_v22 }
 0x5ae   :  { %v18318_v1 = vsel %vm15370_vm9, 4294967295, %v18317_v1  ;;  %v4231_v47 = vmax.f32 %v4083_v8, %v4173_v45  ;;  %vm15391_vm15 = vmand %vm18322_vm2, %vm18293_vm0  ;;  %v17541_v8 = vunpack.i.l.bf16 %v15376_v36  ;;  %v15399_v45 = vpop.permute.xlu1 %10389 }
 0x5af   :  { %v4313_v9 = vsel %vm18321_vm1, %v18320_v19, %v18319_v10  ;;  %18325 = vst [vmem:[#allocation32_spill] sm:$0xff] %v15399_v45  ;;  %v18326_v10 = vunpack.i.h.bf16 %v18303_v60  ;;  %v18327_v19 = vunpack.i.l.bf16 %v18087_v27  ;;  %vm18328_vm2 = vmmov %vm18293_vm0  ;;  %vm18329_vm0 = vcmp.eq.s32.totalorder %v4515_v26, %v12280_v50 }
 0x5b0   :  { %vm15410_vm13 = vmand %vm18329_vm0, %vm18328_vm2  ;;  %v4370_v12 = vmax.f32 %v4222_v25, %v4313_v9  ;;  %v18335_v27 = vmov 0  ;;  %v4500_v26 = vadd.s32 832, %v12264_v3  ;;  %v18340_v9 = vunpack.i.l.bf16 %v14690_v31  ;;  %3418 = vrot.lane.b32.xlu1 %v15489_v20, %s10697_s4 }
 0x5b1   :  { %v4321_v18 = vsel %vm18321_vm1, %v18327_v19, %v18326_v10  ;;  %vm18333_vm4 = vmmov %vm18328_vm2  ;;  %v4501_v10 = vadd.s32 840, %v12264_v3  ;;  %v18337_v19 = vunpack.i.h.bf16 %v15047_v6  ;;  %vm18338_vm1 = vcmask 1039360  }
 0x5b2   :  { %v15416_v15 = vmax.f32 %v4231_v47, %v4321_v18  ;;  %vm15422_vm7 = vmand %vm18334_vm10, %vm18333_vm4  ;;  %v18339_v47 = vunpack.i.h.bf16 %v15376_v36  ;;  %v10549_v18 = vld [vmem:[#allocation4 + $0xd8] sm:$0xf]  ;;  %vm18342_vm0 = vcmp.eq.s32.totalorder %v4499_v0, %v12280_v50  ;;  %5272 = vmatprep.mubr.f32.mxu1 %v4370_v12  ;;  %vm18346_vm10 = vcmp.eq.s32.totalorder %v4516_v52, %v12280_v50 }
 0x5b3   :  { %v18336_v27 = vsel %vm15422_vm7, 4294967295, %v18335_v27  ;;  %v2699_v25 = vsel %vm18338_vm1, %v18337_v19, %v17541_v8  ;;  %vm18341_vm2 = vmmov %vm18338_vm1  ;;  %v15443_v45 = vpack.i.bf16 %v15265_v24, %v10549_v18  ;;  %v15459_v18 = vpop.permute.xlu0 %10294  ;;  %v18347_v8 = vmov 0  ;;  %5273 = vmatmul.mubr.f32.vlgmr.msra.gmra.mrb[42].mxu1 %v15095_v44 }
 0x5b4   :  { %18332 = vst [vmem:[#allocation31_spill] sm:$0xff] %v15416_v15  ;;  %v15438_v63 = vsel %vm18341_vm2, %v18340_v9, %v18339_v47  ;;  %vm15453_vm1 = vmand %vm18342_vm0, %vm18333_vm4  ;;  %v10550_v47 = vld [vmem:[#allocation4 + $0x78] sm:$0xff]  ;;  %v4518_v0 = vadd.s32 976, %v12264_v3  ;;  %v18350_v15 = vunpack.i.h.bf16 %v14371_v51  ;;  %v17550_v12 = vunpack.i.l.bf16 %v14931_v32  ;;  %3714 = vrot.lane.b32.xlu1 %v15489_v20, %s10699_s17 }
 0x5b5   :  { %v2757_v9 = vmax.f32 %v10550_v47, %v2699_v25  ;;  %vm18345_vm2 = vmmov %vm18333_vm4  ;;  %vm18351_vm4 = vcmask 1031168   ;;  %v17549_v25 = vunpack.i.l.bf16 %v14870_v4  ;;  %v15477_v47 = vpop.permute.xlu1 %10399  ;;  %vm18353_vm0 = vcmp.eq.s32.totalorder %v4517_v53, %v12280_v50  ;;  %10484 = vrot.lane.b32.xlu0 %v15443_v45, %s10698_s16 }
 0x5b6   :  { %vm15465_vm14 = vmand %vm18346_vm10, %vm18345_vm2  ;;  %v2846_v19 = vsel %vm18351_vm4, %v18350_v15, %v18349_v43  ;;  %v18354_v52 = vmov 0  ;;  %vm4663_vm9 = vcmp.eq.s32.totalorder %v4501_v10, %v12280_v50  ;;  %v4502_v44 = vadd.s32 848, %v12264_v3 }
 0x5b7   :  { %v18348_v8 = vsel %vm15465_vm14, 4294967295, %v18347_v8  ;;  %vm18352_vm10 = vmmov %vm18345_vm2  ;;  %v2904_v43 = vmax.f32 %v2757_v9, %v2846_v19  ;;  %v18357_v53 = vunpack.i.h.bf16 %v15087_v7  ;;  %v17551_v42 = vunpack.i.l.bf16 %v15459_v18 }
 0x5b8   :  { %vm15484_vm2 = vmand %vm18353_vm0, %vm18352_vm10  ;;  %vm4662_vm0 = vcmp.eq.s32.totalorder %v4500_v26, %v12280_v50  ;;  %v4503_v15 = vadd.s32 856, %v12264_v3  ;;  %v17554_v9 = vunpack.i.l.bf16 %v15017_v16  ;;  %v4521_v19 = vadd.s32 1000, %v12264_v3  ;;  %4009 = vrot.lane.b32.xlu1 %v15489_v20, %s10701_s8 }
 0x5b9   :  { %v18355_v52 = vsel %vm15484_vm2, 4294967295, %v18354_v52  ;;  %vm18356_vm4 = vmpackc.low %vm15229_vm6, %vm15206_vm3  ;;  %v2993_v24 = vsel %vm18358_vm12, %v18357_v53, %v17549_v25  ;;  %v15528_v25 = vpop.permute.xlu0 %10304  ;;  %vm18361_vm12 = vcmask 1014784   ;;  %v15541_v30 = vpop.permute.xlu1 %10409  ;;  %v18392_v16 = vunpack.i.l.bf16 %v14046_v2  ;;  %10494 = vrot.lane.b32.xlu0 %v15443_v45, %s10700_s19 }
 0x5ba   :  { %9091 = vmatpush3.bf16.msk.msra.mxu1 %vm18356_vm4, %v17708_v29  ;;  %vm18359_vm3 = vmpackc.low %vm15260_vm11, %vm15241_vm5  ;;  %v3051_v53 = vmax.f32 %v2904_v43, %v2993_v24  ;;  %vm4680_vm11 = vcmp.eq.s32.totalorder %v4518_v0, %v12280_v50  ;;  %v3140_v55 = vsel %vm18361_vm12, %v18360_v17, %v17550_v12  ;;  %vm18365_vm12 = vnez %v18295_v40  ;;  %v10551_v12 = vld [vmem:[#allocation4 + $0x30] sm:$0xff] }
 0x5bb   :  { %9093 = vmatprep.subr.msk.bf16.mxu1 %vm18359_vm3, %v17708_v29  ;;  %vm18362_vm4 = vmmov %vm18352_vm10  ;;  %vm18371_vm5 = vcmask 1006592   ;;  %v18372_v17 = vunpack.i.h.bf16 %v15459_v18  ;;  %vm18406_vm7 = vcmask 990208   ;;  %v18445_v43 = vunpack.i.l.bf16 %v15047_v6 }
 0x5bc   :  { %vm15547_vm3 = vmand %vm4662_vm0, %vm18362_vm4  ;;  %v3198_v24 = vmax.f32 %v3051_v53, %v3140_v55  ;;  %v4520_v53 = vadd.s32 992, %v12264_v3  ;;  %v3287_v40 = vsel %vm18371_vm5, %v18370_v37, %v17551_v42  ;;  %v18373_v55 = vunpack.i.l.bf16 %v18161_v23  ;;  %4305 = vrot.lane.b32.xlu1 %v15489_v20, %s10703_s21 }
 0x5bd   :  { %vm18366_vm6 = vmpackc.low %vm15301_vm8, %vm18365_vm12  ;;  %v18381_v37 = vunpack.i.l.bf16 %v14982_v5  ;;  %v15608_v0 = vpop.permute.xlu0 %10314  ;;  %10504 = vrot.lane.b32.xlu0 %v15443_v45, %s10702_s20 }
 0x5be   :  { %9095 = vmatpush3.bf16.msk.msra.mxu1 %vm18366_vm6, %v17708_v29  ;;  %vm18367_vm10 = vmmov %vm18362_vm4  ;;  %v3345_v42 = vmax.f32 %v3198_v24, %v3287_v40  ;;  %18386 = vst [vmem:[#allocation22_spill] sm:$0xff] %v15608_v0  ;;  %v17581_v40 = vunpack.i.h.bf16 %v15608_v0  ;;  %vm4682_vm2 = vcmp.eq.s32.totalorder %v4520_v53, %v12280_v50 }
 0x5bf   :  { %vm15564_vm0 = vmand %vm4663_vm9, %vm18367_vm10  ;;  %vm18375_vm9 = vnez %v18309_v28  ;;  %vm18376_vm10 = vnez %v18305_v58  ;;  %v18384_v58 = vunpack.i.h.bf16 %v18263_v61 }
 0x5c0   :  { %vm18374_vm8 = vmmov %vm18371_vm5 }
 0x5c1   :  { %v3295_v10 = vsel %vm18374_vm8, %v18373_v55, %v18372_v17  ;;  %vm18377_vm6 = vmpackc.low %vm18375_vm9, %vm18376_vm10  ;;  %v18382_v17 = vunpack.i.h.bf16 %v18253_v38  ;;  %vm18385_vm9 = vcmask 982016   ;;  %vm18388_vm10 = vcmp.eq.s32.totalorder %v4519_v33, %v12280_v50  ;;  %10509 = vrot.lane.b32.xlu0 %v15443_v45, %s10703_s21  ;;  %v18462_v33 = vld [vmem:[#allocation30_spill] sm:$0xff]  ;;  %v18479_v45 = vld [vmem:[#allocation37_spill] sm:$0xff] }
 0x5c2   :  { %9097 = vmatprep.subr.msk.bf16.mxu1 %vm18377_vm6, %v17708_v29  ;;  %vm18378_vm5 = vmmov %vm18362_vm4  ;;  %vm18383_vm4 = vcmask 998400   ;;  %v3730_v55 = vsel %vm18385_vm9, %v18384_v58, %v17554_v9  ;;  %v15626_v58 = vpop.permute.xlu1 %10419  ;;  %vm18394_vm9 = vcmp.eq.s32.totalorder %v4502_v44, %v12280_v50  ;;  %v4504_v9 = vadd.s32 864, %v12264_v3 }
 0x5c3   :  { %vm15593_vm12 = vmand %vm4680_vm11, %vm18378_vm5  ;;  %v3435_v28 = vsel %vm18383_vm4, %v18382_v17, %v18381_v37  ;;  %v18391_v17 = vunpack.i.h.bf16 %v15528_v25  ;;  %vm18393_vm4 = vcmask 990208   ;;  %v18397_v37 = vmax.f32 %v15089_v62, %v15438_v63 }
 0x5c4   :  { %vm18387_vm11 = vmmov %vm18378_vm5  ;;  %v3493_v61 = vmax.f32 %v3345_v42, %v3435_v28  ;;  %v4505_v62 = vadd.s32 872, %v12264_v3  ;;  %v18404_v63 = vunpack.i.l.bf16 %v15528_v25  ;;  %v17562_v44 = vunpack.i.l.bf16 %v15608_v0 }
 0x5c5   :  { %vm15614_vm6 = vmand %vm18388_vm10, %vm18387_vm11  ;;  %v3591_v24 = vsel %vm18393_vm4, %v18392_v16, %v18391_v17  ;;  %v3797_v2 = vmax.f32 %v18397_v37, %v3295_v10  ;;  %vm18398_vm10 = vnez %v18318_v1  ;;  %vm18399_vm4 = vnez %v18311_v21  ;;  %v15682_v37 = vpop.permute.xlu0 %10324 }
 0x5c6   :  { %vm15632_vm11 = vmand %vm18394_vm9, %vm18378_vm5  ;;  %vm18401_vm9 = vcmp.eq.s32.totalorder %v4503_v15, %v12280_v50  ;;  %v18405_v1 = vunpack.i.h.bf16 %v15155_v14  ;;  %v18407_v42 = vunpack.i.l.bf16 %v18193_v39  ;;  %v4522_v10 = vadd.s32 1008, %v12264_v3  ;;  %18410 = vst [vmem:[#allocation39_spill] sm:$0xff] %v15682_v37 }
 0x5c7   :  { %vm18400_vm8 = vmpackc.low %vm18398_vm10, %vm18399_vm4  ;;  %v3945_v39 = vmax.f32 %v3797_v2, %v3591_v24  ;;  %v17579_v17 = vunpack.i.h.bf16 %v15682_v37  ;;  %v18411_v24 = vunpack.i.h.bf16 %v15093_v46 }
 0x5c8   :  { %9099 = vmatpush3.bf16.msk.msra.mxu1 %vm18400_vm8, %v17708_v29  ;;  %vm15652_vm14 = vmand %vm18401_vm9, %vm18378_vm5  ;;  %v3583_v21 = vsel %vm18406_vm7, %v18405_v1, %v18404_v63  ;;  %vm18408_vm8 = vcmask 973824   ;;  %vm4683_vm5 = vcmp.eq.s32.totalorder %v4521_v19, %v12280_v50  ;;  %v15692_v63 = vpop.permute.xlu1 %3672  ;;  %vm4666_vm9 = vcmp.eq.s32.totalorder %v4504_v9, %v12280_v50 }
 0x5c9   :  { %v3886_v15 = vsel %vm18408_vm8, %v18407_v42, %v17581_v40  ;;  %vm18409_vm10 = vmpackc.low %vm15410_vm13, %vm15391_vm15  ;;  %v3641_v28 = vmax.f32 %v3493_v61, %v3583_v21  ;;  %v18412_v61 = vunpack.i.l.bf16 %v18215_v22  ;;  %vm18413_vm15 = vcmask 949248  }
 0x5ca   :  { %9101 = vmatprep.subr.msk.bf16.mxu1 %vm18409_vm10, %v17708_v29  ;;  %v17560_v1 = vunpack.i.l.bf16 %v15093_v46  ;;  %v4093_v42 = vmax.f32 %v3945_v39, %v3886_v15  ;;  %vm18414_vm8 = vnez %v18336_v27  ;;  %vm18420_vm7 = vcmask 973824  }
 0x5cb   :  { %v4330_v2 = vsel %vm18413_vm15, %v18412_v61, %v18411_v24  ;;  %v3788_v21 = vmax.f32 %v3641_v28, %v3730_v55  ;;  %vm18415_vm10 = vmpackc.low %vm15453_vm1, %vm18414_vm8  ;;  %vm18416_vm15 = vcmp.lt.s32.totalorder %v12266_v13, 91  ;;  %v18419_v55 = vunpack.i.h.bf16 %v15186_v57  ;;  %v15750_v24 = vpop.permute.xlu0 %10334 }
 0x5cc   :  { %9103 = vmatpush3.bf16.msk.msra.mxu1 %vm18415_vm10, %v17708_v29  ;;  %vm15717_vm13 = vmand %vm4682_vm2, %vm18416_vm15  ;;  %v17561_v27 = vunpack.i.l.bf16 %v15682_v37  ;;  %v18421_v15 = vunpack.i.l.bf16 %v18211_v56  ;;  %vm18422_vm1 = vcmask 957440   ;;  %vm18423_vm2 = vnez %v18355_v52  ;;  %18429 = vst [vmem:[#allocation33_spill] sm:$0xff] %v15750_v24 }
 0x5cd   :  { %v3878_v31 = vsel %vm18420_vm7, %v18419_v55, %v17562_v44  ;;  %vm18424_vm8 = vnez %v18348_v8  ;;  %vm18426_vm7 = vmmov %vm18416_vm15  ;;  %v4506_v52 = vadd.s32 880, %v12264_v3  ;;  %v18433_v19 = vunpack.i.h.bf16 %v15235_v49  ;;  %v15769_v55 = vpop.permute.xlu1 %4263 }
 0x5ce   :  { %v4182_v53 = vsel %vm18422_vm1, %v18421_v15, %v17579_v17  ;;  %vm18425_vm10 = vmpackc.low %vm18423_vm2, %vm18424_vm8  ;;  %vm4684_vm1 = vcmp.eq.s32.totalorder %v4522_v10, %v12280_v50  ;;  %v3936_v56 = vmax.f32 %v3788_v21, %v3878_v31  ;;  %vm4685_vm8 = vcmp.eq.s32.totalorder %v4523_v35, %v12280_v50 }
 0x5cf   :  { %9105 = vmatprep.subr.msk.bf16.mxu1 %vm18425_vm10, %v17708_v29  ;;  %vm15745_vm15 = vmand %vm4683_vm5, %vm18426_vm7  ;;  %v4241_v28 = vmax.f32 %v4093_v42, %v4182_v53  ;;  %vm18434_vm5 = vcmask 965632   ;;  %v17564_v21 = vunpack.i.h.bf16 %v15750_v24  ;;  %v17563_v42 = vunpack.i.l.bf16 %v15750_v24 }
 0x5d0   :  { %vm18430_vm4 = vmmov %vm18426_vm7  ;;  %v4026_v61 = vsel %vm18434_vm5, %v18433_v19, %v17559_v48  ;;  %v4507_v31 = vadd.s32 888, %v12264_v3  ;;  %v18438_v53 = vunpack.i.h.bf16 %v18303_v60  ;;  %vm18439_vm7 = vcmask 949248  }
 0x5d1   :  { %vm15756_vm2 = vmand %vm4666_vm9, %vm18430_vm4  ;;  %vm18435_vm9 = vcmp.eq.s32.totalorder %v4505_v62, %v12280_v50  ;;  %v4084_v15 = vmax.f32 %v3936_v56, %v4026_v61  ;;  %v15787_v48 = vmax.f32 %v4241_v28, %v4330_v2  ;;  %v17575_v62 = vunpack.i.h.bf16 %v15129_v11 }
 0x5d2   :  { %vm15775_vm10 = vmand %vm18435_vm9, %vm18430_vm4  ;;  %v4322_v19 = vsel %vm18439_vm7, %v18438_v53, %v17560_v1  ;;  %v18443_v2 = vunpack.i.h.bf16 %v15308_v34  ;;  %vm18444_vm7 = vcmask 957440   ;;  %v18447_v10 = vunpack.i.h.bf16 %v15376_v36  ;;  %v15846_v1 = vpop.permute.xlu1 %2790 }
 0x5d3   :  { %vm18440_vm5 = vmpackc.low %vm15564_vm0, %vm15547_vm3  ;;  %vm18446_vm3 = vcmask 1039360   ;;  %v17578_v61 = vunpack.i.l.bf16 %v15129_v11  ;;  %v17566_v53 = vunpack.i.l.bf16 %v15477_v47  ;;  %v18466_v39 = vunpack.i.l.bf16 %v15087_v7 }
 0x5d4   :  { %9107 = vmatpush3.bf16.msk.msra.mxu1 %vm18440_vm5, %v17708_v29  ;;  %vm15799_vm9 = vmand %vm4684_vm1, %vm18430_vm4  ;;  %v4174_v26 = vsel %vm18444_vm7, %v18443_v2, %v17561_v27  ;;  %v2691_v56 = vsel %vm18446_vm3, %v18445_v43, %v17564_v21  ;;  %v15837_v2 = vpop.permute.xlu0 %10339  ;;  %vm4669_vm7 = vcmp.eq.s32.totalorder %v4507_v31, %v12280_v50  ;;  %v17570_v9 = vunpack.i.l.bf16 %v15626_v58 }
 0x5d5   :  { %vm18448_vm0 = vmmov %vm18446_vm3  ;;  %v4232_v43 = vmax.f32 %v4084_v15, %v4174_v26  ;;  %v2748_v23 = vmax.f32 %v10551_v12, %v2691_v56  ;;  %v17565_v35 = vunpack.i.h.bf16 %v15837_v2  ;;  %v10552_v15 = vld [vmem:[#allocation4 + $0xc8] sm:$0xf]  ;;  %vm18453_vm3 = vcmask 1031168  }
 0x5d6   :  { %v2708_v28 = vsel %vm18448_vm0, %v18447_v10, %v17563_v42  ;;  %vm18449_vm1 = vmpackc.low %vm15614_vm6, %vm15593_vm12  ;;  %vm4668_vm6 = vcmp.eq.s32.totalorder %v4506_v52, %v12280_v50  ;;  %v17580_v10 = vunpack.i.l.bf16 %v15837_v2  ;;  %v15857_v56 = vsel %vm18453_vm3, %v17566_v53, %v15846_v1  ;;  %v15859_v12 = vld [vmem:[#allocation4 + $0x48] sm:$0xff] }
 0x5d7   :  { %9109 = vmatprep.subr.msk.bf16.mxu1 %vm18449_vm1, %v17708_v29  ;;  %vm18450_vm5 = vmmov %vm18430_vm4  ;;  %v2767_v26 = vmax.f32 %v10552_v15, %v2708_v28  ;;  %4117 = vrot.lane.b32.xlu0 %v15859_v12, %s10702_s20  ;;  %v4380_v27 = vmax.f32 %v4232_v43, %v4322_v19  ;;  %v18455_v28 = vunpack.i.l.bf16 %v14371_v51  ;;  %v18457_v19 = vld [vmem:[#allocation26_spill] sm:$0xff]  ;;  %v18480_v51 = vunpack.i.h.bf16 %v15459_v18 }
 0x5d8   :  { %vm15831_vm4 = vmand %vm4685_vm8, %vm18450_vm5  ;;  %v18458_v43 = vunpack.i.h.bf16 %v18457_v19  ;;  %v15901_v21 = vpop.permute.xlu0 %10349 }
 0x5d9   :  { %vm9112_vm12 = vmpackc.low %vm15745_vm15, %vm15717_vm13  ;;  %5277 = vmatprep.mubr.f32.mxu1 %v4380_v27  ;;  %v17572_v31 = vunpack.i.l.bf16 %v15901_v21 }
 0x5da   :  { %vm9114_vm8 = vmpackc.low %vm15775_vm10, %vm15756_vm2  ;;  %v2855_v16 = vsel %vm18453_vm3, %v18458_v43, %v17580_v10  ;;  %v17568_v43 = vunpack.i.l.bf16 %v15541_v30  ;;  %vm18478_vm10 = vcmask 1006592   ;;  %v18505_v10 = vld [vmem:[#allocation32_spill] sm:$0xff] }
 0x5db   :  { %vm18454_vm0 = vmpackc.low %vm15652_vm14, %vm15632_vm11  ;;  %vm18459_vm14 = vcmp.lt.s32.totalorder %v12266_v13, 91  ;;  %v2914_v42 = vmax.f32 %v2767_v26, %v2855_v16  ;;  %v17567_v26 = vunpack.i.h.bf16 %v15901_v21  ;;  %v18470_v16 = vld [vmem:[#allocation31_spill] sm:$0xff] }
 0x5dc   :  { %9111 = vmatpush3.bf16.msk.msra.mxu1 %vm18454_vm0, %v17708_v29  ;;  %vm9116_vm1 = vmpackc.low %vm15831_vm4, %vm15799_vm9  ;;  %v15967_v6 = vpop.permute.xlu0 %10359  ;;  %vm18482_vm4 = vcmask 998400  }
 0x5dd   :  { %vm18456_vm5 = vmmov %vm18453_vm3  ;;  %9113 = vmatprep.subr.msk.bf16.mxu1 %vm9112_vm12, %v17708_v29  ;;  %vm18467_vm12 = vcmask 1022976   ;;  %5278 = vmatmul.mubr.f32.gmra.mrb[44].mxu1 %v18470_v16  ;;  %vm18490_vm3 = vcmask 990208  }
 0x5de   :  { %v2838_v15 = vsel %vm18456_vm5, %v18455_v28, %v17565_v35  ;;  %vm15895_vm11 = vmand %vm4668_vm6, %vm18459_vm14  ;;  %v17569_v28 = vunpack.i.h.bf16 %v18462_v33  ;;  %v2985_v52 = vsel %vm18467_vm12, %v18466_v39, %v17575_v62  ;;  %v18472_v39 = vld [vmem:[#allocation25_spill] sm:$0xff] }
 0x5df   :  { %v2895_v44 = vmax.f32 %v2748_v23, %v2838_v15  ;;  %vm18463_vm13 = vmmov %vm18459_vm14  ;;  %v18468_v23 = vunpack.i.h.bf16 %v14870_v4  ;;  %v15923_v15 = vpop.permute.xlu1 %3084  ;;  %2663 = vrot.lane.b32.xlu0 %v18472_v39, %s10689_s18 }
 0x5e0   :  { %vm15907_vm15 = vmand %vm4669_vm7, %vm18463_vm13  ;;  %vm18471_vm7 = vcmask 1014784   ;;  %9115 = vmatpush3.bf16.msk.msra.mxu1 %vm9114_vm8, %v17708_v29 }
 0x5e1   :  { %vm18469_vm6 = vmmov %vm18467_vm12  ;;  %v3042_v35 = vmax.f32 %v2895_v44, %v2985_v52  ;;  %v15930_v7 = vsel %vm18471_vm7, %v17568_v43, %v15923_v15  ;;  %v18473_v44 = vunpack.i.l.bf16 %v18242_v59  ;;  %v18475_v52 = vunpack.i.h.bf16 %v14931_v32  ;;  %9117 = vmatprep.subr.msk.bf16.mxu1 %vm9116_vm1, %v17708_v29 }
 0x5e2   :  { %v3002_v27 = vsel %vm18469_vm6, %v18468_v23, %v17578_v61  ;;  %v17571_v23 = vunpack.i.l.bf16 %v18462_v33  ;;  %vm18474_vm0 = vmmov %vm18471_vm7  ;;  %v18477_v59 = vunpack.i.l.bf16 %v15115_v41  ;;  %v17574_v41 = vunpack.i.l.bf16 %v15967_v6 }
 0x5e3   :  { %v3061_v53 = vmax.f32 %v2914_v42, %v3002_v27  ;;  %v3132_v42 = vsel %vm18474_vm0, %v18473_v44, %v17567_v26  ;;  %vm18476_vm5 = vmmov %vm18474_vm0  ;;  %v17573_v26 = vunpack.i.h.bf16 %v15967_v6  ;;  %v15977_v43 = vpop.permute.xlu1 %3378  ;;  %2957 = vrot.lane.b32.xlu0 %v18472_v39, %s10690_s27  ;;  %vm18504_vm12 = vcmask 973824  }
 0x5e4   :  { %v3149_v27 = vsel %vm18476_vm5, %v18475_v52, %v17572_v31  ;;  %vm9118_vm2 = vmpackc.low %vm15907_vm15, %vm15895_vm11  ;;  %v3279_v8 = vsel %vm18478_vm10, %v18477_v59, %v17569_v28  ;;  %v3189_v16 = vmax.f32 %v3042_v35, %v3132_v42  ;;  %v17577_v52 = vunpack.i.h.bf16 %v18479_v45  ;;  %v16001_v31 = vpop.permute.xlu0 %10369 }
 0x5e5   :  { %v3208_v44 = vmax.f32 %v3061_v53, %v3149_v27  ;;  %vm18481_vm9 = vmmov %vm18478_vm10  ;;  %v15983_v53 = vsel %vm18482_vm4, %v17570_v9, %v15977_v43  ;;  %9119 = vmatpush3.bf16.msk.msra.mxu1 %vm9118_vm2, %v17708_v29  ;;  %v17576_v35 = vunpack.i.l.bf16 %v18479_v45  ;;  %v18483_v42 = vunpack.i.l.bf16 %v18253_v38 }
 0x5e6   :  { %v3296_v22 = vsel %vm18481_vm9, %v18480_v51, %v17571_v23  ;;  %v3336_v59 = vmax.f32 %v3189_v16, %v3279_v8  ;;  %vm18484_vm8 = vmmov %vm18482_vm4  ;;  %v18485_v8 = vunpack.i.h.bf16 %v14982_v5  ;;  %v18488_v51 = vld [vmem:[#allocation36_spill] sm:$0xff]  ;;  %v18489_v38 = vunpack.i.l.bf16 %v15155_v14 }
 0x5e7   :  { %v3355_v28 = vmax.f32 %v3208_v44, %v3296_v22  ;;  %v3427_v27 = vsel %vm18484_vm8, %v18483_v42, %v17573_v26  ;;  %vm18486_vm1 = vmmov %vm18482_vm4  ;;  %v18487_v44 = vmov 0.0|0.0   ;;  %v17584_v22 = vunpack.i.h.bf16 %v18488_v51  ;;  %3251 = vrot.lane.b32.xlu0 %v18472_v39, %s10692_s28 }
 0x5e8   :  { %v3444_v16 = vsel %vm18486_vm1, %v18485_v8, %v17574_v41  ;;  %9120 = vmatprep.subr.bf16.mxu1 %v18487_v44  ;;  %v3484_v9 = vmax.f32 %v3336_v59, %v3427_v27  ;;  %v3575_v42 = vsel %vm18490_vm3, %v18489_v38, %v17577_v52  ;;  %v18491_v26 = vunpack.i.h.bf16 %v15528_v25  ;;  %vm18492_vm14 = vmmov %vm18490_vm3  ;;  %v16015_v59 = vpop.permute.xlu1 %3674  ;;  %v18496_v38 = vld [vmem:[#allocation20_spill] sm:$0xff] }
 0x5e9   :  { %v3503_v23 = vmax.f32 %v3355_v28, %v3444_v16  ;;  %v17582_v41 = vunpack.i.h.bf16 %v16001_v31  ;;  %v17583_v62 = vunpack.i.l.bf16 %v16001_v31  ;;  %18493 = vst [vmem:[#allocation40_spill] sm:$0xff] %v16015_v59  ;;  %vm18494_vm11 = vcmask 982016   ;;  %vm18508_vm6 = vmmov %vm18504_vm12 }
 0x5ea   :  { %v3592_v8 = vsel %vm18492_vm14, %v18491_v26, %v17576_v35  ;;  %v3632_v28 = vmax.f32 %v3484_v9, %v3575_v42  ;;  %v16020_v14 = vsel %vm18494_vm11, %v15692_v63, %v16015_v59  ;;  %v18497_v35 = vld [vmem:[#allocation24_spill] sm:$0xff]  ;;  %vm18499_vm13 = vmmov %vm18494_vm11  ;;  %v17588_v26 = vunpack.i.h.bf16 %v18505_v10 }
 0x5eb   :  { %v3651_v27 = vmax.f32 %v3503_v23, %v3592_v8  ;;  %18495 = vst [vmem:[#allocation28_spill] sm:$0xff] %v16020_v14  ;;  %v18498_v52 = vunpack.i.l.bf16 %v18497_v35  ;;  %v18500_v23 = vld [vmem:[#allocation19_spill] sm:$0xff]  ;;  %vm18502_vm15 = vmmov %vm18494_vm11  ;;  %v18503_v8 = vunpack.i.l.bf16 %v15186_v57  ;;  %v16042_v14 = vpop.permute.xlu0 %10379  ;;  %v18506_v35 = vunpack.i.l.bf16 %v18488_v51  ;;  %3546 = vrot.lane.b32.xlu0 %v18472_v39, %s10698_s16 }
 0x5ec   :  { %v18501_v9 = vunpack.i.h.bf16 %v18500_v23  ;;  %v17586_v57 = vunpack.i.l.bf16 %v16042_v14  ;;  %v16052_v23 = vpop.permute.xlu1 %10429  ;;  %vm18511_vm7 = vcmask 957440   ;;  %vm18513_vm0 = vcmask 965632  }
 0x5ed   :  { %v3722_v61 = vsel %vm18499_vm13, %v18498_v52, %v17582_v41  ;;  %v3870_v17 = vsel %vm18504_vm12, %v18503_v8, %v17584_v22  ;;  %v18507_v41 = vunpack.i.h.bf16 %v15608_v0  ;;  %v17589_v8 = vunpack.i.l.bf16 %v18496_v38  ;;  %vm18515_vm5 = vmmov %vm18513_vm0 }
 0x5ee   :  { %v3739_v42 = vsel %vm18502_vm15, %v18501_v9, %v17583_v62  ;;  %v3779_v40 = vmax.f32 %v3632_v28, %v3722_v61  ;;  %v17585_v62 = vunpack.i.h.bf16 %v16042_v14  ;;  %v18510_v22 = vunpack.i.l.bf16 %v15308_v34  ;;  %vm18524_vm4 = vmmov %vm18511_vm7 }
 0x5ef   :  { %v3798_v16 = vmax.f32 %v3651_v27, %v3739_v42  ;;  %v3887_v9 = vsel %vm18508_vm6, %v18507_v41, %v18506_v35  ;;  %v17587_v27 = vunpack.i.h.bf16 %v16052_v23  ;;  %v18509_v42 = vunpack.i.h.bf16 %v18496_v38  ;;  %3841 = vrot.lane.b32.xlu0 %v18472_v39, %s10700_s19 }
 0x5f0   :  { %v3927_v61 = vmax.f32 %v3779_v40, %v3870_v17  ;;  %v18512_v52 = vunpack.i.l.bf16 %v15235_v49  ;;  %v18514_v17 = vunpack.i.h.bf16 %v15051_v54  ;;  %v18516_v34 = vunpack.i.l.bf16 %v18303_v60  ;;  %v10556_v54 = vld [vmem:[#allocation4 + $0x80] sm:$0xff] }
 0x5f1   :  { %v3946_v28 = vmax.f32 %v3798_v16, %v3887_v9  ;;  %v4166_v41 = vsel %vm18511_vm7, %v18510_v22, %v18509_v42  ;;  %vm18517_vm2 = vcmask 949248   ;;  %v18518_v49 = vunpack.i.l.bf16 %v15837_v2 }
 0x5f2   :  { %v4018_v40 = vsel %vm18513_vm0, %v18512_v52, %v17585_v62  ;;  %v4035_v16 = vsel %vm18515_vm5, %v18514_v17, %v17586_v57  ;;  %v4314_v22 = vsel %vm18517_vm2, %v18516_v34, %v17588_v26  ;;  %vm18519_vm10 = vcmask 1031168   ;;  %v16084_v62 = vpop.permute.xlu0 %10394  ;;  %v10554_v26 = vld [vmem:[#allocation4 + $0xd0] sm:$0xf]  ;;  %vm18538_vm11 = vmmov %vm18517_vm2 }
 0x5f3   :  { %v4075_v9 = vmax.f32 %v3927_v61, %v4018_v40  ;;  %v4094_v42 = vmax.f32 %v3946_v28, %v4035_v16  ;;  %v2856_v52 = vsel %vm18519_vm10, %v18518_v49, %v17587_v27  ;;  %v18520_v35 = vunpack.i.h.bf16 %v15477_v47  ;;  %vm18522_vm9 = vmmov %vm18519_vm10  ;;  %v16094_v28 = vpop.permute.xlu1 %10434  ;;  %v10555_v27 = vld [vmem:[#allocation4 + $0x38] sm:$0xff]  ;;  %4137 = vrot.lane.b32.xlu0 %v18472_v39, %s10702_s20 }
 0x5f4   :  { %v18521_v17 = vunpack.i.l.bf16 %v18457_v19  ;;  %v17593_v61 = vunpack.i.l.bf16 %v16084_v62  ;;  %v18523_v40 = vunpack.i.h.bf16 %v15682_v37  ;;  %v18525_v49 = vunpack.i.l.bf16 %v15477_v47  ;;  %vm18527_vm8 = vmmov %vm18522_vm9 }
 0x5f5   :  { %v18526_v19 = vunpack.i.h.bf16 %v15837_v2  ;;  %v2768_v60 = vmax.f32 %v10554_v26, %v2856_v52  ;;  %v18528_v34 = vunpack.i.h.bf16 %v15750_v24  ;;  %vm18529_vm1 = vcmask 1039360  }
 0x5f6   :  { %v2847_v57 = vsel %vm18522_vm9, %v18521_v17, %v18520_v35  ;;  %v4183_v16 = vsel %vm18524_vm4, %v18523_v40, %v17589_v8  ;;  %v4223_v17 = vmax.f32 %v4075_v9, %v4166_v41  ;;  %v18530_v8 = vunpack.i.h.bf16 %v16084_v62  ;;  %vm18532_vm3 = vmmov %vm18529_vm1  ;;  %v7590_v41 = vpop.f32.mrb[30].mxu1  ;;  %v16126_v24 = vpop.permute.xlu0 %10404 }
 0x5f7   :  { %v2839_v35 = vsel %vm18527_vm8, %v18526_v19, %v18525_v49  ;;  %v2692_v40 = vsel %vm18529_vm1, %v18528_v34, %v17593_v61  ;;  %v18531_v2 = vunpack.i.l.bf16 %v15376_v36  ;;  %v4242_v9 = vmax.f32 %v4094_v42, %v4183_v16  ;;  %v7591_v61 = vpop.f32.mrb[31].mxu1  ;;  %v16132_v42 = vpop.permute.xlu1 %10439  ;;  %2683 = vrot.lane.b32.xlu0 %v15489_v20, %s10689_s18 }
 0x5f8   :  { %v16119_v19 = vmax.f32 %v4223_v17, %v4314_v22  ;;  %v2749_v37 = vmax.f32 %v10555_v27, %v2692_v40  ;;  %v18533_v52 = vunpack.i.h.bf16 %v16094_v28  ;;  %v18534_v0 = vunpack.i.l.bf16 %v15129_v11 }
 0x5f9   :  { %v2700_v49 = vsel %vm18532_vm3, %v18531_v2, %v18530_v8  ;;  %vm18535_vm14 = vcmask 1022976   ;;  %v16128_v59 = vadd.f32 %v7591_v61, %v7590_v41  ;;  %v17602_v8 = vunpack.i.h.bf16 %v16126_v24 }
 0x5fa   :  { %v2758_v26 = vmax.f32 %v10556_v54, %v2700_v49  ;;  %v3003_v34 = vsel %vm18535_vm14, %v18534_v0, %v18533_v52  ;;  %v10406_v22 = vunpack.i.l.bf16 %v16126_v24  ;;  %v2896_v27 = vmax.f32 %v2749_v37, %v2839_v35  ;;  %vm18540_vm13 = vmmov %vm18535_vm14 }
 0x5fb   :  { %v2915_v36 = vmax.f32 %v2768_v60, %v3003_v34  ;;  %v17597_v16 = vunpack.i.h.bf16 %v16132_v42  ;;  %v18536_v0 = vunpack.i.l.bf16 %v18505_v10  ;;  %v18537_v17 = vunpack.i.h.bf16 %v15093_v46  ;;  %vm18542_vm15 = vmmov %vm18540_vm13  ;;  %v16162_v34 = vpop.permute.xlu0 %10414  ;;  %2977 = vrot.lane.b32.xlu0 %v15489_v20, %s10690_s27 }
 0x5fc   :  { %v2905_v54 = vmax.f32 %v2758_v26, %v2847_v57  ;;  %v18539_v61 = vunpack.i.h.bf16 %v15129_v11  ;;  %v18541_v37 = vunpack.i.l.bf16 %v14870_v4  ;;  %v18543_v39 = vunpack.i.h.bf16 %v15541_v30 }
 0x5fd   :  { %v4331_v60 = vsel %vm18538_vm11, %v18537_v17, %v18536_v0  ;;  %v18544_v2 = vunpack.i.l.bf16 %v14931_v32  ;;  %vm18545_vm12 = vcmask 1014784   ;;  %v18546_v11 = vunpack.i.l.bf16 %v15901_v21  ;;  %v16167_v17 = vpop.permute.xlu1 %10444 }
 0x5fe   :  { %v2986_v40 = vsel %vm18540_vm13, %v18539_v61, %v10406_v22  ;;  %v2994_v57 = vsel %vm18542_vm15, %v18541_v37, %v17602_v8  ;;  %v4390_v35 = vmax.f32 %v4242_v9, %v4331_v60  ;;  %vm18547_vm6 = vmmov %vm18545_vm12  ;;  %v17598_v4 = vunpack.i.h.bf16 %v15626_v58 }
 0x5ff   :  { %v3141_v49 = vsel %vm18545_vm12, %v18544_v2, %v18543_v39  ;;  %v3043_v41 = vmax.f32 %v2896_v27, %v2986_v40  ;;  %v3052_v26 = vmax.f32 %v2905_v54, %v2994_v57  ;;  %v3150_v52 = vsel %vm18547_vm6, %v18546_v11, %v17597_v16  ;;  %vm18550_vm7 = vmmov %vm18547_vm6  ;;  %3271 = vrot.lane.b32.xlu0 %v15489_v20, %s10692_s28 }
 0x600   :  { %v3062_v0 = vmax.f32 %v2915_v36, %v3150_v52  ;;  %5282 = vmatprep.mubr.f32.mxu1 %v4390_v35  ;;  %v17600_v9 = vunpack.i.h.bf16 %v16162_v34  ;;  %v17601_v32 = vunpack.i.l.bf16 %v16162_v34  ;;  %v18548_v27 = vunpack.i.l.bf16 %v15541_v30 }
 0x601   :  { %v18549_v54 = vunpack.i.h.bf16 %v15901_v21  ;;  %5283 = vmatmul.mubr.f32.gmra.mrb[46].mxu1 %v15787_v48  ;;  %v3199_v61 = vmax.f32 %v3052_v26, %v3141_v49  ;;  %v17596_v40 = vunpack.i.h.bf16 %v16167_v17  ;;  %v18551_v36 = vunpack.i.h.bf16 %v18462_v33  ;;  %v16193_v49 = vpop.permute.xlu0 %3524 }
 0x602   :  { %vm18552_vm0 = vcmask 1006592   ;;  %v18553_v21 = vunpack.i.l.bf16 %v15459_v18  ;;  %v18555_v39 = vunpack.i.l.bf16 %v18462_v33  ;;  %v18557_v26 = vunpack.i.l.bf16 %v14982_v5 }
 0x603   :  { %v3133_v60 = vsel %vm18550_vm7, %v18549_v54, %v18548_v27  ;;  %v3280_v37 = vsel %vm18552_vm0, %v18551_v36, %v17601_v32  ;;  %vm18554_vm5 = vmmov %vm18552_vm0  ;;  %vm18558_vm10 = vcmask 998400   ;;  %v16202_v27 = vpop.permute.xlu1 %10454  ;;  %v18560_v54 = vunpack.i.h.bf16 %v15967_v6  ;;  %3566 = vrot.lane.b32.xlu0 %v15489_v20, %s10698_s16 }
 0x604   :  { %v3288_v57 = vsel %vm18554_vm5, %v18553_v21, %v17600_v9  ;;  %v3190_v35 = vmax.f32 %v3043_v41, %v3133_v60  ;;  %vm18556_vm2 = vmmov %vm18552_vm0  ;;  %v3436_v11 = vsel %vm18558_vm10, %v18557_v26, %v17598_v4  ;;  %v18559_v41 = vunpack.i.l.bf16 %v15626_v58 }
 0x605   :  { %v3346_v48 = vmax.f32 %v3199_v61, %v3288_v57  ;;  %v3297_v2 = vsel %vm18556_vm2, %v18555_v39, %v17596_v40  ;;  %vm18561_vm9 = vmmov %vm18558_vm10  ;;  %v17599_v60 = vunpack.i.l.bf16 %v16202_v27  ;;  %vm18563_vm4 = vcmask 990208   ;;  %v16225_v57 = vpop.permute.xlu0 %3819 }
 0x606   :  { %v16200_v52 = vmax.f32 %v3062_v0, %v3297_v2  ;;  %v3337_v18 = vmax.f32 %v3190_v35, %v3280_v37  ;;  %v3428_v33 = vsel %vm18561_vm9, %v18560_v54, %v18559_v41  ;;  %v18562_v0 = vunpack.i.h.bf16 %v18479_v45  ;;  %vm18565_vm8 = vmmov %vm18563_vm4 }
 0x607   :  { %v16210_v61 = vmax.f32 %v3346_v48, %v3436_v11  ;;  %v18564_v37 = vunpack.i.l.bf16 %v15528_v25  ;;  %v16229_v39 = vpop.permute.xlu1 %10464  ;;  %v18566_v2 = vunpack.i.h.bf16 %v16001_v31  ;;  %vm18567_vm1 = vcmask 982016   ;;  %3861 = vrot.lane.b32.xlu0 %v15489_v20, %s10700_s19 }
 0x608   :  { %v3485_v5 = vmax.f32 %v3337_v18, %v3428_v33  ;;  %v3576_v36 = vsel %vm18563_vm4, %v18562_v0, %v16193_v49  ;;  %v4524_v25 = vadd.s32 1024, %v12264_v3  ;;  %v4525_v18 = vadd.s32 1032, %v12264_v3 }
 0x609   :  { %v16223_v21 = vsel %vm18565_vm8, %v18564_v37, %v17599_v60  ;;  %v3723_v26 = vsel %vm18567_vm1, %v18566_v2, %v15692_v63  ;;  %v18568_v41 = vunpack.i.h.bf16 %v18488_v51  ;;  %vm18569_vm3 = vcmask 973824   ;;  %v16243_v33 = vpop.permute.xlu0 %3967 }
 0x60a   :  { %v3633_v35 = vmax.f32 %v3485_v5, %v3576_v36  ;;  %v4526_v5 = vadd.s32 1040, %v12264_v3  ;;  %v18570_v63 = vunpack.i.h.bf16 %v16042_v14  ;;  %vm18571_vm14 = vcmask 965632  }
 0x60b   :  { %v3871_v54 = vsel %vm18569_vm3, %v18568_v41, %v16225_v57  ;;  %v16250_v37 = vpop.permute.xlu1 %10474  ;;  %vm4686_vm11 = vcmp.eq.s32.totalorder %v4524_v25, %v12280_v50  ;;  %vm4687_vm13 = vcmp.eq.s32.totalorder %v4525_v18, %v12280_v50  ;;  %vm18573_vm12 = vcmask 957440   ;;  %4157 = vrot.lane.b32.xlu0 %v15489_v20, %s10702_s20 }
 0x60c   :  { %v3780_v11 = vmax.f32 %v3633_v35, %v3723_v26  ;;  %v4019_v36 = vsel %vm18571_vm14, %v18570_v63, %v16243_v33  ;;  %v4527_v35 = vadd.s32 1048, %v12264_v3  ;;  %vm4688_vm15 = vcmp.eq.s32.totalorder %v4526_v5, %v12280_v50 }
 0x60d   :  { %v16257_v26 = vpop.permute.xlu0 %4115  ;;  %vm18574_vm6 = vcmp.lt.s32.totalorder %v12266_v13, 91  ;;  %v4528_v25 = vadd.s32 1056, %v12264_v3  ;;  %vm18581_vm10 = vcmask 949248   ;;  %v18588_v16 = vunpack.i.l.bf16 %v16084_v62 }
 0x60e   :  { %v3928_v0 = vmax.f32 %v3780_v11, %v3871_v54  ;;  %v18572_v11 = vunpack.i.h.bf16 %v18496_v38  ;;  %vm16268_vm7 = vmand %vm4686_vm11, %vm18574_vm6  ;;  %vm4689_vm0 = vcmp.eq.s32.totalorder %v4527_v35, %v12280_v50  ;;  %vm18589_vm3 = vcmask 1039360  }
 0x60f   :  { %v16264_v54 = vpop.permute.xlu1 %3122  ;;  %vm18577_vm5 = vmmov %vm18574_vm6  ;;  %vm4690_vm11 = vcmp.eq.s32.totalorder %v4528_v25, %v12280_v50 }
 0x610   :  { %v4076_v2 = vmax.f32 %v3928_v0, %v4019_v36  ;;  %v4167_v41 = vsel %vm18573_vm12, %v18572_v11, %v16257_v26  ;;  %vm16278_vm2 = vmand %vm4687_vm13, %vm18577_vm5  ;;  %v4529_v0 = vadd.s32 1064, %v12264_v3  ;;  %v18580_v36 = vunpack.i.h.bf16 %v18505_v10 }
 0x611   :  { %vm18582_vm9 = vmmov %vm18577_vm5 }
 0x612   :  { %v4224_v18 = vmax.f32 %v4076_v2, %v4167_v41  ;;  %v4315_v11 = vsel %vm18581_vm10, %v18580_v36, %v15769_v55  ;;  %vm16289_vm4 = vmand %vm4688_vm15, %vm18582_vm9  ;;  %v2644_v2 = vpop.permute.xlu0 %2643  ;;  %vm4691_vm13 = vcmp.eq.s32.totalorder %v4529_v0, %v12280_v50  ;;  %v17607_v0 = vunpack.i.l.bf16 %v16094_v28 }
 0x613   :  { %vm18585_vm8 = vmmov %vm18577_vm5  ;;  %v2693_v48 = vsel %vm18589_vm3, %v18588_v16, %v2644_v2  ;;  %v2751_v36 = vmax.f32 %v15859_v12, %v2644_v2  ;;  %v16303_v4 = vpop.permute.xlu1 %3416  ;;  %v4531_v12 = vadd.s32 1080, %v12264_v3  ;;  %v4532_v16 = vadd.s32 1088, %v12264_v3 }
 0x614   :  { %v4372_v41 = vmax.f32 %v4224_v18, %v4315_v11  ;;  %vm16295_vm1 = vmand %vm4689_vm0, %vm18585_vm8  ;;  %v4530_v18 = vadd.s32 1072, %v12264_v3  ;;  %v10557_v11 = vld [vmem:[#allocation4 + $0x40] sm:$0xff]  ;;  %v17609_v2 = vunpack.i.l.bf16 %v16052_v23  ;;  %vm18593_vm0 = vcmask 1022976  }
 0x615   :  { %vm9121_vm14 = vmpackc.low %vm16278_vm2, %vm16268_vm7  ;;  %v2750_v60 = vmax.f32 %v10557_v11, %v2693_v48  ;;  %v2898_v9 = vmax.f32 %v2751_v36, %v15846_v1  ;;  %vm4693_vm10 = vcmp.eq.s32.totalorder %v4531_v12, %v12280_v50  ;;  %vm4694_vm9 = vcmp.eq.s32.totalorder %v4532_v16, %v12280_v50 }
 0x616   :  { %5352 = vmatprep.mubr.f32.mxu1 %v4372_v41  ;;  %vm9124_vm15 = vmpackc.low %vm16295_vm1, %vm16289_vm4  ;;  %v2938_v48 = vpop.permute.xlu0 %2937  ;;  %vm4692_vm2 = vcmp.eq.s32.totalorder %v4530_v18, %v12280_v50  ;;  %vm18598_vm8 = vcmask 1031168   ;;  %v4534_v11 = vadd.s32 1104, %v12264_v3  ;;  %vm18600_vm3 = vcmask 982016  }
 0x617   :  { %5353 = vmatmul.mubr.f32.vlgmr.msra.gmra.mrb[48].mxu1 %v16119_v19  ;;  %v2897_v20 = vmax.f32 %v2750_v60, %v15857_v56  ;;  %vm18590_vm12 = vmmov %vm18577_vm5  ;;  %v4533_v19 = vadd.s32 1096, %v12264_v3  ;;  %v2987_v56 = vsel %vm18593_vm0, %v10406_v22, %v2938_v48  ;;  %v3045_v60 = vmax.f32 %v2898_v9, %v2938_v48  ;;  %v16342_v5 = vpop.permute.xlu1 %10489 }
 0x618   :  { %9122 = vmatpush1.bf16.msk.msra.mxu1 %vm9121_vm14, %v17708_v29  ;;  %vm16334_vm6 = vmand %vm4690_vm11, %vm18590_vm12  ;;  %v10491_v41 = vunpack.i.l.bf16 %v16342_v5  ;;  %v18597_v22 = vunpack.i.h.bf16 %v15477_v47  ;;  %v17604_v48 = vunpack.i.l.bf16 %v16132_v42  ;;  %v18601_v47 = vunpack.i.h.bf16 %v16126_v24  ;;  %v10558_v24 = vld [vmem:[#allocation4 + $0x88] sm:$0xff] }
 0x619   :  { %9123 = vmatprep.subr.bf16.mxu1 %v18487_v44  ;;  %vm18594_vm7 = vmmov %vm18577_vm5  ;;  %v3044_v25 = vmax.f32 %v2897_v20, %v2987_v56  ;;  %v3192_v36 = vmax.f32 %v3045_v60, %v15923_v15  ;;  %v18599_v20 = vunpack.i.l.bf16 %v16001_v31  ;;  %vm4695_vm11 = vcmp.eq.s32.totalorder %v4533_v19, %v12280_v50 }
 0x61a   :  { %vm16349_vm5 = vmand %vm4691_vm13, %vm18594_vm7  ;;  %v2848_v9 = vsel %vm18598_vm8, %v18597_v22, %v17609_v2  ;;  %v3232_v32 = vpop.permute.xlu0 %3231  ;;  %vm18604_vm12 = vcmask 1006592   ;;  %vm4696_vm8 = vcmp.eq.s32.totalorder %v4534_v11, %v12280_v50  ;;  %v17603_v12 = vunpack.i.l.bf16 %v16167_v17 }
 0x61b   :  { %v3740_v56 = vsel %vm18600_vm3, %v18599_v20, %v10491_v41  ;;  %v3191_v8 = vmax.f32 %v3044_v25, %v15930_v7  ;;  %vm9127_vm14 = vmpackc.low %vm16349_vm5, %vm16334_vm6  ;;  %v18603_v7 = vunpack.i.l.bf16 %v16162_v34  ;;  %v3339_v35 = vmax.f32 %v3192_v36, %v3232_v32  ;;  %v16392_v60 = vpop.permute.xlu1 %10499 }
 0x61c   :  { %9125 = vmatpush1.bf16.msk.msra.mxu1 %vm9124_vm15, %v17708_v29  ;;  %vm18602_vm13 = vmmov %vm18593_vm0  ;;  %v3356_v15 = vmax.f32 %v16200_v52, %v3740_v56  ;;  %v2759_v22 = vmax.f32 %v10558_v24, %v2848_v9  ;;  %v10501_v20 = vunpack.i.l.bf16 %v16392_v60  ;;  %v4535_v36 = vadd.s32 1112, %v12264_v3 }
 0x61d   :  { %v2995_v31 = vsel %vm18602_vm13, %v18601_v47, %v17607_v0  ;;  %v3281_v40 = vsel %vm18604_vm12, %v18603_v7, %v3232_v32  ;;  %9126 = vmatprep.subr.bf16.mxu1 %v18487_v44  ;;  %vm18605_vm4 = vmmov %vm18594_vm7  ;;  %v3487_v18 = vmax.f32 %v3339_v35, %v15977_v43  ;;  %v18614_v56 = vunpack.i.l.bf16 %v16042_v14 }
 0x61e   :  { %vm16399_vm1 = vmand %vm4692_vm2, %vm18605_vm4  ;;  %v3338_v52 = vmax.f32 %v3191_v8, %v3281_v40  ;;  %v2906_v9 = vmax.f32 %v2759_v22, %v2995_v31  ;;  %v3527_v43 = vpop.permute.xlu0 %3526  ;;  %v18619_v14 = vunpack.i.h.bf16 %v15541_v30  ;;  %vm18620_vm13 = vcmask 1014784  }
 0x61f   :  { %vm18608_vm15 = vmmov %vm18605_vm4  ;;  %vm18621_vm12 = vcmask 990208   ;;  %v3635_v63 = vmax.f32 %v3487_v18, %v3527_v43  ;;  %v16451_v40 = vpop.permute.xlu1 %3821  ;;  %vm4697_vm5 = vcmp.eq.s32.totalorder %v4535_v36, %v12280_v50  ;;  %v4536_v30 = vadd.s32 1120, %v12264_v3  ;;  %v18625_v18 = vld [vmem:[#allocation28_spill] sm:$0xff] }
 0x620   :  { %vm16408_vm0 = vmand %vm4693_vm10, %vm18608_vm15  ;;  %vm18615_vm10 = vcmask 965632   ;;  %v3486_v7 = vmax.f32 %v3338_v52, %v15983_v53  ;;  %9128 = vmatpush1.bf16.msk.msra.mxu1 %vm9127_vm14, %v17708_v29  ;;  %v3142_v53 = vsel %vm18620_vm13, %v18619_v14, %v17604_v48  ;;  %v3577_v1 = vsel %vm18621_vm12, %v16193_v49, %v3527_v43  ;;  %v18622_v49 = vld [vmem:[#allocation40_spill] sm:$0xff] }
 0x621   :  { %vm18611_vm7 = vmmov %vm18605_vm4  ;;  %v4036_v47 = vsel %vm18615_vm10, %v18614_v56, %v10501_v20  ;;  %9129 = vmatprep.subr.bf16.mxu1 %v18487_v44  ;;  %v17606_v35 = vunpack.i.h.bf16 %v16202_v27  ;;  %v16463_v24 = vmax.f32 %v3635_v63, %v18622_v49  ;;  %v4538_v25 = vadd.s32 1136, %v12264_v3 }
 0x622   :  { %vm16418_vm2 = vmand %vm4694_vm9, %vm18611_vm7  ;;  %v3504_v31 = vmax.f32 %v3356_v15, %v4036_v47  ;;  %v3634_v19 = vmax.f32 %v3486_v7, %v3577_v1  ;;  %v4537_v15 = vadd.s32 1128, %v12264_v3  ;;  %v3053_v22 = vmax.f32 %v2906_v9, %v3142_v53  ;;  %v16476_v47 = vpop.permute.xlu0 %10424 }
 0x623   :  { %vm18616_vm9 = vmmov %vm18605_vm4  ;;  %v18623_v52 = vunpack.i.h.bf16 %v16162_v34  ;;  %v4539_v9 = vadd.s32 1144, %v12264_v3  ;;  %v17605_v34 = vunpack.i.h.bf16 %v16229_v39  ;;  %v10466_v7 = vunpack.i.l.bf16 %v16229_v39  ;;  %v16494_v1 = vpop.permute.xlu1 %3969 }
 0x624   :  { %vm16440_vm3 = vmand %vm4695_vm11, %vm18616_vm9  ;;  %vm18624_vm11 = vcmask 1006592   ;;  %v3781_v56 = vmax.f32 %v3634_v19, %v18625_v18  ;;  %vm18628_vm15 = vcmask 973824   ;;  %v10427_v53 = vunpack.i.h.bf16 %v16476_v47  ;;  %v18635_v18 = vld [vmem:[#allocation33_spill] sm:$0xff] }
 0x625   :  { %vm9130_vm6 = vmpackc.low %vm16408_vm0, %vm16399_vm1  ;;  %v3289_v32 = vsel %vm18624_vm11, %v18623_v52, %v17603_v12  ;;  %v3872_v14 = vsel %vm18628_vm15, %v16225_v57, %v16451_v40  ;;  %vm4699_vm9 = vcmp.eq.s32.totalorder %v4537_v15, %v12280_v50  ;;  %v18633_v57 = vunpack.i.l.bf16 %v16202_v27 }
 0x626   :  { %vm9133_vm14 = vmpackc.low %vm16440_vm3, %vm16418_vm2  ;;  %9131 = vmatpush1.bf16.msk.msra.mxu1 %vm9130_vm6, %v17708_v29  ;;  %v3929_v63 = vmax.f32 %v3781_v56, %v3872_v14  ;;  %v17608_v36 = vunpack.i.h.bf16 %v16250_v37  ;;  %v10476_v52 = vunpack.i.l.bf16 %v16250_v37  ;;  %v18636_v56 = vunpack.i.l.bf16 %v18635_v18  ;;  %v16524_v48 = vpop.permute.xlu0 %10449  ;;  %v7593_v18 = vpop.f32.mrb[32].mxu1 }
 0x627   :  { %vm16483_vm1 = vmand %vm4696_vm8, %vm18605_vm4  ;;  %9132 = vmatprep.subr.bf16.mxu1 %v18487_v44  ;;  %v3200_v14 = vmax.f32 %v3053_v22, %v3289_v32  ;;  %v4540_v22 = vadd.s32 1152, %v12264_v3  ;;  %v10426_v16 = vunpack.i.l.bf16 %v16476_v47  ;;  %v10452_v8 = vunpack.i.h.bf16 %v16524_v48 }
 0x628   :  { %vm18629_vm0 = vmmov %vm18605_vm4 }
 0x629   :  { %vm16501_vm7 = vmand %vm4697_vm5, %vm18629_vm0  ;;  %vm4700_vm5 = vcmp.eq.s32.totalorder %v4538_v25, %v12280_v50  ;;  %v18654_v25 = vunpack.i.h.bf16 %v16084_v62  ;;  %v4542_v62 = vadd.s32 1168, %v12264_v3 }
 0x62a   :  { %vm18632_vm8 = vmmov %vm18615_vm10  ;;  %vm4698_vm10 = vcmp.eq.s32.totalorder %v4536_v30, %v12280_v50  ;;  %9134 = vmatpush1.bf16.msk.msra.mxu1 %vm9133_vm14, %v17708_v29  ;;  %vm4701_vm14 = vcmp.eq.s32.totalorder %v4539_v9, %v12280_v50  ;;  %v16587_v2 = vpop.permute.xlu0 %10459 }
 0x62b   :  { %v4020_v19 = vsel %vm18632_vm8, %v16243_v33, %v16494_v1  ;;  %vm18634_vm13 = vmmov %vm18621_vm12  ;;  %vm18637_vm12 = vcmask 1039360   ;;  %9135 = vmatprep.subr.bf16.mxu1 %v18487_v44  ;;  %vm18647_vm8 = vcmask 998400   ;;  %v17610_v11 = vunpack.i.h.bf16 %v16587_v2 }
 0x62c   :  { %v3585_v49 = vsel %vm18634_vm13, %v18633_v57, %v17606_v35  ;;  %v2709_v33 = vsel %vm18637_vm12, %v18636_v56, %v10427_v53  ;;  %v16522_v12 = vmax.f32 %v3929_v63, %v4020_v19  ;;  %vm9136_vm6 = vmpackc.low %vm16501_vm7, %vm16483_vm1  ;;  %v10461_v43 = vunpack.i.l.bf16 %v16587_v2 }
 0x62d   :  { %vm18638_vm11 = vmmov %vm18628_vm15  ;;  %v3347_v19 = vmax.f32 %v3200_v14, %v3585_v49  ;;  %v3652_v57 = vmax.f32 %v3504_v31, %v2709_v33  ;;  %v17611_v49 = vunpack.i.l.bf16 %v16524_v48  ;;  %v18646_v31 = vunpack.i.l.bf16 %v15967_v6  ;;  %v7594_v33 = vpop.f32.mrb[33].mxu1 }
 0x62e   :  { %v3880_v32 = vsel %vm18638_vm11, %v10466_v7, %v17605_v34  ;;  %vm18639_vm2 = vmmov %vm18629_vm0  ;;  %v4541_v34 = vadd.s32 1160, %v12264_v3  ;;  %9137 = vmatpush1.bf16.msk.msra.mxu1 %vm9136_vm6, %v17708_v29  ;;  %vm4702_vm7 = vcmp.eq.s32.totalorder %v4540_v22, %v12280_v50  ;;  %v18661_v56 = vmax.f32 %v16210_v61, %v16223_v21 }
 0x62f   :  { %vm16550_vm3 = vmand %vm4698_vm10, %vm18639_vm2  ;;  %v3445_v15 = vsel %vm18647_vm8, %v18646_v31, %v10452_v8  ;;  %v3495_v35 = vmax.f32 %v3347_v19, %v3880_v32  ;;  %9138 = vmatprep.subr.bf16.mxu1 %v18487_v44  ;;  %v18656_v19 = vunpack.i.h.bf16 %v15626_v58  ;;  %v4548_v58 = vadd.s32 1216, %v12264_v3 }
 0x630   :  { %vm18642_vm4 = vmmov %vm18629_vm0  ;;  %vm18645_vm0 = vcmask 957440   ;;  %v16583_v0 = vmax.f32 %v3652_v57, %v3445_v15  ;;  %vm4703_vm6 = vcmp.eq.s32.totalorder %v4541_v34, %v12280_v50  ;;  %v16634_v15 = vpop.permute.xlu0 %10469 }
 0x631   :  { %vm16559_vm15 = vmand %vm4699_vm9, %vm18642_vm4  ;;  %v4176_v30 = vsel %vm18645_vm0, %v10476_v52, %v17608_v36  ;;  %v16585_v36 = vadd.f32 %v7594_v33, %v7593_v18  ;;  %v18658_v18 = vld [vmem:[#allocation19_spill] sm:$0xff]  ;;  %v4544_v33 = vadd.s32 1184, %v12264_v3 }
 0x632   :  { %vm18648_vm10 = vmmov %vm18639_vm2  ;;  %v3643_v9 = vmax.f32 %v3495_v35, %v4176_v30  ;;  %v18659_v31 = vunpack.i.l.bf16 %v18658_v18  ;;  %v4543_v35 = vadd.s32 1176, %v12264_v3  ;;  %v10471_v18 = vunpack.i.l.bf16 %v16634_v15 }
 0x633   :  { %vm16579_vm9 = vmand %vm4700_vm5, %vm18648_vm10  ;;  %vm18655_vm5 = vcmask 1039360  }
 0x634   :  { %vm18651_vm13 = vmmov %vm18639_vm2  ;;  %v2701_v32 = vsel %vm18655_vm5, %v18654_v25, %v10426_v16  ;;  %vm18660_vm2 = vcmask 982016   ;;  %v4545_v25 = vadd.s32 1192, %v12264_v3  ;;  %vm18674_vm5 = vcmask 965632  }
 0x635   :  { %vm16599_vm12 = vmand %vm4701_vm14, %vm18651_vm13  ;;  %v3731_v63 = vsel %vm18660_vm2, %v18659_v31, %v10461_v43  ;;  %v3790_v22 = vmax.f32 %v3643_v9, %v2701_v32  ;;  %v18665_v32 = vld [vmem:[#allocation22_spill] sm:$0xff]  ;;  %vm4704_vm13 = vcmp.eq.s32.totalorder %v4542_v62, %v12280_v50  ;;  %v4547_v62 = vadd.s32 1208, %v12264_v3 }
 0x636   :  { %vm9139_vm1 = vmpackc.low %vm16559_vm15, %vm16550_vm3  ;;  %v3789_v30 = vmax.f32 %v18661_v56, %v3731_v63  ;;  %v18666_v9 = vunpack.i.l.bf16 %v18665_v32  ;;  %vm18667_vm15 = vcmask 973824   ;;  %v18672_v56 = vld [vmem:[#allocation21_spill] sm:$0xff] }
 0x637   :  { %vm18657_vm11 = vmmov %vm18647_vm8  ;;  %9140 = vmatpush1.bf16.msk.msra.mxu1 %vm9139_vm1, %v17708_v29 }
 0x638   :  { %v3437_v57 = vsel %vm18657_vm11, %v18656_v19, %v17611_v49  ;;  %vm9142_vm3 = vmpackc.low %vm16599_vm12, %vm16579_vm9  ;;  %v3879_v61 = vsel %vm18667_vm15, %v18666_v9, %v10466_v7  ;;  %v10472_v19 = vunpack.i.h.bf16 %v16634_v15  ;;  %9141 = vmatprep.subr.bf16.mxu1 %v18487_v44  ;;  %v16672_v49 = vpop.permute.xlu0 %10479  ;;  %vm4706_vm11 = vcmp.eq.s32.totalorder %v4544_v33, %v12280_v50 }
 0x639   :  { %vm18662_vm14 = vmmov %vm18642_vm4  ;;  %v3938_v63 = vmax.f32 %v3790_v22, %v3437_v57  ;;  %v3937_v7 = vmax.f32 %v3789_v30, %v3879_v61  ;;  %v7596_v57 = vpop.f32.mrb[34].mxu1  ;;  %v18676_v22 = vld [vmem:[#allocation39_spill] sm:$0xff]  ;;  %v10482_v14 = vunpack.i.h.bf16 %v16672_v49  ;;  %v10481_v61 = vunpack.i.l.bf16 %v16672_v49 }
 0x63a   :  { %vm16639_vm4 = vmand %vm4702_vm7, %vm18662_vm14  ;;  %vm4705_vm7 = vcmp.eq.s32.totalorder %v4543_v35, %v12280_v50  ;;  %v18677_v30 = vunpack.i.l.bf16 %v18676_v22  ;;  %vm18678_vm14 = vcmask 957440   ;;  %v18686_v22 = vunpack.i.l.bf16 %v15093_v46 }
 0x63b   :  { %vm18668_vm0 = vmmov %vm18660_vm2  ;;  %9143 = vmatpush1.bf16.msk.msra.mxu1 %vm9142_vm3, %v17708_v29  ;;  %vm4707_vm2 = vcmp.eq.s32.totalorder %v4545_v25, %v12280_v50  ;;  %v4549_v25 = vadd.s32 1224, %v12264_v3  ;;  %v4552_v35 = vadd.s32 1248, %v12264_v3  ;;  %v4553_v46 = vadd.s32 1256, %v12264_v3 }
 0x63c   :  { %v3732_v21 = vsel %vm18668_vm0, %v10461_v43, %v17610_v11  ;;  %vm18669_vm8 = vmmov %vm18648_vm10  ;;  %v18673_v43 = vunpack.i.l.bf16 %v18672_v56  ;;  %v4175_v6 = vsel %vm18678_vm14, %v18677_v30, %v10476_v52  ;;  %9144 = vmatprep.subr.bf16.mxu1 %v18487_v44  ;;  %vm18685_vm0 = vcmask 949248  }
 0x63d   :  { %vm16660_vm10 = vmand %vm4703_vm6, %vm18669_vm8  ;;  %v4086_v11 = vmax.f32 %v3938_v63, %v3732_v21  ;;  %v7597_v21 = vpop.f32.mrb[35].mxu1  ;;  %v4546_v63 = vadd.s32 1200, %v12264_v3 }
 0x63e   :  { %v4027_v32 = vsel %vm18674_vm5, %v18673_v43, %v10471_v18  ;;  %vm18675_vm1 = vmmov %vm18674_vm5  ;;  %v16703_v52 = vadd.f32 %v7597_v21, %v7596_v57 }
 0x63f   :  { %v4028_v9 = vsel %vm18675_vm1, %v10471_v18, %v10472_v19  ;;  %v4085_v34 = vmax.f32 %v3937_v7, %v4027_v32  ;;  %vm9145_vm6 = vmpackc.low %vm16660_vm10, %vm16639_vm4  ;;  %v4324_v32 = vsel %vm18685_vm0, %v10481_v61, %v10482_v14  ;;  %vm4708_vm14 = vcmp.eq.s32.totalorder %v4546_v63, %v12280_v50  ;;  %v10559_v63 = vld [vmem:[#allocation4 + $0xd8] sm:$0xf] }
 0x640   :  { %vm18679_vm9 = vmmov %vm18669_vm8  ;;  %v4234_v7 = vmax.f32 %v4086_v11, %v4028_v9  ;;  %v16728_v9 = vpop.permute.xlu0 %2681  ;;  %9146 = vmatpush1.bf16.msk.msra.mxu1 %vm9145_vm6, %v17708_v29  ;;  %vm4709_vm4 = vcmp.eq.s32.totalorder %v4547_v62, %v12280_v50  ;;  %vm18694_vm10 = vcmask 1039360   ;;  %v4551_v18 = vadd.s32 1240, %v12264_v3 }
 0x641   :  { %vm16698_vm12 = vmand %vm4704_vm13, %vm18679_vm9  ;;  %v4233_v56 = vmax.f32 %v4085_v34, %v4175_v6  ;;  %9147 = vmatprep.subr.bf16.mxu1 %v18487_v44  ;;  %v2710_v33 = vsel %vm18694_vm10, %v10427_v53, %v16728_v9  ;;  %v4550_v53 = vadd.s32 1232, %v12264_v3  ;;  %v18698_v6 = vunpack.i.h.bf16 %v16052_v23 }
 0x642   :  { %vm18682_vm3 = vmmov %vm18669_vm8  ;;  %v4382_v34 = vmax.f32 %v4234_v7, %v4324_v32  ;;  %v2769_v7 = vmax.f32 %v10559_v63, %v2710_v33  ;;  %v18703_v32 = vunpack.i.h.bf16 %v16094_v28 }
 0x643   :  { %vm16709_vm15 = vmand %vm4705_vm7, %vm18682_vm3 }
 0x644   :  { %vm18687_vm8 = vmmov %vm18685_vm0  ;;  %5357 = vmatprep.mubr.f32.mxu1 %v4382_v34  ;;  %v16761_v31 = vpop.permute.xlu0 %2828  ;;  %vm4710_vm0 = vcmp.eq.s32.totalorder %v4548_v58, %v12280_v50  ;;  %v18711_v58 = vunpack.i.h.bf16 %v16132_v42 }
 0x645   :  { %v4323_v11 = vsel %vm18687_vm8, %v18686_v22, %v10481_v61  ;;  %vm18688_vm13 = vmmov %vm18682_vm3  ;;  %vm4711_vm8 = vcmp.eq.s32.totalorder %v4549_v25, %v12280_v50 }
 0x646   :  { %vm16724_vm5 = vmand %vm4706_vm11, %vm18688_vm13  ;;  %v4381_v57 = vmax.f32 %v4233_v56, %v4323_v11  ;;  %v16785_v56 = vpop.permute.xlu1 %4265 }
 0x647   :  { %vm18691_vm1 = vmmov %vm18682_vm3 }
 0x648   :  { %vm16740_vm7 = vmand %vm4707_vm2, %vm18691_vm1  ;;  %5358 = vmatmul.mubr.f32.gmra.mrb[50].mxu1 %v4381_v57  ;;  %v16787_v62 = vpop.permute.xlu0 %2975 }
 0x649   :  { %vm9148_vm11 = vmpackc.low %vm16709_vm15, %vm16698_vm12  ;;  %vm18699_vm12 = vcmask 1031168  }
 0x64a   :  { %vm9151_vm6 = vmpackc.low %vm16740_vm7, %vm16724_vm5  ;;  %9149 = vmatpush1.bf16.msk.msra.mxu1 %vm9148_vm11, %v17708_v29  ;;  %v2857_v61 = vsel %vm18699_vm12, %v18698_v6, %v16761_v31  ;;  %vm18704_vm11 = vcmask 1022976   ;;  %vm4713_vm5 = vcmp.eq.s32.totalorder %v4551_v18, %v12280_v50  ;;  %v16849_v18 = vpop.permute.xlu1 %2810 }
 0x64b   :  { %vm18695_vm2 = vmmov %vm18691_vm1  ;;  %9150 = vmatprep.subr.bf16.mxu1 %v18487_v44  ;;  %v2916_v43 = vmax.f32 %v2769_v7, %v2857_v61  ;;  %v3004_v22 = vsel %vm18704_vm11, %v18703_v32, %v16787_v62  ;;  %v18718_v61 = vunpack.i.h.bf16 %v16167_v17  ;;  %v4554_v7 = vadd.s32 1264, %v12264_v3 }
 0x64c   :  { %vm16766_vm9 = vmand %vm4708_vm14, %vm18695_vm2  ;;  %v16830_v30 = vpop.permute.xlu0 %3269 }
 0x64d   :  { %vm18700_vm3 = vmmov %vm18691_vm1  ;;  %vm4712_vm1 = vcmp.eq.s32.totalorder %v4550_v53, %v12280_v50  ;;  %v3063_v34 = vmax.f32 %v2916_v43, %v3004_v22  ;;  %v10492_v22 = vunpack.i.h.bf16 %v16342_v5 }
 0x64e   :  { %vm16778_vm15 = vmand %vm4709_vm4, %vm18700_vm3  ;;  %9152 = vmatpush1.bf16.msk.msra.mxu1 %vm9151_vm6, %v17708_v29  ;;  %vm18712_vm6 = vcmask 1014784  }
 0x64f   :  { %vm9154_vm13 = vmpackc.low %vm16778_vm15, %vm16766_vm9  ;;  %9153 = vmatprep.subr.bf16.mxu1 %v18487_v44  ;;  %v3151_v33 = vsel %vm18712_vm6, %v18711_v58, %v16264_v54  ;;  %vm18719_vm15 = vcmask 1006592   ;;  %vm18727_vm6 = vcmask 990208  }
 0x650   :  { %vm18705_vm14 = vmmov %vm18695_vm2  ;;  %v3210_v53 = vmax.f32 %v3063_v34, %v3151_v33  ;;  %v3298_v21 = vsel %vm18719_vm15, %v18718_v61, %v16830_v30  ;;  %v16857_v43 = vpop.permute.xlu0 %10484 }
 0x651   :  { %vm16807_vm4 = vmand %vm4710_vm0, %vm18705_vm14  ;;  %v10487_v11 = vunpack.i.h.bf16 %v16857_v43 }
 0x652   :  { %vm18708_vm7 = vmmov %vm18695_vm2  ;;  %9155 = vmatpush1.bf16.msk.msra.mxu1 %vm9154_vm13, %v17708_v29  ;;  %v3357_v63 = vmax.f32 %v3210_v53, %v3298_v21  ;;  %vm4715_vm13 = vcmp.eq.s32.totalorder %v4553_v46, %v12280_v50  ;;  %v10502_v53 = vunpack.i.h.bf16 %v16392_v60  ;;  %v18730_v21 = vunpack.i.l.bf16 %v18479_v45 }
 0x653   :  { %vm16815_vm10 = vmand %vm4711_vm8, %vm18708_vm7  ;;  %9156 = vmatprep.subr.bf16.mxu1 %v18487_v44  ;;  %vm4714_vm8 = vcmp.eq.s32.totalorder %v4552_v35, %v12280_v50  ;;  %v10486_v35 = vunpack.i.l.bf16 %v16857_v43  ;;  %v18735_v45 = vunpack.i.l.bf16 %v18488_v51 }
 0x654   :  { %vm16826_vm9 = vmand %vm4712_vm1, %vm18695_vm2  ;;  %v16886_v33 = vpop.permute.xlu0 %10494 }
 0x655   :  { %vm18715_vm12 = vmmov %vm18695_vm2  ;;  %v3594_v46 = vsel %vm18727_vm6, %v10486_v35, %v10487_v11  ;;  %v10497_v61 = vunpack.i.h.bf16 %v16886_v33  ;;  %v10496_v6 = vunpack.i.l.bf16 %v16886_v33 }
 0x656   :  { %vm16835_vm3 = vmand %vm4713_vm5, %vm18715_vm12  ;;  %vm18728_vm12 = vcmask 982016  }
 0x657   :  { %vm9157_vm0 = vmpackc.low %vm16815_vm10, %vm16807_vm4  ;;  %vm18723_vm4 = vcmask 998400   ;;  %vm4716_vm10 = vcmp.eq.s32.totalorder %v4554_v7, %v12280_v50  ;;  %v3741_v50 = vsel %vm18728_vm12, %v10491_v41, %v10492_v22  ;;  %vm18749_vm12 = vcmask 1031168  }
 0x658   :  { %vm9160_vm1 = vmpackc.low %vm16835_vm3, %vm16826_vm9  ;;  %9158 = vmatpush1.bf16.msk.msra.mxu1 %vm9157_vm0, %v17708_v29  ;;  %v3446_v3 = vsel %vm18723_vm4, %v10452_v8, %v16303_v4  ;;  %v16884_v8 = vpop.permute.xlu1 %3104  ;;  %vm18732_vm0 = vcmask 973824   ;;  %v16915_v32 = vpop.permute.xlu0 %10504  ;;  %vm18741_vm4 = vcmask 949248  }
 0x659   :  { %vm18720_vm11 = vmmov %vm18695_vm2  ;;  %9159 = vmatprep.subr.bf16.mxu1 %v18487_v44  ;;  %v3505_v57 = vmax.f32 %v3357_v63, %v3446_v3  ;;  %v3889_v41 = vsel %vm18732_vm0, %v10496_v6, %v10497_v61  ;;  %v18733_v3 = vmov 0.0   ;;  %v18779_v5 = vunpack.i.h.bf16 %v16915_v32 }
 0x65a   :  { %vm16862_vm14 = vmand %vm4714_vm8, %vm18720_vm11  ;;  %vm18734_vm8 = vcmask 965632  }
 0x65b   :  { %vm18724_vm5 = vmmov %vm18695_vm2  ;;  %v3653_v58 = vmax.f32 %v3505_v57, %v3594_v46  ;;  %v4037_v13 = vsel %vm18734_vm8, %v10501_v20, %v10502_v53  ;;  %v17612_v57 = vunpack.i.h.bf16 %v16915_v32  ;;  %v10506_v46 = vunpack.i.l.bf16 %v16915_v32  ;;  %v5449_v32 = vld [vmem:[#allocation11] sm:$0xff] }
 0x65c   :  { %vm16876_vm7 = vmand %vm4715_vm13, %vm18724_vm5  ;;  %9161 = vmatpush1.bf16.msk.msra.mxu1 %vm9160_vm1, %v17708_v29  ;;  %vm18738_vm1 = vcmask 957440   ;;  %vm18759_vm8 = vcmask 990208  }
 0x65d   :  { %vm9163_vm2 = vmpackc.low %vm16876_vm7, %vm16862_vm14  ;;  %9162 = vmatprep.subr.bf16.mxu1 %v18487_v44  ;;  %v3800_v25 = vmax.f32 %v3653_v58, %v3741_v50  ;;  %v3399_v58 = vpop.permute.xlu1 %3398  ;;  %vm18740_vm14 = vcmask 1043456  }
 0x65e   :  { %vm18729_vm9 = vmmov %vm18724_vm5 }
 0x65f   :  { %vm4876_vm3 = vmand %vm4716_vm10, %vm18729_vm9  ;;  %v3948_v7 = vmax.f32 %v3800_v25, %v3889_v41  ;;  %v3930_v25 = vmax.f32 %v16463_v24, %v16451_v40  ;;  %v16939_v41 = vpop.permute.xlu0 %10509  ;;  %vm18751_vm9 = vcmask 1022976  }
 0x660   :  { %vm18731_vm15 = vmmov %vm18727_vm6  ;;  %9164 = vmatpush1.bf16.msk.msra.mxu1 %vm9163_vm2, %v17708_v29  ;;  %v5035_v34 = vsel %vm4876_vm3, 1.0, %v18733_v3  ;;  %vm18746_vm6 = vcmask 1039360   ;;  %vm18753_vm3 = vcmask 1014784  }
 0x661   :  { %v3593_v63 = vsel %vm18731_vm15, %v18730_v21, %v10486_v35  ;;  %vm18736_vm13 = vmmov %vm18732_vm0  ;;  %5428 = vmatprep.subr.mxu1 %v18733_v3  ;;  %v4096_v50 = vmax.f32 %v3948_v7, %v4037_v13  ;;  %v18737_v21 = vunpack.i.l.bf16 %v18496_v38  ;;  %v4078_v38 = vmax.f32 %v3930_v25, %v16494_v1 }
 0x662   :  { %v3888_v35 = vsel %vm18736_vm13, %v18735_v45, %v10496_v6  ;;  %v3947_v29 = vmax.f32 %v16583_v0, %v3593_v63  ;;  %vm18739_vm11 = vmmov %vm18738_vm1  ;;  %v10512_v45 = vunpack.i.h.bf16 %v16939_v41  ;;  %v10511_v0 = vunpack.i.l.bf16 %v16939_v41  ;;  %v6079_v41 = vld [vmem:[#allocation11 + $0x388] sm:$0xff] }
 0x663   :  { %v4184_v20 = vsel %vm18738_vm1, %v18737_v21, %v10506_v46  ;;  %v4185_v51 = vsel %vm18739_vm11, %v10506_v46, %v17612_v57  ;;  %v18742_v7 = vunpack.i.l.bf16 %v18505_v10  ;;  %vm18743_vm5 = vmmov %vm18741_vm4  ;;  %vm18755_vm15 = vcmask 1006592  }
 0x664   :  { %v4095_v6 = vmax.f32 %v3947_v29, %v3888_v35  ;;  %7548 = vmatpush1.msk.msra.mxu1 %vm18740_vm14, %v5035_v34  ;;  %v4244_v24 = vmax.f32 %v4096_v50, %v4185_v51  ;;  %v4333_v63 = vsel %vm18741_vm4, %v10511_v0, %v10512_v45  ;;  %v3695_v35 = vpop.permute.xlu1 %3694  ;;  %v4118_v34 = vpop.permute.xlu0 %4117  ;;  %vm18744_vm7 = vmmov %vm18738_vm1  ;;  %vm18757_vm0 = vcmask 998400  }
 0x665   :  { %9165 = vmatprep.subr.bf16.mxu1 %v18487_v44  ;;  %v4332_v13 = vsel %vm18743_vm5, %v18742_v7, %v10511_v0  ;;  %v4168_v21 = vsel %vm18744_vm7, %v16257_v26, %v4118_v34  ;;  %v4226_v57 = vmax.f32 %v4078_v38, %v4118_v34  ;;  %vm18745_vm10 = vmmov %vm18741_vm4  ;;  %v7631_v51 = vpop.f32.mrb[36].mxu1  ;;  %v10560_v0 = vld [vmem:[#allocation4 + $0x98] sm:$0xff]  ;;  %vm18761_vm13 = vcmask 982016  }
 0x666   :  { %v4243_v40 = vmax.f32 %v4095_v6, %v4184_v20  ;;  %v4392_v46 = vmax.f32 %v4244_v24, %v4333_v63  ;;  %v4225_v50 = vmax.f32 %v16522_v12, %v4168_v21  ;;  %v4316_v1 = vsel %vm18745_vm10, %v15769_v55, %v16785_v56  ;;  %vm18747_vm2 = vmmov %vm18741_vm4  ;;  %v10561_v24 = vld [vmem:[#allocation4 + $0x90] sm:$0xff] }
 0x667   :  { %v4374_v25 = vmax.f32 %v4226_v57, %v16785_v56  ;;  %v18748_v55 = vunpack.i.l.bf16 %v16052_v23  ;;  %v18752_v21 = vunpack.i.l.bf16 %v16132_v42  ;;  %vm18763_vm1 = vcmask 973824   ;;  %vm18766_vm14 = vmmov %vm18744_vm7 }
 0x668   :  { %v4391_v29 = vmax.f32 %v4243_v40, %v4332_v13  ;;  %5362 = vmatprep.mubr.f32.mxu1 %v4392_v46  ;;  %v4373_v10 = vmax.f32 %v4225_v50, %v4316_v1  ;;  %v2664_v20 = vpop.permute.xlu0 %2663  ;;  %v7632_v40 = vpop.f32.mrb[37].mxu1  ;;  %v18750_v13 = vunpack.i.l.bf16 %v16094_v28  ;;  %vm18764_vm11 = vcmask 965632   ;;  %vm18767_vm4 = vmmov %vm18747_vm2 }
 0x669   :  { %v2702_v6 = vsel %vm18746_vm6, %v10426_v16, %v2664_v20  ;;  %v2761_v26 = vmax.f32 %v10560_v0, %v2664_v20  ;;  %v3990_v12 = vpop.permute.xlu1 %3989  ;;  %v7633_v63 = vadd.f32 %v7632_v40, %v7631_v51  ;;  %v2849_v56 = vsel %vm18749_vm12, %v18748_v55, %v16849_v18  ;;  %vm18768_vm5 = vmmov %vm18746_vm6 }
 0x66a   :  { %5363 = vmatmul.mubr.f32.gmra.mrb[52].mxu1 %v4391_v29  ;;  %v2760_v38 = vmax.f32 %v10561_v24, %v2702_v6  ;;  %v3143_v23 = vsel %vm18753_vm3, %v18752_v21, %v16884_v8  ;;  %v18756_v51 = vunpack.i.l.bf16 %v16524_v48  ;;  %v18758_v40 = vunpack.i.h.bf16 %v16202_v27  ;;  %vm18769_vm7 = vmmov %vm18747_vm2 }
 0x66b   :  { %7549 = vmatprep.mubr.msk.f32.mxu1 %vm18747_vm2, %v4374_v25  ;;  %v2908_v57 = vmax.f32 %v2761_v26, %v16849_v18  ;;  %v16969_v47 = vadd.f32 %v7633_v63, %v16128_v59  ;;  %v18754_v59 = vunpack.i.l.bf16 %v16167_v17  ;;  %v18760_v17 = vunpack.i.h.bf16 %v16587_v2  ;;  %vm18770_vm10 = vmmov %vm18749_vm12 }
 0x66c   :  { %v2958_v16 = vpop.permute.xlu0 %2957  ;;  %v2907_v7 = vmax.f32 %v2760_v38, %v2849_v56  ;;  %v3438_v6 = vsel %vm18757_vm0, %v18756_v51, %v3399_v58  ;;  %v18762_v48 = vunpack.i.h.bf16 %v16229_v39  ;;  %v4029_v27 = vsel %vm18764_vm11, %v10472_v19, %v3990_v12  ;;  %vm18771_vm6 = vmmov %vm18751_vm9 }
 0x66d   :  { %v2996_v34 = vsel %vm18751_vm9, %v18750_v13, %v2958_v16  ;;  %v3055_v46 = vmax.f32 %v2908_v57, %v2958_v16  ;;  %v4286_v1 = vpop.permute.xlu1 %4285  ;;  %v3733_v55 = vsel %vm18761_vm13, %v18760_v17, %v3695_v35  ;;  %v18765_v2 = vunpack.i.h.bf16 %v16250_v37  ;;  %vm18772_vm2 = vmmov %vm18753_vm3 }
 0x66e   :  { %5433 = vmatmul.mubr.f32.vlgmr.msra.gmra.mrb[54].mxu1 %v4373_v10  ;;  %v3054_v29 = vmax.f32 %v2907_v7, %v2996_v34  ;;  %v4325_v39 = vsel %vm18767_vm4, %v10482_v14, %v4286_v1  ;;  %vm18773_vm12 = vmmov %vm18755_vm15 }
 0x66f   :  { %v3202_v50 = vmax.f32 %v3055_v46, %v16884_v8  ;;  %vm18774_vm9 = vmmov %vm18757_vm0 }
 0x670   :  { %v3252_v18 = vpop.permute.xlu0 %3251  ;;  %v3201_v25 = vmax.f32 %v3054_v29, %v3143_v23  ;;  %vm18775_vm3 = vmmov %vm18759_vm8 }
 0x671   :  { %v3290_v10 = vsel %vm18755_vm15, %v18754_v59, %v3252_v18  ;;  %v3349_v20 = vmax.f32 %v3202_v50, %v3252_v18  ;;  %v2831_v38 = vpop.permute.xlu1 %2830  ;;  %v7634_v59 = vpop.f32.mrb[38].mxu1  ;;  %vm18776_vm15 = vmmov %vm18761_vm13 }
 0x672   :  { %v3348_v28 = vmax.f32 %v3201_v25, %v3290_v10  ;;  %v2858_v49 = vsel %vm18770_vm10, %v16761_v31, %v2831_v38  ;;  %vm18777_vm0 = vmmov %vm18763_vm1 }
 0x673   :  { %v3497_v0 = vmax.f32 %v3349_v20, %v3399_v58  ;;  %v7635_v20 = vpop.f32.mrb[39].mxu1  ;;  %vm18780_vm13 = vmmov %vm18766_vm14 }
 0x674   :  { %v3547_v26 = vpop.permute.xlu0 %3546  ;;  %v3496_v42 = vmax.f32 %v3348_v28, %v3438_v6  ;;  %v10563_v28 = vld [vmem:[#allocation4 + $0xe0] sm:$0xf]  ;;  %v7636_v6 = vadd.f32 %v7635_v20, %v7634_v59  ;;  %v5450_v59 = vld [vmem:[#allocation11 + $0x8] sm:$0xff]  ;;  %v6080_v20 = vld [vmem:[#allocation11 + $0x390] sm:$0xff] }
 0x675   :  { %v3586_v8 = vsel %vm18759_vm8, %v18758_v40, %v3547_v26  ;;  %v3645_v24 = vmax.f32 %v3497_v0, %v3547_v26  ;;  %v3125_v46 = vpop.permute.xlu1 %3124  ;;  %vm18778_vm8 = vmmov %vm18764_vm11 }
 0x676   :  { %v3644_v63 = vmax.f32 %v3496_v42, %v3586_v8  ;;  %v3152_v8 = vsel %vm18772_vm2, %v16264_v54, %v3125_v46 }
 0x677   :  { %v3792_v56 = vmax.f32 %v3645_v24, %v3695_v35 }
 0x678   :  { %v3842_v57 = vpop.permute.xlu0 %3841  ;;  %v3791_v16 = vmax.f32 %v3644_v63, %v3733_v55 }
 0x679   :  { %v3881_v58 = vsel %vm18763_vm1, %v18762_v48, %v3842_v57  ;;  %v3940_v7 = vmax.f32 %v3792_v56, %v3842_v57  ;;  %v3419_v37 = vpop.permute.xlu1 %3418  ;;  %vm18781_vm1 = vmmov %vm18767_vm4  ;;  %vm7338_vm4 = vcmask 0  }
 0x67a   :  { %v3939_v13 = vmax.f32 %v3791_v16, %v3881_v58  ;;  %v3447_v56 = vsel %vm18774_vm9, %v16303_v4, %v3419_v37  ;;  %vm18782_vm11 = vmmov %vm18781_vm1 }
 0x67b   :  { %v4088_v34 = vmax.f32 %v3940_v7, %v3990_v12  ;;  %v10562_v12 = vld [vmem:[#allocation4 + $0xe8] sm:$0xf] }
 0x67c   :  { %v4138_v29 = vpop.permute.xlu0 %4137  ;;  %v4087_v21 = vmax.f32 %v3939_v13, %v4029_v27 }
 0x67d   :  { %v4177_v35 = vsel %vm18766_vm14, %v18765_v2, %v4138_v29  ;;  %v4236_v23 = vmax.f32 %v4088_v34, %v4138_v29  ;;  %v3715_v63 = vpop.permute.xlu1 %3714  ;;  %vm18783_vm14 = vmmov 0  }
 0x67e   :  { %v4235_v50 = vmax.f32 %v4087_v21, %v4177_v35  ;;  %v3742_v13 = vsel %vm18776_vm15, %v10492_v22, %v3715_v63 }
 0x67f   :  { %v4384_v18 = vmax.f32 %v4236_v23, %v4286_v1  ;;  %v17009_v1 = vadd.f32 %v7636_v6, %v16585_v36  ;;  %v5454_v6 = vld [vmem:[#allocation11 + $0x28] sm:$0xff] }
 0x680   :  { %v2684_v25 = vpop.permute.xlu0 %2683  ;;  %v4383_v15 = vmax.f32 %v4235_v50, %v4325_v39  ;;  %v7637_v39 = vpop.f32.mrb[40].mxu1 }
 0x681   :  { %v2711_v19 = vsel %vm18768_vm5, %v16728_v9, %v2684_v25  ;;  %v2771_v10 = vmax.f32 %v10562_v12, %v2684_v25  ;;  %7550 = vmatprep.mubr.msk.f32.mxu1 %vm18769_vm7, %v4384_v18  ;;  %v4010_v58 = vpop.permute.xlu1 %4009  ;;  %v7638_v18 = vpop.f32.mrb[41].mxu1  ;;  %v5451_v12 = vld [vmem:[#allocation11 + $0x10] sm:$0xff] }
 0x682   :  { %v2770_v51 = vmax.f32 %v10563_v28, %v2711_v19  ;;  %5438 = vmatmul.mubr.f32.gmra.mrb[56].mxu1 %v4383_v15  ;;  %v4038_v43 = vsel %vm18778_vm8, %v10502_v53, %v4010_v58  ;;  %v7639_v60 = vadd.f32 %v7638_v18, %v7637_v39  ;;  %v6078_v15 = vld [vmem:[#allocation11 + $0x380] sm:$0xff]  ;;  %v9166_v19 = vpack.c.bf16 %v5450_v59, %v5449_v32 }
 0x683   :  { %v2918_v14 = vmax.f32 %v2771_v10, %v2831_v38  ;;  %v9334_v10 = vpack.c.bf16 %v6079_v41, %v6078_v15 }
 0x684   :  { %v2978_v0 = vpop.permute.xlu0 %2977  ;;  %v2917_v26 = vmax.f32 %v2770_v51, %v2858_v49  ;;  %v17039_v53 = vadd.f32 %v7639_v60, %v16703_v52  ;;  %9167 = vmatpush3.bf16.msra.mxu1 %v9166_v19  ;;  %v5453_v51 = vld [vmem:[#allocation11 + $0x20] sm:$0xff] }
 0x685   :  { %v3005_v9 = vsel %vm18771_vm6, %v16787_v62, %v2978_v0  ;;  %v3065_v42 = vmax.f32 %v2918_v14, %v2978_v0  ;;  %v4306_v21 = vpop.permute.xlu1 %4305  ;;  %9335 = vmatpush3.bf16.msra.mxu0 %v9334_v10  ;;  %9168 = vmatprep.subr.bf16.mxu1 %v18487_v44  ;;  %v6082_v49 = vld [vmem:[#allocation11 + $0x3a0] sm:$0xff]  ;;  %v6083_v14 = vld [vmem:[#allocation11 + $0x3a8] sm:$0xff]  ;;  %v9172_v0 = vpack.c.bf16 %v5454_v6, %v5453_v51 }
 0x686   :  { %v3064_v40 = vmax.f32 %v2917_v26, %v3005_v9  ;;  %v4334_v33 = vsel %vm18781_vm1, %v10512_v45, %v4306_v21  ;;  %v5452_v45 = vld [vmem:[#allocation11 + $0x18] sm:$0xff]  ;;  %9336 = vmatprep.subr.bf16.mxu0 %v18487_v44  ;;  %v9340_v26 = vpack.c.bf16 %v6083_v14, %v6082_v49  ;;  %v5455_v9 = vld [vmem:[#allocation11 + $0x30] sm:$0xff]  ;;  %v6169_v6 = vld [vmem:[#allocation11 + $0x408] sm:$0xff] }
 0x687   :  { %v3212_v24 = vmax.f32 %v3065_v42, %v3125_v46  ;;  %v9169_v28 = vpack.c.bf16 %v5452_v45, %v5451_v12  ;;  %v5456_v42 = vld [vmem:[#allocation11 + $0x38] sm:$0xff] }
 0x688   :  { %v3272_v17 = vpop.permute.xlu0 %3271  ;;  %v3211_v55 = vmax.f32 %v3064_v40, %v3152_v8  ;;  %v6084_v40 = vld [vmem:[#allocation11 + $0x3b0] sm:$0xff]  ;;  %v6085_v8 = vld [vmem:[#allocation11 + $0x3b8] sm:$0xff] }
 0x689   :  { %v3299_v31 = vsel %vm18773_vm12, %v16830_v30, %v3272_v17  ;;  %v3359_v38 = vmax.f32 %v3212_v24, %v3272_v17  ;;  %9170 = vmatpush3.bf16.msra.mxu1 %v9169_v28  ;;  %v9175_v24 = vpack.c.bf16 %v5456_v42, %v5455_v9  ;;  %v5457_v17 = vld [vmem:[#allocation11 + $0x40] sm:$0xff]  ;;  %v5539_v9 = vld [vmem:[#allocation11 + $0x90] sm:$0xff]  ;;  %v5540_v42 = vld [vmem:[#allocation11 + $0x98] sm:$0xff] }
 0x68a   :  { %v3358_v36 = vmax.f32 %v3211_v55, %v3299_v31  ;;  %9171 = vmatprep.subr.bf16.mxu1 %v18487_v44  ;;  %v5458_v55 = vld [vmem:[#allocation11 + $0x48] sm:$0xff]  ;;  %v6086_v31 = vld [vmem:[#allocation11 + $0x3c0] sm:$0xff] }
 0x68b   :  { %v3507_v57 = vmax.f32 %v3359_v38, %v3419_v37  ;;  %v6081_v37 = vld [vmem:[#allocation11 + $0x398] sm:$0xff]  ;;  %v6087_v38 = vld [vmem:[#allocation11 + $0x3c8] sm:$0xff]  ;;  %v5537_v28 = vld [vmem:[#allocation11 + $0x80] sm:$0xff] }
 0x68c   :  { %v3567_v16 = vpop.permute.xlu0 %3566  ;;  %v3506_v62 = vmax.f32 %v3358_v36, %v3447_v56  ;;  %v9337_v52 = vpack.c.bf16 %v6081_v37, %v6080_v20  ;;  %v9178_v36 = vpack.c.bf16 %v5458_v55, %v5457_v17  ;;  %v9346_v56 = vpack.c.bf16 %v6087_v38, %v6086_v31  ;;  %v5541_v55 = vld [vmem:[#allocation11 + $0xa0] sm:$0xff]  ;;  %v5542_v31 = vld [vmem:[#allocation11 + $0xa8] sm:$0xff] }
 0x68d   :  { %v3595_v48 = vsel %vm18775_vm3, %v10487_v11, %v3567_v16  ;;  %v3655_v54 = vmax.f32 %v3507_v57, %v3567_v16  ;;  %9173 = vmatpush3.bf16.msra.mxu1 %v9172_v0  ;;  %v5459_v57 = vld [vmem:[#allocation11 + $0x50] sm:$0xff]  ;;  %v5460_v16 = vld [vmem:[#allocation11 + $0x58] sm:$0xff]  ;;  %v9193_v17 = vpack.c.bf16 %v5540_v42, %v5539_v9  ;;  %v5633_v9 = vld [vmem:[#allocation11 + $0x128] sm:$0xff] }
 0x68e   :  { %v3654_v7 = vmax.f32 %v3506_v62, %v3595_v48  ;;  %9338 = vmatpush3.bf16.msra.mxu0 %v9337_v52  ;;  %9174 = vmatprep.subr.bf16.mxu1 %v18487_v44  ;;  %v6088_v62 = vld [vmem:[#allocation11 + $0x3d0] sm:$0xff]  ;;  %v6089_v48 = vld [vmem:[#allocation11 + $0x3d8] sm:$0xff]  ;;  %v5538_v52 = vld [vmem:[#allocation11 + $0x88] sm:$0xff] }
 0x68f   :  { %v3802_v30 = vmax.f32 %v3655_v54, %v3715_v63  ;;  %9339 = vmatprep.subr.bf16.mxu0 %v18487_v44  ;;  %v9343_v63 = vpack.c.bf16 %v6085_v8, %v6084_v40  ;;  %v9181_v54 = vpack.c.bf16 %v5460_v16, %v5459_v57  ;;  %v9190_v14 = vpack.c.bf16 %v5538_v52, %v5537_v28  ;;  %v5543_v16 = vld [vmem:[#allocation11 + $0xb0] sm:$0xff] }
 0x690   :  { %v3862_v27 = vpop.permute.xlu0 %3861  ;;  %v3801_v34 = vmax.f32 %v3654_v7, %v3742_v13  ;;  %v9349_v7 = vpack.c.bf16 %v6089_v48, %v6088_v62  ;;  %v5461_v13 = vld [vmem:[#allocation11 + $0x60] sm:$0xff]  ;;  %v9196_v57 = vpack.c.bf16 %v5542_v31, %v5541_v55  ;;  %v5544_v62 = vld [vmem:[#allocation11 + $0xb8] sm:$0xff]  ;;  %v5630_v52 = vld [vmem:[#allocation11 + $0x110] sm:$0xff] }
 0x691   :  { %v3890_v4 = vsel %vm18777_vm0, %v10497_v61, %v3862_v27  ;;  %v3950_v46 = vmax.f32 %v3802_v30, %v3862_v27  ;;  %9176 = vmatpush3.bf16.msra.mxu1 %v9175_v24  ;;  %v5462_v30 = vld [vmem:[#allocation11 + $0x68] sm:$0xff]  ;;  %v6170_v24 = vld [vmem:[#allocation11 + $0x410] sm:$0xff] }
 0x692   :  { %v3949_v29 = vmax.f32 %v3801_v34, %v3890_v4  ;;  %9341 = vmatpush3.bf16.msra.mxu0 %v9340_v26  ;;  %9177 = vmatprep.subr.bf16.mxu1 %v18487_v44  ;;  %v9184_v4 = vpack.c.bf16 %v5462_v30, %v5461_v13  ;;  %v5545_v13 = vld [vmem:[#allocation11 + $0xc0] sm:$0xff]  ;;  %v5546_v30 = vld [vmem:[#allocation11 + $0xc8] sm:$0xff]  ;;  %v6262_v31 = vld [vmem:[#allocation11 + $0x4b0] sm:$0xff] }
 0x693   :  { %v4098_v11 = vmax.f32 %v3950_v46, %v4010_v58  ;;  %9342 = vmatprep.subr.bf16.mxu0 %v18487_v44  ;;  %v7672_v58 = vpop.f32.mrb[42].mxu1 }
 0x694   :  { %v4158_v2 = vpop.permute.xlu0 %4157  ;;  %v4097_v35 = vmax.f32 %v3949_v29, %v4038_v43  ;;  %v7673_v27 = vpop.f32.mrb[43].mxu1  ;;  %v6090_v29 = vld [vmem:[#allocation11 + $0x3e0] sm:$0xff]  ;;  %v6091_v43 = vld [vmem:[#allocation11 + $0x3e8] sm:$0xff] }
 0x695   :  { %v4186_v22 = vsel %vm18780_vm13, %v18779_v5, %v4158_v2  ;;  %v4246_v23 = vmax.f32 %v4098_v11, %v4158_v2  ;;  %9179 = vmatpush3.bf16.msra.mxu1 %v9178_v36  ;;  %v7674_v34 = vadd.f32 %v7673_v27, %v7672_v58  ;;  %v5463_v11 = vld [vmem:[#allocation11 + $0x70] sm:$0xff]  ;;  %v5464_v2 = vld [vmem:[#allocation11 + $0x78] sm:$0xff]  ;;  %v6172_v36 = vld [vmem:[#allocation11 + $0x420] sm:$0xff] }
 0x696   :  { %v4245_v50 = vmax.f32 %v4097_v35, %v4186_v22  ;;  %9344 = vmatpush3.bf16.msra.mxu0 %v9343_v63  ;;  %9180 = vmatprep.subr.bf16.mxu1 %v18487_v44  ;;  %v9187_v35 = vpack.c.bf16 %v5464_v2, %v5463_v11  ;;  %v6092_v5 = vld [vmem:[#allocation11 + $0x3f0] sm:$0xff]  ;;  %v6093_v22 = vld [vmem:[#allocation11 + $0x3f8] sm:$0xff] }
 0x697   :  { %v4394_v61 = vmax.f32 %v4246_v23, %v4306_v21  ;;  %9345 = vmatprep.subr.bf16.mxu0 %v18487_v44  ;;  %v5275_v46 = vadd.f32 %v7674_v34, %v16969_v47  ;;  %v9352_v21 = vpack.c.bf16 %v6091_v43, %v6090_v29  ;;  %v9355_v47 = vpack.c.bf16 %v6093_v22, %v6092_v5  ;;  %v6171_v63 = vld [vmem:[#allocation11 + $0x418] sm:$0xff]  ;;  %v6176_v34 = vld [vmem:[#allocation11 + $0x440] sm:$0xff]  ;;  %v5547_v29 = vld [vmem:[#allocation11 + $0xd0] sm:$0xff] }
 0x698   :  { %v4393_v25 = vmax.f32 %v4245_v50, %v4334_v33  ;;  %v9361_v38 = vpack.c.bf16 %v6171_v63, %v6170_v24  ;;  %v6175_v58 = vld [vmem:[#allocation11 + $0x438] sm:$0xff]  ;;  %v5549_v5 = vld [vmem:[#allocation11 + $0xe0] sm:$0xff]  ;;  %v5550_v22 = vld [vmem:[#allocation11 + $0xe8] sm:$0xff] }
 0x699   :  { %7551 = vmatprep.mubr.msk.f32.mxu1 %vm18782_vm11, %v4394_v61  ;;  %9182 = vmatpush3.bf16.msra.mxu1 %v9181_v54  ;;  %v6174_v54 = vld [vmem:[#allocation11 + $0x430] sm:$0xff]  ;;  %v5548_v43 = vld [vmem:[#allocation11 + $0xd8] sm:$0xff] }
 0x69a   :  { %5443 = vmatmul.mubr.f32.gmra.mrb[58].mxu1 %v4393_v25  ;;  %9347 = vmatpush3.bf16.msra.mxu0 %v9346_v56  ;;  %v6173_v56 = vld [vmem:[#allocation11 + $0x428] sm:$0xff]  ;;  %v9367_v27 = vpack.c.bf16 %v6175_v58, %v6174_v54  ;;  %v6179_v2 = vld [vmem:[#allocation11 + $0x458] sm:$0xff]  ;;  %v5634_v63 = vld [vmem:[#allocation11 + $0x130] sm:$0xff] }
 0x69b   :  { %8126 = vmatprep.mubr.msk.f32.mxu1 %vm18783_vm14, %v18733_v3  ;;  %9348 = vmatprep.subr.bf16.mxu0 %v18487_v44  ;;  %v9364_v48 = vpack.c.bf16 %v6173_v56, %v6172_v36  ;;  %v5636_v56 = vld [vmem:[#allocation11 + $0x140] sm:$0xff]  ;;  %v6265_v54 = vld [vmem:[#allocation11 + $0x4c8] sm:$0xff] }
 0x69c   :  { %9183 = vmatprep.subr.bf16.mxu1 %v18487_v44 }
 0x69d   :  { %9185 = vmatpush3.bf16.msra.mxu1 %v9184_v4  ;;  %v6177_v4 = vld [vmem:[#allocation11 + $0x448] sm:$0xff] }
 0x69e   :  { %9350 = vmatpush3.bf16.msra.mxu0 %v9349_v7  ;;  %9186 = vmatprep.subr.bf16.mxu1 %v18487_v44  ;;  %v9199_v7 = vpack.c.bf16 %v5544_v62, %v5543_v16  ;;  %v9370_v11 = vpack.c.bf16 %v6177_v4, %v6176_v34  ;;  %v6266_v4 = vld [vmem:[#allocation11 + $0x4d0] sm:$0xff] }
 0x69f   :  { %9351 = vmatprep.subr.bf16.mxu0 %v18487_v44 }
 0x6a1   :  { %9188 = vmatpush3.bf16.msra.mxu1 %v9187_v35  ;;  %v9205_v35 = vpack.c.bf16 %v5548_v43, %v5547_v29  ;;  %v5640_v43 = vld [vmem:[#allocation11 + $0x160] sm:$0xff] }
 0x6a2   :  { %9353 = vmatpush3.bf16.msra.mxu0 %v9352_v21  ;;  %9189 = vmatprep.subr.bf16.mxu1 %v18487_v44  ;;  %v6178_v21 = vld [vmem:[#allocation11 + $0x450] sm:$0xff] }
 0x6a3   :  { %9354 = vmatprep.subr.bf16.mxu0 %v18487_v44 }
 0x6a6   :  { %9356 = vmatpush3.bf16.msra.mxu0 %v9355_v47  ;;  %v9373_v47 = vpack.c.bf16 %v6179_v2, %v6178_v21  ;;  %v6268_v21 = vld [vmem:[#allocation11 + $0x4e0] sm:$0xff]  ;;  %v6269_v2 = vld [vmem:[#allocation11 + $0x4e8] sm:$0xff] }
 0x6a7   :  { %9357 = vmatprep.subr.bf16.mxu0 %v18487_v44 }
 0x6b0   :  { %v7675_v23 = vpop.f32.mrb[44].mxu1 }
 0x6b1   :  { %v7676_v50 = vpop.f32.mrb[45].mxu1 }
 0x6b2   :  { %v7677_v39 = vadd.f32 %v7676_v50, %v7675_v23  ;;  %v6180_v50 = vld [vmem:[#allocation11 + $0x460] sm:$0xff] }
 0x6b4   :  { %v5280_v33 = vadd.f32 %v7677_v39, %v17009_v1  ;;  %v6168_v1 = vld [vmem:[#allocation11 + $0x400] sm:$0xff]  ;;  %v6181_v39 = vld [vmem:[#allocation11 + $0x468] sm:$0xff] }
 0x6b5   :  { %v9358_v40 = vpack.c.bf16 %v6169_v6, %v6168_v1  ;;  %v6258_v6 = vld [vmem:[#allocation11 + $0x490] sm:$0xff] }
 0x6d4   :  { %v7678_v61 = vpop.f32.mrb[46].mxu1 }
 0x6d5   :  { %v7679_v18 = vpop.f32.mrb[47].mxu1 }
 0x6d6   :  { %v7680_v60 = vadd.f32 %v7679_v18, %v7678_v61  ;;  %v9208_v18 = vpack.c.bf16 %v5550_v22, %v5549_v5  ;;  %v5642_v5 = vld [vmem:[#allocation11 + $0x170] sm:$0xff]  ;;  %v5643_v22 = vld [vmem:[#allocation11 + $0x178] sm:$0xff] }
 0x6d8   :  { %v5285_v25 = vadd.f32 %v7680_v60, %v17039_v53  ;;  %v5551_v60 = vld [vmem:[#allocation11 + $0xf0] sm:$0xff] }
 0x6ea   :  { %v7713_v32 = vpop.f32.mrb[48].mxu1 }
 0x6eb   :  { %v7714_v59 = vpop.f32.mrb[49].mxu1 }
 0x6ec   :  { %v7715_v15 = vadd.f32 %v7714_v59, %v7713_v32  ;;  %v9376_v32 = vpack.c.bf16 %v6181_v39, %v6180_v50  ;;  %v6182_v59 = vld [vmem:[#allocation11 + $0x470] sm:$0xff]  ;;  %v6271_v50 = vld [vmem:[#allocation11 + $0x4f8] sm:$0xff]  ;;  %v9235_v39 = vpack.c.bf16 %v5643_v22, %v5642_v5  ;;  %v6437_v5 = vld [vmem:[#allocation11 + $0x580] sm:$0xff] }
 0x6ed   :  { %v6438_v22 = vld [vmem:[#allocation11 + $0x588] sm:$0xff] }
 0x6ee   :  { %v5355_v19 = vadd.f32 %v7715_v15, %v5275_v46  ;;  %v9202_v46 = vpack.c.bf16 %v5546_v30, %v5545_v13  ;;  %v6183_v15 = vld [vmem:[#allocation11 + $0x478] sm:$0xff]  ;;  %v5638_v30 = vld [vmem:[#allocation11 + $0x150] sm:$0xff] }
 0x71b   :  { %v7716_v41 = vpop.f32.mrb[50].mxu1 }
 0x71c   :  { %v7717_v12 = vpop.f32.mrb[51].mxu1 }
 0x71d   :  { %v7718_v45 = vadd.f32 %v7717_v12, %v7716_v41  ;;  %v5628_v41 = vld [vmem:[#allocation11 + $0x100] sm:$0xff]  ;;  %v5629_v12 = vld [vmem:[#allocation11 + $0x108] sm:$0xff] }
 0x71f   :  { %v17062_v10 = vadd.f32 %v7718_v45, %v5280_v33  ;;  %v9379_v45 = vpack.c.bf16 %v6183_v15, %v6182_v59 }
 0x73d   :  { %v7719_v20 = vpop.f32.mrb[52].mxu1 }
 0x73e   :  { %v7720_v37 = vpop.f32.mrb[53].mxu1 }
 0x73f   :  { %v7721_v51 = vadd.f32 %v7720_v37, %v7719_v20  ;;  %v6257_v20 = vld [vmem:[#allocation11 + $0x488] sm:$0xff]  ;;  %v9214_v37 = vpack.c.bf16 %v5629_v12, %v5628_v41  ;;  %v5721_v41 = vld [vmem:[#allocation11 + $0x198] sm:$0xff] }
 0x741   :  { %v5434_v49 = vpop.f32.mrb[54].mxu1  ;;  %v17064_v0 = vadd.f32 %v7721_v51, %v5285_v25  ;;  %v5552_v25 = vld [vmem:[#allocation11 + $0xf8] sm:$0xff] }
 0x742   :  { %v17066_v53 = vadd.f32 %v5434_v49, %v5355_v19  ;;  %v5436_v26 = vpop.f32.mrb[55].mxu1  ;;  %v9211_v19 = vpack.c.bf16 %v5552_v25, %v5551_v60  ;;  %v5631_v51 = vld [vmem:[#allocation11 + $0x118] sm:$0xff]  ;;  %v6347_v25 = vld [vmem:[#allocation11 + $0x500] sm:$0xff] }
 0x743   :  { %v6259_v49 = vld [vmem:[#allocation11 + $0x498] sm:$0xff]  ;;  %v5632_v26 = vld [vmem:[#allocation11 + $0x120] sm:$0xff] }
 0x744   :  { %8127 = vmatmul.mubr.f32.vlgmr.msra.gmra.mrb[60].mxu1 %v17066_v53  ;;  %v6094_v8 = vrot.slane %v17066_v53, 7  ;;  %v5554_v28 = vrot.slane %v17066_v53, 1  ;;  %v9385_v42 = vpack.c.bf16 %v6259_v49, %v6258_v6  ;;  %v9220_v24 = vpack.c.bf16 %v5633_v9, %v5632_v26  ;;  %v6352_v6 = vld [vmem:[#allocation11 + $0x528] sm:$0xff]  ;;  %v5725_v26 = vld [vmem:[#allocation11 + $0x1b8] sm:$0xff] }
 0x745   :  { %9191 = vmatpush3.bf16.msra.mxu1 %v9190_v14  ;;  %8161 = vmatprep.mubr.msk.f32.mxu1 %vm18783_vm14, %v18733_v3  ;;  %v9217_v14 = vpack.c.bf16 %v5631_v51, %v5630_v52  ;;  %v5644_v15 = vrot.slane %v17066_v53, 2  ;;  %v5723_v52 = vld [vmem:[#allocation11 + $0x1a8] sm:$0xff] }
 0x746   :  { %8372 = vmatmul.mubr.f32.vlgmr.msra.gmra.mrb[36].mxu0 %v6094_v8  ;;  %9192 = vmatprep.subr.bf16.mxu1 %v18487_v44  ;;  %v6261_v8 = vld [vmem:[#allocation11 + $0x4a8] sm:$0xff] }
 0x747   :  { %9359 = vmatpush3.bf16.msra.mxu0 %v9358_v40  ;;  %8406 = vmatprep.mubr.msk.f32.mxu0 %vm18783_vm14, %v18733_v3  ;;  %v6260_v40 = vld [vmem:[#allocation11 + $0x4a0] sm:$0xff] }
 0x748   :  { %9360 = vmatprep.subr.bf16.mxu0 %v18487_v44  ;;  %v9388_v55 = vpack.c.bf16 %v6261_v8, %v6260_v40  ;;  %v6354_v40 = vld [vmem:[#allocation11 + $0x538] sm:$0xff] }
 0x749   :  { %9194 = vmatpush3.bf16.msra.mxu1 %v9193_v17  ;;  %v5635_v17 = vld [vmem:[#allocation11 + $0x138] sm:$0xff] }
 0x74a   :  { %9195 = vmatprep.subr.bf16.mxu1 %v18487_v44  ;;  %v9223_v36 = vpack.c.bf16 %v5635_v17, %v5634_v63  ;;  %v5727_v63 = vld [vmem:[#allocation11 + $0x1c8] sm:$0xff] }
 0x74b   :  { %9362 = vmatpush3.bf16.msra.mxu0 %v9361_v38  ;;  %v6263_v38 = vld [vmem:[#allocation11 + $0x4b8] sm:$0xff] }
 0x74c   :  { %9363 = vmatprep.subr.bf16.mxu0 %v18487_v44  ;;  %v9391_v16 = vpack.c.bf16 %v6263_v38, %v6262_v31  ;;  %v6356_v31 = vld [vmem:[#allocation11 + $0x548] sm:$0xff] }
 0x74d   :  { %9197 = vmatpush3.bf16.msra.mxu1 %v9196_v57  ;;  %v5637_v57 = vld [vmem:[#allocation11 + $0x148] sm:$0xff] }
 0x74e   :  { %9198 = vmatprep.subr.bf16.mxu1 %v18487_v44  ;;  %v9226_v13 = vpack.c.bf16 %v5637_v57, %v5636_v56  ;;  %v5729_v56 = vld [vmem:[#allocation11 + $0x1d8] sm:$0xff] }
 0x74f   :  { %9365 = vmatpush3.bf16.msra.mxu0 %v9364_v48  ;;  %v6264_v48 = vld [vmem:[#allocation11 + $0x4c0] sm:$0xff] }
 0x750   :  { %9366 = vmatprep.subr.bf16.mxu0 %v18487_v44  ;;  %v9394_v34 = vpack.c.bf16 %v6265_v54, %v6264_v48  ;;  %v5730_v54 = vld [vmem:[#allocation11 + $0x1e0] sm:$0xff] }
 0x751   :  { %9200 = vmatpush3.bf16.msra.mxu1 %v9199_v7 }
 0x752   :  { %9201 = vmatprep.subr.bf16.mxu1 %v18487_v44 }
 0x753   :  { %9368 = vmatpush3.bf16.msra.mxu0 %v9367_v27  ;;  %v5639_v27 = vld [vmem:[#allocation11 + $0x158] sm:$0xff] }
 0x754   :  { %9369 = vmatprep.subr.bf16.mxu0 %v18487_v44  ;;  %v9229_v29 = vpack.c.bf16 %v5639_v27, %v5638_v30  ;;  %v6359_v30 = vld [vmem:[#allocation11 + $0x560] sm:$0xff]  ;;  %v6360_v27 = vld [vmem:[#allocation11 + $0x568] sm:$0xff] }
 0x755   :  { %9203 = vmatpush3.bf16.msra.mxu1 %v9202_v46  ;;  %v5439_v23 = vpop.f32.mrb[56].mxu1  ;;  %v6267_v46 = vld [vmem:[#allocation11 + $0x4d8] sm:$0xff] }
 0x756   :  { %9204 = vmatprep.subr.bf16.mxu1 %v18487_v44  ;;  %v17085_v33 = vadd.f32 %v5439_v23, %v17062_v10  ;;  %v5441_v61 = vpop.f32.mrb[57].mxu1  ;;  %v6256_v10 = vld [vmem:[#allocation11 + $0x480] sm:$0xff]  ;;  %v6270_v23 = vld [vmem:[#allocation11 + $0x4f0] sm:$0xff] }
 0x757   :  { %9371 = vmatpush3.bf16.msra.mxu0 %v9370_v11  ;;  %v9382_v1 = vpack.c.bf16 %v6257_v20, %v6256_v10  ;;  %v9397_v11 = vpack.c.bf16 %v6267_v46, %v6266_v4  ;;  %v5718_v61 = vld [vmem:[#allocation11 + $0x180] sm:$0xff]  ;;  %v9403_v60 = vpack.c.bf16 %v6271_v50, %v6270_v23  ;;  %v6349_v10 = vld [vmem:[#allocation11 + $0x510] sm:$0xff]  ;;  %v6350_v20 = vld [vmem:[#allocation11 + $0x518] sm:$0xff]  ;;  %v5734_v23 = vrot.slane %v17066_v53, 3 }
 0x758   :  { %9372 = vmatprep.subr.bf16.mxu0 %v18487_v44  ;;  %v9409_v51 = vpack.c.bf16 %v6350_v20, %v6349_v10  ;;  %v5732_v4 = vld [vmem:[#allocation11 + $0x1f0] sm:$0xff]  ;;  %v5733_v46 = vld [vmem:[#allocation11 + $0x1f8] sm:$0xff] }
 0x759   :  { %9206 = vmatpush3.bf16.msra.mxu1 %v9205_v35  ;;  %v5810_v50 = vld [vmem:[#allocation11 + $0x210] sm:$0xff]  ;;  %v5815_v20 = vld [vmem:[#allocation11 + $0x238] sm:$0xff] }
 0x75a   :  { %9207 = vmatprep.subr.bf16.mxu1 %v18487_v44  ;;  %v5814_v10 = vld [vmem:[#allocation11 + $0x230] sm:$0xff] }
 0x75b   :  { %9374 = vmatpush3.bf16.msra.mxu0 %v9373_v47  ;;  %v9400_v47 = vpack.c.bf16 %v6269_v2, %v6268_v21  ;;  %v5808_v21 = vld [vmem:[#allocation11 + $0x200] sm:$0xff]  ;;  %v5809_v2 = vld [vmem:[#allocation11 + $0x208] sm:$0xff] }
 0x75c   :  { %9375 = vmatprep.subr.bf16.mxu0 %v18487_v44 }
 0x75d   :  { %9209 = vmatpush3.bf16.msra.mxu1 %v9208_v18  ;;  %v5719_v18 = vld [vmem:[#allocation11 + $0x188] sm:$0xff] }
 0x75e   :  { %9210 = vmatprep.subr.bf16.mxu1 %v18487_v44  ;;  %v9238_v59 = vpack.c.bf16 %v5719_v18, %v5718_v61  ;;  %v9430_v61 = vpack.c.bf16 %v6438_v22, %v6437_v5  ;;  %v6363_v18 = vrot.slane %v17085_v33, 2  ;;  %v6530_v5 = vld [vmem:[#allocation11 + $0x618] sm:$0xff] }
 0x75f   :  { %9377 = vmatpush3.bf16.msra.mxu0 %v9376_v32  ;;  %v6348_v32 = vld [vmem:[#allocation11 + $0x508] sm:$0xff] }
 0x760   :  { %9378 = vmatprep.subr.bf16.mxu0 %v18487_v44  ;;  %v9406_v12 = vpack.c.bf16 %v6348_v32, %v6347_v25  ;;  %v6440_v25 = vld [vmem:[#allocation11 + $0x598] sm:$0xff] }
 0x761   :  { %9212 = vmatpush3.bf16.msra.mxu1 %v9211_v19  ;;  %v5720_v19 = vld [vmem:[#allocation11 + $0x190] sm:$0xff] }
 0x762   :  { %9213 = vmatprep.subr.bf16.mxu1 %v18487_v44 }
 0x763   :  { %9380 = vmatpush3.bf16.msra.mxu0 %v9379_v45  ;;  %v6273_v45 = vrot.slane %v17085_v33, 1 }
 0x764   :  { %8162 = vmatmul.mubr.f32.vlgmr.msra.gmra.mrb[60].mxu1 %v5554_v28  ;;  %9381 = vmatprep.subr.bf16.mxu0 %v18487_v44  ;;  %v5722_v28 = vld [vmem:[#allocation11 + $0x1a0] sm:$0xff] }
 0x765   :  { %9215 = vmatpush3.bf16.msra.mxu1 %v9214_v37  ;;  %8196 = vmatprep.mubr.msk.f32.mxu1 %vm18783_vm14, %v18733_v3  ;;  %v9241_v37 = vpack.c.bf16 %v5721_v41, %v5720_v19  ;;  %v9244_v49 = vpack.c.bf16 %v5723_v52, %v5722_v28  ;;  %v6441_v41 = vld [vmem:[#allocation11 + $0x5a0] sm:$0xff]  ;;  %v6443_v28 = vld [vmem:[#allocation11 + $0x5b0] sm:$0xff]  ;;  %v6444_v52 = vld [vmem:[#allocation11 + $0x5b8] sm:$0xff] }
 0x766   :  { %8407 = vmatmul.mubr.f32.vlgmr.msra.gmra.mrb[36].mxu0 %v17085_v33  ;;  %9216 = vmatprep.subr.bf16.mxu1 %v18487_v44 }
 0x767   :  { %9383 = vmatpush3.bf16.msra.mxu0 %v9382_v1  ;;  %8441 = vmatprep.mubr.msk.f32.mxu0 %vm18783_vm14, %v18733_v3  ;;  %v6351_v1 = vld [vmem:[#allocation11 + $0x520] sm:$0xff] }
 0x768   :  { %9384 = vmatprep.subr.bf16.mxu0 %v18487_v44  ;;  %v9412_v9 = vpack.c.bf16 %v6352_v6, %v6351_v1  ;;  %v5816_v1 = vld [vmem:[#allocation11 + $0x240] sm:$0xff]  ;;  %v5817_v6 = vld [vmem:[#allocation11 + $0x248] sm:$0xff] }
 0x769   :  { %9218 = vmatpush3.bf16.msra.mxu1 %v9217_v14  ;;  %v5724_v14 = vld [vmem:[#allocation11 + $0x1b0] sm:$0xff] }
 0x76a   :  { %9219 = vmatprep.subr.bf16.mxu1 %v18487_v44  ;;  %v9247_v8 = vpack.c.bf16 %v5725_v26, %v5724_v14  ;;  %v6445_v14 = vld [vmem:[#allocation11 + $0x5c0] sm:$0xff]  ;;  %v6446_v26 = vld [vmem:[#allocation11 + $0x5c8] sm:$0xff] }
 0x76b   :  { %9386 = vmatpush3.bf16.msra.mxu0 %v9385_v42  ;;  %v6353_v42 = vld [vmem:[#allocation11 + $0x530] sm:$0xff] }
 0x76c   :  { %9387 = vmatprep.subr.bf16.mxu0 %v18487_v44  ;;  %v9415_v17 = vpack.c.bf16 %v6354_v40, %v6353_v42  ;;  %v5818_v42 = vld [vmem:[#allocation11 + $0x250] sm:$0xff]  ;;  %v5819_v40 = vld [vmem:[#allocation11 + $0x258] sm:$0xff] }
 0x76d   :  { %9221 = vmatpush3.bf16.msra.mxu1 %v9220_v24  ;;  %v5444_v62 = vpop.f32.mrb[58].mxu1  ;;  %v5726_v24 = vld [vmem:[#allocation11 + $0x1c0] sm:$0xff] }
 0x76e   :  { %9222 = vmatprep.subr.bf16.mxu1 %v18487_v44  ;;  %v17106_v58 = vadd.f32 %v5444_v62, %v17064_v0  ;;  %v5446_v7 = vpop.f32.mrb[59].mxu1  ;;  %v5641_v0 = vld [vmem:[#allocation11 + $0x168] sm:$0xff]  ;;  %v9250_v38 = vpack.c.bf16 %v5727_v63, %v5726_v24  ;;  %v6358_v62 = vld [vmem:[#allocation11 + $0x558] sm:$0xff]  ;;  %v6447_v24 = vld [vmem:[#allocation11 + $0x5d0] sm:$0xff] }
 0x76f   :  { %9389 = vmatpush3.bf16.msra.mxu0 %v9388_v55  ;;  %v9232_v35 = vpack.c.bf16 %v5641_v0, %v5640_v43  ;;  %v6355_v55 = vld [vmem:[#allocation11 + $0x540] sm:$0xff]  ;;  %v5731_v7 = vld [vmem:[#allocation11 + $0x1e8] sm:$0xff]  ;;  %v6361_v43 = vld [vmem:[#allocation11 + $0x570] sm:$0xff] }
 0x770   :  { %9390 = vmatprep.subr.bf16.mxu0 %v18487_v44  ;;  %v9418_v57 = vpack.c.bf16 %v6356_v31, %v6355_v55  ;;  %v6362_v0 = vld [vmem:[#allocation11 + $0x578] sm:$0xff]  ;;  %v5820_v55 = vld [vmem:[#allocation11 + $0x260] sm:$0xff]  ;;  %v5821_v31 = vld [vmem:[#allocation11 + $0x268] sm:$0xff] }
 0x771   :  { %9224 = vmatpush3.bf16.msra.mxu1 %v9223_v36  ;;  %v5728_v36 = vld [vmem:[#allocation11 + $0x1d0] sm:$0xff]  ;;  %v6448_v63 = vld [vmem:[#allocation11 + $0x5d8] sm:$0xff] }
 0x772   :  { %9225 = vmatprep.subr.bf16.mxu1 %v18487_v44  ;;  %v9253_v48 = vpack.c.bf16 %v5729_v56, %v5728_v36  ;;  %v6449_v36 = vld [vmem:[#allocation11 + $0x5e0] sm:$0xff]  ;;  %v6450_v56 = vld [vmem:[#allocation11 + $0x5e8] sm:$0xff] }
 0x773   :  { %9392 = vmatpush3.bf16.msra.mxu0 %v9391_v16  ;;  %v6357_v16 = vld [vmem:[#allocation11 + $0x550] sm:$0xff] }
 0x774   :  { %9393 = vmatprep.subr.bf16.mxu0 %v18487_v44 }
 0x775   :  { %9227 = vmatpush3.bf16.msra.mxu1 %v9226_v13  ;;  %v9421_v13 = vpack.c.bf16 %v6358_v62, %v6357_v16  ;;  %v5822_v16 = vld [vmem:[#allocation11 + $0x270] sm:$0xff]  ;;  %v5823_v62 = vld [vmem:[#allocation11 + $0x278] sm:$0xff] }
 0x776   :  { %9228 = vmatprep.subr.bf16.mxu1 %v18487_v44 }
 0x777   :  { %9395 = vmatpush3.bf16.msra.mxu0 %v9394_v34  ;;  %v9256_v34 = vpack.c.bf16 %v5731_v7, %v5730_v54  ;;  %v6451_v54 = vld [vmem:[#allocation11 + $0x5f0] sm:$0xff]  ;;  %v6452_v7 = vld [vmem:[#allocation11 + $0x5f8] sm:$0xff] }
 0x778   :  { %9396 = vmatprep.subr.bf16.mxu0 %v18487_v44 }
 0x779   :  { %9230 = vmatpush3.bf16.msra.mxu1 %v9229_v29  ;;  %v9424_v29 = vpack.c.bf16 %v6360_v27, %v6359_v30  ;;  %v5898_v30 = vld [vmem:[#allocation11 + $0x280] sm:$0xff]  ;;  %v5899_v27 = vld [vmem:[#allocation11 + $0x288] sm:$0xff] }
 0x77a   :  { %9231 = vmatprep.subr.bf16.mxu1 %v18487_v44 }
 0x77b   :  { %9398 = vmatpush3.bf16.msra.mxu0 %v9397_v11  ;;  %v9259_v11 = vpack.c.bf16 %v5733_v46, %v5732_v4  ;;  %v6527_v4 = vld [vmem:[#allocation11 + $0x600] sm:$0xff]  ;;  %v6528_v46 = vld [vmem:[#allocation11 + $0x608] sm:$0xff] }
 0x77c   :  { %9399 = vmatprep.subr.bf16.mxu0 %v18487_v44 }
 0x77d   :  { %9233 = vmatpush3.bf16.msra.mxu1 %v9232_v35  ;;  %v9427_v35 = vpack.c.bf16 %v6362_v0, %v6361_v43  ;;  %v5824_v43 = vrot.slane %v17066_v53, 4  ;;  %v5900_v0 = vld [vmem:[#allocation11 + $0x290] sm:$0xff] }
 0x77e   :  { %9234 = vmatprep.subr.bf16.mxu1 %v18487_v44 }
 0x77f   :  { %9401 = vmatpush3.bf16.msra.mxu0 %v9400_v47  ;;  %v9262_v47 = vpack.c.bf16 %v5809_v2, %v5808_v21  ;;  %v9454_v21 = vpack.c.bf16 %v6528_v46, %v6527_v4  ;;  %v6453_v2 = vrot.slane %v17085_v33, 3  ;;  %v6620_v4 = vld [vmem:[#allocation11 + $0x698] sm:$0xff] }
 0x780   :  { %9402 = vmatprep.subr.bf16.mxu0 %v18487_v44 }
 0x781   :  { %9236 = vmatpush3.bf16.msra.mxu1 %v9235_v39  ;;  %v5811_v39 = vld [vmem:[#allocation11 + $0x218] sm:$0xff] }
 0x782   :  { %9237 = vmatprep.subr.bf16.mxu1 %v18487_v44  ;;  %v9265_v32 = vpack.c.bf16 %v5811_v39, %v5810_v50  ;;  %v6531_v39 = vld [vmem:[#allocation11 + $0x620] sm:$0xff] }
 0x783   :  { %9404 = vmatpush3.bf16.msra.mxu0 %v9403_v60  ;;  %v6439_v60 = vld [vmem:[#allocation11 + $0x590] sm:$0xff] }
 0x784   :  { %8197 = vmatmul.mubr.f32.vlgmr.msra.gmra.mrb[60].mxu1 %v5644_v15  ;;  %9405 = vmatprep.subr.bf16.mxu0 %v18487_v44  ;;  %v5813_v15 = vld [vmem:[#allocation11 + $0x228] sm:$0xff]  ;;  %v9433_v19 = vpack.c.bf16 %v6440_v25, %v6439_v60  ;;  %v5904_v60 = vld [vmem:[#allocation11 + $0x2b0] sm:$0xff]  ;;  %v5905_v25 = vld [vmem:[#allocation11 + $0x2b8] sm:$0xff] }
 0x785   :  { %9239 = vmatpush3.bf16.msra.mxu1 %v9238_v59  ;;  %8231 = vmatprep.mubr.msk.f32.mxu1 %vm18783_vm14, %v18733_v3  ;;  %v5812_v59 = vld [vmem:[#allocation11 + $0x220] sm:$0xff] }
 0x786   :  { %8442 = vmatmul.mubr.f32.vlgmr.msra.gmra.mrb[36].mxu0 %v6273_v45  ;;  %9240 = vmatprep.subr.bf16.mxu1 %v18487_v44  ;;  %v9268_v45 = vpack.c.bf16 %v5813_v15, %v5812_v59  ;;  %v6533_v59 = vld [vmem:[#allocation11 + $0x630] sm:$0xff]  ;;  %v6534_v15 = vld [vmem:[#allocation11 + $0x638] sm:$0xff] }
 0x787   :  { %9407 = vmatpush3.bf16.msra.mxu0 %v9406_v12  ;;  %8476 = vmatprep.mubr.msk.f32.mxu0 %vm18783_vm14, %v18733_v3  ;;  %v6442_v12 = vld [vmem:[#allocation11 + $0x5a8] sm:$0xff] }
 0x788   :  { %9408 = vmatprep.subr.bf16.mxu0 %v18487_v44 }
 0x789   :  { %9242 = vmatpush3.bf16.msra.mxu1 %v9241_v37  ;;  %v9436_v37 = vpack.c.bf16 %v6442_v12, %v6441_v41  ;;  %v5906_v41 = vld [vmem:[#allocation11 + $0x2c0] sm:$0xff]  ;;  %v5907_v12 = vld [vmem:[#allocation11 + $0x2c8] sm:$0xff] }
 0x78a   :  { %9243 = vmatprep.subr.bf16.mxu1 %v18487_v44 }
 0x78b   :  { %9410 = vmatpush3.bf16.msra.mxu0 %v9409_v51  ;;  %v9271_v51 = vpack.c.bf16 %v5815_v20, %v5814_v10  ;;  %v6535_v10 = vld [vmem:[#allocation11 + $0x640] sm:$0xff]  ;;  %v6536_v20 = vld [vmem:[#allocation11 + $0x648] sm:$0xff] }
 0x78c   :  { %9411 = vmatprep.subr.bf16.mxu0 %v18487_v44 }
 0x78d   :  { %9245 = vmatpush3.bf16.msra.mxu1 %v9244_v49  ;;  %v9439_v49 = vpack.c.bf16 %v6444_v52, %v6443_v28  ;;  %v5908_v28 = vld [vmem:[#allocation11 + $0x2d0] sm:$0xff]  ;;  %v5909_v52 = vld [vmem:[#allocation11 + $0x2d8] sm:$0xff] }
 0x78e   :  { %9246 = vmatprep.subr.bf16.mxu1 %v18487_v44 }
 0x78f   :  { %9413 = vmatpush3.bf16.msra.mxu0 %v9412_v9  ;;  %v9274_v9 = vpack.c.bf16 %v5817_v6, %v5816_v1  ;;  %v6537_v1 = vld [vmem:[#allocation11 + $0x650] sm:$0xff]  ;;  %v6538_v6 = vld [vmem:[#allocation11 + $0x658] sm:$0xff] }
 0x790   :  { %9414 = vmatprep.subr.bf16.mxu0 %v18487_v44 }
 0x791   :  { %9248 = vmatpush3.bf16.msra.mxu1 %v9247_v8  ;;  %v9442_v8 = vpack.c.bf16 %v6446_v26, %v6445_v14  ;;  %v5910_v14 = vld [vmem:[#allocation11 + $0x2e0] sm:$0xff]  ;;  %v5911_v26 = vld [vmem:[#allocation11 + $0x2e8] sm:$0xff] }
 0x792   :  { %9249 = vmatprep.subr.bf16.mxu1 %v18487_v44 }
 0x793   :  { %9416 = vmatpush3.bf16.msra.mxu0 %v9415_v17  ;;  %v9277_v17 = vpack.c.bf16 %v5819_v40, %v5818_v42  ;;  %v6539_v42 = vld [vmem:[#allocation11 + $0x660] sm:$0xff]  ;;  %v6540_v40 = vld [vmem:[#allocation11 + $0x668] sm:$0xff] }
 0x794   :  { %9417 = vmatprep.subr.bf16.mxu0 %v18487_v44 }
 0x795   :  { %9251 = vmatpush3.bf16.msra.mxu1 %v9250_v38  ;;  %v9445_v38 = vpack.c.bf16 %v6448_v63, %v6447_v24  ;;  %v5912_v24 = vld [vmem:[#allocation11 + $0x2f0] sm:$0xff]  ;;  %v5913_v63 = vld [vmem:[#allocation11 + $0x2f8] sm:$0xff] }
 0x796   :  { %9252 = vmatprep.subr.bf16.mxu1 %v18487_v44 }
 0x797   :  { %9419 = vmatpush3.bf16.msra.mxu0 %v9418_v57  ;;  %v9280_v57 = vpack.c.bf16 %v5821_v31, %v5820_v55  ;;  %v6541_v55 = vld [vmem:[#allocation11 + $0x670] sm:$0xff]  ;;  %v6542_v31 = vld [vmem:[#allocation11 + $0x678] sm:$0xff] }
 0x798   :  { %9420 = vmatprep.subr.bf16.mxu0 %v18487_v44 }
 0x799   :  { %9254 = vmatpush3.bf16.msra.mxu1 %v9253_v48  ;;  %v9448_v48 = vpack.c.bf16 %v6450_v56, %v6449_v36  ;;  %v5988_v36 = vld [vmem:[#allocation11 + $0x300] sm:$0xff]  ;;  %v5989_v56 = vld [vmem:[#allocation11 + $0x308] sm:$0xff] }
 0x79a   :  { %9255 = vmatprep.subr.bf16.mxu1 %v18487_v44 }
 0x79b   :  { %9422 = vmatpush3.bf16.msra.mxu0 %v9421_v13  ;;  %v9283_v13 = vpack.c.bf16 %v5823_v62, %v5822_v16  ;;  %v6617_v16 = vld [vmem:[#allocation11 + $0x680] sm:$0xff]  ;;  %v6618_v62 = vld [vmem:[#allocation11 + $0x688] sm:$0xff] }
 0x79c   :  { %9423 = vmatprep.subr.bf16.mxu0 %v18487_v44 }
 0x79d   :  { %9257 = vmatpush3.bf16.msra.mxu1 %v9256_v34  ;;  %v9451_v34 = vpack.c.bf16 %v6452_v7, %v6451_v54  ;;  %v5914_v54 = vrot.slane %v17066_v53, 5  ;;  %v5990_v7 = vld [vmem:[#allocation11 + $0x310] sm:$0xff] }
 0x79e   :  { %9258 = vmatprep.subr.bf16.mxu1 %v18487_v44 }
 0x79f   :  { %9425 = vmatpush3.bf16.msra.mxu0 %v9424_v29  ;;  %v9286_v29 = vpack.c.bf16 %v5899_v27, %v5898_v30  ;;  %v9478_v30 = vpack.c.bf16 %v6618_v62, %v6617_v16  ;;  %v6543_v27 = vrot.slane %v17085_v33, 4  ;;  %v6714_v16 = vld [vmem:[#allocation11 + $0x738] sm:$0xff] }
 0x7a0   :  { %9426 = vmatprep.subr.bf16.mxu0 %v18487_v44 }
 0x7a1   :  { %9260 = vmatpush3.bf16.msra.mxu1 %v9259_v11  ;;  %v5901_v11 = vld [vmem:[#allocation11 + $0x298] sm:$0xff] }
 0x7a2   :  { %9261 = vmatprep.subr.bf16.mxu1 %v18487_v44  ;;  %v9289_v22 = vpack.c.bf16 %v5901_v11, %v5900_v0  ;;  %v6621_v11 = vld [vmem:[#allocation11 + $0x6a0] sm:$0xff] }
 0x7a3   :  { %9428 = vmatpush3.bf16.msra.mxu0 %v9427_v35  ;;  %v6529_v35 = vld [vmem:[#allocation11 + $0x610] sm:$0xff] }
 0x7a4   :  { %8232 = vmatmul.mubr.f32.vlgmr.msra.gmra.mrb[60].mxu1 %v5734_v23  ;;  %9429 = vmatprep.subr.bf16.mxu0 %v18487_v44  ;;  %v5903_v23 = vld [vmem:[#allocation11 + $0x2a8] sm:$0xff]  ;;  %v9457_v50 = vpack.c.bf16 %v6530_v5, %v6529_v35  ;;  %v5994_v35 = vld [vmem:[#allocation11 + $0x330] sm:$0xff]  ;;  %v5995_v5 = vld [vmem:[#allocation11 + $0x338] sm:$0xff] }
 0x7a5   :  { %9263 = vmatpush3.bf16.msra.mxu1 %v9262_v47  ;;  %8266 = vmatprep.mubr.msk.f32.mxu1 %vm18783_vm14, %v18733_v3  ;;  %v5902_v47 = vld [vmem:[#allocation11 + $0x2a0] sm:$0xff] }
 0x7a6   :  { %8477 = vmatmul.mubr.f32.vlgmr.msra.gmra.mrb[36].mxu0 %v6363_v18  ;;  %9264 = vmatprep.subr.bf16.mxu1 %v18487_v44  ;;  %v9292_v18 = vpack.c.bf16 %v5903_v23, %v5902_v47  ;;  %v6623_v47 = vld [vmem:[#allocation11 + $0x6b0] sm:$0xff]  ;;  %v6624_v23 = vld [vmem:[#allocation11 + $0x6b8] sm:$0xff] }
 0x7a7   :  { %9431 = vmatpush3.bf16.msra.mxu0 %v9430_v61  ;;  %8511 = vmatprep.mubr.msk.f32.mxu0 %vm18783_vm14, %v18733_v3  ;;  %v6532_v61 = vld [vmem:[#allocation11 + $0x628] sm:$0xff] }
 0x7a8   :  { %9432 = vmatprep.subr.bf16.mxu0 %v18487_v44 }
 0x7a9   :  { %9266 = vmatpush3.bf16.msra.mxu1 %v9265_v32  ;;  %v9460_v32 = vpack.c.bf16 %v6532_v61, %v6531_v39  ;;  %v5996_v39 = vld [vmem:[#allocation11 + $0x340] sm:$0xff]  ;;  %v5997_v61 = vld [vmem:[#allocation11 + $0x348] sm:$0xff] }
 0x7aa   :  { %9267 = vmatprep.subr.bf16.mxu1 %v18487_v44 }
 0x7ab   :  { %9434 = vmatpush3.bf16.msra.mxu0 %v9433_v19  ;;  %v9295_v19 = vpack.c.bf16 %v5905_v25, %v5904_v60  ;;  %v6625_v60 = vld [vmem:[#allocation11 + $0x6c0] sm:$0xff]  ;;  %v6626_v25 = vld [vmem:[#allocation11 + $0x6c8] sm:$0xff] }
 0x7ac   :  { %9435 = vmatprep.subr.bf16.mxu0 %v18487_v44 }
 0x7ad   :  { %9269 = vmatpush3.bf16.msra.mxu1 %v9268_v45  ;;  %v9463_v45 = vpack.c.bf16 %v6534_v15, %v6533_v59  ;;  %v5998_v59 = vld [vmem:[#allocation11 + $0x350] sm:$0xff]  ;;  %v5999_v15 = vld [vmem:[#allocation11 + $0x358] sm:$0xff] }
 0x7ae   :  { %9270 = vmatprep.subr.bf16.mxu1 %v18487_v44 }
 0x7af   :  { %9437 = vmatpush3.bf16.msra.mxu0 %v9436_v37  ;;  %v9298_v37 = vpack.c.bf16 %v5907_v12, %v5906_v41  ;;  %v6627_v41 = vld [vmem:[#allocation11 + $0x6d0] sm:$0xff]  ;;  %v6628_v12 = vld [vmem:[#allocation11 + $0x6d8] sm:$0xff] }
 0x7b0   :  { %9438 = vmatprep.subr.bf16.mxu0 %v18487_v44 }
 0x7b1   :  { %9272 = vmatpush3.bf16.msra.mxu1 %v9271_v51  ;;  %v9466_v51 = vpack.c.bf16 %v6536_v20, %v6535_v10  ;;  %v6000_v10 = vld [vmem:[#allocation11 + $0x360] sm:$0xff]  ;;  %v6001_v20 = vld [vmem:[#allocation11 + $0x368] sm:$0xff] }
 0x7b2   :  { %9273 = vmatprep.subr.bf16.mxu1 %v18487_v44 }
 0x7b3   :  { %9440 = vmatpush3.bf16.msra.mxu0 %v9439_v49  ;;  %v9301_v49 = vpack.c.bf16 %v5909_v52, %v5908_v28  ;;  %v6629_v28 = vld [vmem:[#allocation11 + $0x6e0] sm:$0xff]  ;;  %v6630_v52 = vld [vmem:[#allocation11 + $0x6e8] sm:$0xff] }
 0x7b4   :  { %9441 = vmatprep.subr.bf16.mxu0 %v18487_v44 }
 0x7b5   :  { %9275 = vmatpush3.bf16.msra.mxu1 %v9274_v9  ;;  %v9469_v9 = vpack.c.bf16 %v6538_v6, %v6537_v1  ;;  %v6002_v1 = vld [vmem:[#allocation11 + $0x370] sm:$0xff]  ;;  %v6003_v6 = vld [vmem:[#allocation11 + $0x378] sm:$0xff] }
 0x7b6   :  { %9276 = vmatprep.subr.bf16.mxu1 %v18487_v44 }
 0x7b7   :  { %9443 = vmatpush3.bf16.msra.mxu0 %v9442_v8  ;;  %v9304_v8 = vpack.c.bf16 %v5911_v26, %v5910_v14  ;;  %v6631_v14 = vld [vmem:[#allocation11 + $0x6f0] sm:$0xff]  ;;  %v6632_v26 = vld [vmem:[#allocation11 + $0x6f8] sm:$0xff] }
 0x7b8   :  { %9444 = vmatprep.subr.bf16.mxu0 %v18487_v44 }
 0x7b9   :  { %9278 = vmatpush3.bf16.msra.mxu1 %v9277_v17  ;;  %v9472_v17 = vpack.c.bf16 %v6540_v40, %v6539_v42  ;;  %v9499_v42 = vpack.c.bf16 %v6632_v26, %v6631_v14  ;;  %v6707_v40 = vld [vmem:[#allocation11 + $0x700] sm:$0xff]  ;;  %v6890_v14 = vld [vmem:[#allocation11 + $0x818] sm:$0xff] }
 0x7ba   :  { %9279 = vmatprep.subr.bf16.mxu1 %v18487_v44 }
 0x7bb   :  { %9446 = vmatpush3.bf16.msra.mxu0 %v9445_v38  ;;  %v9307_v38 = vpack.c.bf16 %v5913_v63, %v5912_v24  ;;  %v6004_v24 = vrot.slane %v17066_v53, 6  ;;  %v6711_v53 = vld [vmem:[#allocation11 + $0x720] sm:$0xff] }
 0x7bc   :  { %9447 = vmatprep.subr.bf16.mxu0 %v18487_v44 }
 0x7bd   :  { %9281 = vmatpush3.bf16.msra.mxu1 %v9280_v57  ;;  %v9475_v57 = vpack.c.bf16 %v6542_v31, %v6541_v55  ;;  %v6709_v55 = vld [vmem:[#allocation11 + $0x710] sm:$0xff]  ;;  %v6710_v31 = vld [vmem:[#allocation11 + $0x718] sm:$0xff] }
 0x7be   :  { %9282 = vmatprep.subr.bf16.mxu1 %v18487_v44 }
 0x7bf   :  { %9449 = vmatpush3.bf16.msra.mxu0 %v9448_v48  ;;  %v9310_v48 = vpack.c.bf16 %v5989_v56, %v5988_v36  ;;  %v6712_v36 = vld [vmem:[#allocation11 + $0x728] sm:$0xff] }
 0x7c0   :  { %9450 = vmatprep.subr.bf16.mxu0 %v18487_v44  ;;  %v9508_v56 = vpack.c.bf16 %v6712_v36, %v6711_v53  ;;  %v6899_v36 = vld [vmem:[#allocation11 + $0x860] sm:$0xff] }
 0x7c1   :  { %9284 = vmatpush3.bf16.msra.mxu1 %v9283_v13  ;;  %v5991_v13 = vld [vmem:[#allocation11 + $0x318] sm:$0xff] }
 0x7c2   :  { %9285 = vmatprep.subr.bf16.mxu1 %v18487_v44  ;;  %v9313_v46 = vpack.c.bf16 %v5991_v13, %v5990_v7  ;;  %v6717_v13 = vld [vmem:[#allocation11 + $0x750] sm:$0xff] }
 0x7c3   :  { %9452 = vmatpush3.bf16.msra.mxu0 %v9451_v34  ;;  %v6619_v34 = vld [vmem:[#allocation11 + $0x690] sm:$0xff] }
 0x7c4   :  { %8267 = vmatmul.mubr.f32.vlgmr.msra.gmra.mrb[60].mxu1 %v5824_v43  ;;  %9453 = vmatprep.subr.bf16.mxu0 %v18487_v44  ;;  %v5993_v43 = vld [vmem:[#allocation11 + $0x328] sm:$0xff]  ;;  %v9481_v0 = vpack.c.bf16 %v6620_v4, %v6619_v34  ;;  %v6719_v34 = vld [vmem:[#allocation11 + $0x760] sm:$0xff] }
 0x7c5   :  { %9287 = vmatpush3.bf16.msra.mxu1 %v9286_v29  ;;  %8301 = vmatprep.mubr.msk.f32.mxu1 %vm18783_vm14, %v18733_v3  ;;  %v5992_v29 = vld [vmem:[#allocation11 + $0x320] sm:$0xff]  ;;  %v6720_v4 = vld [vmem:[#allocation11 + $0x768] sm:$0xff] }
 0x7c6   :  { %8512 = vmatmul.mubr.f32.vlgmr.msra.gmra.mrb[36].mxu0 %v6453_v2  ;;  %9288 = vmatprep.subr.bf16.mxu1 %v18487_v44  ;;  %v9316_v2 = vpack.c.bf16 %v5993_v43, %v5992_v29  ;;  %v6721_v29 = vld [vmem:[#allocation11 + $0x770] sm:$0xff]  ;;  %v6722_v43 = vld [vmem:[#allocation11 + $0x778] sm:$0xff] }
 0x7c7   :  { %9455 = vmatpush3.bf16.msra.mxu0 %v9454_v21  ;;  %8546 = vmatprep.mubr.msk.f32.mxu0 %vm18783_vm14, %v18733_v3  ;;  %v6622_v21 = vld [vmem:[#allocation11 + $0x6a8] sm:$0xff] }
 0x7c8   :  { %9456 = vmatprep.subr.bf16.mxu0 %v18487_v44 }
 0x7c9   :  { %9290 = vmatpush3.bf16.msra.mxu1 %v9289_v22  ;;  %v9484_v22 = vpack.c.bf16 %v6622_v21, %v6621_v11  ;;  %v6797_v11 = vld [vmem:[#allocation11 + $0x780] sm:$0xff]  ;;  %v6798_v21 = vld [vmem:[#allocation11 + $0x788] sm:$0xff] }
 0x7ca   :  { %9291 = vmatprep.subr.bf16.mxu1 %v18487_v44 }
 0x7cb   :  { %9458 = vmatpush3.bf16.msra.mxu0 %v9457_v50  ;;  %v9319_v50 = vpack.c.bf16 %v5995_v5, %v5994_v35  ;;  %v6723_v35 = vrot.slane %v17085_v33, 6  ;;  %v6799_v5 = vld [vmem:[#allocation11 + $0x790] sm:$0xff] }
 0x7cc   :  { %9459 = vmatprep.subr.bf16.mxu0 %v18487_v44 }
 0x7cd   :  { %9293 = vmatpush3.bf16.msra.mxu1 %v9292_v18  ;;  %v9487_v18 = vpack.c.bf16 %v6624_v23, %v6623_v47  ;;  %v6801_v23 = vld [vmem:[#allocation11 + $0x7a0] sm:$0xff] }
 0x7ce   :  { %9294 = vmatprep.subr.bf16.mxu1 %v18487_v44 }
 0x7cf   :  { %9461 = vmatpush3.bf16.msra.mxu0 %v9460_v32  ;;  %v9322_v32 = vpack.c.bf16 %v5997_v61, %v5996_v39  ;;  %v6803_v61 = vld [vmem:[#allocation11 + $0x7b0] sm:$0xff] }
 0x7d0   :  { %9462 = vmatprep.subr.bf16.mxu0 %v18487_v44 }
 0x7d1   :  { %9296 = vmatpush3.bf16.msra.mxu1 %v9295_v19  ;;  %v9490_v19 = vpack.c.bf16 %v6626_v25, %v6625_v60  ;;  %v6805_v25 = vld [vmem:[#allocation11 + $0x7c0] sm:$0xff] }
 0x7d2   :  { %9297 = vmatprep.subr.bf16.mxu1 %v18487_v44 }
 0x7d3   :  { %9464 = vmatpush3.bf16.msra.mxu0 %v9463_v45  ;;  %v9325_v45 = vpack.c.bf16 %v5999_v15, %v5998_v59  ;;  %v6807_v15 = vld [vmem:[#allocation11 + $0x7d0] sm:$0xff] }
 0x7d4   :  { %9465 = vmatprep.subr.bf16.mxu0 %v18487_v44 }
 0x7d5   :  { %9299 = vmatpush3.bf16.msra.mxu1 %v9298_v37  ;;  %v9493_v37 = vpack.c.bf16 %v6628_v12, %v6627_v41  ;;  %v6809_v12 = vld [vmem:[#allocation11 + $0x7e0] sm:$0xff] }
 0x7d6   :  { %9300 = vmatprep.subr.bf16.mxu1 %v18487_v44 }
 0x7d7   :  { %9467 = vmatpush3.bf16.msra.mxu0 %v9466_v51  ;;  %v9328_v51 = vpack.c.bf16 %v6001_v20, %v6000_v10  ;;  %v6811_v20 = vld [vmem:[#allocation11 + $0x7f0] sm:$0xff] }
 0x7d8   :  { %9468 = vmatprep.subr.bf16.mxu0 %v18487_v44 }
 0x7d9   :  { %9302 = vmatpush3.bf16.msra.mxu1 %v9301_v49  ;;  %v9496_v49 = vpack.c.bf16 %v6630_v52, %v6629_v28  ;;  %v6887_v52 = vld [vmem:[#allocation11 + $0x800] sm:$0xff] }
 0x7da   :  { %9303 = vmatprep.subr.bf16.mxu1 %v18487_v44 }
 0x7db   :  { %9470 = vmatpush3.bf16.msra.mxu0 %v9469_v9  ;;  %v9331_v9 = vpack.c.bf16 %v6003_v6, %v6002_v1  ;;  %v6813_v6 = vrot.slane %v17085_v33, 7 }
 0x7dc   :  { %9471 = vmatprep.subr.bf16.mxu0 %v18487_v44 }
 0x7dd   :  { %9305 = vmatpush3.bf16.msra.mxu1 %v9304_v8  ;;  %v6708_v8 = vld [vmem:[#allocation11 + $0x708] sm:$0xff] }
 0x7de   :  { %9306 = vmatprep.subr.bf16.mxu1 %v18487_v44  ;;  %v9502_v63 = vpack.c.bf16 %v6708_v8, %v6707_v40  ;;  %v6893_v8 = vld [vmem:[#allocation11 + $0x830] sm:$0xff] }
 0x7df   :  { %9473 = vmatpush3.bf16.msra.mxu0 %v9472_v17  ;;  %v6633_v17 = vrot.slane %v17085_v33, 5  ;;  %v6894_v33 = vld [vmem:[#allocation11 + $0x838] sm:$0xff] }
 0x7e0   :  { %9474 = vmatprep.subr.bf16.mxu0 %v18487_v44 }
 0x7e1   :  { %9308 = vmatpush3.bf16.msra.mxu1 %v9307_v38  ;;  %v9505_v38 = vpack.c.bf16 %v6710_v31, %v6709_v55  ;;  %v6897_v31 = vld [vmem:[#allocation11 + $0x850] sm:$0xff] }
 0x7e2   :  { %9309 = vmatprep.subr.bf16.mxu1 %v18487_v44 }
 0x7e3   :  { %9476 = vmatpush3.bf16.msra.mxu0 %v9475_v57  ;;  %v6713_v57 = vld [vmem:[#allocation11 + $0x730] sm:$0xff] }
 0x7e4   :  { %8302 = vmatmul.mubr.f32.vlgmr.msra.gmra.mrb[60].mxu1 %v5914_v54  ;;  %9477 = vmatprep.subr.bf16.mxu0 %v18487_v44  ;;  %v9511_v62 = vpack.c.bf16 %v6714_v16, %v6713_v57  ;;  %v6716_v54 = vld [vmem:[#allocation11 + $0x748] sm:$0xff]  ;;  %v6901_v16 = vld [vmem:[#allocation11 + $0x870] sm:$0xff] }
 0x7e5   :  { %9311 = vmatpush3.bf16.msra.mxu1 %v9310_v48  ;;  %8336 = vmatprep.mubr.msk.f32.mxu1 %vm18783_vm14, %v18733_v3  ;;  %v6715_v48 = vld [vmem:[#allocation11 + $0x740] sm:$0xff] }
 0x7e6   :  { %8547 = vmatmul.mubr.f32.vlgmr.msra.gmra.mrb[36].mxu0 %v6543_v27  ;;  %9312 = vmatprep.subr.bf16.mxu1 %v18487_v44  ;;  %v9514_v7 = vpack.c.bf16 %v6716_v54, %v6715_v48  ;;  %v6975_v54 = vld [vmem:[#allocation11 + $0x880] sm:$0xff] }
 0x7e7   :  { %9479 = vmatpush3.bf16.msra.mxu0 %v9478_v30  ;;  %8581 = vmatprep.mubr.msk.f32.mxu0 %vm18783_vm14, %v18733_v3  ;;  %v6718_v30 = vld [vmem:[#allocation11 + $0x758] sm:$0xff] }
 0x7e8   :  { %9480 = vmatprep.subr.bf16.mxu0 %v18487_v44  ;;  %v9517_v27 = vpack.c.bf16 %v6718_v30, %v6717_v13  ;;  %v6977_v30 = vld [vmem:[#allocation11 + $0x890] sm:$0xff] }
 0x7e9   :  { %9314 = vmatpush3.bf16.msra.mxu1 %v9313_v46  ;;  %v9520_v46 = vpack.c.bf16 %v6720_v4, %v6719_v34  ;;  %v6979_v4 = vld [vmem:[#allocation11 + $0x8a0] sm:$0xff] }
 0x7ea   :  { %9315 = vmatprep.subr.bf16.mxu1 %v18487_v44 }
 0x7eb   :  { %9482 = vmatpush3.bf16.msra.mxu0 %v9481_v0  ;;  %v9523_v0 = vpack.c.bf16 %v6722_v43, %v6721_v29  ;;  %v6981_v43 = vld [vmem:[#allocation11 + $0x8b0] sm:$0xff] }
 0x7ec   :  { %9483 = vmatprep.subr.bf16.mxu0 %v18487_v44 }
 0x7ed   :  { %9317 = vmatpush3.bf16.msra.mxu1 %v9316_v2  ;;  %v9526_v2 = vpack.c.bf16 %v6798_v21, %v6797_v11  ;;  %v6983_v21 = vld [vmem:[#allocation11 + $0x8c0] sm:$0xff] }
 0x7ee   :  { %9318 = vmatprep.subr.bf16.mxu1 %v18487_v44 }
 0x7ef   :  { %9485 = vmatpush3.bf16.msra.mxu0 %v9484_v22  ;;  %v6800_v22 = vld [vmem:[#allocation11 + $0x798] sm:$0xff] }
 0x7f0   :  { %9486 = vmatprep.subr.bf16.mxu0 %v18487_v44  ;;  %v9529_v47 = vpack.c.bf16 %v6800_v22, %v6799_v5  ;;  %v6985_v5 = vld [vmem:[#allocation11 + $0x8d0] sm:$0xff]  ;;  %v6986_v22 = vld [vmem:[#allocation11 + $0x8d8] sm:$0xff] }
 0x7f1   :  { %9320 = vmatpush3.bf16.msra.mxu1 %v9319_v50  ;;  %v6802_v50 = vld [vmem:[#allocation11 + $0x7a8] sm:$0xff] }
 0x7f2   :  { %9321 = vmatprep.subr.bf16.mxu1 %v18487_v44  ;;  %v9532_v39 = vpack.c.bf16 %v6802_v50, %v6801_v23  ;;  %v6987_v23 = vld [vmem:[#allocation11 + $0x8e0] sm:$0xff]  ;;  %v6988_v50 = vld [vmem:[#allocation11 + $0x8e8] sm:$0xff] }
 0x7f3   :  { %9488 = vmatpush3.bf16.msra.mxu0 %v9487_v18  ;;  %v6804_v18 = vld [vmem:[#allocation11 + $0x7b8] sm:$0xff] }
 0x7f4   :  { %9489 = vmatprep.subr.bf16.mxu0 %v18487_v44  ;;  %v9535_v60 = vpack.c.bf16 %v6804_v18, %v6803_v61  ;;  %v6989_v61 = vld [vmem:[#allocation11 + $0x8f0] sm:$0xff]  ;;  %v6990_v18 = vld [vmem:[#allocation11 + $0x8f8] sm:$0xff] }
 0x7f5   :  { %9323 = vmatpush3.bf16.msra.mxu1 %v9322_v32  ;;  %v6806_v32 = vld [vmem:[#allocation11 + $0x7c8] sm:$0xff] }
 0x7f6   :  { %9324 = vmatprep.subr.bf16.mxu1 %v18487_v44  ;;  %v9538_v59 = vpack.c.bf16 %v6806_v32, %v6805_v25  ;;  %v7066_v25 = vld [vmem:[#allocation11 + $0x900] sm:$0xff]  ;;  %v7067_v32 = vld [vmem:[#allocation11 + $0x908] sm:$0xff] }
 0x7f7   :  { %9491 = vmatpush3.bf16.msra.mxu0 %v9490_v19  ;;  %v6808_v19 = vld [vmem:[#allocation11 + $0x7d8] sm:$0xff] }
 0x7f8   :  { %9492 = vmatprep.subr.bf16.mxu0 %v18487_v44  ;;  %v9541_v41 = vpack.c.bf16 %v6808_v19, %v6807_v15  ;;  %v6992_v15 = vrot.slane %v17106_v58, 1  ;;  %v7068_v19 = vld [vmem:[#allocation11 + $0x910] sm:$0xff] }
 0x7f9   :  { %9326 = vmatpush3.bf16.msra.mxu1 %v9325_v45  ;;  %v6810_v45 = vld [vmem:[#allocation11 + $0x7e8] sm:$0xff] }
 0x7fa   :  { %9327 = vmatprep.subr.bf16.mxu1 %v18487_v44  ;;  %v9544_v10 = vpack.c.bf16 %v6810_v45, %v6809_v12  ;;  %v7070_v45 = vld [vmem:[#allocation11 + $0x920] sm:$0xff] }
 0x7fb   :  { %9494 = vmatpush3.bf16.msra.mxu0 %v9493_v37  ;;  %v6812_v37 = vld [vmem:[#allocation11 + $0x7f8] sm:$0xff] }
 0x7fc   :  { %9495 = vmatprep.subr.bf16.mxu0 %v18487_v44  ;;  %v9547_v28 = vpack.c.bf16 %v6812_v37, %v6811_v20  ;;  %v7072_v37 = vld [vmem:[#allocation11 + $0x930] sm:$0xff] }
 0x7fd   :  { %9329 = vmatpush3.bf16.msra.mxu1 %v9328_v51  ;;  %v6888_v51 = vld [vmem:[#allocation11 + $0x808] sm:$0xff] }
 0x7fe   :  { %9330 = vmatprep.subr.bf16.mxu1 %v18487_v44  ;;  %v9550_v1 = vpack.c.bf16 %v6888_v51, %v6887_v52  ;;  %v7074_v51 = vld [vmem:[#allocation11 + $0x940] sm:$0xff] }
 0x7ff   :  { %9497 = vmatpush3.bf16.msra.mxu0 %v9496_v49  ;;  %v6889_v49 = vld [vmem:[#allocation11 + $0x810] sm:$0xff] }
 0x800   :  { %9498 = vmatprep.subr.bf16.mxu0 %v18487_v44  ;;  %v9553_v26 = vpack.c.bf16 %v6890_v14, %v6889_v49  ;;  %v7076_v49 = vld [vmem:[#allocation11 + $0x950] sm:$0xff]  ;;  %v7077_v14 = vld [vmem:[#allocation11 + $0x958] sm:$0xff] }
 0x801   :  { %9332 = vmatpush3.bf16.msra.mxu1 %v9331_v9  ;;  %v6891_v9 = vld [vmem:[#allocation11 + $0x820] sm:$0xff] }
 0x802   :  { %9645 = vmatprep.subr.bf16.mxu1 %v18487_v44 }
 0x803   :  { %9500 = vmatpush3.bf16.msra.mxu0 %v9499_v42  ;;  %v6892_v42 = vld [vmem:[#allocation11 + $0x828] sm:$0xff] }
 0x804   :  { %8337 = vmatmul.mubr.f32.vlgmr.msra.gmra.mrb[60].mxu1 %v6004_v24  ;;  %9501 = vmatprep.subr.bf16.mxu0 %v18487_v44  ;;  %v9556_v40 = vpack.c.bf16 %v6892_v42, %v6891_v9  ;;  %v9559_v24 = vpack.c.bf16 %v6894_v33, %v6893_v8  ;;  %v7078_v9 = vld [vmem:[#allocation11 + $0x960] sm:$0xff]  ;;  %v7079_v42 = vld [vmem:[#allocation11 + $0x968] sm:$0xff]  ;;  %v7080_v8 = vld [vmem:[#allocation11 + $0x970] sm:$0xff] }
 0x805   :  { %8826 = vmatprep.mubr.msk.f32.mxu1 %vm18783_vm14, %v18733_v3  ;;  %v7081_v33 = vld [vmem:[#allocation11 + $0x978] sm:$0xff] }
 0x806   :  { %8582 = vmatmul.mubr.f32.vlgmr.msra.gmra.mrb[36].mxu0 %v6633_v17  ;;  %v6896_v17 = vld [vmem:[#allocation11 + $0x848] sm:$0xff] }
 0x807   :  { %9503 = vmatpush3.bf16.msra.mxu0 %v9502_v63  ;;  %8616 = vmatprep.mubr.msk.f32.mxu0 %vm18783_vm14, %v18733_v3  ;;  %v6895_v63 = vld [vmem:[#allocation11 + $0x840] sm:$0xff] }
 0x808   :  { %9504 = vmatprep.subr.bf16.mxu0 %v18487_v44  ;;  %v9562_v55 = vpack.c.bf16 %v6896_v17, %v6895_v63  ;;  %v7156_v63 = vld [vmem:[#allocation11 + $0x980] sm:$0xff]  ;;  %v7157_v17 = vld [vmem:[#allocation11 + $0x988] sm:$0xff] }
 0x80b   :  { %9506 = vmatpush3.bf16.msra.mxu0 %v9505_v38  ;;  %v6898_v38 = vld [vmem:[#allocation11 + $0x858] sm:$0xff] }
 0x80c   :  { %9507 = vmatprep.subr.bf16.mxu0 %v18487_v44  ;;  %v9565_v53 = vpack.c.bf16 %v6898_v38, %v6897_v31  ;;  %v7082_v31 = vrot.slane %v17106_v58, 2  ;;  %v7158_v38 = vld [vmem:[#allocation11 + $0x990] sm:$0xff] }
 0x80f   :  { %9509 = vmatpush3.bf16.msra.mxu0 %v9508_v56  ;;  %v6900_v56 = vld [vmem:[#allocation11 + $0x868] sm:$0xff] }
 0x810   :  { %9510 = vmatprep.subr.bf16.mxu0 %v18487_v44  ;;  %v9568_v57 = vpack.c.bf16 %v6900_v56, %v6899_v36  ;;  %v7160_v56 = vld [vmem:[#allocation11 + $0x9a0] sm:$0xff] }
 0x813   :  { %9512 = vmatpush3.bf16.msra.mxu0 %v9511_v62  ;;  %v6902_v62 = vld [vmem:[#allocation11 + $0x878] sm:$0xff] }
 0x814   :  { %9513 = vmatprep.subr.bf16.mxu0 %v18487_v44  ;;  %v9571_v48 = vpack.c.bf16 %v6902_v62, %v6901_v16  ;;  %v7162_v62 = vld [vmem:[#allocation11 + $0x9b0] sm:$0xff] }
 0x817   :  { %9515 = vmatpush3.bf16.msra.mxu0 %v9514_v7  ;;  %v6976_v7 = vld [vmem:[#allocation11 + $0x888] sm:$0xff] }
 0x818   :  { %9516 = vmatprep.subr.bf16.mxu0 %v18487_v44  ;;  %v9574_v13 = vpack.c.bf16 %v6976_v7, %v6975_v54  ;;  %v7164_v7 = vld [vmem:[#allocation11 + $0x9c0] sm:$0xff] }
 0x81b   :  { %9518 = vmatpush3.bf16.msra.mxu0 %v9517_v27  ;;  %v6978_v27 = vld [vmem:[#allocation11 + $0x898] sm:$0xff] }
 0x81c   :  { %9519 = vmatprep.subr.bf16.mxu0 %v18487_v44  ;;  %v9577_v34 = vpack.c.bf16 %v6978_v27, %v6977_v30  ;;  %v7167_v27 = vld [vmem:[#allocation11 + $0x9d8] sm:$0xff] }
 0x81f   :  { %9521 = vmatpush3.bf16.msra.mxu0 %v9520_v46  ;;  %v6980_v46 = vld [vmem:[#allocation11 + $0x8a8] sm:$0xff] }
 0x820   :  { %9522 = vmatprep.subr.bf16.mxu0 %v18487_v44  ;;  %v9580_v29 = vpack.c.bf16 %v6980_v46, %v6979_v4  ;;  %v7168_v4 = vld [vmem:[#allocation11 + $0x9e0] sm:$0xff]  ;;  %v7169_v46 = vld [vmem:[#allocation11 + $0x9e8] sm:$0xff] }
 0x823   :  { %9524 = vmatpush3.bf16.msra.mxu0 %v9523_v0  ;;  %v6982_v0 = vld [vmem:[#allocation11 + $0x8b8] sm:$0xff] }
 0x824   :  { %9525 = vmatprep.subr.bf16.mxu0 %v18487_v44  ;;  %v9583_v11 = vpack.c.bf16 %v6982_v0, %v6981_v43  ;;  %v7170_v43 = vld [vmem:[#allocation11 + $0x9f0] sm:$0xff]  ;;  %v7171_v0 = vld [vmem:[#allocation11 + $0x9f8] sm:$0xff] }
 0x826   :  { %8617 = vmatmul.mubr.f32.vlgmr.msra.gmra.mrb[36].mxu0 %v6723_v35 }
 0x827   :  { %9527 = vmatpush3.bf16.msra.mxu0 %v9526_v2  ;;  %8651 = vmatprep.mubr.msk.f32.mxu0 %vm18783_vm14, %v18733_v3  ;;  %v6984_v2 = vld [vmem:[#allocation11 + $0x8c8] sm:$0xff] }
 0x828   :  { %9528 = vmatprep.subr.bf16.mxu0 %v18487_v44  ;;  %v9586_v35 = vpack.c.bf16 %v6984_v2, %v6983_v21  ;;  %v7172_v21 = vrot.slane %v17106_v58, 3 }
 0x82b   :  { %9530 = vmatpush3.bf16.msra.mxu0 %v9529_v47  ;;  %v9589_v47 = vpack.c.bf16 %v6986_v22, %v6985_v5  ;;  %v7251_v5 = vld [vmem:[%s17349_s7] sm:$0xff]  ;;  %v7252_v22 = vld [vmem:[%s17349_s7 + $0x8] sm:$0xff] }
 0x82c   :  { %9531 = vmatprep.subr.bf16.mxu0 %v18487_v44 }
 0x82f   :  { %9533 = vmatpush3.bf16.msra.mxu0 %v9532_v39  ;;  %v9592_v39 = vpack.c.bf16 %v6988_v50, %v6987_v23  ;;  %v7253_v23 = vld [vmem:[%s17349_s7 + $0x10] sm:$0xff] }
 0x830   :  { %9534 = vmatprep.subr.bf16.mxu0 %v18487_v44 }
 0x833   :  { %9536 = vmatpush3.bf16.msra.mxu0 %v9535_v60  ;;  %v9595_v60 = vpack.c.bf16 %v6990_v18, %v6989_v61  ;;  %v7256_v61 = vld [vmem:[%s17349_s7 + $0x28] sm:$0xff] }
 0x834   :  { %9537 = vmatprep.subr.bf16.mxu0 %v18487_v44 }
 0x837   :  { %9539 = vmatpush3.bf16.msra.mxu0 %v9538_v59  ;;  %v9598_v59 = vpack.c.bf16 %v7067_v32, %v7066_v25  ;;  %v7258_v25 = vld [vmem:[%s17349_s7 + $0x38] sm:$0xff] }
 0x838   :  { %9540 = vmatprep.subr.bf16.mxu0 %v18487_v44 }
 0x83b   :  { %9542 = vmatpush3.bf16.msra.mxu0 %v9541_v41  ;;  %v7069_v41 = vld [vmem:[#allocation11 + $0x918] sm:$0xff] }
 0x83c   :  { %9543 = vmatprep.subr.bf16.mxu0 %v18487_v44  ;;  %v9601_v12 = vpack.c.bf16 %v7069_v41, %v7068_v19  ;;  %v7261_v41 = vld [vmem:[%s17349_s7 + $0x50] sm:$0xff] }
 0x83f   :  { %9545 = vmatpush3.bf16.msra.mxu0 %v9544_v10  ;;  %v7071_v10 = vld [vmem:[#allocation11 + $0x928] sm:$0xff] }
 0x840   :  { %9546 = vmatprep.subr.bf16.mxu0 %v18487_v44  ;;  %v9604_v20 = vpack.c.bf16 %v7071_v10, %v7070_v45  ;;  %v7263_v10 = vld [vmem:[%s17349_s7 + $0x60] sm:$0xff] }
 0x843   :  { %9548 = vmatpush3.bf16.msra.mxu0 %v9547_v28  ;;  %v7073_v28 = vld [vmem:[#allocation11 + $0x938] sm:$0xff] }
 0x844   :  { %9549 = vmatprep.subr.bf16.mxu0 %v18487_v44  ;;  %v9607_v52 = vpack.c.bf16 %v7073_v28, %v7072_v37  ;;  %v7265_v28 = vld [vmem:[%s17349_s7 + $0x70] sm:$0xff] }
 0x846   :  { %8652 = vmatmul.mubr.f32.vlgmr.msra.gmra.mrb[36].mxu0 %v6813_v6 }
 0x847   :  { %9551 = vmatpush3.bf16.msra.mxu0 %v9550_v1  ;;  %8686 = vmatprep.mubr.msk.f32.mxu0 %vm18783_vm14, %v18733_v3  ;;  %v7075_v1 = vld [vmem:[#allocation11 + $0x948] sm:$0xff] }
 0x848   :  { %9552 = vmatprep.subr.bf16.mxu0 %v18487_v44  ;;  %v9610_v6 = vpack.c.bf16 %v7075_v1, %v7074_v51  ;;  %v5448_v1 = vld [vmem:[#allocation12] sm:$0x1] }
 0x84b   :  { %9554 = vmatpush3.bf16.msra.mxu0 %v9553_v26  ;;  %v9613_v26 = vpack.c.bf16 %v7077_v14, %v7076_v49 }
 0x84c   :  { %9555 = vmatprep.subr.bf16.mxu0 %v18487_v44 }
 0x84f   :  { %9557 = vmatpush3.bf16.msra.mxu0 %v9556_v40  ;;  %v9616_v40 = vpack.c.bf16 %v7079_v42, %v7078_v9 }
 0x850   :  { %9558 = vmatprep.subr.bf16.mxu0 %v18487_v44 }
 0x853   :  { %9560 = vmatpush3.bf16.msra.mxu0 %v9559_v24  ;;  %v9619_v24 = vpack.c.bf16 %v7081_v33, %v7080_v8 }
 0x854   :  { %9561 = vmatprep.subr.bf16.mxu0 %v18487_v44 }
 0x857   :  { %9563 = vmatpush3.bf16.msra.mxu0 %v9562_v55  ;;  %v9622_v55 = vpack.c.bf16 %v7157_v17, %v7156_v63 }
 0x858   :  { %9564 = vmatprep.subr.bf16.mxu0 %v18487_v44 }
 0x85b   :  { %9566 = vmatpush3.bf16.msra.mxu0 %v9565_v53  ;;  %v7159_v53 = vld [vmem:[#allocation11 + $0x998] sm:$0xff] }
 0x85c   :  { %9567 = vmatprep.subr.bf16.mxu0 %v18487_v44  ;;  %v9625_v36 = vpack.c.bf16 %v7159_v53, %v7158_v38 }
 0x85f   :  { %9569 = vmatpush3.bf16.msra.mxu0 %v9568_v57  ;;  %v7161_v57 = vld [vmem:[#allocation11 + $0x9a8] sm:$0xff] }
 0x860   :  { %9570 = vmatprep.subr.bf16.mxu0 %v18487_v44  ;;  %v9628_v16 = vpack.c.bf16 %v7161_v57, %v7160_v56 }
 0x863   :  { %9572 = vmatpush3.bf16.msra.mxu0 %v9571_v48  ;;  %v7163_v48 = vld [vmem:[#allocation11 + $0x9b8] sm:$0xff] }
 0x864   :  { %9573 = vmatprep.subr.bf16.mxu0 %v18487_v44  ;;  %v9631_v54 = vpack.c.bf16 %v7163_v48, %v7162_v62 }
 0x866   :  { %8687 = vmatmul.mubr.f32.vlgmr.msra.gmra.mrb[36].mxu0 %v17106_v58  ;;  %v7254_v58 = vld [vmem:[%s17349_s7 + $0x18] sm:$0xff] }
 0x867   :  { %9575 = vmatpush3.bf16.msra.mxu0 %v9574_v13  ;;  %8721 = vmatprep.mubr.msk.f32.mxu0 %vm18783_vm14, %v18733_v3  ;;  %v7165_v13 = vld [vmem:[#allocation11 + $0x9c8] sm:$0xff]  ;;  %v9649_v50 = vpack.c.bf16 %v7254_v58, %v7253_v23 }
 0x868   :  { %9576 = vmatprep.subr.bf16.mxu0 %v18487_v44  ;;  %v9634_v30 = vpack.c.bf16 %v7165_v13, %v7164_v7 }
 0x86b   :  { %9578 = vmatpush3.bf16.msra.mxu0 %v9577_v34 }
 0x86c   :  { %9579 = vmatprep.subr.bf16.mxu0 %v18487_v44 }
 0x86f   :  { %9581 = vmatpush3.bf16.msra.mxu0 %v9580_v29  ;;  %v9640_v29 = vpack.c.bf16 %v7169_v46, %v7168_v4 }
 0x870   :  { %9582 = vmatprep.subr.bf16.mxu0 %v18487_v44 }
 0x873   :  { %9584 = vmatpush3.bf16.msra.mxu0 %v9583_v11  ;;  %v9643_v11 = vpack.c.bf16 %v7171_v0, %v7170_v43 }
 0x874   :  { %9585 = vmatprep.subr.bf16.mxu0 %v18487_v44 }
 0x877   :  { %9587 = vmatpush3.bf16.msra.mxu0 %v9586_v35 }
 0x878   :  { %9588 = vmatprep.subr.bf16.mxu0 %v18487_v44 }
 0x87b   :  { %9590 = vmatpush3.bf16.msra.mxu0 %v9589_v47  ;;  %v9646_v47 = vpack.c.bf16 %v7252_v22, %v7251_v5 }
 0x87c   :  { %9591 = vmatprep.subr.bf16.mxu0 %v18487_v44 }
 0x87d   :  { %9647 = vmatpush3.bf16.msra.mxu1 %v9646_v47 }
 0x87e   :  { %9648 = vmatprep.subr.bf16.mxu1 %v18487_v44 }
 0x87f   :  { %9593 = vmatpush3.bf16.msra.mxu0 %v9592_v39  ;;  %v7255_v39 = vld [vmem:[%s17349_s7 + $0x20] sm:$0xff] }
 0x880   :  { %9594 = vmatprep.subr.bf16.mxu0 %v18487_v44  ;;  %v9652_v18 = vpack.c.bf16 %v7256_v61, %v7255_v39 }
 0x881   :  { %9650 = vmatpush3.bf16.msra.mxu1 %v9649_v50 }
 0x882   :  { %9651 = vmatprep.subr.bf16.mxu1 %v18487_v44 }
 0x883   :  { %9596 = vmatpush3.bf16.msra.mxu0 %v9595_v60  ;;  %v7257_v60 = vld [vmem:[%s17349_s7 + $0x30] sm:$0xff] }
 0x884   :  { %9597 = vmatprep.subr.bf16.mxu0 %v18487_v44  ;;  %v9655_v32 = vpack.c.bf16 %v7258_v25, %v7257_v60 }
 0x885   :  { %9653 = vmatpush3.bf16.msra.mxu1 %v9652_v18 }
 0x886   :  { %8722 = vmatmul.mubr.f32.vlgmr.msra.gmra.mrb[36].mxu0 %v6992_v15  ;;  %9654 = vmatprep.subr.bf16.mxu1 %v18487_v44  ;;  %v7260_v15 = vld [vmem:[%s17349_s7 + $0x48] sm:$0xff] }
 0x887   :  { %9599 = vmatpush3.bf16.msra.mxu0 %v9598_v59  ;;  %8756 = vmatprep.mubr.msk.f32.mxu0 %vm18783_vm14, %v18733_v3  ;;  %v7259_v59 = vld [vmem:[%s17349_s7 + $0x40] sm:$0xff] }
 0x888   :  { %9600 = vmatprep.subr.bf16.mxu0 %v18487_v44  ;;  %v9658_v19 = vpack.c.bf16 %v7260_v15, %v7259_v59 }
 0x889   :  { %9656 = vmatpush3.bf16.msra.mxu1 %v9655_v32 }
 0x88a   :  { %9657 = vmatprep.subr.bf16.mxu1 %v18487_v44 }
 0x88b   :  { %9602 = vmatpush3.bf16.msra.mxu0 %v9601_v12  ;;  %v7262_v12 = vld [vmem:[%s17349_s7 + $0x58] sm:$0xff] }
 0x88c   :  { %9603 = vmatprep.subr.bf16.mxu0 %v18487_v44  ;;  %v9661_v45 = vpack.c.bf16 %v7262_v12, %v7261_v41 }
 0x88d   :  { %9659 = vmatpush3.bf16.msra.mxu1 %v9658_v19 }
 0x88e   :  { %9660 = vmatprep.subr.bf16.mxu1 %v18487_v44 }
 0x88f   :  { %9605 = vmatpush3.bf16.msra.mxu0 %v9604_v20  ;;  %v7264_v20 = vld [vmem:[%s17349_s7 + $0x68] sm:$0xff] }
 0x890   :  { %9606 = vmatprep.subr.bf16.mxu0 %v18487_v44  ;;  %v9664_v37 = vpack.c.bf16 %v7264_v20, %v7263_v10 }
 0x891   :  { %9662 = vmatpush3.bf16.msra.mxu1 %v9661_v45 }
 0x892   :  { %9663 = vmatprep.subr.bf16.mxu1 %v18487_v44 }
 0x893   :  { %9608 = vmatpush3.bf16.msra.mxu0 %v9607_v52  ;;  %v7266_v52 = vld [vmem:[%s17349_s7 + $0x78] sm:$0xff]  ;;  %s10705_s7 = smov [#allocation14]  }
 0x894   :  { %9609 = vmatprep.subr.bf16.mxu0 %v18487_v44  ;;  %v9667_v51 = vpack.c.bf16 %v7266_v52, %v7265_v28  ;;  %s7346_s25 = sshll.u32 %s10705_s7, 4  ;;  %s7347_s25 = int_to_ptr.vmem [resolvable:$true] %s7346_s25 }
 0x895   :  { %9665 = vmatpush3.bf16.msra.mxu1 %v9664_v37  ;;  %s10652_s26 = scalar_lea.vmem %s7347_s25, 16  ;;  %s10656_s1 = scalar_lea.vmem %s7347_s25, 32 }
 0x896   :  { %9666 = vmatprep.subr.bf16.mxu1 %v18487_v44  ;;  %p10653_p4 = scmp.ne.s32.totalorder %s7347_s25, %s10652_s26  ;;  %p10657_p5 = scmp.lt.s32.totalorder %s7347_s25, %s7347_s25 }
 0x897   :  { %9611 = vmatpush3.bf16.msra.mxu0 %v9610_v6  ;;  %p10658_p6 = scmp.lt.s32.totalorder %s10656_s1, %s10652_s26 }
 0x898   :  { %9612 = vmatprep.subr.bf16.mxu0 %v18487_v44 }
 0x899   :  { %9668 = vmatpush3.bf16.msra.mxu1 %v9667_v51  ;;  %p10659_p7 = por %p10658_p6, %p10657_p5 }
 0x89b   :  { %9614 = vmatpush3.bf16.msra.mxu0 %v9613_v26  ;;  %p10660_p8 = pnand %p10659_p7, %p10653_p4 }
 0x89c   :  { %9615 = vmatprep.subr.bf16.mxu0 %v18487_v44 }
 0x89f   :  { %9617 = vmatpush3.bf16.msra.mxu0 %v9616_v40 }
 0x8a0   :  { %9618 = vmatprep.subr.bf16.mxu0 %v18487_v44 }
 0x8a3   :  { %9620 = vmatpush3.bf16.msra.mxu0 %v9619_v24  ;;  %v7267_v24 = vld [vmem:[#allocation5] sm:$0x1] }
 0x8a4   :  { %9621 = vmatprep.subr.bf16.mxu0 %v18487_v44 }
 0x8a6   :  { %8757 = vmatmul.mubr.f32.vlgmr.msra.gmra.mrb[36].mxu0 %v7082_v31 }
 0x8a7   :  { %9623 = vmatpush3.bf16.msra.mxu0 %v9622_v55  ;;  %8791 = vmatprep.mubr.msk.f32.mxu0 %vm18783_vm14, %v18733_v3  ;;  %v7166_v3 = vld [vmem:[#allocation11 + $0x9d0] sm:$0xff] }
 0x8a8   :  { %9624 = vmatprep.subr.bf16.mxu0 %v18487_v44  ;;  %v9637_v34 = vpack.c.bf16 %v7167_v27, %v7166_v3 }
 0x8ab   :  { %9626 = vmatpush3.bf16.msra.mxu0 %v9625_v36 }
 0x8ac   :  { %9627 = vmatprep.subr.bf16.mxu0 %v18487_v44 }
 0x8af   :  { %9629 = vmatpush3.bf16.msra.mxu0 %v9628_v16 }
 0x8b0   :  { %9630 = vmatprep.subr.bf16.mxu0 %v18487_v44 }
 0x8b3   :  { %9632 = vmatpush3.bf16.msra.mxu0 %v9631_v54 }
 0x8b4   :  { %9633 = vmatprep.subr.bf16.mxu0 %v18487_v44 }
 0x8b7   :  { %9635 = vmatpush3.bf16.msra.mxu0 %v9634_v30 }
 0x8b8   :  { %9636 = vmatprep.subr.bf16.mxu0 %v18487_v44 }
 0x8bb   :  { %9638 = vmatpush3.bf16.msra.mxu0 %v9637_v34 }
 0x8bc   :  { %9639 = vmatprep.subr.bf16.mxu0 %v18487_v44 }
 0x8bf   :  { %9641 = vmatpush3.bf16.msra.mxu0 %v9640_v29 }
 0x8c0   :  { %9642 = vmatprep.subr.bf16.mxu0 %v18487_v44 }
 0x8c3   :  { %9644 = vmatpush3.bf16.msra.mxu0 %v9643_v11 }
 0x8c6   :  { %8792 = vmatmul.mubr.f32.vlgmr.msra.gmra.mrb[36].mxu0 %v7172_v21 }
 0x8d7   :  { %v6072_v2 = vpop.f32.mrb[60].mxu1 }
 0x8d8   :  { %v8338_v35 = vpop.f32.mrb[61].mxu1  ;;  %v9669_v6 = vadd.f32 %v6072_v2, %v5448_v1 }
 0x999   :  { %v7240_v49 = vpop.f32.mrb[36].mxu0 }
 0x99a   :  { %v9670_v14 = vadd.f32 %v9669_v6, %v7240_v49  ;;  %v8793_v26 = vpop.f32.mrb[37].mxu0 }
 0x99c   :  { %v7245_v9 = vsub.f32 0.0, %v9670_v14 }
 0x99e   :  { %v7246_v42 = vmul.f32 1.442695, %v7245_v9 }
 0x9a0   :  { %10525 = vpow2.f32 %v7246_v42 }
 0x9aa   :  { %v10526_v40 = vpop.eup %10525 }
 0x9ab   :  { %v7248_v8 = vadd.f32 1.0, %v10526_v40 }
 0x9ad   :  { %10527 = vrcp.f32 %v7248_v8 }
 0x9b7   :  { %v10528_v33 = vpop.eup %10527 }
 0x9b8   :  { %8827 = vmatmul.mubr.f32.vlgmr.msra.gmra.mrb[62].mxu1 %v10528_v33 }
 0xa8b   :  { %v7334_v63 = vpop.f32.mrb[62].mxu1 }
 0xa8c   :  { %v7335_v44 = vadd.f32 %v7334_v63, %v7267_v24  ;;  %v8828_v17 = vpop.f32.mrb[63].mxu1 }
 0xa8e   :  { %7339 = vst.msk [vmem:[#allocation14] sm:$0x1] %vm7338_vm4, %v7335_v44 }
 0xa8f   :  { %10663 = shalt.err (!%p10660_p8)
}
 0xa90   :  { %s10664_s0 = scalar_lea.hbm %s17351_s9, 16 }
 0xa91   :  { %p10665_p9 = scmp.ne.s32.totalorder %s17351_s9, %s10664_s0  ;;  %p10668_p10 = scmp.lt.u32.totalorder %s10664_s0, %s17351_s9 }
 0xa93   :  { %p10670_p11 = pnand %p10668_p10, %p10665_p9 }
 0xa95   :  { %10673 = shalt.err (!%p10670_p11)
}
 0xa96   :  { %7349 = dma.vmem_to_hbm [thread:$0]  %s7347_s25, 16, %s17351_s9, [#allocation8]  }
 0xa97   :  { %10680 = dma.done.wait [#allocation8], 16  }
 0xa98   :  { %10681 = vsyncadd [#allocation8], 4294967280 }
 0xa99   :  { %7353 = vsyncpa [#allocation7], 1 }
 0xa9a   :  { %7354 = vsyncpa [#allocation10], 1 }
 0xa9b   :  { %7355 = vsyncpa [#allocation13], 1 }
 0xa9c   :  { %7356 = vsyncpa [#allocation8], 1 }

</bundles_post_ra>
